<compile_context>
chip_gen: v6e
topology: v6e:2x2x1
jax: 0.10.0
libtpu: 0.0.40
codegen_flags: <defaults>
</compile_context>

<pallas_src>
import functools

import jax
import jax.numpy as jnp
from jax.experimental import pallas as pl
from jax.experimental.pallas import tpu as pltpu


def _basic_block_kernel(x_ref, w1_ref, s1_ref, t1_ref, w2_ref, s2_ref, t2_ref,
                        out_ref, xpad_ref, col_ref):
    """One batch element of the fused BasicBlock.

    x_ref  : (1, H, W, Cp)      bf16, channel-padded NHWC input
    w1_ref : (9*Cp, Cp)         bf16, conv1 weights, taps stacked along K
    s1_ref : (1, Cp)            f32,  folded BN1 scale
    t1_ref : (1, Cp)            f32,  folded BN1 shift
    w2_ref : (9*Cp, Cp)         bf16, conv2 weights
    s2_ref : (1, Cp)            f32,  folded BN2 scale
    t2_ref : (1, Cp)            f32,  folded BN2 shift
    out_ref: (1, H, W, Cp)      f32,  lane-dense output
    xpad_ref: (H+2, W+2, Cp)    bf16 VMEM scratch (spatially padded image)
    col_ref : (H*W, 9*Cp)       bf16 VMEM scratch (im2col buffer)
    """
    H = out_ref.shape[1]
    W = out_ref.shape[2]
    Cp = out_ref.shape[3]

    def build_im2col():
        # 9 shifted taps of the padded image -> columns of the im2col buffer.
        for dh in range(3):
            for dw in range(3):
                t = dh * 3 + dw
                tap = xpad_ref[dh:dh + H, dw:dw + W, :].reshape(H * W, Cp)
                col_ref[:, t * Cp:(t + 1) * Cp] = tap

    x = x_ref[0]                                             # (H, W, Cp) bf16

    # ---- conv1 (3x3, pad=1) -> bn1 -> relu ----------------------------------
    xpad_ref[...] = jnp.zeros_like(xpad_ref)                 # zero halo once
    xpad_ref[1:H + 1, 1:W + 1, :] = x
    build_im2col()
    y = jnp.dot(col_ref[...], w1_ref[...],
                preferred_element_type=jnp.float32)          # (H*W, Cp) f32
    y = jnp.maximum(y * s1_ref[...] + t1_ref[...], 0.0)

    # ---- conv2 (3x3, pad=1) -> bn2 ------------------------------------------
    # halo of xpad is still zero; only the interior needs rewriting.
    xpad_ref[1:H + 1, 1:W + 1, :] = y.reshape(H, W, Cp).astype(xpad_ref.dtype)
    build_im2col()
    y = jnp.dot(col_ref[...], w2_ref[...],
                preferred_element_type=jnp.float32)
    y = y * s2_ref[...] + t2_ref[...]

    # ---- residual add + relu ------------------------------------------------
    identity = x.reshape(H * W, Cp).astype(jnp.float32)
    out = jnp.maximum(y + identity, 0.0)
    out_ref[...] = out.reshape(1, H, W, Cp).astype(out_ref.dtype)


def _basic_block_forward(x_nhwc_p, w1, s1, t1, w2, s2, t2):
    """x_nhwc_p: (N, H, W, Cp) bf16 channel-padded. Returns (N, H, W, Cp) f32."""
    N, H, W, Cp = x_nhwc_p.shape

    kernel = pl.pallas_call(
        _basic_block_kernel,
        out_shape=jax.ShapeDtypeStruct((N, H, W, Cp), jnp.float32),
        grid_spec=pltpu.PrefetchScalarGridSpec(
            num_scalar_prefetch=0,
            grid=(N,),
            in_specs=[
                pl.BlockSpec((1, H, W, Cp), lambda n: (n, 0, 0, 0)),
                pl.BlockSpec((9 * Cp, Cp), lambda n: (0, 0)),   # resident weights
                pl.BlockSpec((1, Cp), lambda n: (0, 0)),
                pl.BlockSpec((1, Cp), lambda n: (0, 0)),
                pl.BlockSpec((9 * Cp, Cp), lambda n: (0, 0)),
                pl.BlockSpec((1, Cp), lambda n: (0, 0)),
                pl.BlockSpec((1, Cp), lambda n: (0, 0)),
            ],
            out_specs=pl.BlockSpec((1, H, W, Cp), lambda n: (n, 0, 0, 0)),
            scratch_shapes=[
                pltpu.VMEM((H + 2, W + 2, Cp), jnp.bfloat16),   # padded image
                pltpu.VMEM((H * W, 9 * Cp), jnp.bfloat16),      # im2col buffer
            ],
        ),
        compiler_params=pltpu.CompilerParams(
            dimension_semantics=("parallel",),
            vmem_limit_bytes=32 * 1024 * 1024,
        ),
    )
    return kernel(x_nhwc_p, w1, s1, t1, w2, s2, t2)


def _prep_conv3x3(w_oihw, cp):
    """OIHW (Cout,Cin,3,3) -> (9*Cp, Cp) bf16 with taps stacked along K."""
    cout, cin = w_oihw.shape[0], w_oihw.shape[1]
    w = jnp.transpose(w_oihw, (2, 3, 1, 0))                      # HWIO
    w = jnp.pad(w, ((0, 0), (0, 0), (0, cp - cin), (0, cp - cout)))
    return w.reshape(9 * cp, cp).astype(jnp.bfloat16)


def _fold_bn(gamma, beta, mean, var, eps, cp):
    scale = gamma / jnp.sqrt(var + eps)
    shift = beta - mean * scale
    scale = jnp.pad(scale, (0, cp - scale.shape[0]))
    shift = jnp.pad(shift, (0, cp - shift.shape[0]))
    return scale.reshape(1, cp).astype(jnp.float32), \
           shift.reshape(1, cp).astype(jnp.float32)


class BasicBlockPallas:
    """Deterministically-initialized replica of the PyTorch BasicBlock."""

    expansion = 1

    def __init__(self, in_channels, out_channels, stride=1, downsample=None,
                 key=None, eps=1e-5):
        if stride != 1 or downsample is not None or in_channels != out_channels:
            # TODO(synk): stride>1 / downsample projection path not implemented.
            raise NotImplementedError(
                "Only the identity-shortcut BasicBlock is implemented.")
        C = out_channels
        self.C = C
        self.Cp = max(128, ((C + 127) // 128) * 128)   # lane-dense channel pad
        self.eps = eps

        key = jax.random.PRNGKey(0) if key is None else key
        k1, k2 = jax.random.split(key)
        std = 0.05
        # f32 master weights (used by the plain-JAX reference).
        self.w1_oihw = std * jax.random.normal(k1, (C, in_channels, 3, 3), jnp.float32)
        self.w2_oihw = std * jax.random.normal(k2, (C, C, 3, 3), jnp.float32)

        # BatchNorm parameters at PyTorch initialization (inference-mode fold).
        self.bn1_gamma = jnp.ones((C,), jnp.float32)
        self.bn1_beta = jnp.zeros((C,), jnp.float32)
        self.bn1_mean = jnp.zeros((C,), jnp.float32)
        self.bn1_var = jnp.ones((C,), jnp.float32)
        self.bn2_gamma = jnp.ones((C,), jnp.float32)
        self.bn2_beta = jnp.zeros((C,), jnp.float32)
        self.bn2_mean = jnp.zeros((C,), jnp.float32)
        self.bn2_var = jnp.ones((C,), jnp.float32)

        # Kernel-ready parameters (channel-padded, bf16 weights, folded BN).
        self.w1p = _prep_conv3x3(self.w1_oihw, self.Cp)
        self.w2p = _prep_conv3x3(self.w2_oihw, self.Cp)
        self.s1, self.t1 = _fold_bn(self.bn1_gamma, self.bn1_beta,
                                    self.bn1_mean, self.bn1_var, eps, self.Cp)
        self.s2, self.t2 = _fold_bn(self.bn2_gamma, self.bn2_beta,
                                    self.bn2_mean, self.bn2_var, eps, self.Cp)

    @functools.partial(jax.jit, static_argnums=0)
    def __call__(self, x_nchw):
        N, C, H, W = x_nchw.shape
        Cp = self.Cp
        # NCHW -> NHWC, pad channels to the 128-lane layout, cast to bf16.
        x = jnp.transpose(x_nchw, (0, 2, 3, 1))
        x = jnp.pad(x, ((0, 0), (0, 0), (0, 0), (0, Cp - C))).astype(jnp.bfloat16)

        out = _basic_block_forward(x, self.w1p, self.s1, self.t1,
                                   self.w2p, self.s2, self.t2)

        out = out[..., :C]                       # drop channel padding (zeros)
        return jnp.transpose(out, (0, 3, 1, 2))  # back to NCHW


def _reference(x_nchw, block):
    """Plain-JAX f32 reference (lax conv) for a sanity check."""
    x = jnp.transpose(x_nchw, (0, 2, 3, 1)).astype(jnp.float32)

    def conv_bn(inp, w_oihw, gamma, beta, mean, var, eps):
        w = jnp.transpose(w_oihw, (2, 3, 1, 0))  # HWIO
        y = jax.lax.conv_general_dilated(
            inp, w, (1, 1), "SAME",
            dimension_numbers=("NHWC", "HWIO", "NHWC"))
        scale = gamma / jnp.sqrt(var + eps)
        shift = beta - mean * scale
        return y * scale + shift

    y = jnp.maximum(conv_bn(x, block.w1_oihw, block.bn1_gamma, block.bn1_beta,
                            block.bn1_mean, block.bn1_var, block.eps), 0.0)
    y = conv_bn(y, block.w2_oihw, block.bn2_gamma, block.bn2_beta,
                block.bn2_mean, block.bn2_var, block.eps)
    y = jnp.maximum(y + x, 0.0)
    return jnp.transpose(y, (0, 3, 1, 2))


if __name__ == "__main__":
    N, C, H, W = 2, 4, 16, 16

    key = jax.random.PRNGKey(0)
    kx, kp = jax.random.split(key)
    x = jax.random.normal(kx, (N, C, H, W), jnp.float32)

    block = BasicBlockPallas(C, C, stride=1, downsample=None, key=kp)

    out = block(x)
    jax.block_until_ready(out)
    assert out.shape == (N, C, H, W)

    ref = _reference(x, block)
    # bf16 matmul inputs (f32 accumulation) -> loosened tolerance vs f32 ref.
    max_err = float(jnp.max(jnp.abs(out - ref)))
    assert jnp.allclose(out, ref, atol=5e-2, rtol=5e-2), max_err

    print("KERNEL_OK")
</pallas_src>

<mosaic_0001>
module attributes {stable_mosaic.version = 11 : i64} {
  func.func @_basic_block_kernel(%arg0: i32, %arg1: memref<1x16x16x128xbf16, #tpu.memory_space<vmem>>, %arg2: memref<1152x128xbf16, #tpu.memory_space<vmem>>, %arg3: memref<1x128xf32, #tpu.memory_space<vmem>>, %arg4: memref<1x128xf32, #tpu.memory_space<vmem>>, %arg5: memref<1152x128xbf16, #tpu.memory_space<vmem>>, %arg6: memref<1x128xf32, #tpu.memory_space<vmem>>, %arg7: memref<1x128xf32, #tpu.memory_space<vmem>>, %arg8: memref<1x16x16x128xf32, #tpu.memory_space<vmem>>, %arg9: memref<18x18x128xbf16, #tpu.memory_space<vmem>>, %arg10: memref<256x1152xbf16, #tpu.memory_space<vmem>>) attributes {dimension_semantics = [#tpu.dimension_semantics<parallel>], iteration_bounds = array<i64: 2>, scalar_prefetch = 0 : i64, scratch_operands = 2 : i64, tpu.core_type = #tpu.core_type<tc>, window_params = [{transform_indices = @transform_0, window_bounds = array<i64: 1, 16, 16, 128>}, {pipeline_mode = #tpu.pipeline_mode<synchronous>, transform_indices = @transform_1, window_bounds = array<i64: 1152, 128>}, {pipeline_mode = #tpu.pipeline_mode<synchronous>, transform_indices = @transform_2, window_bounds = array<i64: 1, 128>}, {pipeline_mode = #tpu.pipeline_mode<synchronous>, transform_indices = @transform_3, window_bounds = array<i64: 1, 128>}, {pipeline_mode = #tpu.pipeline_mode<synchronous>, transform_indices = @transform_4, window_bounds = array<i64: 1152, 128>}, {pipeline_mode = #tpu.pipeline_mode<synchronous>, transform_indices = @transform_5, window_bounds = array<i64: 1, 128>}, {pipeline_mode = #tpu.pipeline_mode<synchronous>, transform_indices = @transform_6, window_bounds = array<i64: 1, 128>}, {transform_indices = @transform_7, window_bounds = array<i64: 1, 16, 16, 128>}]} {
    %c0 = arith.constant 0 : index
    %c0_0 = arith.constant 0 : index
    %c0_1 = arith.constant 0 : index
    %c0_2 = arith.constant 0 : index
    %0 = vector.load %arg1[%c0, %c0_0, %c0_1, %c0_2] : memref<1x16x16x128xbf16, #tpu.memory_space<vmem>>, vector<1x16x16x128xbf16>
    %1 = vector.shape_cast %0 : vector<1x16x16x128xbf16> to vector<16x16x128xbf16>
    %cst = arith.constant 0.000000e+00 : bf16
    %2 = vector.broadcast %cst : bf16 to vector<18x18x128xbf16>
    %c0_3 = arith.constant 0 : index
    %c0_4 = arith.constant 0 : index
    %c0_5 = arith.constant 0 : index
    %3 = vector.load %arg9[%c0_3, %c0_4, %c0_5] : memref<18x18x128xbf16, #tpu.memory_space<vmem>>, vector<18x18x128xbf16>
    tpu.vector_store %arg9[%c0_3, %c0_4, %c0_5], %2 {strides = array<i32>} : memref<18x18x128xbf16, #tpu.memory_space<vmem>>, vector<18x18x128xbf16>,
    %c1 = arith.constant 1 : index
    %c1_6 = arith.constant 1 : index
    %c0_7 = arith.constant 0 : index
    %4 = vector.load %arg9[%c1, %c1_6, %c0_7] : memref<18x18x128xbf16, #tpu.memory_space<vmem>>, vector<16x16x128xbf16>
    tpu.vector_store %arg9[%c1, %c1_6, %c0_7], %1 {strides = array<i32>} : memref<18x18x128xbf16, #tpu.memory_space<vmem>>, vector<16x16x128xbf16>,
    %c0_8 = arith.constant 0 : index
    %c0_9 = arith.constant 0 : index
    %c0_10 = arith.constant 0 : index
    %5 = vector.load %arg9[%c0_8, %c0_9, %c0_10] : memref<18x18x128xbf16, #tpu.memory_space<vmem>>, vector<16x16x128xbf16>
    %6 = vector.shape_cast %5 : vector<16x16x128xbf16> to vector<256x128xbf16>
    %c0_11 = arith.constant 0 : index
    %c0_12 = arith.constant 0 : index
    %7 = vector.load %arg10[%c0_11, %c0_12] : memref<256x1152xbf16, #tpu.memory_space<vmem>>, vector<256x128xbf16>
    tpu.vector_store %arg10[%c0_11, %c0_12], %6 {strides = array<i32>} : memref<256x1152xbf16, #tpu.memory_space<vmem>>, vector<256x128xbf16>,
    %c0_13 = arith.constant 0 : index
    %c1_14 = arith.constant 1 : index
    %c0_15 = arith.constant 0 : index
    %8 = vector.load %arg9[%c0_13, %c1_14, %c0_15] : memref<18x18x128xbf16, #tpu.memory_space<vmem>>, vector<16x16x128xbf16>
    %9 = vector.shape_cast %8 : vector<16x16x128xbf16> to vector<256x128xbf16>
    %c0_16 = arith.constant 0 : index
    %c128 = arith.constant 128 : index
    %10 = vector.load %arg10[%c0_16, %c128] : memref<256x1152xbf16, #tpu.memory_space<vmem>>, vector<256x128xbf16>
    tpu.vector_store %arg10[%c0_16, %c128], %9 {strides = array<i32>} : memref<256x1152xbf16, #tpu.memory_space<vmem>>, vector<256x128xbf16>,
    %c0_17 = arith.constant 0 : index
    %c2 = arith.constant 2 : index
    %c0_18 = arith.constant 0 : index
    %11 = vector.load %arg9[%c0_17, %c2, %c0_18] : memref<18x18x128xbf16, #tpu.memory_space<vmem>>, vector<16x16x128xbf16>
    %12 = vector.shape_cast %11 : vector<16x16x128xbf16> to vector<256x128xbf16>
    %c0_19 = arith.constant 0 : index
    %c256 = arith.constant 256 : index
    %13 = vector.load %arg10[%c0_19, %c256] : memref<256x1152xbf16, #tpu.memory_space<vmem>>, vector<256x128xbf16>
    tpu.vector_store %arg10[%c0_19, %c256], %12 {strides = array<i32>} : memref<256x1152xbf16, #tpu.memory_space<vmem>>, vector<256x128xbf16>,
    %c1_20 = arith.constant 1 : index
    %c0_21 = arith.constant 0 : index
    %c0_22 = arith.constant 0 : index
    %14 = vector.load %arg9[%c1_20, %c0_21, %c0_22] : memref<18x18x128xbf16, #tpu.memory_space<vmem>>, vector<16x16x128xbf16>
    %15 = vector.shape_cast %14 : vector<16x16x128xbf16> to vector<256x128xbf16>
    %c0_23 = arith.constant 0 : index
    %c384 = arith.constant 384 : index
    %16 = vector.load %arg10[%c0_23, %c384] : memref<256x1152xbf16, #tpu.memory_space<vmem>>, vector<256x128xbf16>
    tpu.vector_store %arg10[%c0_23, %c384], %15 {strides = array<i32>} : memref<256x1152xbf16, #tpu.memory_space<vmem>>, vector<256x128xbf16>,
    %c1_24 = arith.constant 1 : index
    %c1_25 = arith.constant 1 : index
    %c0_26 = arith.constant 0 : index
    %17 = vector.load %arg9[%c1_24, %c1_25, %c0_26] : memref<18x18x128xbf16, #tpu.memory_space<vmem>>, vector<16x16x128xbf16>
    %18 = vector.shape_cast %17 : vector<16x16x128xbf16> to vector<256x128xbf16>
    %c0_27 = arith.constant 0 : index
    %c512 = arith.constant 512 : index
    %19 = vector.load %arg10[%c0_27, %c512] : memref<256x1152xbf16, #tpu.memory_space<vmem>>, vector<256x128xbf16>
    tpu.vector_store %arg10[%c0_27, %c512], %18 {strides = array<i32>} : memref<256x1152xbf16, #tpu.memory_space<vmem>>, vector<256x128xbf16>,
    %c1_28 = arith.constant 1 : index
    %c2_29 = arith.constant 2 : index
    %c0_30 = arith.constant 0 : index
    %20 = vector.load %arg9[%c1_28, %c2_29, %c0_30] : memref<18x18x128xbf16, #tpu.memory_space<vmem>>, vector<16x16x128xbf16>
    %21 = vector.shape_cast %20 : vector<16x16x128xbf16> to vector<256x128xbf16>
    %c0_31 = arith.constant 0 : index
    %c640 = arith.constant 640 : index
    %22 = vector.load %arg10[%c0_31, %c640] : memref<256x1152xbf16, #tpu.memory_space<vmem>>, vector<256x128xbf16>
    tpu.vector_store %arg10[%c0_31, %c640], %21 {strides = array<i32>} : memref<256x1152xbf16, #tpu.memory_space<vmem>>, vector<256x128xbf16>,
    %c2_32 = arith.constant 2 : index
    %c0_33 = arith.constant 0 : index
    %c0_34 = arith.constant 0 : index
    %23 = vector.load %arg9[%c2_32, %c0_33, %c0_34] : memref<18x18x128xbf16, #tpu.memory_space<vmem>>, vector<16x16x128xbf16>
    %24 = vector.shape_cast %23 : vector<16x16x128xbf16> to vector<256x128xbf16>
    %c0_35 = arith.constant 0 : index
    %c768 = arith.constant 768 : index
    %25 = vector.load %arg10[%c0_35, %c768] : memref<256x1152xbf16, #tpu.memory_space<vmem>>, vector<256x128xbf16>
    tpu.vector_store %arg10[%c0_35, %c768], %24 {strides = array<i32>} : memref<256x1152xbf16, #tpu.memory_space<vmem>>, vector<256x128xbf16>,
    %c2_36 = arith.constant 2 : index
    %c1_37 = arith.constant 1 : index
    %c0_38 = arith.constant 0 : index
    %26 = vector.load %arg9[%c2_36, %c1_37, %c0_38] : memref<18x18x128xbf16, #tpu.memory_space<vmem>>, vector<16x16x128xbf16>
    %27 = vector.shape_cast %26 : vector<16x16x128xbf16> to vector<256x128xbf16>
    %c0_39 = arith.constant 0 : index
    %c896 = arith.constant 896 : index
    %28 = vector.load %arg10[%c0_39, %c896] : memref<256x1152xbf16, #tpu.memory_space<vmem>>, vector<256x128xbf16>
    tpu.vector_store %arg10[%c0_39, %c896], %27 {strides = array<i32>} : memref<256x1152xbf16, #tpu.memory_space<vmem>>, vector<256x128xbf16>,
    %c2_40 = arith.constant 2 : index
    %c2_41 = arith.constant 2 : index
    %c0_42 = arith.constant 0 : index
    %29 = vector.load %arg9[%c2_40, %c2_41, %c0_42] : memref<18x18x128xbf16, #tpu.memory_space<vmem>>, vector<16x16x128xbf16>
    %30 = vector.shape_cast %29 : vector<16x16x128xbf16> to vector<256x128xbf16>
    %c0_43 = arith.constant 0 : index
    %c1024 = arith.constant 1024 : index
    %31 = vector.load %arg10[%c0_43, %c1024] : memref<256x1152xbf16, #tpu.memory_space<vmem>>, vector<256x128xbf16>
    tpu.vector_store %arg10[%c0_43, %c1024], %30 {strides = array<i32>} : memref<256x1152xbf16, #tpu.memory_space<vmem>>, vector<256x128xbf16>,
    %c0_44 = arith.constant 0 : index
    %c0_45 = arith.constant 0 : index
    %32 = vector.load %arg10[%c0_44, %c0_45] : memref<256x1152xbf16, #tpu.memory_space<vmem>>, vector<256x1152xbf16>
    %c0_46 = arith.constant 0 : index
    %c0_47 = arith.constant 0 : index
    %33 = vector.load %arg2[%c0_46, %c0_47] : memref<1152x128xbf16, #tpu.memory_space<vmem>>, vector<1152x128xbf16>
    %cst_48 = arith.constant dense<0.000000e+00> : vector<256x128xf32>
    %34 = tpu.matmul %32, %33, %cst_48 {dimension_numbers = #tpu.dot_dimension_numbers<[1], [0], [0], [1], [0, 0, 1, 1], [], []>} : vector<256x1152xbf16>, vector<1152x128xbf16>, vector<256x128xf32> -> vector<256x128xf32>
    %c0_49 = arith.constant 0 : index
    %c0_50 = arith.constant 0 : index
    %35 = vector.load %arg3[%c0_49, %c0_50] : memref<1x128xf32, #tpu.memory_space<vmem>>, vector<1x128xf32>
    %36 = vector.broadcast %35 : vector<1x128xf32> to vector<256x128xf32>
    %37 = arith.mulf %34, %36 : vector<256x128xf32>
    %c0_51 = arith.constant 0 : index
    %c0_52 = arith.constant 0 : index
    %38 = vector.load %arg4[%c0_51, %c0_52] : memref<1x128xf32, #tpu.memory_space<vmem>>, vector<1x128xf32>
    %39 = vector.broadcast %38 : vector<1x128xf32> to vector<256x128xf32>
    %40 = arith.addf %37, %39 : vector<256x128xf32>
    %cst_53 = arith.constant 0.000000e+00 : f32
    %41 = vector.broadcast %cst_53 : f32 to vector<256x128xf32>
    %42 = arith.maximumf %40, %41 : vector<256x128xf32>
    %43 = vector.shape_cast %42 : vector<256x128xf32> to vector<16x16x128xf32>
    %44 = arith.truncf %43 : vector<16x16x128xf32> to vector<16x16x128xbf16>
    %c1_54 = arith.constant 1 : index
    %c1_55 = arith.constant 1 : index
    %c0_56 = arith.constant 0 : index
    %45 = vector.load %arg9[%c1_54, %c1_55, %c0_56] : memref<18x18x128xbf16, #tpu.memory_space<vmem>>, vector<16x16x128xbf16>
    tpu.vector_store %arg9[%c1_54, %c1_55, %c0_56], %44 {strides = array<i32>} : memref<18x18x128xbf16, #tpu.memory_space<vmem>>, vector<16x16x128xbf16>,
    %c0_57 = arith.constant 0 : index
    %c0_58 = arith.constant 0 : index
    %c0_59 = arith.constant 0 : index
    %46 = vector.load %arg9[%c0_57, %c0_58, %c0_59] : memref<18x18x128xbf16, #tpu.memory_space<vmem>>, vector<16x16x128xbf16>
    %47 = vector.shape_cast %46 : vector<16x16x128xbf16> to vector<256x128xbf16>
    %c0_60 = arith.constant 0 : index
    %c0_61 = arith.constant 0 : index
    %48 = vector.load %arg10[%c0_60, %c0_61] : memref<256x1152xbf16, #tpu.memory_space<vmem>>, vector<256x128xbf16>
    tpu.vector_store %arg10[%c0_60, %c0_61], %47 {strides = array<i32>} : memref<256x1152xbf16, #tpu.memory_space<vmem>>, vector<256x128xbf16>,
    %c0_62 = arith.constant 0 : index
    %c1_63 = arith.constant 1 : index
    %c0_64 = arith.constant 0 : index
    %49 = vector.load %arg9[%c0_62, %c1_63, %c0_64] : memref<18x18x128xbf16, #tpu.memory_space<vmem>>, vector<16x16x128xbf16>
    %50 = vector.shape_cast %49 : vector<16x16x128xbf16> to vector<256x128xbf16>
    %c0_65 = arith.constant 0 : index
    %c128_66 = arith.constant 128 : index
    %51 = vector.load %arg10[%c0_65, %c128_66] : memref<256x1152xbf16, #tpu.memory_space<vmem>>, vector<256x128xbf16>
    tpu.vector_store %arg10[%c0_65, %c128_66], %50 {strides = array<i32>} : memref<256x1152xbf16, #tpu.memory_space<vmem>>, vector<256x128xbf16>,
    %c0_67 = arith.constant 0 : index
    %c2_68 = arith.constant 2 : index
    %c0_69 = arith.constant 0 : index
    %52 = vector.load %arg9[%c0_67, %c2_68, %c0_69] : memref<18x18x128xbf16, #tpu.memory_space<vmem>>, vector<16x16x128xbf16>
    %53 = vector.shape_cast %52 : vector<16x16x128xbf16> to vector<256x128xbf16>
    %c0_70 = arith.constant 0 : index
    %c256_71 = arith.constant 256 : index
    %54 = vector.load %arg10[%c0_70, %c256_71] : memref<256x1152xbf16, #tpu.memory_space<vmem>>, vector<256x128xbf16>
    tpu.vector_store %arg10[%c0_70, %c256_71], %53 {strides = array<i32>} : memref<256x1152xbf16, #tpu.memory_space<vmem>>, vector<256x128xbf16>,
    %c1_72 = arith.constant 1 : index
    %c0_73 = arith.constant 0 : index
    %c0_74 = arith.constant 0 : index
    %55 = vector.load %arg9[%c1_72, %c0_73, %c0_74] : memref<18x18x128xbf16, #tpu.memory_space<vmem>>, vector<16x16x128xbf16>
    %56 = vector.shape_cast %55 : vector<16x16x128xbf16> to vector<256x128xbf16>
    %c0_75 = arith.constant 0 : index
    %c384_76 = arith.constant 384 : index
    %57 = vector.load %arg10[%c0_75, %c384_76] : memref<256x1152xbf16, #tpu.memory_space<vmem>>, vector<256x128xbf16>
    tpu.vector_store %arg10[%c0_75, %c384_76], %56 {strides = array<i32>} : memref<256x1152xbf16, #tpu.memory_space<vmem>>, vector<256x128xbf16>,
    %c1_77 = arith.constant 1 : index
    %c1_78 = arith.constant 1 : index
    %c0_79 = arith.constant 0 : index
    %58 = vector.load %arg9[%c1_77, %c1_78, %c0_79] : memref<18x18x128xbf16, #tpu.memory_space<vmem>>, vector<16x16x128xbf16>
    %59 = vector.shape_cast %58 : vector<16x16x128xbf16> to vector<256x128xbf16>
    %c0_80 = arith.constant 0 : index
    %c512_81 = arith.constant 512 : index
    %60 = vector.load %arg10[%c0_80, %c512_81] : memref<256x1152xbf16, #tpu.memory_space<vmem>>, vector<256x128xbf16>
    tpu.vector_store %arg10[%c0_80, %c512_81], %59 {strides = array<i32>} : memref<256x1152xbf16, #tpu.memory_space<vmem>>, vector<256x128xbf16>,
    %c1_82 = arith.constant 1 : index
    %c2_83 = arith.constant 2 : index
    %c0_84 = arith.constant 0 : index
    %61 = vector.load %arg9[%c1_82, %c2_83, %c0_84] : memref<18x18x128xbf16, #tpu.memory_space<vmem>>, vector<16x16x128xbf16>
    %62 = vector.shape_cast %61 : vector<16x16x128xbf16> to vector<256x128xbf16>
    %c0_85 = arith.constant 0 : index
    %c640_86 = arith.constant 640 : index
    %63 = vector.load %arg10[%c0_85, %c640_86] : memref<256x1152xbf16, #tpu.memory_space<vmem>>, vector<256x128xbf16>
    tpu.vector_store %arg10[%c0_85, %c640_86], %62 {strides = array<i32>} : memref<256x1152xbf16, #tpu.memory_space<vmem>>, vector<256x128xbf16>,
    %c2_87 = arith.constant 2 : index
    %c0_88 = arith.constant 0 : index
    %c0_89 = arith.constant 0 : index
    %64 = vector.load %arg9[%c2_87, %c0_88, %c0_89] : memref<18x18x128xbf16, #tpu.memory_space<vmem>>, vector<16x16x128xbf16>
    %65 = vector.shape_cast %64 : vector<16x16x128xbf16> to vector<256x128xbf16>
    %c0_90 = arith.constant 0 : index
    %c768_91 = arith.constant 768 : index
    %66 = vector.load %arg10[%c0_90, %c768_91] : memref<256x1152xbf16, #tpu.memory_space<vmem>>, vector<256x128xbf16>
    tpu.vector_store %arg10[%c0_90, %c768_91], %65 {strides = array<i32>} : memref<256x1152xbf16, #tpu.memory_space<vmem>>, vector<256x128xbf16>,
    %c2_92 = arith.constant 2 : index
    %c1_93 = arith.constant 1 : index
    %c0_94 = arith.constant 0 : index
    %67 = vector.load %arg9[%c2_92, %c1_93, %c0_94] : memref<18x18x128xbf16, #tpu.memory_space<vmem>>, vector<16x16x128xbf16>
    %68 = vector.shape_cast %67 : vector<16x16x128xbf16> to vector<256x128xbf16>
    %c0_95 = arith.constant 0 : index
    %c896_96 = arith.constant 896 : index
    %69 = vector.load %arg10[%c0_95, %c896_96] : memref<256x1152xbf16, #tpu.memory_space<vmem>>, vector<256x128xbf16>
    tpu.vector_store %arg10[%c0_95, %c896_96], %68 {strides = array<i32>} : memref<256x1152xbf16, #tpu.memory_space<vmem>>, vector<256x128xbf16>,
    %c2_97 = arith.constant 2 : index
    %c2_98 = arith.constant 2 : index
    %c0_99 = arith.constant 0 : index
    %70 = vector.load %arg9[%c2_97, %c2_98, %c0_99] : memref<18x18x128xbf16, #tpu.memory_space<vmem>>, vector<16x16x128xbf16>
    %71 = vector.shape_cast %70 : vector<16x16x128xbf16> to vector<256x128xbf16>
    %c0_100 = arith.constant 0 : index
    %c1024_101 = arith.constant 1024 : index
    %72 = vector.load %arg10[%c0_100, %c1024_101] : memref<256x1152xbf16, #tpu.memory_space<vmem>>, vector<256x128xbf16>
    tpu.vector_store %arg10[%c0_100, %c1024_101], %71 {strides = array<i32>} : memref<256x1152xbf16, #tpu.memory_space<vmem>>, vector<256x128xbf16>,
    %c0_102 = arith.constant 0 : index
    %c0_103 = arith.constant 0 : index
    %73 = vector.load %arg10[%c0_102, %c0_103] : memref<256x1152xbf16, #tpu.memory_space<vmem>>, vector<256x1152xbf16>
    %c0_104 = arith.constant 0 : index
    %c0_105 = arith.constant 0 : index
    %74 = vector.load %arg5[%c0_104, %c0_105] : memref<1152x128xbf16, #tpu.memory_space<vmem>>, vector<1152x128xbf16>
    %cst_106 = arith.constant dense<0.000000e+00> : vector<256x128xf32>
    %75 = tpu.matmul %73, %74, %cst_106 {dimension_numbers = #tpu.dot_dimension_numbers<[1], [0], [0], [1], [0, 0, 1, 1], [], []>} : vector<256x1152xbf16>, vector<1152x128xbf16>, vector<256x128xf32> -> vector<256x128xf32>
    %c0_107 = arith.constant 0 : index
    %c0_108 = arith.constant 0 : index
    %76 = vector.load %arg6[%c0_107, %c0_108] : memref<1x128xf32, #tpu.memory_space<vmem>>, vector<1x128xf32>
    %77 = vector.broadcast %76 : vector<1x128xf32> to vector<256x128xf32>
    %78 = arith.mulf %75, %77 : vector<256x128xf32>
    %c0_109 = arith.constant 0 : index
    %c0_110 = arith.constant 0 : index
    %79 = vector.load %arg7[%c0_109, %c0_110] : memref<1x128xf32, #tpu.memory_space<vmem>>, vector<1x128xf32>
    %80 = vector.broadcast %79 : vector<1x128xf32> to vector<256x128xf32>
    %81 = arith.addf %78, %80 : vector<256x128xf32>
    %82 = vector.shape_cast %1 : vector<16x16x128xbf16> to vector<256x128xbf16>
    %83 = arith.extf %82 : vector<256x128xbf16> to vector<256x128xf32>
    %84 = arith.addf %81, %83 : vector<256x128xf32>
    %cst_111 = arith.constant 0.000000e+00 : f32
    %85 = vector.broadcast %cst_111 : f32 to vector<256x128xf32>
    %86 = arith.maximumf %84, %85 : vector<256x128xf32>
    %87 = vector.shape_cast %86 : vector<256x128xf32> to vector<1x16x16x128xf32>
    %c0_112 = arith.constant 0 : index
    %c0_113 = arith.constant 0 : index
    %c0_114 = arith.constant 0 : index
    %c0_115 = arith.constant 0 : index
    %88 = vector.load %arg8[%c0_112, %c0_113, %c0_114, %c0_115] : memref<1x16x16x128xf32, #tpu.memory_space<vmem>>, vector<1x16x16x128xf32>
    tpu.vector_store %arg8[%c0_112, %c0_113, %c0_114, %c0_115], %87 {strides = array<i32>} : memref<1x16x16x128xf32, #tpu.memory_space<vmem>>, vector<1x16x16x128xf32>,
    return
  }
  func.func @transform_0(%arg0: i32) -> (i32, i32, i32, i32) {
    %c0_i32 = arith.constant 0 : i32
    %c0_i32_0 = arith.constant 0 : i32
    %c0_i32_1 = arith.constant 0 : i32
    %c0_i32_2 = arith.constant 0 : i32
    return %arg0, %c0_i32, %c0_i32_0, %c0_i32_1 : i32, i32, i32, i32
  }
  func.func @transform_1(%arg0: i32) -> (i32, i32) {
    %c0_i32 = arith.constant 0 : i32
    %c0_i32_0 = arith.constant 0 : i32
    %c0_i32_1 = arith.constant 0 : i32
    return %c0_i32, %c0_i32_0 : i32, i32
  }
  func.func @transform_2(%arg0: i32) -> (i32, i32) {
    %c0_i32 = arith.constant 0 : i32
    %c0_i32_0 = arith.constant 0 : i32
    %c0_i32_1 = arith.constant 0 : i32
    return %c0_i32, %c0_i32_0 : i32, i32
  }
  func.func @transform_3(%arg0: i32) -> (i32, i32) {
    %c0_i32 = arith.constant 0 : i32
    %c0_i32_0 = arith.constant 0 : i32
    %c0_i32_1 = arith.constant 0 : i32
    return %c0_i32, %c0_i32_0 : i32, i32
  }
  func.func @transform_4(%arg0: i32) -> (i32, i32) {
    %c0_i32 = arith.constant 0 : i32
    %c0_i32_0 = arith.constant 0 : i32
    %c0_i32_1 = arith.constant 0 : i32
    return %c0_i32, %c0_i32_0 : i32, i32
  }
  func.func @transform_5(%arg0: i32) -> (i32, i32) {
    %c0_i32 = arith.constant 0 : i32
    %c0_i32_0 = arith.constant 0 : i32
    %c0_i32_1 = arith.constant 0 : i32
    return %c0_i32, %c0_i32_0 : i32, i32
  }
  func.func @transform_6(%arg0: i32) -> (i32, i32) {
    %c0_i32 = arith.constant 0 : i32
    %c0_i32_0 = arith.constant 0 : i32
    %c0_i32_1 = arith.constant 0 : i32
    return %c0_i32, %c0_i32_0 : i32, i32
  }
  func.func @transform_7(%arg0: i32) -> (i32, i32, i32, i32) {
    %c0_i32 = arith.constant 0 : i32
    %c0_i32_0 = arith.constant 0 : i32
    %c0_i32_1 = arith.constant 0 : i32
    %c0_i32_2 = arith.constant 0 : i32
    return %arg0, %c0_i32, %c0_i32_0, %c0_i32_1 : i32, i32, i32, i32
  }
}

</mosaic_0001>

<bundles_post_ra>
// kernel: a_call__.1
= control target key start
LH: loop header
LB: loop body
LE: loop exit
PB: predicated region body
PF: predicated region fallthrough
CT: control target
= control target key end

     0   :  { %12 = vsyncpa [#allocation5], 0  ;;  %s13618_s24 = smov 0   ;;  %s16326_s0 = inlined_call_operand.vmem [shape: bf16[2,16,16,128], index: 0, kind: input, shape index: {}]   ;;  %s16327_s1 = inlined_call_operand.hbm [shape: bf16[1152,128], index: 1, kind: input, shape index: {}]   ;;  %s16328_s2 = inlined_call_operand.vmem [shape: f32[1,128], index: 2, kind: input, shape index: {}, may-alias: {2,5}]   ;;  %s16329_s3 = inlined_call_operand.vmem [shape: f32[1,128], index: 3, kind: input, shape index: {}, may-alias: {3,6}]   ;;  %s16330_s4 = inlined_call_operand.vmem [shape: bf16[1152,128], index: 4, kind: input, shape index: {}]   ;;  %s16331_s5 = inlined_call_operand.vmem [shape: f32[1,128], index: 5, kind: input, shape index: {}, may-alias: {2,5}]   ;;  %s16332_s6 = inlined_call_operand.vmem [shape: f32[1,128], index: 6, kind: input, shape index: {}, may-alias: {3,6}]   ;;  %s16333_s7 = inlined_call_operand.vmem [shape: f32[2,16,16,128], index: 7, kind: output, shape index: {}]  }
   0x1 LB: > { %s13624_s25 = sadd.s32 4294967295, %s13572_s24   ;;  %p11288_p0 = scmp.ge.s32.totalorder %s13572_s24, 1  ;;  %s13572_s24 = sphi %s13618_s24, %s18_s24  }
   0x2   : > { %p201_p1 = scmp.lt.s32.totalorder %s13572_s24, 3  ;;  %s13574_s26 = smov [#allocation4]  }
   0x3   : > { %s213_s27 = sshll.u32 %s13574_s26, 4  ;;  %p12945_p3 = scmp.eq.s32.totalorder %s13624_s25, 0  ;;  %s214_s27 = int_to_ptr.vmem [resolvable:$true] %s213_s27 }
   0x4   : > { %p13628_p2 = pnand %p11288_p0, %p201_p1  ;;  %s13547_s29 = scalar_lea.vmem %s214_s27, 9216 }
   0x5   : > { %p13548_p7 = scmp.ne.s32.totalorder %s214_s27, %s13547_s29  ;;  %p13555_p10 = scmp.lt.s32.totalorder %s214_s27, %s214_s27 }
   0x6   : > { %p12941_p4 = pneg %p13628_p2  ;;  %p13556_p11 = scmp.lt.s32.totalorder %s13547_s29, %s13547_s29 }
   0x8   : > { %p12942_p5 = pnand %p12945_p3, %p12941_p4  ;;  %p13557_p12 = por %p13556_p11, %p13555_p10 }
   0xa   : > { %p13538_p6 = pneg %p12942_p5 }
   0xc   : > { %p13550_p8 = pnand %p13548_p7, %p13538_p6 }
   0xe   : > { %p13551_p9 = pneg %p13550_p8 }
  0x10   : > { %p13558_p13 = pnand %p13557_p12, %p13551_p9 }
  0x12   : > { %13561 = shalt.err (!%p13558_p13)
}
  0x13   : > { %s13575_s30 = smov 64   ;;  %s13576_s8 = smov 4  }
  0x14   : > { %12944 = dma.hbm_to_vmem [thread:$0]  (!%p12942_p5), %s16327_s1, 9216, %s214_s27, [#allocation5], %s13575_s30, %s13575_s30, %s13576_s8  }
  0x15   : > { %252 = sbr.rel (%p13628_p2) target bundleno = 1432 (0x598), region = 48 }
  0x1a   : > { %13567 = dma.done.wait (%p12945_p3), [#allocation5], 9216  }
  0x1b   : > { %13569 = vsyncadd (%p12945_p3), [#allocation5], 4294958080  ;;  %v13577_v0 = vmov 0   ;;  %v12959_v1 = vld [vmem:[#allocation4 + $0x78] sm:$0xff]   ;;  %v12963_v5 = vld [vmem:[#allocation4 + $0x70] sm:$0xff]   ;;  %p284_p0 = scmp.lt.s32.totalorder %s13624_s25, 1 }
  0x1c   : > { %327 = vst [vmem:[#allocation2] sm:$0xf] %v13577_v0  ;;  %328 = vst [vmem:[#allocation2 + $0x4] sm:$0xf] %v13577_v0  ;;  %v12960_v2 = vld [vmem:[#allocation4 + $0xf8] sm:$0xff]   ;;  %11897 = vmatprep.subr.bf16.mxu0 %v12959_v1  ;;  %v12964_v6 = vld [vmem:[#allocation4 + $0xf0] sm:$0xff]  }
  0x1d   : > { %329 = vst [vmem:[#allocation2 + $0x8] sm:$0x1] %v13577_v0  ;;  %330 = vst [vmem:[#allocation2 + $0xc] sm:$0xf] %v13577_v0  ;;  %v12961_v3 = vld [vmem:[#allocation4 + $0x38] sm:$0xff]   ;;  %12009 = vmatprep.subr.bf16.mxu1 %v12960_v2  ;;  %v12965_v7 = vld [vmem:[#allocation4 + $0x30] sm:$0xff]  }
  0x1e   : > { %331 = vst [vmem:[#allocation2 + $0x10] sm:$0xf] %v13577_v0  ;;  %332 = vst [vmem:[#allocation2 + $0x14] sm:$0x1] %v13577_v0  ;;  %v12962_v4 = vld [vmem:[#allocation4 + $0xb8] sm:$0xff]   ;;  %11898 = vmatpush3.bf16.msra.mxu0 %v12961_v3  ;;  %v12966_v8 = vld [vmem:[#allocation4 + $0xb0] sm:$0xff]  }
  0x1f   : > { %333 = vst [vmem:[#allocation2 + $0x18] sm:$0xf] %v13577_v0  ;;  %334 = vst [vmem:[#allocation2 + $0x1c] sm:$0xf] %v13577_v0  ;;  %12010 = vmatpush3.bf16.msra.mxu1 %v12962_v4  ;;  %11899 = vmatprep.subr.bf16.mxu0 %v12963_v5  ;;  %v12967_v9 = vld [vmem:[#allocation4 + $0x68] sm:$0xff]   ;;  %v12971_v13 = vld [vmem:[#allocation4 + $0x60] sm:$0xff]  }
  0x20   : > { %335 = vst [vmem:[#allocation2 + $0x20] sm:$0x1] %v13577_v0  ;;  %336 = vst [vmem:[#allocation2 + $0x24] sm:$0xf] %v13577_v0  ;;  %12011 = vmatprep.subr.bf16.mxu1 %v12964_v6  ;;  %v12968_v10 = vld [vmem:[#allocation4 + $0xe8] sm:$0xff]   ;;  %v12972_v14 = vld [vmem:[#allocation4 + $0xe0] sm:$0xff]  }
  0x21   : > { %337 = vst [vmem:[#allocation2 + $0x28] sm:$0xf] %v13577_v0  ;;  %338 = vst [vmem:[#allocation2 + $0x2c] sm:$0x1] %v13577_v0  ;;  %v12969_v11 = vld [vmem:[#allocation4 + $0x28] sm:$0xff]   ;;  %v12973_v15 = vld [vmem:[#allocation4 + $0x20] sm:$0xff]  }
  0x22   : > { %339 = vst [vmem:[#allocation2 + $0x30] sm:$0xf] %v13577_v0  ;;  %340 = vst [vmem:[#allocation2 + $0x34] sm:$0xf] %v13577_v0  ;;  %11900 = vmatpush3.bf16.msra.mxu0 %v12965_v7  ;;  %v12970_v12 = vld [vmem:[#allocation4 + $0xa8] sm:$0xff]   ;;  %v12974_v16 = vld [vmem:[#allocation4 + $0xa0] sm:$0xff]  }
  0x23   : > { %341 = vst [vmem:[#allocation2 + $0x38] sm:$0x1] %v13577_v0  ;;  %342 = vst [vmem:[#allocation2 + $0x3c] sm:$0xf] %v13577_v0  ;;  %12012 = vmatpush3.bf16.msra.mxu1 %v12966_v8  ;;  %11901 = vmatprep.subr.bf16.mxu0 %v12967_v9  ;;  %v12975_v17 = vld [vmem:[#allocation4 + $0x58] sm:$0xff]   ;;  %v12979_v21 = vld [vmem:[#allocation4 + $0x50] sm:$0xff]  }
  0x24   : > { %343 = vst [vmem:[#allocation2 + $0x40] sm:$0xf] %v13577_v0  ;;  %344 = vst [vmem:[#allocation2 + $0x44] sm:$0x1] %v13577_v0  ;;  %12013 = vmatprep.subr.bf16.mxu1 %v12968_v10  ;;  %v12976_v18 = vld [vmem:[#allocation4 + $0xd8] sm:$0xff]   ;;  %v12980_v22 = vld [vmem:[#allocation4 + $0xd0] sm:$0xff]  }
  0x25   : > { %345 = vst [vmem:[#allocation2 + $0x48] sm:$0xf] %v13577_v0  ;;  %346 = vst [vmem:[#allocation2 + $0x4c] sm:$0xf] %v13577_v0  ;;  %v12977_v19 = vld [vmem:[#allocation4 + $0x18] sm:$0xff]   ;;  %v12981_v23 = vld [vmem:[#allocation4 + $0x10] sm:$0xff]  }
  0x26   : > { %347 = vst [vmem:[#allocation2 + $0x50] sm:$0x1] %v13577_v0  ;;  %348 = vst [vmem:[#allocation2 + $0x54] sm:$0xf] %v13577_v0  ;;  %11902 = vmatpush3.bf16.msra.mxu0 %v12969_v11  ;;  %v12978_v20 = vld [vmem:[#allocation4 + $0x98] sm:$0xff]   ;;  %v12982_v24 = vld [vmem:[#allocation4 + $0x90] sm:$0xff]  }
  0x27   : > { %349 = vst [vmem:[#allocation2 + $0x58] sm:$0xf] %v13577_v0  ;;  %350 = vst [vmem:[#allocation2 + $0x5c] sm:$0x1] %v13577_v0  ;;  %12014 = vmatpush3.bf16.msra.mxu1 %v12970_v12  ;;  %11903 = vmatprep.subr.bf16.mxu0 %v12971_v13  ;;  %v12983_v25 = vld [vmem:[#allocation4 + $0x48] sm:$0xff]   ;;  %s16499_s25 = smov (!%p284_p0, %s13624_s25), 1 }
  0x28   : > { %351 = vst [vmem:[#allocation2 + $0x60] sm:$0xf] %v13577_v0  ;;  %352 = vst [vmem:[#allocation2 + $0x64] sm:$0xf] %v13577_v0  ;;  %12015 = vmatprep.subr.bf16.mxu1 %v12972_v14  ;;  %v12984_v26 = vld [vmem:[#allocation4 + $0xc8] sm:$0xff]   ;;  %v12987_v29 = vld [vmem:[#allocation4 + $0x40] sm:$0xff]  }
  0x29   : > { %353 = vst [vmem:[#allocation2 + $0x68] sm:$0x1] %v13577_v0  ;;  %354 = vst [vmem:[#allocation2 + $0x6c] sm:$0xf] %v13577_v0  ;;  %v12985_v27 = vld [vmem:[#allocation4 + $0x8] sm:$0xff]   ;;  %v12988_v30 = vld [vmem:[#allocation4 + $0xc0] sm:$0xff]  }
  0x2a   : > { %355 = vst [vmem:[#allocation2 + $0x70] sm:$0xf] %v13577_v0  ;;  %356 = vst [vmem:[#allocation2 + $0x74] sm:$0x1] %v13577_v0  ;;  %11904 = vmatpush3.bf16.msra.mxu0 %v12973_v15  ;;  %v12986_v28 = vld [vmem:[#allocation4 + $0x88] sm:$0xff]   ;;  %v12989_v31 = vld [vmem:[#allocation4] sm:$0xff]  }
  0x2b   : > { %357 = vst [vmem:[#allocation2 + $0x78] sm:$0xf] %v13577_v0  ;;  %358 = vst [vmem:[#allocation2 + $0x7c] sm:$0xf] %v13577_v0  ;;  %12016 = vmatpush3.bf16.msra.mxu1 %v12974_v16  ;;  %11905 = vmatprep.subr.bf16.mxu0 %v12975_v17  ;;  %vm934_vm0 = vsmask.f32 3328 }
  0x2c   : > { %359 = vst [vmem:[#allocation2 + $0x80] sm:$0x1] %v13577_v0  ;;  %360 = vst [vmem:[#allocation2 + $0x84] sm:$0xf] %v13577_v0  ;;  %12017 = vmatprep.subr.bf16.mxu1 %v12976_v18  ;;  %vm935_vm1 = vsmask.f32 7440 }
  0x2d   : > { %361 = vst [vmem:[#allocation2 + $0x88] sm:$0xf] %v13577_v0  ;;  %362 = vst [vmem:[#allocation2 + $0x8c] sm:$0x1] %v13577_v0  ;;  %v12990_v32 = vld [vmem:[#allocation4 + $0x80] sm:$0xff]   ;;  %s11863_s11 = sshll.u32 %s16499_s25, 7 }
  0x2e   : > { %363 = vst [vmem:[#allocation2 + $0x90] sm:$0xf] %v13577_v0  ;;  %364 = vst [vmem:[#allocation2 + $0x94] sm:$0xf] %v13577_v0  ;;  %11906 = vmatpush3.bf16.msra.mxu0 %v12977_v19  ;;  %vm705_vm2 = vcmask 1043456   ;;  %v12995_v43 = vld [vmem:[#allocation4 + $0x178] sm:$0xff]   ;;  %s13654_s14 = scalar_lea.vmem %s16326_s0, %s11863_s11 }
  0x2f   : > { %365 = vst [vmem:[#allocation2 + $0x98] sm:$0x1] %v13577_v0  ;;  %366 = vst [vmem:[#allocation2 + $0x9c] sm:$0xf] %v13577_v0  ;;  %12018 = vmatpush3.bf16.msra.mxu1 %v12978_v20  ;;  %11907 = vmatprep.subr.bf16.mxu0 %v12979_v21  ;;  %v822_v33 = vld [vmem:[#allocation2] sm:$0xf] }
  0x30   : > { %367 = vst [vmem:[#allocation2 + $0xa0] sm:$0xf] %v13577_v0  ;;  %368 = vst [vmem:[#allocation2 + $0xa4] sm:$0x1] %v13577_v0  ;;  %12019 = vmatprep.subr.bf16.mxu1 %v12980_v22  ;;  %v823_v34 = vld [vmem:[#allocation2 + $0x4] sm:$0xf] }
  0x31   : > { %369 = vst [vmem:[#allocation2 + $0xa8] sm:$0xf] %v13577_v0  ;;  %370 = vst [vmem:[#allocation2 + $0xac] sm:$0xf] %v13577_v0  ;;  %v886_v35 = vld [vmem:[#allocation2] sm:$0xf] }
  0x32   : > { %371 = vst [vmem:[#allocation2 + $0xb0] sm:$0x1] %v13577_v0  ;;  %372 = vst [vmem:[#allocation2 + $0xb4] sm:$0xf] %v13577_v0  ;;  %11908 = vmatpush3.bf16.msra.mxu0 %v12981_v23  ;;  %v887_v36 = vld [vmem:[#allocation2 + $0x4] sm:$0xf] }
  0x33   : > { %373 = vst [vmem:[#allocation2 + $0xb8] sm:$0xf] %v13577_v0  ;;  %374 = vst [vmem:[#allocation2 + $0xbc] sm:$0x1] %v13577_v0  ;;  %12020 = vmatpush3.bf16.msra.mxu1 %v12982_v24  ;;  %11909 = vmatprep.subr.bf16.mxu0 %v12983_v25  ;;  %v888_v37 = vld [vmem:[#allocation2 + $0x8] sm:$0x1] }
  0x34   : > { %375 = vst [vmem:[#allocation2 + $0xc0] sm:$0xf] %v13577_v0  ;;  %376 = vst [vmem:[#allocation2 + $0xc4] sm:$0xf] %v13577_v0  ;;  %12021 = vmatprep.subr.bf16.mxu1 %v12984_v26  ;;  %v938_v38 = vshrl.u32 %v886_v35, 16  ;;  %v941_v39 = vshll.u32 %v886_v35, 16 }
  0x35   : > { %377 = vst [vmem:[#allocation2 + $0xc8] sm:$0x1] %v13577_v0  ;;  %378 = vst [vmem:[#allocation2 + $0xcc] sm:$0xf] %v13577_v0  ;;  %vm381_vm3 = vsmask.f32 256 }
  0x36   : > { %379 = vst [vmem:[#allocation2 + $0xd0] sm:$0xf] %v13577_v0  ;;  %380 = vst [vmem:[#allocation2 + $0xd4] sm:$0x1] %v13577_v0  ;;  %11910 = vmatpush3.bf16.msra.mxu0 %v12985_v27  ;;  %vm382_vm4 = vsmask.f32 4368 }
  0x37   : > { %12022 = vmatpush3.bf16.msra.mxu1 %v12986_v28  ;;  %11911 = vmatprep.subr.bf16.mxu0 %v12987_v29  ;;  %854 = vst [vmem:[#allocation3] sm:$0xf] %v822_v33  ;;  %855 = vst [vmem:[#allocation3 + $0x24] sm:$0xf] %v823_v34  ;;  %v947_v40 = vshll.u32 %v887_v36, 16  ;;  %v951_v41 = vshrl.u32 %v887_v36, 16 }
  0x38   : > { %12023 = vmatprep.subr.bf16.mxu1 %v12988_v30  ;;  %v957_v42 = vshll.u32 %v888_v37, 16  ;;  %vm706_vm5 = vsmask.f32 7938  ;;  %v940_v44 = vrot.slane %v938_v38, 4  ;;  %v943_v45 = vrot.slane %v941_v39, 5  ;;  %vm13658_vm8 = vmor %vm934_vm0, %vm935_vm1  ;;  %s11864_s12 = sshll.u32 %s16499_s25, 8 }
  0x39   : > { %v6304_v46 = vld [vmem:[#allocation2] sm:$0xf]  ;;  %vm712_vm6 = vcmask 1040384   ;;  %vm1481_vm7 = vcmask 1042432   ;;  %v949_v47 = vrot.slane %v947_v40, 5  ;;  %v953_v48 = vrot.slane %v951_v41, 4  ;;  %vm13673_vm10 = vmand %vm705_vm2, %vm706_vm5  ;;  %s16059_s15 = scalar_lea.vmem %s16333_s7, %s11864_s12 }
  0x3a   : > { %11912 = vmatpush3.bf16.msra.mxu0 %v12989_v31  ;;  %v959_v49 = vrot.slane %v957_v42, 5  ;;  %v6305_v50 = vld [vmem:[#allocation2 + $0x4] sm:$0xf]  ;;  %v6353_v51 = vshrl.u32 %v6304_v46, 16  ;;  %v944_v52 = vor.u32 %v943_v45, %v940_v44  ;;  %v6306_v53 = vld [vmem:[#allocation2 + $0x8] sm:$0x1]  ;;  %vm13687_vm12 = vmor %vm381_vm3, %vm382_vm4 }
  0x3b   : > { %12024 = vmatpush3.bf16.msra.mxu1 %v12990_v32  ;;  %12121 = vmatprep.subr.bf16.mxu0 %v12995_v43  ;;  %v6356_v54 = vshll.u32 %v6304_v46, 16  ;;  %v6362_v55 = vshll.u32 %v6305_v50, 16  ;;  %v6366_v56 = vshrl.u32 %v6305_v50, 16  ;;  %v16345_v57 = vmov 0  ;;  %v295_v61 = vld [vmem:[%s13654_s14] sm:$0xf]  ;;  %vm13695_vm13 = vmand %vm712_vm6, %vm381_vm3 }
  0x3c   : > { %v16346_v57 = vsel %vm13658_vm8, 4294967295, %v16345_v57  ;;  %v954_v58 = vor.u32 %v953_v48, %v949_v47  ;;  %v6355_v59 = vrot.slane %v6353_v51, 4  ;;  %v6372_v60 = vshll.u32 %v6306_v53, 16  ;;  %v296_v62 = vld [vmem:[%s13654_s14 + $0x4] sm:$0xf]  ;;  %v12996_v48 = vld [vmem:[#allocation4 + $0x138] sm:$0xff]  }
  0x3d   : > { %16347 = vst [vmem:[#allocation7_spill] sm:$0xff] %v16346_v57  ;;  %v945_v63 = vrot.slane %v944_v52, 4  ;;  %v6358_v0 = vrot.slane %v6356_v54, 5  ;;  %v13664_v1 = vrot.slane %v6362_v55, 5  ;;  %v6368_v2 = vrot.slane %v6366_v56, 4  ;;  %v13007_v56 = vld [vmem:[#allocation4 + $0x170] sm:$0xff]  }
  0x3e   : > { %v955_v3 = vrot.slane %v954_v58, 4  ;;  %v385_v4 = vshrl.u32 %v295_v61, 16  ;;  %v388_v5 = vshll.u32 %v295_v61, 16  ;;  %v1385_v6 = vld [vmem:[#allocation2] sm:$0xe]  ;;  %vm1482_vm9 = vcmask 1046532  }
  0x3f   : > { %v950_v7 = vsel %vm13658_vm8, %v945_v63, %v949_v47  ;;  %v6359_v8 = vor.u32 %v6358_v0, %v6355_v59  ;;  %v6369_v9 = vor.u32 %v6368_v2, %v13664_v1  ;;  %v393_v10 = vshrl.u32 %v296_v62, 16  ;;  %v1386_v11 = vld [vmem:[#allocation2 + $0x4] sm:$0xf]  ;;  %v1387_v12 = vld [vmem:[#allocation2 + $0x8] sm:$0x1]  ;;  %vm13679_vm11 = vmor %vm1481_vm7, %vm1482_vm9 }
  0x40   : > { %v960_v13 = vsel %vm13658_vm8, %v955_v3, %v959_v49  ;;  %1353 = vst [vmem:[#allocation3 + $0x4] sm:$0xf] %v950_v7  ;;  %v387_v14 = vrot.slane %v385_v4, 7  ;;  %v396_v15 = vshll.u32 %v296_v62, 16  ;;  %v16348_v16 = vmov 0 }
  0x41   : > { %v16349_v16 = vsel %vm13673_vm10, 4294967295, %v16348_v16  ;;  %v708_v17 = vld [vmem:[#allocation2 + $0xc] sm:$0xf]  ;;  %v11297_v18 = vrot.slane %v1385_v6, 9  ;;  %1354 = vst [vmem:[#allocation3 + $0x28] sm:$0xf] %v960_v13 }
  0x42   : > { %16350 = vst [vmem:[#allocation8_spill] sm:$0xff] %v16349_v16  ;;  %v6360_v19 = vrot.slane %v6359_v8, 4  ;;  %v6374_v20 = vrot.slane %v6372_v60, 5  ;;  %v395_v21 = vrot.slane %v393_v10, 7  ;;  %v16351_v22 = vmov 0  ;;  %v13008_v8 = vld [vmem:[#allocation4 + $0x130] sm:$0xff]  }
  0x43   : > { %v16352_v22 = vsel %vm13679_vm11, 4294967295, %v16351_v22  ;;  %v1486_v23 = vrot.slane %v1386_v11, 5  ;;  %v13683_v24 = vld [vmem:[#allocation2] sm:$0xe]  ;;  %v6370_v25 = vrot.slane %v6369_v9, 4  ;;  %v16354_v26 = vmov 0 }
  0x44   : > { %16353 = vst [vmem:[#allocation9_spill] sm:$0xff] %v16352_v22  ;;  %v16355_v26 = vsel %vm13687_vm12, 4294967295, %v16354_v26  ;;  %v390_v27 = vor.u32 %v388_v5, %v387_v14  ;;  %v391_v28 = vrot.slane %v387_v14, 4  ;;  %v1489_v29 = vrot.slane %v1387_v12, 5  ;;  %v13691_v30 = vld [vmem:[#allocation2 + $0x4] sm:$0xf] }
  0x45   : > { %16356 = vst [vmem:[#allocation10_spill] sm:$0xff] %v16355_v26  ;;  %v398_v31 = vor.u32 %v396_v15, %v395_v21  ;;  %v400_v32 = vrot.slane %v395_v21, 4  ;;  %v16357_v33 = vmov 0  ;;  %v13699_v34 = vld [vmem:[#allocation2 + $0x8] sm:$0x1]  ;;  %v1487_v37 = vsel %vm13679_vm11, %v11297_v18, %v1486_v23  ;;  %v13019_v13 = vld [vmem:[#allocation4 + $0x168] sm:$0xff]  }
  0x46   : > { %v16358_v33 = vsel %vm13695_vm13, 4294967295, %v16357_v33  ;;  %v6240_v35 = vld [vmem:[#allocation2] sm:$0xf]  ;;  %v709_v36 = vsel %vm13673_vm10, %v390_v27, %v708_v17  ;;  %v1488_v38 = vrot.slane %v1486_v23, 4  ;;  %v6365_v39 = vsel %vm13658_vm8, %v6360_v19, %v13664_v1  ;;  %1628 = vst [vmem:[#allocation3 + $0x8] sm:$0xf] %v1487_v37 }
  0x47   : > { %16359 = vst [vmem:[#allocation11_spill] sm:$0xff] %v16358_v33  ;;  %v399_v40 = vsel %vm13687_vm12, %v391_v28, %v398_v31  ;;  %710 = vst [vmem:[#allocation2 + $0xc] sm:$0xf] %v709_v36  ;;  %v11595_v41 = vrot.slane %v13683_v24, 9  ;;  %v714_v42 = vld [vmem:[#allocation2 + $0x14] sm:$0x1]  ;;  %v6375_v45 = vsel %vm13658_vm8, %v6370_v25, %v6374_v20 }
  0x48   : > { %v297_v43 = vld [vmem:[%s13654_s14 + $0x8] sm:$0xf]  ;;  %v6241_v44 = vld [vmem:[#allocation2 + $0x4] sm:$0xf]  ;;  %711 = vst [vmem:[#allocation2 + $0x10] sm:$0xf] %v399_v40  ;;  %v1490_v46 = vsel %vm13679_vm11, %v1488_v38, %v1489_v29  ;;  %v715_v49 = vsel %vm13695_vm13, %v400_v32, %v714_v42 }
  0x49   : > { %v6898_v47 = vrot.slane %v13691_v30, 5  ;;  %v298_v50 = vld [vmem:[%s13654_s14 + $0xc] sm:$0xf]  ;;  %v3325_v51 = vld [vmem:[#allocation3] sm:$0xff]  ;;  %1629 = vst [vmem:[#allocation3 + $0x2c] sm:$0xf] %v1490_v46 }
  0x4a   : > { %716 = vst [vmem:[#allocation2 + $0x14] sm:$0x1] %v715_v49  ;;  %v402_v52 = vshrl.u32 %v297_v43, 16  ;;  %v405_v53 = vshll.u32 %v297_v43, 16  ;;  %v410_v54 = vshrl.u32 %v298_v50, 16  ;;  %v413_v55 = vshll.u32 %v298_v50, 16 }
  0x4b   : > { %v3330_v58 = vld [vmem:[#allocation3 + $0x24] sm:$0xff]  ;;  %v6901_v60 = vrot.slane %v13699_v34, 5  ;;  %v717_v61 = vld [vmem:[#allocation2 + $0x18] sm:$0xf]  ;;  %6272 = vst [vmem:[#allocation3] sm:$0xf] %v6240_v35  ;;  %v6899_v35 = vsel %vm13679_vm11, %v11595_v41, %v6898_v47 }
  0x4c   : > { %v12991_v59 = vld [vmem:[#allocation3 + $0x4] ss:$36 sps:$4 sm:$0xff]   ;;  %6273 = vst [vmem:[#allocation3 + $0x24] sm:$0xf] %v6241_v44  ;;  %v11345_v62 = vcombine.low %v3325_v51, %v3330_v58  ;;  %v404_v63 = vrot.slane %v402_v52, 7  ;;  %v412_v0 = vrot.slane %v410_v54, 7 }
  0x4d   : > { %6768 = vst [vmem:[#allocation3 + $0x4] sm:$0xf] %v6365_v39  ;;  %6769 = vst [vmem:[#allocation3 + $0x28] sm:$0xf] %v6375_v45  ;;  %v299_v1 = vld [vmem:[%s13654_s14 + $0x10] sm:$0xf]  ;;  %4829 = vmatprep.mubr.bf16.mxu0 %v12991_v59 }
  0x4e   : > { %v13723_v2 = vld [vmem:[%s13654_s14 + $0x14] sm:$0xf]  ;;  %v6900_v3 = vrot.slane %v6898_v47, 4  ;;  %v721_v4 = vld [vmem:[#allocation2 + $0x20] sm:$0x1]  ;;  %v419_v5 = vshrl.u32 %v299_v1, 16  ;;  %4830 = vmatmul.mubr.bf16.vlgmr.msra.gmra.mxu0 %v11345_v62  ;;  %v407_v9 = vor.u32 %v405_v53, %v404_v63  ;;  %v415_v11 = vor.u32 %v413_v55, %v412_v0 }
  0x4f   : > { %v422_v6 = vshll.u32 %v299_v1, 16  ;;  %v427_v7 = vshrl.u32 %v13723_v2, 16  ;;  %v408_v10 = vrot.slane %v404_v63, 4  ;;  %v417_v12 = vrot.slane %v412_v0, 4  ;;  %v1660_v14 = vld [vmem:[#allocation2 + $0xc] sm:$0xf]  ;;  %12122 = vmatpush3.bf16.msra.mxu0 %v12996_v48 }
  0x50   : > { %v824_v15 = vld [vmem:[#allocation2 + $0xc] sm:$0xf]  ;;  %v1661_v18 = vld [vmem:[#allocation2 + $0x10] sm:$0xf]  ;;  %1692 = vst [vmem:[#allocation3 + $0xc] sm:$0xf] %v1660_v14  ;;  %v718_v23 = vsel %vm13673_vm10, %v407_v9, %v717_v61  ;;  %12123 = vmatprep.subr.bf16.mxu0 %v13007_v56  ;;  %v6902_v36 = vsel %vm13679_vm11, %v6900_v3, %v6901_v60 }
  0x51   : > { %v889_v17 = vld [vmem:[#allocation2 + $0xc] sm:$0xf]  ;;  %v825_v19 = vld [vmem:[#allocation2 + $0x10] sm:$0xf]  ;;  %856 = vst [vmem:[#allocation3 + $0x48] sm:$0xf] %v824_v15  ;;  %v416_v21 = vsel %vm13687_vm12, %v408_v10, %v415_v11  ;;  %v722_v25 = vsel %vm13695_vm13, %v417_v12, %v721_v4 }
  0x52   : > { %v890_v20 = vld [vmem:[#allocation2 + $0x10] sm:$0xf]  ;;  %1693 = vst [vmem:[#allocation3 + $0x30] sm:$0xf] %v1661_v18  ;;  %857 = vst [vmem:[#allocation3 + $0x6c] sm:$0xf] %v825_v19 }
  0x53   : > { %v891_v27 = vld [vmem:[#allocation2 + $0x14] sm:$0x1]  ;;  %v962_v28 = vshrl.u32 %v889_v17, 16  ;;  %v965_v29 = vshll.u32 %v889_v17, 16  ;;  %v971_v31 = vshll.u32 %v890_v20, 16  ;;  %v975_v32 = vshrl.u32 %v890_v20, 16  ;;  %12124 = vmatpush3.bf16.msra.mxu0 %v13008_v8 }
  0x54   : > { %719 = vst [vmem:[#allocation2 + $0x18] sm:$0xf] %v718_v23  ;;  %720 = vst [vmem:[#allocation2 + $0x1c] sm:$0xf] %v416_v21  ;;  %v13020_v34 = vld [vmem:[#allocation4 + $0x128] sm:$0xff]   ;;  %v981_v37 = vshll.u32 %v891_v27, 16  ;;  %12125 = vmatprep.subr.bf16.mxu0 %v13019_v13 }
  0x55   : > { %723 = vst [vmem:[#allocation2 + $0x20] sm:$0x1] %v722_v25  ;;  %v1388_v38 = vld [vmem:[#allocation2 + $0xc] sm:$0xe]  ;;  %v1389_v39 = vld [vmem:[#allocation2 + $0x10] sm:$0xf] }
  0x56   : > { %v13742_v40 = vrot.slane %v419_v5, 7  ;;  %v724_v42 = vld [vmem:[#allocation2 + $0x24] sm:$0xf]  ;;  %v13031_v43 = vld [vmem:[#allocation4 + $0x160] sm:$0xff]   ;;  %v964_v44 = vrot.slane %v962_v28, 4  ;;  %v967_v45 = vrot.slane %v965_v29, 5 }
  0x57   : > { %v973_v46 = vrot.slane %v971_v31, 5  ;;  %v977_v48 = vrot.slane %v975_v32, 4  ;;  %v1390_v30 = vld [vmem:[#allocation2 + $0x14] sm:$0x1]  ;;  %v11298_v24 = vrot.slane %v1388_v38, 9  ;;  %v1493_v49 = vrot.slane %v1389_v39, 5  ;;  %12126 = vmatpush3.bf16.msra.mxu0 %v13020_v34 }
  0x58   : > { %v1496_v41 = vrot.slane %v1390_v30, 5  ;;  %v430_v47 = vshll.u32 %v13723_v2, 16  ;;  %v968_v50 = vor.u32 %v967_v45, %v964_v44  ;;  %v983_v52 = vrot.slane %v981_v37, 5  ;;  %v13032_v54 = vld [vmem:[#allocation4 + $0x120] sm:$0xff]   ;;  %v13043_v61 = vld [vmem:[#allocation4 + $0x158] sm:$0xff]   ;;  %v3326_v62 = vld [vmem:[#allocation3 + $0x8] sm:$0xff]  ;;  %12127 = vmatprep.subr.bf16.mxu0 %v13031_v43 }
  0x59   : > { %v978_v51 = vor.u32 %v977_v48, %v973_v46  ;;  %v424_v53 = vor.u32 %v422_v6, %v13742_v40  ;;  %v1494_v55 = vsel %vm13679_vm11, %v11298_v24, %v1493_v49  ;;  %v1495_v56 = vrot.slane %v1493_v49, 4  ;;  %v13750_v60 = vld [vmem:[%s13654_s14 + $0x18] sm:$0xf]  ;;  %v728_v2 = vld [vmem:[#allocation2 + $0x2c] sm:$0x1]  ;;  %v3331_v4 = vld [vmem:[#allocation3 + $0x2c] sm:$0xff] }
  0x5a   : > { %v425_v58 = vrot.slane %v13742_v40, 4  ;;  %v429_v59 = vrot.slane %v427_v7, 7  ;;  %v969_v63 = vrot.slane %v968_v50, 4  ;;  %1630 = vst [vmem:[#allocation3 + $0x50] sm:$0xf] %v1494_v55  ;;  %v436_v3 = vshrl.u32 %v13750_v60, 16 }
  0x5b   : > { %v979_v0 = vrot.slane %v978_v51, 4  ;;  %v725_v1 = vsel %vm13673_vm10, %v424_v53, %v724_v42  ;;  %v12993_v5 = vld [vmem:[#allocation3 + $0xc] ss:$36 sps:$4 sm:$0xff]   ;;  %v1497_v6 = vsel %vm13679_vm11, %v1495_v56, %v1496_v41  ;;  %v1662_v7 = vld [vmem:[#allocation2 + $0x18] sm:$0xf]  ;;  %v11347_v10 = vcombine.low %v3326_v62, %v3331_v4  ;;  %v13044_v17 = vld [vmem:[#allocation4 + $0x118] sm:$0xff]   ;;  %12128 = vmatpush3.bf16.msra.mxu0 %v13032_v54 }
  0x5c   : > { %v432_v8 = vor.u32 %v430_v47, %v429_v59  ;;  %v434_v9 = vrot.slane %v429_v59, 4  ;;  %726 = vst [vmem:[#allocation2 + $0x24] sm:$0xf] %v725_v1  ;;  %7040 = vst [vmem:[#allocation3 + $0x8] sm:$0xf] %v6899_v35  ;;  %v974_v11 = vsel %vm13658_vm8, %v969_v63, %v973_v46  ;;  %4990 = vmatprep.mubr.bf16.mxu1 %v12993_v5  ;;  %12129 = vmatprep.subr.bf16.mxu0 %v13043_v61 }
  0x5d   : > { %7041 = vst [vmem:[#allocation3 + $0x2c] sm:$0xf] %v6902_v36  ;;  %v984_v12 = vsel %vm13658_vm8, %v979_v0, %v983_v52  ;;  %1631 = vst [vmem:[#allocation3 + $0x74] sm:$0xf] %v1497_v6  ;;  %v1663_v13 = vld [vmem:[#allocation2 + $0x1c] sm:$0xf]  ;;  %4991 = vmatmul.mubr.bf16.vlgmr.msra.gmra.mxu1 %v11347_v10 }
  0x5e   : > { %1694 = vst [vmem:[#allocation3 + $0x54] sm:$0xf] %v1662_v7  ;;  %v826_v14 = vld [vmem:[#allocation2 + $0x18] sm:$0xf]  ;;  %v827_v15 = vld [vmem:[#allocation2 + $0x1c] sm:$0xf]  ;;  %v433_v21 = vsel %vm13687_vm12, %v425_v58, %v432_v8  ;;  %v729_v23 = vsel %vm13695_vm13, %v434_v9, %v728_v2 }
  0x5f   : > { %1355 = vst [vmem:[#allocation3 + $0x4c] sm:$0xf] %v974_v11  ;;  %1356 = vst [vmem:[#allocation3 + $0x70] sm:$0xf] %v984_v12  ;;  %v892_v18 = vld [vmem:[#allocation2 + $0x18] sm:$0xf]  ;;  %12130 = vmatpush3.bf16.msra.mxu0 %v13044_v17 }
  0x60   : > { %1695 = vst [vmem:[#allocation3 + $0x78] sm:$0xf] %v1663_v13  ;;  %858 = vst [vmem:[#allocation3 + $0x90] sm:$0xf] %v826_v14  ;;  %v893_v19 = vld [vmem:[#allocation2 + $0x1c] sm:$0xf] }
  0x61   : > { %859 = vst [vmem:[#allocation3 + $0xb4] sm:$0xf] %v827_v15  ;;  %v894_v20 = vld [vmem:[#allocation2 + $0x20] sm:$0x1]  ;;  %v986_v25 = vshrl.u32 %v892_v18, 16  ;;  %v989_v27 = vshll.u32 %v892_v18, 16 }
  0x62   : > { %v995_v28 = vshll.u32 %v893_v19, 16  ;;  %v999_v29 = vshrl.u32 %v893_v19, 16  ;;  %727 = vst [vmem:[#allocation2 + $0x28] sm:$0xf] %v433_v21  ;;  %v1391_v31 = vld [vmem:[#allocation2 + $0x18] sm:$0xe] }
  0x63   : > { %730 = vst [vmem:[#allocation2 + $0x2c] sm:$0x1] %v729_v23  ;;  %v1005_v32 = vshll.u32 %v894_v20, 16  ;;  %v1392_v34 = vld [vmem:[#allocation2 + $0x1c] sm:$0xf]  ;;  %v11299_v36 = vrot.slane %v1391_v31, 9 }
  0x64   : > { %v1393_v35 = vld [vmem:[#allocation2 + $0x20] sm:$0x1]  ;;  %v988_v37 = vrot.slane %v986_v25, 4  ;;  %v991_v38 = vrot.slane %v989_v27, 5  ;;  %v997_v39 = vrot.slane %v995_v28, 5  ;;  %v1001_v40 = vrot.slane %v999_v29, 4 }
  0x65   : > { %v1007_v42 = vrot.slane %v1005_v32, 5  ;;  %v1500_v43 = vrot.slane %v1392_v34, 5  ;;  %v1503_v44 = vrot.slane %v1393_v35, 5  ;;  %v13765_v45 = vrot.slane %v436_v3, 7  ;;  %v1664_v30 = vld [vmem:[#allocation2 + $0x24] sm:$0xf] }
  0x66   : > { %v992_v46 = vor.u32 %v991_v38, %v988_v37  ;;  %v1002_v48 = vor.u32 %v1001_v40, %v997_v39  ;;  %v828_v24 = vld [vmem:[#allocation2 + $0x24] sm:$0xf]  ;;  %1696 = vst [vmem:[#allocation3 + $0x9c] sm:$0xf] %v1664_v30  ;;  %v302_v52 = vld [vmem:[%s13654_s14 + $0x1c] sm:$0xf] }
  0x67   : > { %v895_v49 = vld [vmem:[#allocation2 + $0x24] sm:$0xf]  ;;  %v1501_v41 = vsel %vm13679_vm11, %v11299_v36, %v1500_v43  ;;  %v1502_v47 = vrot.slane %v1500_v43, 4  ;;  %860 = vst [vmem:[#allocation3 + $0xd8] sm:$0xf] %v828_v24  ;;  %v439_v12 = vshll.u32 %v13750_v60, 16 }
  0x68   : > { %v1010_v50 = vshrl.u32 %v895_v49, 16  ;;  %v1013_v51 = vshll.u32 %v895_v49, 16  ;;  %v3335_v53 = vld [vmem:[#allocation3 + $0x48] sm:$0xff]  ;;  %v993_v56 = vrot.slane %v992_v46, 4  ;;  %v1003_v58 = vrot.slane %v1002_v48, 4  ;;  %v13056_v24 = vld [vmem:[#allocation4 + $0x110] sm:$0xff]  }
  0x69   : > { %v3340_v54 = vld [vmem:[#allocation3 + $0x6c] sm:$0xff]  ;;  %1632 = vst [vmem:[#allocation3 + $0x98] sm:$0xf] %v1501_v41  ;;  %v12999_v59 = vld [vmem:[#allocation3 + $0x54] ss:$36 sps:$4 sm:$0xff]   ;;  %v1504_v63 = vsel %vm13679_vm11, %v1502_v47, %v1503_v44  ;;  %v442_v14 = vrot.slane %v13765_v45, 4  ;;  %v441_v23 = vor.u32 %v439_v12, %v13765_v45 }
  0x6a   : > { %v12997_v55 = vld [vmem:[#allocation3 + $0x4c] ss:$36 sps:$4 sm:$0xff]   ;;  %v11354_v61 = vcombine.low %v3335_v53, %v3340_v54  ;;  %v1012_v0 = vrot.slane %v1010_v50, 4  ;;  %v998_v2 = vsel %vm13658_vm8, %v993_v56, %v997_v39  ;;  %v1008_v3 = vsel %vm13658_vm8, %v1003_v58, %v1007_v42  ;;  %1633 = vst [vmem:[#allocation3 + $0xbc] sm:$0xf] %v1504_v63  ;;  %4998 = vmatprep.mubr.bf16.mxu1 %v12999_v59 }
  0x6b   : > { %v13001_v62 = vld [vmem:[#allocation3 + $0x50] ss:$36 sps:$4 sm:$0xff]   ;;  %v1394_v1 = vld [vmem:[#allocation2 + $0x24] sm:$0xe]  ;;  %4837 = vmatprep.mubr.bf16.mxu0 %v12997_v55  ;;  %v731_v7 = vld [vmem:[#allocation2 + $0x30] sm:$0xf] }
  0x6c   : > { %v1665_v4 = vld [vmem:[#allocation2 + $0x28] sm:$0xf]  ;;  %4838 = vmatmul.mubr.bf16.gmra.mxu0 %v11354_v61  ;;  %1357 = vst [vmem:[#allocation3 + $0x94] sm:$0xf] %v998_v2  ;;  %1358 = vst [vmem:[#allocation3 + $0xb8] sm:$0xf] %v1008_v3  ;;  %4999 = vmatmul.mubr.bf16.gmra.mxu1 %v13001_v62  ;;  %v732_v37 = vsel %vm13673_vm10, %v441_v23, %v731_v7 }
  0x6d   : > { %v829_v5 = vld [vmem:[#allocation2 + $0x28] sm:$0xf]  ;;  %1697 = vst [vmem:[#allocation3 + $0xc0] sm:$0xf] %v1665_v4  ;;  %v897_v8 = vld [vmem:[#allocation2 + $0x2c] sm:$0x1] }
  0x6e   : > { %v896_v6 = vld [vmem:[#allocation2 + $0x28] sm:$0xf]  ;;  %861 = vst [vmem:[#allocation3 + $0xfc] sm:$0xf] %v829_v5  ;;  %v1015_v9 = vrot.slane %v1013_v51, 5  ;;  %v1029_v13 = vshll.u32 %v897_v8, 16 }
  0x6f   : > { %v1019_v10 = vshll.u32 %v896_v6, 16  ;;  %v1023_v11 = vshrl.u32 %v896_v6, 16  ;;  %v444_v15 = vshrl.u32 %v302_v52, 16  ;;  %v447_v17 = vshll.u32 %v302_v52, 16  ;;  %v1395_v18 = vld [vmem:[#allocation2 + $0x28] sm:$0xf] }
  0x70   : > { %v1016_v19 = vor.u32 %v1015_v9, %v1012_v0  ;;  %v1396_v25 = vld [vmem:[#allocation2 + $0x2c] sm:$0x1]  ;;  %v735_v27 = vld [vmem:[#allocation2 + $0x38] sm:$0x1]  ;;  %v303_v28 = vld [vmem:[%s13654_s14 + $0x20] sm:$0xf] }
  0x71   : > { %v1021_v20 = vrot.slane %v1019_v10, 5  ;;  %v1025_v21 = vrot.slane %v1023_v11, 4  ;;  %v1031_v29 = vrot.slane %v1029_v13, 5  ;;  %v446_v31 = vrot.slane %v444_v15, 7  ;;  %v304_v34 = vld [vmem:[%s13654_s14 + $0x24] sm:$0xf] }
  0x72   : > { %v11300_v32 = vrot.slane %v1394_v1, 9  ;;  %v1507_v60 = vrot.slane %v1395_v18, 5  ;;  %v1017_v35 = vrot.slane %v1016_v19, 4  ;;  %v1510_v38 = vrot.slane %v1396_v25, 5  ;;  %v13055_v39 = vld [vmem:[#allocation4 + $0x150] sm:$0xff]   ;;  %v13067_v7 = vld [vmem:[#allocation4 + $0x148] sm:$0xff]  }
  0x73   : > { %v1026_v36 = vor.u32 %v1025_v21, %v1021_v20  ;;  %v449_v40 = vor.u32 %v447_v17, %v446_v31  ;;  %v451_v42 = vrot.slane %v446_v31, 4  ;;  %733 = vst [vmem:[#allocation2 + $0x30] sm:$0xf] %v732_v37  ;;  %v453_v48 = vshrl.u32 %v303_v28, 16  ;;  %12131 = vmatprep.subr.bf16.mxu0 %v13055_v39  ;;  %v3345_v49 = vld [vmem:[#allocation3 + $0x90] sm:$0xff]  ;;  %v13068_v12 = vld [vmem:[#allocation4 + $0x108] sm:$0xff]  }
  0x74   : > { %v1508_v43 = vsel %vm13679_vm11, %v11300_v32, %v1507_v60  ;;  %v1509_v44 = vrot.slane %v1507_v60, 4  ;;  %v1022_v45 = vsel %vm13658_vm8, %v1017_v35, %v1021_v20  ;;  %v456_v30 = vshll.u32 %v303_v28, 16  ;;  %v3350_v41 = vld [vmem:[#allocation3 + $0xb4] sm:$0xff]  ;;  %v738_v54 = vld [vmem:[#allocation2 + $0x3c] sm:$0xf]  ;;  %12132 = vmatpush3.bf16.msra.mxu0 %v13056_v24 }
  0x75   : > { %v1027_v46 = vrot.slane %v1026_v36, 4  ;;  %1634 = vst [vmem:[#allocation3 + $0xe0] sm:$0xf] %v1508_v43  ;;  %v13002_v47 = vld [vmem:[#allocation3 + $0x94] ss:$36 sps:$4 sm:$0xff]   ;;  %v450_v50 = vsel %vm13687_vm12, %v442_v14, %v449_v40  ;;  %v736_v52 = vsel %vm13695_vm13, %v451_v42, %v735_v27  ;;  %v461_v53 = vshrl.u32 %v304_v34, 16  ;;  %12133 = vmatprep.subr.bf16.mxu0 %v13067_v7 }
  0x76   : > { %1359 = vst [vmem:[#allocation3 + $0xdc] sm:$0xf] %v1022_v45  ;;  %v1511_v51 = vsel %vm13679_vm11, %v1509_v44, %v1510_v38  ;;  %v13004_v55 = vld [vmem:[#allocation3 + $0x9c] ss:$36 sps:$4 sm:$0xff]   ;;  %v11363_v56 = vcombine.low %v3345_v49, %v3350_v41  ;;  %734 = vst [vmem:[#allocation2 + $0x34] sm:$0xf] %v450_v50  ;;  %4845 = vmatprep.mubr.bf16.mxu0 %v13002_v47 }
  0x77   : > { %v13006_v58 = vld [vmem:[#allocation3 + $0x98] ss:$36 sps:$4 sm:$0xff]   ;;  %v1032_v59 = vsel %vm13658_vm8, %v1027_v46, %v1031_v29  ;;  %1635 = vst [vmem:[#allocation3 + $0x104] sm:$0xf] %v1511_v51  ;;  %737 = vst [vmem:[#allocation2 + $0x38] sm:$0x1] %v736_v52  ;;  %5006 = vmatprep.mubr.bf16.mxu1 %v13004_v55 }
  0x78   : > { %v455_v61 = vrot.slane %v453_v48, 7  ;;  %1360 = vst [vmem:[#allocation3 + $0x100] sm:$0xf] %v1032_v59  ;;  %v463_v62 = vrot.slane %v461_v53, 7  ;;  %v464_v63 = vshll.u32 %v304_v34, 16  ;;  %4846 = vmatmul.mubr.bf16.gmra.mxu0 %v11363_v56  ;;  %5007 = vmatmul.mubr.bf16.gmra.mxu1 %v13006_v58  ;;  %v13070_v55 = vld [vmem:[#allocation4 + $0x1b8] sm:$0xff]  }
  0x79   : > { %v742_v0 = vld [vmem:[#allocation2 + $0x44] sm:$0x1]  ;;  %v305_v1 = vld [vmem:[%s13654_s14 + $0x28] sm:$0xf]  ;;  %v306_v4 = vld [vmem:[%s13654_s14 + $0x2c] sm:$0xf]  ;;  %12134 = vmatpush3.bf16.msra.mxu0 %v13068_v12 }
  0x7a   : > { %v458_v2 = vor.u32 %v456_v30, %v455_v61  ;;  %v459_v3 = vrot.slane %v455_v61, 4  ;;  %v470_v5 = vshrl.u32 %v305_v1, 16  ;;  %v473_v6 = vshll.u32 %v305_v1, 16  ;;  %v1666_v13 = vld [vmem:[#allocation2 + $0x30] sm:$0xf]  ;;  %v13076_v7 = vld [vmem:[#allocation4 + $0x1b0] sm:$0xff]  }
  0x7b   : > { %v466_v8 = vor.u32 %v464_v63, %v463_v62  ;;  %v468_v9 = vrot.slane %v463_v62, 4  ;;  %v478_v10 = vshrl.u32 %v306_v4, 16  ;;  %v481_v11 = vshll.u32 %v306_v4, 16  ;;  %v830_v14 = vld [vmem:[#allocation2 + $0x30] sm:$0xf] }
  0x7c   : > { %v898_v15 = vld [vmem:[#allocation2 + $0x30] sm:$0xf]  ;;  %v739_v17 = vsel %vm13673_vm10, %v458_v2, %v738_v54  ;;  %1698 = vst [vmem:[#allocation3 + $0xe4] sm:$0xf] %v1666_v13  ;;  %862 = vst [vmem:[#allocation3 + $0x120] sm:$0xf] %v830_v14 }
  0x7d   : > { %v1034_v18 = vshrl.u32 %v898_v15, 16  ;;  %v1037_v19 = vshll.u32 %v898_v15, 16  ;;  %v467_v20 = vsel %vm13687_vm12, %v459_v3, %v466_v8  ;;  %740 = vst [vmem:[#allocation2 + $0x3c] sm:$0xf] %v739_v17  ;;  %v1397_v21 = vld [vmem:[#allocation2 + $0x30] sm:$0xe]  ;;  %v743_v23 = vsel %vm13695_vm13, %v468_v9, %v742_v0 }
  0x7e   : > { %v3355_v25 = vld [vmem:[#allocation3 + $0xd8] sm:$0xff]  ;;  %741 = vst [vmem:[#allocation2 + $0x40] sm:$0xf] %v467_v20  ;;  %v11301_v27 = vrot.slane %v1397_v21, 9  ;;  %744 = vst [vmem:[#allocation2 + $0x44] sm:$0x1] %v743_v23 }
  0x7f   : > { %v472_v28 = vrot.slane %v470_v5, 7  ;;  %v480_v29 = vrot.slane %v478_v10, 7  ;;  %v1667_v31 = vld [vmem:[#allocation2 + $0x34] sm:$0xf]  ;;  %v900_v36 = vld [vmem:[#allocation2 + $0x38] sm:$0x1] }
  0x80   : > { %v831_v32 = vld [vmem:[#allocation2 + $0x34] sm:$0xf]  ;;  %1699 = vst [vmem:[#allocation3 + $0x108] sm:$0xf] %v1667_v31  ;;  %v1036_v37 = vrot.slane %v1034_v18, 4  ;;  %v1039_v44 = vrot.slane %v1037_v19, 5 }
  0x81   : > { %v899_v60 = vld [vmem:[#allocation2 + $0x34] sm:$0xf]  ;;  %863 = vst [vmem:[#allocation3 + $0x144] sm:$0xf] %v831_v32  ;;  %v475_v38 = vor.u32 %v473_v6, %v472_v28  ;;  %v483_v39 = vor.u32 %v481_v11, %v480_v29  ;;  %v745_v40 = vld [vmem:[#allocation2 + $0x48] sm:$0xf] }
  0x82   : > { %v3360_v34 = vld [vmem:[#allocation3 + $0xfc] sm:$0xff]  ;;  %v749_v42 = vld [vmem:[#allocation2 + $0x50] sm:$0x1]  ;;  %v1043_v45 = vshll.u32 %v899_v60, 16  ;;  %v1047_v46 = vshrl.u32 %v899_v60, 16  ;;  %v1053_v24 = vshll.u32 %v900_v36, 16  ;;  %v1040_v51 = vor.u32 %v1039_v44, %v1036_v37 }
  0x83   : > { %v13009_v35 = vld [vmem:[#allocation3 + $0xdc] ss:$36 sps:$4 sm:$0xff]   ;;  %v11372_v43 = vcombine.low %v3355_v25, %v3360_v34  ;;  %v476_v47 = vrot.slane %v472_v28, 4  ;;  %v485_v50 = vrot.slane %v480_v29, 4  ;;  %v13808_v63 = vld [vmem:[%s13654_s14 + $0x30] sm:$0xf]  ;;  %v746_v5 = vsel %vm13673_vm10, %v475_v38, %v745_v40 }
  0x84   : > { %v1398_v48 = vld [vmem:[#allocation2 + $0x34] sm:$0xf]  ;;  %4853 = vmatprep.mubr.bf16.mxu0 %v13009_v35  ;;  %v1399_v49 = vld [vmem:[#allocation2 + $0x38] sm:$0x1]  ;;  %v1045_v52 = vrot.slane %v1043_v45, 5  ;;  %v1049_v53 = vrot.slane %v1047_v46, 4 }
  0x85   : > { %v13069_v30 = vld [vmem:[#allocation4 + $0x1f8] sm:$0xff]   ;;  %v1514_v41 = vrot.slane %v1398_v48, 5  ;;  %4854 = vmatmul.mubr.bf16.gmra.mxu0 %v11372_v43  ;;  %v1517_v54 = vrot.slane %v1399_v49, 5  ;;  %v1055_v56 = vrot.slane %v1053_v24, 5  ;;  %v1668_v61 = vld [vmem:[#allocation2 + $0x3c] sm:$0xf]  ;;  %v484_v62 = vsel %vm13687_vm12, %v476_v47, %v483_v39 }
  0x86   : > { %12233 = vmatprep.subr.bf16.mxu1 %v13069_v30  ;;  %v13071_v0 = vld [vmem:[#allocation4 + $0x1f0] sm:$0xff]   ;;  %v1041_v1 = vrot.slane %v1040_v51, 4  ;;  %v1050_v2 = vor.u32 %v1049_v53, %v1045_v52  ;;  %v1669_v3 = vld [vmem:[#allocation2 + $0x40] sm:$0xf]  ;;  %1700 = vst [vmem:[#allocation3 + $0x12c] sm:$0xf] %v1668_v61  ;;  %v750_v6 = vsel %vm13695_vm13, %v485_v50, %v749_v42 }
  0x87   : > { %v1515_v58 = vsel %vm13679_vm11, %v11301_v27, %v1514_v41  ;;  %v1516_v59 = vrot.slane %v1514_v41, 4  ;;  %v832_v4 = vld [vmem:[#allocation2 + $0x3c] sm:$0xf]  ;;  %748 = vst [vmem:[#allocation2 + $0x4c] sm:$0xf] %v484_v62  ;;  %12234 = vmatpush3.bf16.msra.mxu1 %v13070_v55  ;;  %v487_v29 = vshrl.u32 %v13808_v63, 16 }
  0x88   : > { %1636 = vst [vmem:[#allocation3 + $0x128] sm:$0xf] %v1515_v58  ;;  %1701 = vst [vmem:[#allocation3 + $0x150] sm:$0xf] %v1669_v3  ;;  %v833_v9 = vld [vmem:[#allocation2 + $0x40] sm:$0xf]  ;;  %12235 = vmatprep.subr.bf16.mxu1 %v13071_v0  ;;  %v1046_v14 = vsel %vm13658_vm8, %v1041_v1, %v1045_v52 }
  0x89   : > { %v1518_v8 = vsel %vm13679_vm11, %v1516_v59, %v1517_v54  ;;  %864 = vst [vmem:[#allocation3 + $0x168] sm:$0xf] %v832_v4  ;;  %v901_v10 = vld [vmem:[#allocation2 + $0x3c] sm:$0xf]  ;;  %v902_v11 = vld [vmem:[#allocation2 + $0x40] sm:$0xf] }
  0x8a   : > { %747 = vst [vmem:[#allocation2 + $0x48] sm:$0xf] %v746_v5  ;;  %751 = vst [vmem:[#allocation2 + $0x50] sm:$0x1] %v750_v6  ;;  %v13011_v12 = vld [vmem:[#allocation3 + $0xe4] ss:$36 sps:$4 sm:$0xff]  }
  0x8b   : > { %v13013_v13 = vld [vmem:[#allocation3 + $0xe0] ss:$36 sps:$4 sm:$0xff]   ;;  %v1051_v15 = vrot.slane %v1050_v2, 4  ;;  %1637 = vst [vmem:[#allocation3 + $0x14c] sm:$0xf] %v1518_v8  ;;  %v1058_v18 = vshrl.u32 %v901_v10, 16  ;;  %5014 = vmatprep.mubr.bf16.mxu1 %v13011_v12  ;;  %12236 = vmatpush3.bf16.msra.mxu1 %v13076_v7 }
  0x8c   : > { %865 = vst [vmem:[#allocation3 + $0x18c] sm:$0xf] %v833_v9  ;;  %1361 = vst [vmem:[#allocation3 + $0x124] sm:$0xf] %v1046_v14  ;;  %v903_v17 = vld [vmem:[#allocation2 + $0x44] sm:$0x1]  ;;  %5015 = vmatmul.mubr.bf16.gmra.mxu1 %v13013_v13 }
  0x8d   : > { %v1061_v19 = vshll.u32 %v901_v10, 16  ;;  %v1067_v20 = vshll.u32 %v902_v11, 16  ;;  %v1071_v21 = vshrl.u32 %v902_v11, 16  ;;  %v1056_v23 = vsel %vm13658_vm8, %v1051_v15, %v1055_v56  ;;  %v1400_v27 = vld [vmem:[#allocation2 + $0x3c] sm:$0xe]  ;;  %v13078_v2 = vld [vmem:[#allocation4 + $0x1e8] sm:$0xff]  }
  0x8e   : > { %v1077_v25 = vshll.u32 %v903_v17, 16  ;;  %v1401_v28 = vld [vmem:[#allocation2 + $0x40] sm:$0xf]  ;;  %1362 = vst [vmem:[#allocation3 + $0x148] sm:$0xf] %v1056_v23  ;;  %v1060_v31 = vrot.slane %v1058_v18, 4  ;;  %12237 = vmatprep.subr.bf16.mxu1 %v13078_v2 }
  0x8f   : > { %v1063_v32 = vrot.slane %v1061_v19, 5  ;;  %v1069_v60 = vrot.slane %v1067_v20, 5  ;;  %v1073_v34 = vrot.slane %v1071_v21, 4  ;;  %v1402_v35 = vld [vmem:[#allocation2 + $0x44] sm:$0x1]  ;;  %v11302_v37 = vrot.slane %v1400_v27, 9 }
  0x90   : > { %v1079_v36 = vrot.slane %v1077_v25, 5  ;;  %v1521_v38 = vrot.slane %v1401_v28, 5  ;;  %v1524_v39 = vrot.slane %v1402_v35, 5  ;;  %v1671_v43 = vld [vmem:[#allocation2 + $0x4c] sm:$0xf]  ;;  %v13821_v45 = vrot.slane %v487_v29, 7 }
  0x91   : > { %v1064_v40 = vor.u32 %v1063_v32, %v1060_v31  ;;  %v1074_v42 = vor.u32 %v1073_v34, %v1069_v60  ;;  %v835_v44 = vld [vmem:[#allocation2 + $0x4c] sm:$0xf]  ;;  %v1670_v30 = vld [vmem:[#allocation2 + $0x48] sm:$0xf]  ;;  %1703 = vst [vmem:[#allocation3 + $0x198] sm:$0xf] %v1671_v43 }
  0x92   : > { %v1522_v46 = vsel %vm13679_vm11, %v11302_v37, %v1521_v38  ;;  %v1523_v48 = vrot.slane %v1521_v38, 4  ;;  %v834_v24 = vld [vmem:[#allocation2 + $0x48] sm:$0xf]  ;;  %867 = vst [vmem:[#allocation3 + $0x1d4] sm:$0xf] %v835_v44  ;;  %v490_v49 = vshll.u32 %v13808_v63, 16 }
  0x93   : > { %v13016_v41 = vld [vmem:[#allocation3 + $0x12c] ss:$36 sps:$4 sm:$0xff]   ;;  %v1065_v50 = vrot.slane %v1064_v40, 4  ;;  %1638 = vst [vmem:[#allocation3 + $0x170] sm:$0xf] %v1522_v46  ;;  %v3365_v52 = vld [vmem:[#allocation3 + $0x120] sm:$0xff] }
  0x94   : > { %v13018_v47 = vld [vmem:[#allocation3 + $0x128] ss:$36 sps:$4 sm:$0xff]   ;;  %1702 = vst [vmem:[#allocation3 + $0x174] sm:$0xf] %v1670_v30  ;;  %866 = vst [vmem:[#allocation3 + $0x1b0] sm:$0xf] %v834_v24  ;;  %v1525_v54 = vsel %vm13679_vm11, %v1523_v48, %v1524_v39  ;;  %v492_v58 = vor.u32 %v490_v49, %v13821_v45  ;;  %5022 = vmatprep.mubr.bf16.mxu1 %v13016_v41 }
  0x95   : > { %v308_v51 = vld [vmem:[%s13654_s14 + $0x34] sm:$0xf]  ;;  %v1075_v53 = vrot.slane %v1074_v42, 4  ;;  %v904_v55 = vld [vmem:[#allocation2 + $0x48] sm:$0xf]  ;;  %v1070_v61 = vsel %vm13658_vm8, %v1065_v50, %v1069_v60  ;;  %v3370_v3 = vld [vmem:[#allocation3 + $0x144] sm:$0xff]  ;;  %5023 = vmatmul.mubr.bf16.gmra.mxu1 %v13018_v47 }
  0x96   : > { %v905_v56 = vld [vmem:[#allocation2 + $0x4c] sm:$0xf]  ;;  %v752_v59 = vld [vmem:[#allocation2 + $0x54] sm:$0xf]  ;;  %1639 = vst [vmem:[#allocation3 + $0x194] sm:$0xf] %v1525_v54  ;;  %v11381_v9 = vcombine.low %v3365_v52, %v3370_v3 }
  0x97   : > { %v906_v62 = vld [vmem:[#allocation2 + $0x50] sm:$0x1]  ;;  %v1082_v63 = vshrl.u32 %v904_v55, 16  ;;  %v1085_v0 = vshll.u32 %v904_v55, 16  ;;  %v1091_v1 = vshll.u32 %v905_v56, 16  ;;  %v1080_v5 = vsel %vm13658_vm8, %v1075_v53, %v1079_v36  ;;  %v13079_v14 = vld [vmem:[#allocation4 + $0x1a8] sm:$0xff]  }
  0x98   : > { %v13014_v4 = vld [vmem:[#allocation3 + $0x124] ss:$36 sps:$4 sm:$0xff]   ;;  %1363 = vst [vmem:[#allocation3 + $0x16c] sm:$0xf] %v1070_v61  ;;  %v1095_v6 = vshrl.u32 %v905_v56, 16  ;;  %v1101_v7 = vshll.u32 %v906_v62, 16  ;;  %v753_v23 = vsel %vm13673_vm10, %v492_v58, %v752_v59  ;;  %12238 = vmatpush3.bf16.msra.mxu1 %v13079_v14 }
  0x99   : > { %v493_v8 = vrot.slane %v13821_v45, 4  ;;  %1364 = vst [vmem:[#allocation3 + $0x190] sm:$0xf] %v1080_v5  ;;  %v1084_v10 = vrot.slane %v1082_v63, 4  ;;  %v1087_v11 = vrot.slane %v1085_v0, 5  ;;  %v1093_v12 = vrot.slane %v1091_v1, 5  ;;  %4861 = vmatprep.mubr.bf16.mxu0 %v13014_v4 }
  0x9a   : > { %v1403_v13 = vld [vmem:[#allocation2 + $0x48] sm:$0xe]  ;;  %v1097_v15 = vrot.slane %v1095_v6, 4  ;;  %v1103_v17 = vrot.slane %v1101_v7, 5  ;;  %v495_v18 = vshrl.u32 %v308_v51, 16  ;;  %v498_v19 = vshll.u32 %v308_v51, 16  ;;  %4862 = vmatmul.mubr.bf16.gmra.mxu0 %v11381_v9 }
  0x9b   : > { %v1404_v20 = vld [vmem:[#allocation2 + $0x4c] sm:$0xf]  ;;  %v1088_v21 = vor.u32 %v1087_v11, %v1084_v10  ;;  %v1405_v25 = vld [vmem:[#allocation2 + $0x50] sm:$0x1]  ;;  %v11303_v27 = vrot.slane %v1403_v13, 9  ;;  %v13080_v60 = vld [vmem:[#allocation4 + $0x1e0] sm:$0xff]  }
  0x9c   : > { %v1528_v28 = vrot.slane %v1404_v20, 5  ;;  %v1098_v29 = vor.u32 %v1097_v15, %v1093_v12  ;;  %v497_v31 = vrot.slane %v495_v18, 7  ;;  %754 = vst [vmem:[#allocation2 + $0x54] sm:$0xf] %v753_v23  ;;  %v1531_v32 = vrot.slane %v1405_v25, 5  ;;  %12239 = vmatprep.subr.bf16.mxu1 %v13080_v60  ;;  %v13085_v6 = vld [vmem:[#allocation4 + $0x1a0] sm:$0xff]  }
  0x9d   : > { %v1089_v34 = vrot.slane %v1088_v21, 4  ;;  %v13023_v37 = vld [vmem:[#allocation3 + $0x174] ss:$36 sps:$4 sm:$0xff]   ;;  %v756_v46 = vld [vmem:[#allocation2 + $0x5c] sm:$0x1]  ;;  %12240 = vmatpush3.bf16.msra.mxu1 %v13085_v6 }
  0x9e   : > { %v1529_v35 = vsel %vm13679_vm11, %v11303_v27, %v1528_v28  ;;  %v1530_v36 = vrot.slane %v1528_v28, 4  ;;  %v13025_v38 = vld [vmem:[#allocation3 + $0x170] ss:$36 sps:$4 sm:$0xff]   ;;  %v1099_v39 = vrot.slane %v1098_v29, 4  ;;  %v500_v40 = vor.u32 %v498_v19, %v497_v31  ;;  %v309_v48 = vld [vmem:[%s13654_s14 + $0x38] sm:$0xf]  ;;  %5030 = vmatprep.mubr.bf16.mxu1 %v13023_v37 }
  0x9f   : > { %1640 = vst [vmem:[#allocation3 + $0x1b8] sm:$0xf] %v1529_v35  ;;  %v3375_v42 = vld [vmem:[#allocation3 + $0x168] sm:$0xff]  ;;  %v1094_v43 = vsel %vm13658_vm8, %v1089_v34, %v1093_v12  ;;  %v502_v44 = vrot.slane %v497_v31, 4  ;;  %v310_v47 = vld [vmem:[%s13654_s14 + $0x3c] sm:$0xf]  ;;  %5031 = vmatmul.mubr.bf16.gmra.mxu1 %v13025_v38 }
  0xa0   : > { %v1532_v45 = vsel %vm13679_vm11, %v1530_v36, %v1531_v32  ;;  %v3380_v30 = vld [vmem:[#allocation3 + $0x18c] sm:$0xff]  ;;  %v1104_v49 = vsel %vm13658_vm8, %v1099_v39, %v1103_v17  ;;  %1365 = vst [vmem:[#allocation3 + $0x1b4] sm:$0xf] %v1094_v43  ;;  %v501_v41 = vsel %vm13687_vm12, %v493_v8, %v500_v40  ;;  %v504_v50 = vshrl.u32 %v309_v48, 16  ;;  %v759_v55 = vld [vmem:[#allocation2 + $0x60] sm:$0xf] }
  0xa1   : > { %v13021_v24 = vld [vmem:[#allocation3 + $0x16c] ss:$36 sps:$4 sm:$0xff]   ;;  %1641 = vst [vmem:[#allocation3 + $0x1dc] sm:$0xf] %v1532_v45  ;;  %v11390_v51 = vcombine.low %v3375_v42, %v3380_v30  ;;  %1366 = vst [vmem:[#allocation3 + $0x1d8] sm:$0xf] %v1104_v49  ;;  %v757_v52 = vsel %vm13695_vm13, %v502_v44, %v756_v46 }
  0xa2   : > { %755 = vst [vmem:[#allocation2 + $0x58] sm:$0xf] %v501_v41  ;;  %v507_v53 = vshll.u32 %v309_v48, 16  ;;  %v512_v54 = vshrl.u32 %v310_v47, 16  ;;  %4869 = vmatprep.mubr.bf16.mxu0 %v13021_v24  ;;  %758 = vst [vmem:[#allocation2 + $0x5c] sm:$0x1] %v757_v52 }
  0xa3   : > { %v506_v56 = vrot.slane %v504_v50, 7  ;;  %v515_v58 = vshll.u32 %v310_v47, 16  ;;  %v311_v59 = vld [vmem:[%s13654_s14 + $0x40] sm:$0xf]  ;;  %v312_v61 = vld [vmem:[%s13654_s14 + $0x44] sm:$0xf]  ;;  %4870 = vmatmul.mubr.bf16.gmra.mxu0 %v11390_v51 }
  0xa4   : > { %v1672_v62 = vld [vmem:[#allocation2 + $0x54] sm:$0xf]  ;;  %v514_v7 = vrot.slane %v512_v54, 7  ;;  %v763_v9 = vld [vmem:[#allocation2 + $0x68] sm:$0x1]  ;;  %v521_v10 = vshrl.u32 %v311_v59, 16 }
  0xa5   : > { %v836_v63 = vld [vmem:[#allocation2 + $0x54] sm:$0xf]  ;;  %1704 = vst [vmem:[#allocation3 + $0x1bc] sm:$0xf] %v1672_v62  ;;  %v509_v3 = vor.u32 %v507_v53, %v506_v56  ;;  %v510_v4 = vrot.slane %v506_v56, 4  ;;  %v524_v11 = vshll.u32 %v311_v59, 16 }
  0xa6   : > { %v907_v0 = vld [vmem:[#allocation2 + $0x54] sm:$0xf]  ;;  %868 = vst [vmem:[#allocation3 + $0x1f8] sm:$0xf] %v836_v63  ;;  %v529_v15 = vshrl.u32 %v312_v61, 16  ;;  %v13087_v17 = vld [vmem:[#allocation4 + $0x140] sm:$0xff]   ;;  %v517_v19 = vor.u32 %v515_v58, %v514_v7 }
  0xa7   : > { %v1106_v1 = vshrl.u32 %v907_v0, 16  ;;  %v1109_v2 = vshll.u32 %v907_v0, 16  ;;  %v1406_v5 = vld [vmem:[#allocation2 + $0x54] sm:$0xe]  ;;  %v760_v14 = vsel %vm13673_vm10, %v509_v3, %v759_v55  ;;  %v3385_v18 = vld [vmem:[#allocation3 + $0x1b0] sm:$0xff]  ;;  %v519_v20 = vrot.slane %v514_v7, 4  ;;  %12135 = vmatprep.subr.bf16.mxu0 %v13087_v17 }
  0xa8   : > { %v11304_v8 = vrot.slane %v1406_v5, 9  ;;  %761 = vst [vmem:[#allocation2 + $0x60] sm:$0xf] %v760_v14  ;;  %v523_v21 = vrot.slane %v521_v10, 7  ;;  %v532_v23 = vshll.u32 %v312_v61, 16  ;;  %v3390_v25 = vld [vmem:[#allocation3 + $0x1d4] sm:$0xff]  ;;  %v518_v37 = vsel %vm13687_vm12, %v510_v4, %v517_v19 }
  0xa9   : > { %v1108_v12 = vrot.slane %v1106_v1, 4  ;;  %v1111_v13 = vrot.slane %v1109_v2, 5  ;;  %v13026_v27 = vld [vmem:[#allocation3 + $0x1b4] ss:$36 sps:$4 sm:$0xff]   ;;  %v1673_v28 = vld [vmem:[#allocation2 + $0x58] sm:$0xf]  ;;  %v11399_v60 = vcombine.low %v3385_v18, %v3390_v25  ;;  %v764_v38 = vsel %vm13695_vm13, %v519_v20, %v763_v9 }
  0xaa   : > { %v531_v31 = vrot.slane %v529_v15, 7  ;;  %v766_v32 = vld [vmem:[#allocation2 + $0x6c] sm:$0xf]  ;;  %1705 = vst [vmem:[#allocation3 + $0x1e0] sm:$0xf] %v1673_v28  ;;  %v526_v39 = vor.u32 %v524_v11, %v523_v21  ;;  %4877 = vmatprep.mubr.bf16.mxu0 %v13026_v27  ;;  %v527_v30 = vrot.slane %v523_v21, 4 }
  0xab   : > { %v1112_v29 = vor.u32 %v1111_v13, %v1108_v12  ;;  %v837_v34 = vld [vmem:[#allocation2 + $0x58] sm:$0xf]  ;;  %v909_v36 = vld [vmem:[#allocation2 + $0x5c] sm:$0x1]  ;;  %762 = vst [vmem:[#allocation2 + $0x64] sm:$0xf] %v518_v37  ;;  %4878 = vmatmul.mubr.bf16.gmra.mxu0 %v11399_v60 }
  0xac   : > { %v908_v35 = vld [vmem:[#allocation2 + $0x58] sm:$0xf]  ;;  %869 = vst [vmem:[#allocation3 + $0x21c] sm:$0xf] %v837_v34  ;;  %v1125_v44 = vshll.u32 %v909_v36, 16  ;;  %v534_v24 = vor.u32 %v532_v23, %v531_v31  ;;  %v536_v49 = vrot.slane %v531_v31, 4  ;;  %v767_v55 = vsel %vm13673_vm10, %v526_v39, %v766_v32 }
  0xad   : > { %v1113_v40 = vrot.slane %v1112_v29, 4  ;;  %v1115_v42 = vshll.u32 %v908_v35, 16  ;;  %v1119_v43 = vshrl.u32 %v908_v35, 16  ;;  %v1407_v45 = vld [vmem:[#allocation2 + $0x58] sm:$0xf]  ;;  %v13089_v19 = vld [vmem:[#allocation4 + $0x1d8] sm:$0xff]  }
  0xae   : > { %765 = vst [vmem:[#allocation2 + $0x68] sm:$0x1] %v764_v38  ;;  %v1408_v46 = vld [vmem:[#allocation2 + $0x5c] sm:$0x1]  ;;  %v1535_v48 = vrot.slane %v1407_v45, 5  ;;  %v1127_v50 = vrot.slane %v1125_v44, 5  ;;  %v535_v54 = vsel %vm13687_vm12, %v527_v30, %v534_v24  ;;  %12241 = vmatprep.subr.bf16.mxu1 %v13089_v19 }
  0xaf   : > { %v1117_v41 = vrot.slane %v1115_v42, 5  ;;  %v1121_v47 = vrot.slane %v1119_v43, 4  ;;  %v1538_v51 = vrot.slane %v1408_v46, 5  ;;  %v770_v56 = vld [vmem:[#allocation2 + $0x74] sm:$0x1]  ;;  %v13088_v58 = vld [vmem:[#allocation4 + $0x100] sm:$0xff]  }
  0xb0   : > { %v1536_v52 = vsel %vm13679_vm11, %v11304_v8, %v1535_v48  ;;  %v1537_v53 = vrot.slane %v1535_v48, 4  ;;  %v1674_v62 = vld [vmem:[#allocation2 + $0x60] sm:$0xf]  ;;  %768 = vst [vmem:[#allocation2 + $0x6c] sm:$0xf] %v767_v55  ;;  %v771_v1 = vsel %vm13695_vm13, %v536_v49, %v770_v56  ;;  %12136 = vmatpush3.bf16.msra.mxu0 %v13088_v58  ;;  %v13090_v32 = vld [vmem:[#allocation4 + $0x198] sm:$0xff]  }
  0xb1   : > { %v1118_v59 = vsel %vm13658_vm8, %v1113_v40, %v1117_v41  ;;  %v1122_v61 = vor.u32 %v1121_v47, %v1117_v41  ;;  %1642 = vst [vmem:[#allocation3 + $0x200] sm:$0xf] %v1536_v52  ;;  %v838_v63 = vld [vmem:[#allocation2 + $0x60] sm:$0xf]  ;;  %769 = vst [vmem:[#allocation2 + $0x70] sm:$0xf] %v535_v54  ;;  %12242 = vmatpush3.bf16.msra.mxu1 %v13090_v32 }
  0xb2   : > { %v910_v0 = vld [vmem:[#allocation2 + $0x60] sm:$0xf]  ;;  %1367 = vst [vmem:[#allocation3 + $0x1fc] sm:$0xf] %v1118_v59  ;;  %v1539_v2 = vsel %vm13679_vm11, %v1537_v53, %v1538_v51  ;;  %1706 = vst [vmem:[#allocation3 + $0x204] sm:$0xf] %v1674_v62 }
  0xb3   : > { %870 = vst [vmem:[#allocation3 + $0x240] sm:$0xf] %v838_v63  ;;  %v1130_v3 = vshrl.u32 %v910_v0, 16  ;;  %v1133_v4 = vshll.u32 %v910_v0, 16  ;;  %v1409_v5 = vld [vmem:[#allocation2 + $0x60] sm:$0xe] }
  0xb4   : > { %772 = vst [vmem:[#allocation2 + $0x74] sm:$0x1] %v771_v1  ;;  %v13028_v6 = vld [vmem:[#allocation3 + $0x1bc] ss:$36 sps:$4 sm:$0xff]   ;;  %v1123_v8 = vrot.slane %v1122_v61, 4  ;;  %v11305_v29 = vrot.slane %v1409_v5, 9 }
  0xb5   : > { %v13030_v7 = vld [vmem:[#allocation3 + $0x1b8] ss:$36 sps:$4 sm:$0xff]   ;;  %1643 = vst [vmem:[#allocation3 + $0x224] sm:$0xf] %v1539_v2  ;;  %v13872_v9 = vld [vmem:[%s13654_s14 + $0x48] sm:$0xf]  ;;  %5038 = vmatprep.mubr.bf16.mxu1 %v13028_v6 }
  0xb6   : > { %v1675_v10 = vld [vmem:[#allocation2 + $0x64] sm:$0xf]  ;;  %v1128_v13 = vsel %vm13658_vm8, %v1123_v8, %v1127_v50  ;;  %v912_v14 = vld [vmem:[#allocation2 + $0x68] sm:$0x1]  ;;  %v1132_v15 = vrot.slane %v1130_v3, 4  ;;  %v1135_v17 = vrot.slane %v1133_v4, 5  ;;  %5039 = vmatmul.mubr.bf16.gmra.mxu1 %v13030_v7 }
  0xb7   : > { %v839_v11 = vld [vmem:[#allocation2 + $0x64] sm:$0xf]  ;;  %1707 = vst [vmem:[#allocation3 + $0x228] sm:$0xf] %v1675_v10  ;;  %1368 = vst [vmem:[#allocation3 + $0x220] sm:$0xf] %v1128_v13 }
  0xb8   : > { %v911_v12 = vld [vmem:[#allocation2 + $0x64] sm:$0xf]  ;;  %871 = vst [vmem:[#allocation3 + $0x264] sm:$0xf] %v839_v11  ;;  %v1149_v21 = vshll.u32 %v912_v14, 16  ;;  %v1136_v27 = vor.u32 %v1135_v17, %v1132_v15  ;;  %v538_v37 = vshrl.u32 %v13872_v9, 16 }
  0xb9   : > { %v1139_v18 = vshll.u32 %v911_v12, 16  ;;  %v1143_v20 = vshrl.u32 %v911_v12, 16  ;;  %v1410_v23 = vld [vmem:[#allocation2 + $0x64] sm:$0xf]  ;;  %v1411_v25 = vld [vmem:[#allocation2 + $0x68] sm:$0x1] }
  0xba   : > { %v1542_v31 = vrot.slane %v1410_v23, 5  ;;  %v1151_v34 = vrot.slane %v1149_v21, 5  ;;  %v1545_v35 = vrot.slane %v1411_v25, 5  ;;  %v1676_v36 = vld [vmem:[#allocation2 + $0x6c] sm:$0xf]  ;;  %v3395_v38 = vld [vmem:[#allocation3 + $0x1f8] sm:$0xff] }
  0xbb   : > { %v1141_v28 = vrot.slane %v1139_v18, 5  ;;  %v1145_v60 = vrot.slane %v1143_v20, 4  ;;  %v1137_v39 = vrot.slane %v1136_v27, 4  ;;  %v1677_v43 = vld [vmem:[#allocation2 + $0x70] sm:$0xf]  ;;  %v540_v6 = vrot.slane %v538_v37, 7 }
  0xbc   : > { %v1543_v40 = vsel %vm13679_vm11, %v11305_v29, %v1542_v31  ;;  %v1544_v42 = vrot.slane %v1542_v31, 4  ;;  %1708 = vst [vmem:[#allocation3 + $0x24c] sm:$0xf] %v1676_v36  ;;  %1709 = vst [vmem:[#allocation3 + $0x270] sm:$0xf] %v1677_v43  ;;  %v541_v7 = vshll.u32 %v13872_v9, 16 }
  0xbd   : > { %v1146_v44 = vor.u32 %v1145_v60, %v1141_v28  ;;  %1644 = vst [vmem:[#allocation3 + $0x248] sm:$0xf] %v1543_v40  ;;  %v840_v45 = vld [vmem:[#allocation2 + $0x6c] sm:$0xf]  ;;  %v841_v46 = vld [vmem:[#allocation2 + $0x70] sm:$0xf]  ;;  %v1142_v30 = vsel %vm13658_vm8, %v1137_v39, %v1141_v28 }
  0xbe   : > { %v913_v48 = vld [vmem:[#allocation2 + $0x6c] sm:$0xf]  ;;  %v1546_v24 = vsel %vm13679_vm11, %v1544_v42, %v1545_v35  ;;  %872 = vst [vmem:[#allocation3 + $0x288] sm:$0xf] %v840_v45  ;;  %873 = vst [vmem:[#allocation3 + $0x2ac] sm:$0xf] %v841_v46  ;;  %v543_v18 = vor.u32 %v541_v7, %v540_v6 }
  0xbf   : > { %v914_v49 = vld [vmem:[#allocation2 + $0x70] sm:$0xf]  ;;  %v915_v41 = vld [vmem:[#allocation2 + $0x74] sm:$0x1]  ;;  %v1154_v47 = vshrl.u32 %v913_v48, 16  ;;  %v1157_v50 = vshll.u32 %v913_v48, 16 }
  0xc0   : > { %v314_v51 = vld [vmem:[%s13654_s14 + $0x4c] sm:$0xf]  ;;  %v13035_v52 = vld [vmem:[#allocation3 + $0x204] ss:$36 sps:$4 sm:$0xff]   ;;  %v1147_v54 = vrot.slane %v1146_v44, 4  ;;  %v3400_v55 = vld [vmem:[#allocation3 + $0x21c] sm:$0xff] }
  0xc1   : > { %v13037_v53 = vld [vmem:[#allocation3 + $0x200] ss:$36 sps:$4 sm:$0xff]   ;;  %1369 = vst [vmem:[#allocation3 + $0x244] sm:$0xf] %v1142_v30  ;;  %1645 = vst [vmem:[#allocation3 + $0x26c] sm:$0xf] %v1546_v24  ;;  %5046 = vmatprep.mubr.bf16.mxu1 %v13035_v52  ;;  %v11408_v62 = vcombine.low %v3395_v38, %v3400_v55 }
  0xc2   : > { %v13033_v56 = vld [vmem:[#allocation3 + $0x1fc] ss:$36 sps:$4 sm:$0xff]   ;;  %v1156_v58 = vrot.slane %v1154_v47, 4  ;;  %v1159_v59 = vrot.slane %v1157_v50, 5  ;;  %v1163_v61 = vshll.u32 %v914_v49, 16  ;;  %v1152_v63 = vsel %vm13658_vm8, %v1147_v54, %v1151_v34  ;;  %5047 = vmatmul.mubr.bf16.gmra.mxu1 %v13037_v53  ;;  %v13091_v10 = vld [vmem:[#allocation4 + $0x1d0] sm:$0xff]  }
  0xc3   : > { %v1167_v0 = vshrl.u32 %v914_v49, 16  ;;  %v1173_v1 = vshll.u32 %v915_v41, 16  ;;  %v773_v2 = vld [vmem:[#allocation2 + $0x78] sm:$0xf]  ;;  %v1412_v3 = vld [vmem:[#allocation2 + $0x6c] sm:$0xe]  ;;  %4885 = vmatprep.mubr.bf16.mxu0 %v13033_v56  ;;  %12243 = vmatprep.subr.bf16.mxu1 %v13091_v10 }
  0xc4   : > { %1370 = vst [vmem:[#allocation3 + $0x268] sm:$0xf] %v1152_v63  ;;  %v1160_v4 = vor.u32 %v1159_v59, %v1156_v58  ;;  %v1165_v5 = vrot.slane %v1163_v61, 5  ;;  %v1413_v8 = vld [vmem:[#allocation2 + $0x70] sm:$0xf]  ;;  %4886 = vmatmul.mubr.bf16.gmra.mxu0 %v11408_v62  ;;  %v546_v13 = vshrl.u32 %v314_v51, 16  ;;  %v774_v34 = vsel %vm13673_vm10, %v543_v18, %v773_v2 }
  0xc5   : > { %v1169_v11 = vrot.slane %v1167_v0, 4  ;;  %v1175_v12 = vrot.slane %v1173_v1, 5  ;;  %v549_v14 = vshll.u32 %v314_v51, 16  ;;  %v1414_v15 = vld [vmem:[#allocation2 + $0x74] sm:$0x1]  ;;  %v544_v19 = vrot.slane %v540_v6, 4 }
  0xc6   : > { %v1161_v17 = vrot.slane %v1160_v4, 4  ;;  %v11306_v20 = vrot.slane %v1412_v3, 9  ;;  %v777_v21 = vld [vmem:[#allocation2 + $0x80] sm:$0x1]  ;;  %v548_v25 = vrot.slane %v546_v13, 7  ;;  %v1549_v27 = vrot.slane %v1413_v8, 5 }
  0xc7   : > { %v1170_v23 = vor.u32 %v1169_v11, %v1165_v5  ;;  %v1552_v28 = vrot.slane %v1414_v15, 5  ;;  %v315_v9 = vld [vmem:[%s13654_s14 + $0x50] sm:$0xf]  ;;  %v13096_v29 = vld [vmem:[#allocation4 + $0x190] sm:$0xff]   ;;  %775 = vst [vmem:[#allocation2 + $0x78] sm:$0xf] %v774_v34 }
  0xc8   : > { %v3405_v31 = vld [vmem:[#allocation3 + $0x240] sm:$0xff]  ;;  %v13040_v32 = vld [vmem:[#allocation3 + $0x24c] ss:$36 sps:$4 sm:$0xff]   ;;  %v1166_v60 = vsel %vm13658_vm8, %v1161_v17, %v1165_v5  ;;  %v555_v35 = vshrl.u32 %v315_v9, 16  ;;  %v558_v36 = vshll.u32 %v315_v9, 16  ;;  %v551_v39 = vor.u32 %v549_v14, %v548_v25  ;;  %12244 = vmatpush3.bf16.msra.mxu1 %v13096_v29 }
  0xc9   : > { %v13042_v37 = vld [vmem:[#allocation3 + $0x248] ss:$36 sps:$4 sm:$0xff]   ;;  %v1171_v38 = vrot.slane %v1170_v23, 4  ;;  %1371 = vst [vmem:[#allocation3 + $0x28c] sm:$0xf] %v1166_v60  ;;  %v553_v40 = vrot.slane %v548_v25, 4  ;;  %v1550_v42 = vsel %vm13679_vm11, %v11306_v20, %v1549_v27  ;;  %5054 = vmatprep.mubr.bf16.mxu1 %v13040_v32 }
  0xca   : > { %v316_v43 = vld [vmem:[%s13654_s14 + $0x54] sm:$0xf]  ;;  %v1551_v44 = vrot.slane %v1549_v27, 4  ;;  %1646 = vst [vmem:[#allocation3 + $0x290] sm:$0xf] %v1550_v42  ;;  %v557_v45 = vrot.slane %v555_v35, 7  ;;  %v552_v41 = vsel %vm13687_vm12, %v544_v19, %v551_v39  ;;  %5055 = vmatmul.mubr.bf16.gmra.mxu1 %v13042_v37 }
  0xcb   : > { %v563_v46 = vshrl.u32 %v316_v43, 16  ;;  %v780_v48 = vld [vmem:[#allocation2 + $0x84] sm:$0xf]  ;;  %v3410_v30 = vld [vmem:[#allocation3 + $0x264] sm:$0xff]  ;;  %v1176_v49 = vsel %vm13658_vm8, %v1171_v38, %v1175_v12  ;;  %v778_v47 = vsel %vm13695_vm13, %v553_v40, %v777_v21  ;;  %v566_v50 = vshll.u32 %v316_v43, 16 }
  0xcc   : > { %v13038_v24 = vld [vmem:[#allocation3 + $0x244] ss:$36 sps:$4 sm:$0xff]   ;;  %v11417_v51 = vcombine.low %v3405_v31, %v3410_v30  ;;  %1372 = vst [vmem:[#allocation3 + $0x2b0] sm:$0xf] %v1176_v49  ;;  %776 = vst [vmem:[#allocation2 + $0x7c] sm:$0xf] %v552_v41  ;;  %v1553_v52 = vsel %vm13679_vm11, %v1551_v44, %v1552_v28  ;;  %v560_v53 = vor.u32 %v558_v36, %v557_v45 }
  0xcd   : > { %779 = vst [vmem:[#allocation2 + $0x80] sm:$0x1] %v778_v47  ;;  %v13098_v54 = vld [vmem:[#allocation4 + $0x1c8] sm:$0xff]   ;;  %4893 = vmatprep.mubr.bf16.mxu0 %v13038_v24  ;;  %1647 = vst [vmem:[#allocation3 + $0x2b4] sm:$0xf] %v1553_v52  ;;  %v561_v55 = vrot.slane %v557_v45, 4 }
  0xce   : > { %v565_v56 = vrot.slane %v563_v46, 7  ;;  %v13099_v58 = vld [vmem:[#allocation4 + $0x188] sm:$0xff]   ;;  %4894 = vmatmul.mubr.bf16.gmra.mxu0 %v11417_v51  ;;  %v781_v59 = vsel %vm13673_vm10, %v560_v53, %v780_v48  ;;  %v784_v61 = vld [vmem:[#allocation2 + $0x8c] sm:$0x1]  ;;  %v317_v62 = vld [vmem:[%s13654_s14 + $0x58] sm:$0xf]  ;;  %12245 = vmatprep.subr.bf16.mxu1 %v13098_v54 }
  0xcf   : > { %v318_v63 = vld [vmem:[%s13654_s14 + $0x5c] sm:$0xf]  ;;  %782 = vst [vmem:[#allocation2 + $0x84] sm:$0xf] %v781_v59  ;;  %v572_v2 = vshrl.u32 %v317_v62, 16  ;;  %v575_v3 = vshll.u32 %v317_v62, 16  ;;  %12246 = vmatpush3.bf16.msra.mxu1 %v13099_v58 }
  0xd0   : > { %v568_v0 = vor.u32 %v566_v50, %v565_v56  ;;  %v570_v1 = vrot.slane %v565_v56, 4  ;;  %v13100_v4 = vld [vmem:[#allocation4 + $0x1c0] sm:$0xff]   ;;  %v3415_v5 = vld [vmem:[#allocation3 + $0x288] sm:$0xff]  ;;  %v580_v8 = vshrl.u32 %v318_v63, 16  ;;  %v583_v15 = vshll.u32 %v318_v63, 16 }
  0xd1   : > { %v1678_v6 = vld [vmem:[#allocation2 + $0x78] sm:$0xf]  ;;  %v574_v14 = vrot.slane %v572_v2, 7  ;;  %12247 = vmatprep.subr.bf16.mxu1 %v13100_v4  ;;  %v787_v21 = vld [vmem:[#allocation2 + $0x90] sm:$0xf] }
  0xd2   : > { %v842_v7 = vld [vmem:[#allocation2 + $0x78] sm:$0xf]  ;;  %1710 = vst [vmem:[#allocation3 + $0x294] sm:$0xf] %v1678_v6  ;;  %v569_v11 = vsel %vm13687_vm12, %v561_v55, %v568_v0  ;;  %v785_v13 = vsel %vm13695_vm13, %v570_v1, %v784_v61  ;;  %v582_v20 = vrot.slane %v580_v8, 7 }
  0xd3   : > { %874 = vst [vmem:[#allocation3 + $0x2d0] sm:$0xf] %v842_v7  ;;  %v916_v10 = vld [vmem:[#allocation2 + $0x78] sm:$0xf]  ;;  %783 = vst [vmem:[#allocation2 + $0x88] sm:$0xf] %v569_v11  ;;  %v577_v28 = vor.u32 %v575_v3, %v574_v14 }
  0xd4   : > { %v1415_v12 = vld [vmem:[#allocation2 + $0x78] sm:$0xe]  ;;  %v1178_v17 = vshrl.u32 %v916_v10, 16  ;;  %v1181_v18 = vshll.u32 %v916_v10, 16  ;;  %786 = vst [vmem:[#allocation2 + $0x8c] sm:$0x1] %v785_v13  ;;  %v585_v34 = vor.u32 %v583_v15, %v582_v20 }
  0xd5   : > { %v11307_v19 = vrot.slane %v1415_v12, 9  ;;  %v3420_v23 = vld [vmem:[#allocation3 + $0x2ac] sm:$0xff]  ;;  %v1679_v27 = vld [vmem:[#allocation2 + $0x7c] sm:$0xf]  ;;  %v578_v9 = vrot.slane %v574_v14, 4  ;;  %v788_v30 = vsel %vm13673_vm10, %v577_v28, %v787_v21  ;;  %v587_v56 = vrot.slane %v582_v20, 4 }
  0xd6   : > { %v13045_v25 = vld [vmem:[#allocation3 + $0x28c] ss:$36 sps:$4 sm:$0xff]   ;;  %1711 = vst [vmem:[#allocation3 + $0x2b8] sm:$0xf] %v1679_v27  ;;  %v11426_v29 = vcombine.low %v3415_v5, %v3420_v23  ;;  %v843_v31 = vld [vmem:[#allocation2 + $0x7c] sm:$0xf] }
  0xd7   : > { %v917_v32 = vld [vmem:[#allocation2 + $0x7c] sm:$0xf]  ;;  %v918_v60 = vld [vmem:[#allocation2 + $0x80] sm:$0x1]  ;;  %4901 = vmatprep.mubr.bf16.mxu0 %v13045_v25  ;;  %875 = vst [vmem:[#allocation3 + $0x2f4] sm:$0xf] %v843_v31  ;;  %v586_v48 = vsel %vm13687_vm12, %v578_v9, %v585_v34 }
  0xd8   : > { %v1180_v35 = vrot.slane %v1178_v17, 4  ;;  %v1183_v36 = vrot.slane %v1181_v18, 5  ;;  %v1187_v37 = vshll.u32 %v917_v32, 16  ;;  %v1191_v38 = vshrl.u32 %v917_v32, 16  ;;  %v1416_v39 = vld [vmem:[#allocation2 + $0x7c] sm:$0xf]  ;;  %4902 = vmatmul.mubr.bf16.gmra.mxu0 %v11426_v29 }
  0xd9   : > { %v791_v40 = vld [vmem:[#allocation2 + $0x98] sm:$0x1]  ;;  %v13912_v42 = vld [vmem:[%s13654_s14 + $0x60] sm:$0xf]  ;;  %v1197_v43 = vshll.u32 %v918_v60, 16  ;;  %v1556_v45 = vrot.slane %v1416_v39, 5 }
  0xda   : > { %v1417_v44 = vld [vmem:[#allocation2 + $0x80] sm:$0x1]  ;;  %v1680_v46 = vld [vmem:[#allocation2 + $0x84] sm:$0xf]  ;;  %v1184_v24 = vor.u32 %v1183_v36, %v1180_v35  ;;  %v1189_v49 = vrot.slane %v1187_v37, 5  ;;  %v1193_v41 = vrot.slane %v1191_v38, 4  ;;  %v792_v4 = vsel %vm13695_vm13, %v587_v56, %v791_v40 }
  0xdb   : > { %v1559_v47 = vrot.slane %v1417_v44, 5  ;;  %1712 = vst [vmem:[#allocation3 + $0x2dc] sm:$0xf] %v1680_v46  ;;  %v844_v50 = vld [vmem:[#allocation2 + $0x84] sm:$0xf]  ;;  %v13103_v51 = vld [vmem:[#allocation4 + $0x180] sm:$0xff]   ;;  %v1557_v53 = vsel %vm13679_vm11, %v11307_v19, %v1556_v45 }
  0xdc   : > { %789 = vst [vmem:[#allocation2 + $0x90] sm:$0xf] %v788_v30  ;;  %790 = vst [vmem:[#allocation2 + $0x94] sm:$0xf] %v586_v48  ;;  %v1199_v52 = vrot.slane %v1197_v43, 5  ;;  %v1558_v54 = vrot.slane %v1556_v45, 4  ;;  %v1194_v59 = vor.u32 %v1193_v41, %v1189_v49  ;;  %12248 = vmatpush3.bf16.msra.mxu1 %v13103_v51 }
  0xdd   : > { %876 = vst [vmem:[#allocation3 + $0x318] sm:$0xf] %v844_v50  ;;  %v919_v55 = vld [vmem:[#allocation2 + $0x84] sm:$0xf]  ;;  %v1185_v58 = vrot.slane %v1184_v24, 4  ;;  %v589_v5 = vshrl.u32 %v13912_v42, 16 }
  0xde   : > { %1648 = vst [vmem:[#allocation3 + $0x2d8] sm:$0xf] %v1557_v53  ;;  %v1681_v61 = vld [vmem:[#allocation2 + $0x88] sm:$0xf]  ;;  %v1202_v63 = vshrl.u32 %v919_v55, 16  ;;  %v1560_v0 = vsel %vm13679_vm11, %v1558_v54, %v1559_v47  ;;  %v1205_v3 = vshll.u32 %v919_v55, 16 }
  0xdf   : > { %v845_v62 = vld [vmem:[#allocation2 + $0x88] sm:$0xf]  ;;  %1713 = vst [vmem:[#allocation3 + $0x300] sm:$0xf] %v1681_v61  ;;  %v921_v2 = vld [vmem:[#allocation2 + $0x8c] sm:$0x1]  ;;  %v1190_v8 = vsel %vm13658_vm8, %v1185_v58, %v1189_v49 }
  0xe0   : > { %877 = vst [vmem:[#allocation3 + $0x33c] sm:$0xf] %v845_v62  ;;  %v920_v1 = vld [vmem:[#allocation2 + $0x88] sm:$0xf]  ;;  %v13047_v6 = vld [vmem:[#allocation3 + $0x294] ss:$36 sps:$4 sm:$0xff]  }
  0xe1   : > { %v13049_v7 = vld [vmem:[#allocation3 + $0x290] ss:$36 sps:$4 sm:$0xff]   ;;  %v1195_v10 = vrot.slane %v1194_v59, 4  ;;  %1649 = vst [vmem:[#allocation3 + $0x2fc] sm:$0xf] %v1560_v0  ;;  %v1204_v11 = vrot.slane %v1202_v63, 4  ;;  %5062 = vmatprep.mubr.bf16.mxu1 %v13047_v6 }
  0xe2   : > { %793 = vst [vmem:[#allocation2 + $0x98] sm:$0x1] %v792_v4  ;;  %1373 = vst [vmem:[#allocation3 + $0x2d4] sm:$0xf] %v1190_v8  ;;  %v1207_v12 = vrot.slane %v1205_v3, 5  ;;  %v1211_v13 = vshll.u32 %v920_v1, 16  ;;  %5063 = vmatmul.mubr.bf16.gmra.mxu1 %v13049_v7 }
  0xe3   : > { %v1215_v14 = vshrl.u32 %v920_v1, 16  ;;  %v1418_v15 = vld [vmem:[#allocation2 + $0x84] sm:$0xe]  ;;  %v1200_v17 = vsel %vm13658_vm8, %v1195_v10, %v1199_v52  ;;  %v1221_v18 = vshll.u32 %v921_v2, 16  ;;  %v1419_v19 = vld [vmem:[#allocation2 + $0x88] sm:$0xf] }
  0xe4   : > { %v1420_v20 = vld [vmem:[#allocation2 + $0x8c] sm:$0x1]  ;;  %v11308_v21 = vrot.slane %v1418_v15, 9  ;;  %1374 = vst [vmem:[#allocation3 + $0x2f8] sm:$0xf] %v1200_v17  ;;  %v1208_v23 = vor.u32 %v1207_v12, %v1204_v11  ;;  %v1213_v25 = vrot.slane %v1211_v13, 5 }
  0xe5   : > { %v1217_v27 = vrot.slane %v1215_v14, 4  ;;  %v1563_v28 = vrot.slane %v1419_v19, 5  ;;  %v1682_v9 = vld [vmem:[#allocation2 + $0x90] sm:$0xf]  ;;  %v1223_v31 = vrot.slane %v1221_v18, 5  ;;  %v1566_v32 = vrot.slane %v1420_v20, 5 }
  0xe6   : > { %v13929_v29 = vld [vmem:[#allocation4 + $0x238] sm:$0xff]   ;;  %1714 = vst [vmem:[#allocation3 + $0x324] sm:$0xf] %v1682_v9  ;;  %v1209_v35 = vrot.slane %v1208_v23, 4  ;;  %v320_v54 = vld [vmem:[%s13654_s14 + $0x64] sm:$0xf] }
  0xe7   : > { %v1683_v60 = vld [vmem:[#allocation2 + $0x94] sm:$0xf]  ;;  %v846_v34 = vld [vmem:[#allocation2 + $0x90] sm:$0xf]  ;;  %v1218_v36 = vor.u32 %v1217_v27, %v1213_v25  ;;  %v1564_v37 = vsel %vm13679_vm11, %v11308_v21, %v1563_v28  ;;  %v1565_v38 = vrot.slane %v1563_v28, 4  ;;  %12841 = vmatprep.subr.bf16.mxu0 %v13929_v29  ;;  %v591_v55 = vrot.slane %v589_v5, 7 }
  0xe8   : > { %1715 = vst [vmem:[#allocation3 + $0x348] sm:$0xf] %v1683_v60  ;;  %v847_v39 = vld [vmem:[#allocation2 + $0x94] sm:$0xf]  ;;  %878 = vst [vmem:[#allocation3 + $0x360] sm:$0xf] %v846_v34  ;;  %v1214_v46 = vsel %vm13658_vm8, %v1209_v35, %v1213_v25 }
  0xe9   : > { %1650 = vst [vmem:[#allocation3 + $0x320] sm:$0xf] %v1564_v37  ;;  %879 = vst [vmem:[#allocation3 + $0x384] sm:$0xf] %v847_v39  ;;  %v922_v40 = vld [vmem:[#allocation2 + $0x90] sm:$0xf]  ;;  %v1567_v30 = vsel %vm13679_vm11, %v1565_v38, %v1566_v32 }
  0xea   : > { %v923_v43 = vld [vmem:[#allocation2 + $0x94] sm:$0xf]  ;;  %v1219_v48 = vrot.slane %v1218_v36, 4  ;;  %v3425_v24 = vld [vmem:[#allocation3 + $0x2d0] sm:$0xff]  ;;  %1375 = vst [vmem:[#allocation3 + $0x31c] sm:$0xf] %v1214_v46 }
  0xeb   : > { %v13052_v44 = vld [vmem:[#allocation3 + $0x2dc] ss:$36 sps:$4 sm:$0xff]   ;;  %1651 = vst [vmem:[#allocation3 + $0x344] sm:$0xf] %v1567_v30  ;;  %v1226_v41 = vshrl.u32 %v922_v40, 16  ;;  %v1229_v47 = vshll.u32 %v922_v40, 16 }
  0xec   : > { %v13054_v45 = vld [vmem:[#allocation3 + $0x2d8] ss:$36 sps:$4 sm:$0xff]   ;;  %v924_v49 = vld [vmem:[#allocation2 + $0x98] sm:$0x1]  ;;  %v1235_v50 = vshll.u32 %v923_v43, 16  ;;  %5070 = vmatprep.mubr.bf16.mxu1 %v13052_v44  ;;  %v1224_v51 = vsel %vm13658_vm8, %v1219_v48, %v1223_v31  ;;  %v1239_v52 = vshrl.u32 %v923_v43, 16 }
  0xed   : > { %v1245_v53 = vshll.u32 %v924_v49, 16  ;;  %v3430_v56 = vld [vmem:[#allocation3 + $0x2f4] sm:$0xff]  ;;  %1376 = vst [vmem:[#allocation3 + $0x340] sm:$0xf] %v1224_v51  ;;  %v1228_v59 = vrot.slane %v1226_v41, 4  ;;  %v1231_v61 = vrot.slane %v1229_v47, 5  ;;  %5071 = vmatmul.mubr.bf16.gmra.mxu1 %v13054_v45 }
  0xee   : > { %v13050_v58 = vld [vmem:[#allocation3 + $0x2d4] ss:$36 sps:$4 sm:$0xff]   ;;  %v1237_v62 = vrot.slane %v1235_v50, 5  ;;  %v794_v63 = vld [vmem:[#allocation2 + $0x9c] sm:$0xf]  ;;  %v11435_v0 = vcombine.low %v3425_v24, %v3430_v56  ;;  %v1241_v1 = vrot.slane %v1239_v52, 4 }
  0xef   : > { %v592_v2 = vshll.u32 %v13912_v42, 16  ;;  %v1421_v3 = vld [vmem:[#allocation2 + $0x90] sm:$0xe]  ;;  %4909 = vmatprep.mubr.bf16.mxu0 %v13050_v58  ;;  %v1232_v4 = vor.u32 %v1231_v61, %v1228_v59  ;;  %v1247_v6 = vrot.slane %v1245_v53, 5  ;;  %v597_v7 = vshrl.u32 %v320_v54, 16 }
  0xf0   : > { %v600_v8 = vshll.u32 %v320_v54, 16  ;;  %v1422_v10 = vld [vmem:[#allocation2 + $0x94] sm:$0xf]  ;;  %4910 = vmatmul.mubr.bf16.gmra.mxu0 %v11435_v0  ;;  %v1242_v5 = vor.u32 %v1241_v1, %v1237_v62  ;;  %v1423_v12 = vld [vmem:[#allocation2 + $0x98] sm:$0x1]  ;;  %v11309_v13 = vrot.slane %v1421_v3, 9 }
  0xf1   : > { %v594_v11 = vor.u32 %v592_v2, %v591_v55  ;;  %v1570_v14 = vrot.slane %v1422_v10, 5  ;;  %v1233_v15 = vrot.slane %v1232_v4, 4  ;;  %v595_v17 = vrot.slane %v591_v55, 4  ;;  %v3435_v20 = vld [vmem:[#allocation3 + $0x318] sm:$0xff]  ;;  %v13059_v21 = vld [vmem:[#allocation3 + $0x324] ss:$36 sps:$4 sm:$0xff]  }
  0xf2   : > { %v599_v18 = vrot.slane %v597_v7, 7  ;;  %v1573_v19 = vrot.slane %v1423_v12, 5  ;;  %v1243_v42 = vrot.slane %v1242_v5, 4  ;;  %v13061_v28 = vld [vmem:[#allocation3 + $0x320] ss:$36 sps:$4 sm:$0xff]   ;;  %5078 = vmatprep.mubr.bf16.mxu1 %v13059_v21 }
  0xf3   : > { %v795_v23 = vsel %vm13673_vm10, %v594_v11, %v794_v63  ;;  %v1571_v25 = vsel %vm13679_vm11, %v11309_v13, %v1570_v14  ;;  %v1572_v27 = vrot.slane %v1570_v14, 4  ;;  %v1238_v9 = vsel %vm13658_vm8, %v1233_v15, %v1237_v62  ;;  %v798_v39 = vld [vmem:[#allocation2 + $0xa4] sm:$0x1]  ;;  %v321_v40 = vld [vmem:[%s13654_s14 + $0x68] sm:$0xf] }
  0xf4   : > { %v602_v31 = vor.u32 %v600_v8, %v599_v18  ;;  %796 = vst [vmem:[#allocation2 + $0x9c] sm:$0xf] %v795_v23  ;;  %1652 = vst [vmem:[#allocation3 + $0x368] sm:$0xf] %v1571_v25  ;;  %v3440_v32 = vld [vmem:[#allocation3 + $0x33c] sm:$0xff]  ;;  %v1248_v34 = vsel %vm13658_vm8, %v1243_v42, %v1247_v6  ;;  %v604_v35 = vrot.slane %v599_v18, 4 }
  0xf5   : > { %v13057_v60 = vld [vmem:[#allocation3 + $0x31c] ss:$36 sps:$4 sm:$0xff]   ;;  %1377 = vst [vmem:[#allocation3 + $0x364] sm:$0xf] %v1238_v9  ;;  %v1574_v36 = vsel %vm13679_vm11, %v1572_v27, %v1573_v19  ;;  %v11444_v37 = vcombine.low %v3435_v20, %v3440_v32  ;;  %1378 = vst [vmem:[#allocation3 + $0x388] sm:$0xf] %v1248_v34  ;;  %5079 = vmatmul.mubr.bf16.gmra.mxu1 %v13061_v28 }
  0xf6   : > { %v603_v38 = vsel %vm13687_vm12, %v595_v17, %v602_v31  ;;  %1653 = vst [vmem:[#allocation3 + $0x38c] sm:$0xf] %v1574_v36  ;;  %4917 = vmatprep.mubr.bf16.mxu0 %v13057_v60  ;;  %v799_v43 = vsel %vm13695_vm13, %v604_v35, %v798_v39  ;;  %v322_v44 = vld [vmem:[%s13654_s14 + $0x6c] sm:$0xf]  ;;  %v606_v45 = vshrl.u32 %v321_v40, 16  ;;  %v609_v46 = vshll.u32 %v321_v40, 16 }
  0xf7   : > { %797 = vst [vmem:[#allocation2 + $0xa0] sm:$0xf] %v603_v38  ;;  %800 = vst [vmem:[#allocation2 + $0xa4] sm:$0x1] %v799_v43  ;;  %v614_v48 = vshrl.u32 %v322_v44, 16  ;;  %v617_v30 = vshll.u32 %v322_v44, 16 }
  0xf8   : > { %4918 = vmatmul.mubr.bf16.gmra.mxu0 %v11444_v37  ;;  %v801_v47 = vld [vmem:[#allocation2 + $0xa8] sm:$0xf]  ;;  %v608_v53 = vrot.slane %v606_v45, 7  ;;  %v805_v32 = vld [vmem:[#allocation2 + $0xb0] sm:$0x1] }
  0xf9   : > { %v616_v54 = vrot.slane %v614_v48, 7  ;;  %v323_v60 = vld [vmem:[%s13654_s14 + $0x70] sm:$0xf]  ;;  %v324_v40 = vld [vmem:[%s13654_s14 + $0x74] sm:$0xf] }
  0xfa   : > { %v611_v0 = vor.u32 %v609_v46, %v608_v53  ;;  %v612_v8 = vrot.slane %v608_v53, 4  ;;  %v623_v38 = vshrl.u32 %v323_v60, 16  ;;  %v626_v43 = vshll.u32 %v323_v60, 16  ;;  %v812_v60 = vld [vmem:[#allocation2 + $0xbc] sm:$0x1] }
  0xfb   : > { %v1684_v24 = vld [vmem:[#allocation2 + $0x9c] sm:$0xf]  ;;  %v619_v1 = vor.u32 %v617_v30, %v616_v54  ;;  %v621_v10 = vrot.slane %v616_v54, 4 }
  0xfc   : > { %v848_v49 = vld [vmem:[#allocation2 + $0x9c] sm:$0xf]  ;;  %1716 = vst [vmem:[#allocation3 + $0x36c] sm:$0xf] %v1684_v24  ;;  %v802_v5 = vsel %vm13673_vm10, %v611_v0, %v801_v47  ;;  %v625_v24 = vrot.slane %v623_v38, 7 }
  0xfd   : > { %v925_v41 = vld [vmem:[#allocation2 + $0x9c] sm:$0xf]  ;;  %880 = vst [vmem:[#allocation3 + $0x3a8] sm:$0xf] %v848_v49  ;;  %803 = vst [vmem:[#allocation2 + $0xa8] sm:$0xf] %v802_v5  ;;  %v620_v19 = vsel %vm13687_vm12, %v612_v8, %v619_v1  ;;  %v806_v37 = vsel %vm13695_vm13, %v621_v10, %v805_v32 }
  0xfe   : > { %v3445_v50 = vld [vmem:[#allocation3 + $0x360] sm:$0xff]  ;;  %v1250_v51 = vshrl.u32 %v925_v41, 16  ;;  %v1253_v52 = vshll.u32 %v925_v41, 16  ;;  %v1685_v59 = vld [vmem:[#allocation2 + $0xa0] sm:$0xf]  ;;  %v631_v49 = vshrl.u32 %v324_v40, 16 }
  0xff   : > { %v3450_v55 = vld [vmem:[#allocation3 + $0x384] sm:$0xff]  ;;  %1717 = vst [vmem:[#allocation3 + $0x390] sm:$0xf] %v1685_v59  ;;  %v927_v12 = vld [vmem:[#allocation2 + $0xa4] sm:$0x1]  ;;  %v628_v59 = vor.u32 %v626_v43, %v625_v24 }
 0x100   : > { %v13062_v56 = vld [vmem:[#allocation3 + $0x364] ss:$36 sps:$4 sm:$0xff]   ;;  %v11453_v61 = vcombine.low %v3445_v50, %v3450_v55  ;;  %v1252_v2 = vrot.slane %v1250_v51, 4  ;;  %v1255_v3 = vrot.slane %v1253_v52, 5  ;;  %v1426_v17 = vld [vmem:[#allocation2 + $0xa4] sm:$0x1] }
 0x101   : > { %v1424_v58 = vld [vmem:[#allocation2 + $0x9c] sm:$0xe]  ;;  %v849_v62 = vld [vmem:[#allocation2 + $0xa0] sm:$0xf]  ;;  %4925 = vmatprep.mubr.bf16.mxu0 %v13062_v56  ;;  %v1269_v18 = vshll.u32 %v927_v12, 16  ;;  %v1580_v21 = vrot.slane %v1426_v17, 5 }
 0x102   : > { %v926_v63 = vld [vmem:[#allocation2 + $0xa0] sm:$0xf]  ;;  %881 = vst [vmem:[#allocation3 + $0x3cc] sm:$0xf] %v849_v62  ;;  %v11310_v11 = vrot.slane %v1424_v58, 9  ;;  %4926 = vmatmul.mubr.bf16.gmra.mxu0 %v11453_v61  ;;  %v1256_v13 = vor.u32 %v1255_v3, %v1252_v2  ;;  %v629_v61 = vrot.slane %v625_v24, 4 }
 0x103   : > { %v1259_v4 = vshll.u32 %v926_v63, 16  ;;  %v1263_v6 = vshrl.u32 %v926_v63, 16  ;;  %v1425_v7 = vld [vmem:[#allocation2 + $0xa0] sm:$0xf]  ;;  %804 = vst [vmem:[#allocation2 + $0xac] sm:$0xf] %v620_v19 }
 0x104   : > { %v1577_v20 = vrot.slane %v1425_v7, 5  ;;  %v1257_v42 = vrot.slane %v1256_v13, 4  ;;  %v1271_v25 = vrot.slane %v1269_v18, 5  ;;  %v13066_v35 = vld [vmem:[#allocation3 + $0x368] ss:$36 sps:$4 sm:$0xff]   ;;  %v633_v62 = vrot.slane %v631_v49, 7 }
 0x105   : > { %v1261_v14 = vrot.slane %v1259_v4, 5  ;;  %v1265_v15 = vrot.slane %v1263_v6, 4  ;;  %807 = vst [vmem:[#allocation2 + $0xb0] sm:$0x1] %v806_v37  ;;  %v1686_v44 = vld [vmem:[#allocation2 + $0xa8] sm:$0xf] }
 0x106   : > { %v1578_v27 = vsel %vm13679_vm11, %v11310_v11, %v1577_v20  ;;  %v1579_v28 = vrot.slane %v1577_v20, 4  ;;  %v13064_v34 = vld [vmem:[#allocation3 + $0x36c] ss:$36 sps:$4 sm:$0xff]   ;;  %1718 = vst [vmem:[#allocation3 + $0x3b4] sm:$0xf] %v1686_v44  ;;  %v634_v63 = vshll.u32 %v324_v40, 16 }
 0x107   : > { %v1266_v23 = vor.u32 %v1265_v15, %v1261_v14  ;;  %v1262_v9 = vsel %vm13658_vm8, %v1257_v42, %v1261_v14  ;;  %1654 = vst [vmem:[#allocation3 + $0x3b0] sm:$0xf] %v1578_v27  ;;  %5086 = vmatprep.mubr.bf16.mxu1 %v13064_v34  ;;  %v850_v45 = vld [vmem:[#allocation2 + $0xa8] sm:$0xf]  ;;  %v808_v41 = vld [vmem:[#allocation2 + $0xb4] sm:$0xf] }
 0x108   : > { %1379 = vst [vmem:[#allocation3 + $0x3ac] sm:$0xf] %v1262_v9  ;;  %v1581_v36 = vsel %vm13679_vm11, %v1579_v28, %v1580_v21  ;;  %v928_v46 = vld [vmem:[#allocation2 + $0xa8] sm:$0xf]  ;;  %5087 = vmatmul.mubr.bf16.gmra.mxu1 %v13066_v35  ;;  %882 = vst [vmem:[#allocation3 + $0x3f0] sm:$0xf] %v850_v45  ;;  %v636_v7 = vor.u32 %v634_v63, %v633_v62  ;;  %v809_v8 = vsel %vm13673_vm10, %v628_v59, %v808_v41 }
 0x109   : > { %v1267_v31 = vrot.slane %v1266_v23, 4  ;;  %1655 = vst [vmem:[#allocation3 + $0x3d4] sm:$0xf] %v1581_v36  ;;  %v1274_v48 = vshrl.u32 %v928_v46, 16  ;;  %v1277_v30 = vshll.u32 %v928_v46, 16  ;;  %v638_v9 = vrot.slane %v633_v62, 4 }
 0x10a   : > { %v1427_v47 = vld [vmem:[#allocation2 + $0xa8] sm:$0xe]  ;;  %v1687_v50 = vld [vmem:[#allocation2 + $0xac] sm:$0xf]  ;;  %810 = vst [vmem:[#allocation2 + $0xb4] sm:$0xf] %v809_v8  ;;  %v637_v19 = vsel %vm13687_vm12, %v629_v61, %v636_v7 }
 0x10b   : > { %v1272_v39 = vsel %vm13658_vm8, %v1267_v31, %v1271_v25  ;;  %v851_v51 = vld [vmem:[#allocation2 + $0xac] sm:$0xf]  ;;  %1719 = vst [vmem:[#allocation3 + $0x3d8] sm:$0xf] %v1687_v50  ;;  %v1276_v53 = vrot.slane %v1274_v48, 4  ;;  %v1279_v54 = vrot.slane %v1277_v30, 5  ;;  %v813_v36 = vsel %vm13695_vm13, %v638_v9, %v812_v60 }
 0x10c   : > { %1380 = vst [vmem:[#allocation3 + $0x3d0] sm:$0xf] %v1272_v39  ;;  %v929_v52 = vld [vmem:[#allocation2 + $0xac] sm:$0xf]  ;;  %883 = vst [vmem:[#allocation3 + $0x414] sm:$0xf] %v851_v51 }
 0x10d   : > { %v1283_v55 = vshll.u32 %v929_v52, 16  ;;  %v1287_v56 = vshrl.u32 %v929_v52, 16  ;;  %v1428_v58 = vld [vmem:[#allocation2 + $0xac] sm:$0xf]  ;;  %v1280_v1 = vor.u32 %v1279_v54, %v1276_v53  ;;  %v11311_v4 = vrot.slane %v1427_v47, 9 }
 0x10e   : > { %v930_v6 = vld [vmem:[#allocation2 + $0xb0] sm:$0x1]  ;;  %v1584_v5 = vrot.slane %v1428_v58, 5  ;;  %811 = vst [vmem:[#allocation2 + $0xb8] sm:$0xf] %v637_v19 }
 0x10f   : > { %v3455_v0 = vld [vmem:[#allocation3 + $0x3a8] sm:$0xff]  ;;  %v1285_v2 = vrot.slane %v1283_v55, 5  ;;  %v1289_v3 = vrot.slane %v1287_v56, 4  ;;  %v1429_v10 = vld [vmem:[#allocation2 + $0xb0] sm:$0x1]  ;;  %v1281_v13 = vrot.slane %v1280_v1, 4 }
 0x110   : > { %v1293_v15 = vshll.u32 %v930_v6, 16  ;;  %v1587_v17 = vrot.slane %v1429_v10, 5  ;;  %v1585_v20 = vsel %vm13679_vm11, %v11311_v4, %v1584_v5  ;;  %v1586_v21 = vrot.slane %v1584_v5, 4  ;;  %v13077_v28 = vld [vmem:[#allocation3 + $0x3b0] ss:$36 sps:$4 sm:$0xff]  }
 0x111   : > { %v1290_v14 = vor.u32 %v1289_v3, %v1285_v2  ;;  %v1286_v42 = vsel %vm13658_vm8, %v1281_v13, %v1285_v2  ;;  %1656 = vst [vmem:[#allocation3 + $0x3f8] sm:$0xf] %v1585_v20  ;;  %v325_v34 = vld [vmem:[%s13654_s14 + $0x78] sm:$0xf]  ;;  %v1688_v35 = vld [vmem:[#allocation2 + $0xb4] sm:$0xf] }
 0x112   : > { %v1295_v25 = vrot.slane %v1293_v15, 5  ;;  %v13074_v27 = vld [vmem:[#allocation3 + $0x3b4] ss:$36 sps:$4 sm:$0xff]   ;;  %1381 = vst [vmem:[#allocation3 + $0x3f4] sm:$0xf] %v1286_v42  ;;  %v1588_v31 = vsel %vm13679_vm11, %v1586_v21, %v1587_v17  ;;  %v640_v44 = vshrl.u32 %v325_v34, 16 }
 0x113   : > { %v3460_v11 = vld [vmem:[#allocation3 + $0x3cc] sm:$0xff]  ;;  %v1291_v23 = vrot.slane %v1290_v14, 4  ;;  %1657 = vst [vmem:[#allocation3 + $0x41c] sm:$0xf] %v1588_v31  ;;  %5094 = vmatprep.mubr.bf16.mxu1 %v13074_v27  ;;  %v852_v37 = vld [vmem:[#allocation2 + $0xb4] sm:$0xf] }
 0x114   : > { %v13072_v12 = vld [vmem:[#allocation3 + $0x3ac] ss:$36 sps:$4 sm:$0xff]   ;;  %v11462_v18 = vcombine.low %v3455_v0, %v3460_v11  ;;  %5095 = vmatmul.mubr.bf16.gmra.mxu1 %v13077_v28  ;;  %v931_v38 = vld [vmem:[#allocation2 + $0xb4] sm:$0xf]  ;;  %1720 = vst [vmem:[#allocation3 + $0x3fc] sm:$0xf] %v1688_v35 }
 0x115   : > { %4933 = vmatprep.mubr.bf16.mxu0 %v13072_v12  ;;  %v1296_v32 = vsel %vm13658_vm8, %v1291_v23, %v1295_v25  ;;  %814 = vst [vmem:[#allocation2 + $0xbc] sm:$0x1] %v813_v36  ;;  %884 = vst [vmem:[#allocation3 + $0x438] sm:$0xf] %v852_v37  ;;  %v1298_v39 = vshrl.u32 %v931_v38, 16  ;;  %v1301_v40 = vshll.u32 %v931_v38, 16 }
 0x116   : > { %4934 = vmatmul.mubr.bf16.gmra.mxu0 %v11462_v18  ;;  %1382 = vst [vmem:[#allocation3 + $0x418] sm:$0xf] %v1296_v32  ;;  %v326_v43 = vld [vmem:[%s13654_s14 + $0x7c] sm:$0xf]  ;;  %v643_v45 = vshll.u32 %v325_v34, 16  ;;  %v642_v52 = vrot.slane %v640_v44, 7 }
 0x117   : > { %v1689_v46 = vld [vmem:[#allocation2 + $0xb8] sm:$0xf]  ;;  %v1300_v49 = vrot.slane %v1298_v39, 4  ;;  %v1303_v41 = vrot.slane %v1301_v40, 5  ;;  %v815_v51 = vld [vmem:[#allocation2 + $0xc0] sm:$0xf] }
 0x118   : > { %v853_v48 = vld [vmem:[#allocation2 + $0xb8] sm:$0xf]  ;;  %1721 = vst [vmem:[#allocation3 + $0x420] sm:$0xf] %v1689_v46  ;;  %v648_v53 = vshrl.u32 %v326_v43, 16  ;;  %v651_v54 = vshll.u32 %v326_v43, 16  ;;  %v645_v1 = vor.u32 %v643_v45, %v642_v52 }
 0x119   : > { %v932_v30 = vld [vmem:[#allocation2 + $0xb8] sm:$0xf]  ;;  %v3465_v24 = vld [vmem:[#allocation3 + $0x3f0] sm:$0xff]  ;;  %885 = vst [vmem:[#allocation3 + $0x45c] sm:$0xf] %v853_v48  ;;  %v1304_v59 = vor.u32 %v1303_v41, %v1300_v49  ;;  %v646_v2 = vrot.slane %v642_v52, 4 }
 0x11a   : > { %v1307_v47 = vshll.u32 %v932_v30, 16  ;;  %v1311_v50 = vshrl.u32 %v932_v30, 16  ;;  %v1430_v55 = vld [vmem:[#allocation2 + $0xb4] sm:$0xe]  ;;  %v13990_v3 = vrot.slane %v648_v53, 7  ;;  %v816_v11 = vsel %vm13673_vm10, %v645_v1, %v815_v51 }
 0x11b   : > { %v11312_v63 = vrot.slane %v1430_v55, 9  ;;  %v1431_v4 = vld [vmem:[#allocation2 + $0xb8] sm:$0xf]  ;;  %v1305_v6 = vrot.slane %v1304_v59, 4  ;;  %817 = vst [vmem:[#allocation2 + $0xc0] sm:$0xf] %v816_v11 }
 0x11c   : > { %v1309_v61 = vrot.slane %v1307_v47, 5  ;;  %v1313_v62 = vrot.slane %v1311_v50, 4  ;;  %v1591_v8 = vrot.slane %v1431_v4, 5  ;;  %v933_v10 = vld [vmem:[#allocation2 + $0xbc] sm:$0x1]  ;;  %v653_v5 = vor.u32 %v651_v54, %v13990_v3 }
 0x11d   : > { %v3470_v56 = vld [vmem:[#allocation3 + $0x414] sm:$0xff]  ;;  %v1432_v12 = vld [vmem:[#allocation2 + $0xbc] sm:$0x1]  ;;  %v1317_v15 = vshll.u32 %v933_v10, 16  ;;  %v1726_v31 = vld [vmem:[#allocation2 + $0x14] sm:$0x1] }
 0x11e   : > { %v13081_v58 = vld [vmem:[#allocation3 + $0x3f4] ss:$36 sps:$4 sm:$0xff]   ;;  %v11471_v0 = vcombine.low %v3465_v24, %v3470_v56  ;;  %v1314_v7 = vor.u32 %v1313_v62, %v1309_v61  ;;  %v1310_v13 = vsel %vm13658_vm8, %v1305_v6, %v1309_v61  ;;  %v1592_v17 = vsel %vm13679_vm11, %v11312_v63, %v1591_v8  ;;  %v2222_v44 = vld [vmem:[#allocation2 + $0x14] sm:$0x1]  ;;  %v2493_v56 = vld [vmem:[#allocation2 + $0x18] sm:$0xf] }
 0x11f   : > { %4941 = vmatprep.mubr.bf16.mxu0 %v13081_v58  ;;  %v13083_v18 = vld [vmem:[#allocation3 + $0x3fc] ss:$36 sps:$4 sm:$0xff]   ;;  %1383 = vst [vmem:[#allocation3 + $0x43c] sm:$0xf] %v1310_v13  ;;  %v654_v20 = vsel %vm13687_vm12, %v646_v2, %v653_v5  ;;  %v1593_v21 = vrot.slane %v1591_v8, 4  ;;  %v1319_v42 = vrot.slane %v1317_v15, 5 }
 0x120   : > { %4942 = vmatmul.mubr.bf16.gmra.mxu0 %v11471_v0  ;;  %v1315_v14 = vrot.slane %v1314_v7, 4  ;;  %v13086_v19 = vld [vmem:[#allocation3 + $0x3f8] ss:$36 sps:$4 sm:$0xff]   ;;  %1658 = vst [vmem:[#allocation3 + $0x440] sm:$0xf] %v1592_v17  ;;  %v1594_v23 = vrot.slane %v1432_v12, 5  ;;  %5102 = vmatprep.mubr.bf16.mxu1 %v13083_v18 }
 0x121   : > { %818 = vst [vmem:[#allocation2 + $0xc4] sm:$0xf] %v654_v20  ;;  %v1724_v25 = vld [vmem:[#allocation2 + $0xc] sm:$0xf]  ;;  %v1725_v27 = vld [vmem:[#allocation2 + $0x10] sm:$0xf]  ;;  %5103 = vmatmul.mubr.bf16.gmra.mxu1 %v13086_v19 }
 0x122   : > { %v1320_v28 = vsel %vm13658_vm8, %v1315_v14, %v1319_v42  ;;  %v1595_v9 = vsel %vm13679_vm11, %v1593_v21, %v1594_v23  ;;  %v1773_v32 = vshrl.u32 %v1724_v25, 16  ;;  %v1776_v60 = vshll.u32 %v1724_v25, 16  ;;  %v2220_v34 = vld [vmem:[#allocation2 + $0xc] sm:$0xe]  ;;  %v2221_v38 = vld [vmem:[#allocation2 + $0x10] sm:$0xf] }
 0x123   : > { %1384 = vst [vmem:[#allocation3 + $0x460] sm:$0xf] %v1320_v28  ;;  %1659 = vst [vmem:[#allocation3 + $0x464] sm:$0xf] %v1595_v9  ;;  %v1782_v35 = vshll.u32 %v1725_v27, 16  ;;  %v1786_v36 = vshrl.u32 %v1725_v27, 16 }
 0x124   : > { %v1792_v37 = vshll.u32 %v1726_v31, 16  ;;  %v11313_v39 = vrot.slane %v2220_v34, 9  ;;  %v1775_v40 = vrot.slane %v1773_v32, 4  ;;  %v1778_v43 = vrot.slane %v1776_v60, 5  ;;  %v1690_v46 = vld [vmem:[#allocation2 + $0xc0] sm:$0xf] }
 0x125   : > { %v2318_v45 = vrot.slane %v2221_v38, 5  ;;  %v1784_v48 = vrot.slane %v1782_v35, 5  ;;  %v1788_v30 = vrot.slane %v1786_v36, 4  ;;  %v2321_v24 = vrot.slane %v2222_v44, 5  ;;  %1722 = vst [vmem:[#allocation3 + $0x444] sm:$0xf] %v1690_v46  ;;  %v11913_v46 = vpop.f32.mrf.mxu0 }
 0x126   : > { %v1779_v49 = vor.u32 %v1778_v43, %v1775_v40  ;;  %v1794_v41 = vrot.slane %v1792_v37, 5  ;;  %v3475_v53 = vld [vmem:[#allocation3 + $0x438] sm:$0xff]  ;;  %v2494_v58 = vld [vmem:[#allocation2 + $0x1c] sm:$0xf]  ;;  %2525 = vst [vmem:[#allocation3 + $0x18] sm:$0xf] %v2493_v56 }
 0x127   : > { %v2319_v47 = vsel %vm13679_vm11, %v11313_v39, %v2318_v45  ;;  %v2320_v50 = vrot.slane %v2318_v45, 4  ;;  %v1789_v52 = vor.u32 %v1788_v30, %v1784_v48  ;;  %2526 = vst [vmem:[#allocation3 + $0x3c] sm:$0xf] %v2494_v58  ;;  %v2557_v61 = vld [vmem:[#allocation2 + $0x18] sm:$0xf] }
 0x128   : > { %v1691_v51 = vld [vmem:[#allocation2 + $0xc4] sm:$0xf]  ;;  %2460 = vst [vmem:[#allocation3 + $0x14] sm:$0xf] %v2319_v47  ;;  %v1780_v54 = vrot.slane %v1779_v49, 4  ;;  %v2606_v4 = vshrl.u32 %v2557_v61, 16 }
 0x129   : > { %1723 = vst [vmem:[#allocation3 + $0x468] sm:$0xf] %v1691_v51  ;;  %v2322_v55 = vsel %vm13679_vm11, %v2320_v50, %v2321_v24  ;;  %v1790_v59 = vrot.slane %v1789_v52, 4  ;;  %v2558_v62 = vld [vmem:[#allocation2 + $0x1c] sm:$0xf]  ;;  %v2609_v8 = vshll.u32 %v2557_v61, 16 }
 0x12a   : > { %2461 = vst [vmem:[#allocation3 + $0x38] sm:$0xf] %v2322_v55  ;;  %v3480_v63 = vld [vmem:[#allocation3 + $0x45c] sm:$0xff]  ;;  %v1785_v1 = vsel %vm13658_vm8, %v1780_v54, %v1784_v48  ;;  %v2559_v2 = vld [vmem:[#allocation2 + $0x20] sm:$0x1]  ;;  %v2615_v10 = vshll.u32 %v2558_v62, 16  ;;  %v11914_v55 = vpop.f32.mrf.mxu0 }
 0x12b   : > { %v13092_v0 = vld [vmem:[#allocation3 + $0x43c] ss:$36 sps:$4 sm:$0xff]   ;;  %v11480_v6 = vcombine.low %v3475_v53, %v3480_v63  ;;  %v1795_v7 = vsel %vm13658_vm8, %v1790_v59, %v1794_v41  ;;  %2188 = vst [vmem:[#allocation3 + $0x10] sm:$0xf] %v1785_v1  ;;  %v1728_v11 = vld [vmem:[#allocation2 + $0x1c] sm:$0xf]  ;;  %v14019_v63 = vadd.f32 %v11914_v55, %v11913_v46  ;;  %v12025_v55 = vpop.f32.mrf.mxu1 }
 0x12c   : > { %v1727_v5 = vld [vmem:[#allocation2 + $0x18] sm:$0xf]  ;;  %4949 = vmatprep.mubr.bf16.mxu0 %v13092_v0  ;;  %2189 = vst [vmem:[#allocation3 + $0x34] sm:$0xf] %v1795_v7  ;;  %v2608_v12 = vrot.slane %v2606_v4, 4  ;;  %v2619_v13 = vshrl.u32 %v2558_v62, 16 }
 0x12d   : > { %v2625_v14 = vshll.u32 %v2559_v2, 16  ;;  %v1729_v15 = vld [vmem:[#allocation2 + $0x20] sm:$0x1]  ;;  %v1797_v17 = vshrl.u32 %v1727_v5, 16  ;;  %4950 = vmatmul.mubr.bf16.gmra.mxu0 %v11480_v6  ;;  %v2611_v18 = vrot.slane %v2609_v8, 5  ;;  %v2617_v19 = vrot.slane %v2615_v10, 5 }
 0x12e   : > { %v1800_v20 = vshll.u32 %v1727_v5, 16  ;;  %v1806_v21 = vshll.u32 %v1728_v11, 16  ;;  %v2621_v42 = vrot.slane %v2619_v13, 4  ;;  %v1810_v27 = vshrl.u32 %v1728_v11, 16  ;;  %v2223_v28 = vld [vmem:[#allocation2 + $0x18] sm:$0xe] }
 0x12f   : > { %v2627_v23 = vrot.slane %v2625_v14, 5  ;;  %v1799_v25 = vrot.slane %v1797_v17, 4  ;;  %v13097_v31 = vld [vmem:[#allocation3 + $0x440] ss:$36 sps:$4 sm:$0xff]   ;;  %v2612_v32 = vor.u32 %v2611_v18, %v2608_v12  ;;  %v1816_v37 = vshll.u32 %v1729_v15, 16  ;;  %v13118_v47 = vld [vmem:[#allocation4 + $0x230] sm:$0xff]  }
 0x130   : > { %v13094_v9 = vld [vmem:[#allocation3 + $0x444] ss:$36 sps:$4 sm:$0xff]   ;;  %v1802_v60 = vrot.slane %v1800_v20, 5  ;;  %v2622_v34 = vor.u32 %v2621_v42, %v2617_v19  ;;  %v1808_v35 = vrot.slane %v1806_v21, 5  ;;  %v1812_v36 = vrot.slane %v1810_v27, 4 }
 0x131   : > { %v2224_v38 = vld [vmem:[#allocation2 + $0x1c] sm:$0xf]  ;;  %5110 = vmatprep.mubr.bf16.mxu1 %v13094_v9  ;;  %v2613_v39 = vrot.slane %v2612_v32, 4  ;;  %v2225_v43 = vld [vmem:[#allocation2 + $0x20] sm:$0x1]  ;;  %v11314_v44 = vrot.slane %v2223_v28, 9 }
 0x132   : > { %v1803_v40 = vor.u32 %v1802_v60, %v1799_v25  ;;  %v2325_v45 = vrot.slane %v2224_v38, 5  ;;  %5111 = vmatmul.mubr.bf16.gmra.mxu1 %v13097_v31  ;;  %v2623_v48 = vrot.slane %v2622_v34, 4  ;;  %v1813_v30 = vor.u32 %v1812_v36, %v1808_v35  ;;  %v2495_v41 = vld [vmem:[#allocation2 + $0x24] sm:$0xf]  ;;  %v13101_v50 = vld [vmem:[#allocation3 + $0x14] ss:$36 sps:$4 sm:$0xff]   ;;  %v11916_v60 = vpop.f32.mrf.mxu0 }
 0x133   : > { %v1818_v24 = vrot.slane %v1816_v37, 5  ;;  %v2328_v49 = vrot.slane %v2225_v43, 5  ;;  %v13104_v51 = vld [vmem:[#allocation3 + $0x10] ss:$36 sps:$4 sm:$0xff]   ;;  %v2618_v52 = vsel %vm13658_vm8, %v2613_v39, %v2617_v19  ;;  %2527 = vst [vmem:[#allocation3 + $0x60] sm:$0xf] %v2495_v41  ;;  %5151 = vmatprep.mubr.bf16.mxu0 %v13101_v50 }
 0x134   : > { %v1804_v53 = vrot.slane %v1803_v40, 4  ;;  %v2326_v54 = vsel %vm13679_vm11, %v11314_v44, %v2325_v45  ;;  %v2628_v56 = vsel %vm13658_vm8, %v2623_v48, %v2627_v23  ;;  %3021 = vst [vmem:[#allocation3 + $0x1c] sm:$0xf] %v2618_v52  ;;  %v1814_v58 = vrot.slane %v1813_v30, 4  ;;  %v2496_v61 = vld [vmem:[#allocation2 + $0x28] sm:$0xf] }
 0x135   : > { %v2327_v59 = vrot.slane %v2325_v45, 4  ;;  %2462 = vst [vmem:[#allocation3 + $0x5c] sm:$0xf] %v2326_v54  ;;  %v2560_v62 = vld [vmem:[#allocation2 + $0x24] sm:$0xf]  ;;  %5152 = vmatmul.mubr.bf16.vlgmr.msra.gmra.mxu0 %v13104_v51  ;;  %v13144_v44 = vld [vmem:[#allocation4 + $0x220] sm:$0xff]   ;;  %v11917_v51 = vpop.f32.mrf.mxu0 }
 0x136   : > { %3022 = vst [vmem:[#allocation3 + $0x40] sm:$0xf] %v2628_v56  ;;  %v1809_v0 = vsel %vm13658_vm8, %v1804_v53, %v1808_v35  ;;  %2528 = vst [vmem:[#allocation3 + $0x84] sm:$0xf] %v2496_v61  ;;  %v2561_v1 = vld [vmem:[#allocation2 + $0x28] sm:$0xf]  ;;  %v1819_v7 = vsel %vm13658_vm8, %v1814_v58, %v1818_v24  ;;  %12842 = vmatpush3.bf16.msra.mxu0 %v13929_v29 }
 0x137   : > { %v2562_v2 = vld [vmem:[#allocation2 + $0x2c] sm:$0x1]  ;;  %v2630_v4 = vshrl.u32 %v2560_v62, 16  ;;  %v2633_v6 = vshll.u32 %v2560_v62, 16  ;;  %2190 = vst [vmem:[#allocation3 + $0x58] sm:$0xf] %v1809_v0  ;;  %v2329_v8 = vsel %vm13679_vm11, %v2327_v59, %v2328_v49  ;;  %12843 = vmatprep.subr.bf16.mxu0 %v13118_v47 }
 0x138   : > { %v2639_v10 = vshll.u32 %v2561_v1, 16  ;;  %v2643_v5 = vshrl.u32 %v2561_v1, 16  ;;  %v1730_v11 = vld [vmem:[#allocation2 + $0x24] sm:$0xf]  ;;  %v1731_v12 = vld [vmem:[#allocation2 + $0x28] sm:$0xf] }
 0x139   : > { %v13131_v13 = vld [vmem:[#allocation4 + $0x228] sm:$0xff]   ;;  %2191 = vst [vmem:[#allocation3 + $0x7c] sm:$0xf] %v1819_v7  ;;  %2463 = vst [vmem:[#allocation3 + $0x80] sm:$0xf] %v2329_v8  ;;  %v2632_v14 = vrot.slane %v2630_v4, 4  ;;  %v14036_v7 = vadd.f32 %v11917_v51, %v11916_v60  ;;  %v11919_v51 = vpop.f32.mrf.mxu0 }
 0x13a   : > { %v2635_v15 = vrot.slane %v2633_v6, 5  ;;  %v2649_v17 = vshll.u32 %v2562_v2, 16  ;;  %v1732_v18 = vld [vmem:[#allocation2 + $0x2c] sm:$0x1]  ;;  %v1821_v19 = vshrl.u32 %v1730_v11, 16  ;;  %v2641_v20 = vrot.slane %v2639_v10, 5  ;;  %12844 = vmatpush3.bf16.msra.mxu0 %v13118_v47  ;;  %v12026_v6 = vpop.f32.mrf.mxu1 }
 0x13b   : > { %v2645_v21 = vrot.slane %v2643_v5, 4  ;;  %v1824_v42 = vshll.u32 %v1730_v11, 16  ;;  %v1830_v23 = vshll.u32 %v1731_v12, 16  ;;  %v2226_v25 = vld [vmem:[#allocation2 + $0x24] sm:$0xe]  ;;  %v1834_v31 = vshrl.u32 %v1731_v12, 16  ;;  %12845 = vmatprep.subr.bf16.mxu0 %v13131_v13 }
 0x13c   : > { %v2636_v27 = vor.u32 %v2635_v15, %v2632_v14  ;;  %v2651_v28 = vrot.slane %v2649_v17, 5  ;;  %v1823_v9 = vrot.slane %v1821_v19, 4  ;;  %v2227_v32 = vld [vmem:[#allocation2 + $0x28] sm:$0xf]  ;;  %v1840_v36 = vshll.u32 %v1732_v18, 16  ;;  %v13157_v62 = vld [vmem:[#allocation4 + $0x218] sm:$0xff]  }
 0x13d   : > { %v2646_v29 = vor.u32 %v2645_v21, %v2641_v20  ;;  %v1826_v34 = vrot.slane %v1824_v42, 5  ;;  %v1832_v35 = vrot.slane %v1830_v23, 5  ;;  %v2228_v37 = vld [vmem:[#allocation2 + $0x2c] sm:$0x1]  ;;  %v1836_v39 = vrot.slane %v1834_v31, 4 }
 0x13e   : > { %v2637_v38 = vrot.slane %v2636_v27, 4  ;;  %v11315_v40 = vrot.slane %v2226_v25, 9  ;;  %v2332_v43 = vrot.slane %v2227_v32, 5  ;;  %v13106_v45 = vld [vmem:[#allocation3 + $0x1c] ss:$36 sps:$4 sm:$0xff]   ;;  %v1842_v41 = vrot.slane %v1840_v36, 5  ;;  %12846 = vmatpush3.bf16.msra.mxu0 %v13131_v13 }
 0x13f   : > { %v13108_v46 = vld [vmem:[#allocation3 + $0x18] ss:$36 sps:$4 sm:$0xff]   ;;  %v2647_v48 = vrot.slane %v2646_v29, 4  ;;  %v1827_v30 = vor.u32 %v1826_v34, %v1823_v9  ;;  %v1837_v49 = vor.u32 %v1836_v39, %v1832_v35  ;;  %5312 = vmatprep.mubr.bf16.mxu1 %v13106_v45  ;;  %v2335_v59 = vrot.slane %v2228_v37, 5  ;;  %12847 = vmatprep.subr.bf16.mxu0 %v13144_v44  ;;  %v2565_v5 = vld [vmem:[#allocation2 + $0x38] sm:$0x1] }
 0x140   : > { %v2642_v24 = vsel %vm13658_vm8, %v2637_v38, %v2641_v20  ;;  %v2333_v50 = vsel %vm13679_vm11, %v11315_v40, %v2332_v43  ;;  %v13109_v52 = vld [vmem:[#allocation3 + $0x5c] ss:$36 sps:$4 sm:$0xff]   ;;  %5313 = vmatmul.mubr.bf16.vlgmr.msra.gmra.mxu1 %v13108_v46  ;;  %v2334_v58 = vrot.slane %v2332_v43, 4  ;;  %v2497_v61 = vld [vmem:[#allocation2 + $0x30] sm:$0xf]  ;;  %v2673_v17 = vshll.u32 %v2565_v5, 16  ;;  %v12028_v20 = vpop.f32.mrf.mxu1 }
 0x141   : > { %v13111_v53 = vld [vmem:[#allocation3 + $0x58] ss:$36 sps:$4 sm:$0xff]   ;;  %v2652_v47 = vsel %vm13658_vm8, %v2647_v48, %v2651_v28  ;;  %3023 = vst [vmem:[#allocation3 + $0x64] sm:$0xf] %v2642_v24  ;;  %v1828_v54 = vrot.slane %v1827_v30, 4  ;;  %v1838_v56 = vrot.slane %v1837_v49, 4  ;;  %5159 = vmatprep.mubr.bf16.mxu0 %v13109_v52  ;;  %v12027_v48 = vadd.f32 %v12026_v6, %v12025_v55 }
 0x142   : > { %2464 = vst [vmem:[#allocation3 + $0xa4] sm:$0xf] %v2333_v50  ;;  %3024 = vst [vmem:[#allocation3 + $0x88] sm:$0xf] %v2652_v47  ;;  %v2498_v1 = vld [vmem:[#allocation2 + $0x34] sm:$0xf]  ;;  %5160 = vmatmul.mubr.bf16.gmra.mxu0 %v13111_v53  ;;  %v2336_v10 = vsel %vm13679_vm11, %v2334_v58, %v2335_v59  ;;  %v12029_v34 = vpop.f32.mrf.mxu1 }
 0x143   : > { %v1833_v0 = vsel %vm13658_vm8, %v1828_v54, %v1832_v35  ;;  %2529 = vst [vmem:[#allocation3 + $0xa8] sm:$0xf] %v2497_v61  ;;  %v2563_v2 = vld [vmem:[#allocation2 + $0x30] sm:$0xf]  ;;  %v2564_v4 = vld [vmem:[#allocation2 + $0x34] sm:$0xf]  ;;  %v1843_v8 = vsel %vm13658_vm8, %v1838_v56, %v1842_v41  ;;  %12848 = vmatpush3.bf16.msra.mxu0 %v13144_v44  ;;  %v12030_v30 = vadd.f32 %v12029_v34, %v12028_v20 }
 0x144   : > { %2192 = vst [vmem:[#allocation3 + $0xa0] sm:$0xf] %v1833_v0  ;;  %2530 = vst [vmem:[#allocation3 + $0xcc] sm:$0xf] %v2498_v1  ;;  %v2654_v11 = vshrl.u32 %v2563_v2, 16  ;;  %v2657_v12 = vshll.u32 %v2563_v2, 16  ;;  %12849 = vmatprep.subr.bf16.mxu0 %v13157_v62  ;;  %v12031_v56 = vpop.f32.mrf.mxu1  ;;  %v11920_v2 = vpop.f32.mrf.mxu0 }
 0x145   : > { %v1733_v13 = vld [vmem:[#allocation2 + $0x30] sm:$0xf]  ;;  %2193 = vst [vmem:[#allocation3 + $0xc4] sm:$0xf] %v1843_v8  ;;  %2465 = vst [vmem:[#allocation3 + $0xc8] sm:$0xf] %v2336_v10 }
 0x146   : > { %v2663_v14 = vshll.u32 %v2564_v4, 16  ;;  %v2667_v15 = vshrl.u32 %v2564_v4, 16  ;;  %v1734_v18 = vld [vmem:[#allocation2 + $0x34] sm:$0xf]  ;;  %v1845_v19 = vshrl.u32 %v1733_v13, 16  ;;  %v14042_v21 = vld [vmem:[#allocation4 + $0x210] sm:$0xff]  }
 0x147   : > { %v2656_v42 = vrot.slane %v2654_v11, 4  ;;  %v2659_v23 = vrot.slane %v2657_v12, 5  ;;  %v1735_v25 = vld [vmem:[#allocation2 + $0x38] sm:$0x1]  ;;  %v1848_v27 = vshll.u32 %v1733_v13, 16  ;;  %v1854_v28 = vshll.u32 %v1734_v18, 16  ;;  %12850 = vmatpush3.bf16.msra.mxu0 %v13157_v62  ;;  %v12032_v12 = vpop.f32.mrf.mxu1 }
 0x148   : > { %v2665_v9 = vrot.slane %v2663_v14, 5  ;;  %v2669_v31 = vrot.slane %v2667_v15, 4  ;;  %v2675_v32 = vrot.slane %v2673_v17, 5  ;;  %v1847_v60 = vrot.slane %v1845_v19, 4  ;;  %v2229_v29 = vld [vmem:[#allocation2 + $0x30] sm:$0xe]  ;;  %12851 = vmatprep.subr.bf16.mxu0 %v14042_v21  ;;  %v11922_v19 = vpop.f32.mrf.mxu0 }
 0x149   : > { %v2660_v35 = vor.u32 %v2659_v23, %v2656_v42  ;;  %v1850_v36 = vrot.slane %v1848_v27, 5  ;;  %v1856_v37 = vrot.slane %v1854_v28, 5  ;;  %v1858_v38 = vshrl.u32 %v1734_v18, 16  ;;  %v2230_v39 = vld [vmem:[#allocation2 + $0x34] sm:$0xf]  ;;  %v13183_v58 = vld [vmem:[#allocation4 + $0x208] sm:$0xff]   ;;  %v12034_v27 = vpop.f32.mrf.mxu1 }
 0x14a   : > { %v13112_v40 = vld [vmem:[#allocation3 + $0x64] ss:$36 sps:$4 sm:$0xff]   ;;  %v2670_v45 = vor.u32 %v2669_v31, %v2665_v9  ;;  %v1864_v46 = vshll.u32 %v1735_v25, 16  ;;  %v2231_v41 = vld [vmem:[#allocation2 + $0x38] sm:$0x1]  ;;  %v11316_v50 = vrot.slane %v2229_v29, 9  ;;  %v14048_v62 = vadd.f32 %v12027_v48, %v14019_v63  ;;  %v11923_v29 = vpop.f32.mrf.mxu0 }
 0x14b   : > { %v13114_v43 = vld [vmem:[#allocation3 + $0x60] ss:$36 sps:$4 sm:$0xff]   ;;  %v2661_v24 = vrot.slane %v2660_v35, 4  ;;  %v1851_v44 = vor.u32 %v1850_v36, %v1847_v60  ;;  %v1860_v49 = vrot.slane %v1858_v38, 4  ;;  %5320 = vmatprep.mubr.bf16.mxu1 %v13112_v40  ;;  %v2339_v47 = vrot.slane %v2230_v39, 5  ;;  %12852 = vmatpush3.bf16.msra.mxu0 %v14042_v21  ;;  %v12035_v39 = vpop.f32.mrf.mxu1 }
 0x14c   : > { %v2671_v52 = vrot.slane %v2670_v45, 4  ;;  %v1866_v53 = vrot.slane %v1864_v46, 5  ;;  %v2342_v54 = vrot.slane %v2231_v41, 5  ;;  %5321 = vmatmul.mubr.bf16.gmra.mxu1 %v13114_v43  ;;  %v13115_v59 = vld [vmem:[#allocation3 + $0xa4] ss:$36 sps:$4 sm:$0xff]   ;;  %v14055_v11 = vadd.f32 %v12030_v30, %v14036_v7  ;;  %12853 = vmatprep.subr.bf16.mxu0 %v13183_v58 }
 0x14d   : > { %v13117_v55 = vld [vmem:[#allocation3 + $0xa0] ss:$36 sps:$4 sm:$0xff]   ;;  %v2666_v61 = vsel %vm13658_vm8, %v2661_v24, %v2665_v9  ;;  %v1852_v0 = vrot.slane %v1851_v44, 4  ;;  %v1861_v1 = vor.u32 %v1860_v49, %v1856_v37  ;;  %v2340_v6 = vsel %vm13679_vm11, %v11316_v50, %v2339_v47  ;;  %v2500_v5 = vld [vmem:[#allocation2 + $0x40] sm:$0xf]  ;;  %5167 = vmatprep.mubr.bf16.mxu0 %v13115_v59 }
 0x14e   : > { %v2676_v4 = vsel %vm13658_vm8, %v2671_v52, %v2675_v32  ;;  %3025 = vst [vmem:[#allocation3 + $0xac] sm:$0xf] %v2666_v61  ;;  %v2341_v8 = vrot.slane %v2339_v47, 4  ;;  %v2499_v10 = vld [vmem:[#allocation2 + $0x3c] sm:$0xf]  ;;  %v11921_v17 = vadd.f32 %v11920_v2, %v11919_v51  ;;  %v12033_v18 = vadd.f32 %v12032_v12, %v12031_v56  ;;  %5168 = vmatmul.mubr.bf16.gmra.mxu0 %v13117_v55 }
 0x14f   : > { %3026 = vst [vmem:[#allocation3 + $0xd0] sm:$0xf] %v2676_v4  ;;  %v1857_v63 = vsel %vm13658_vm8, %v1852_v0, %v1856_v37  ;;  %v1862_v13 = vrot.slane %v1861_v1, 4  ;;  %2466 = vst [vmem:[#allocation3 + $0xec] sm:$0xf] %v2340_v6  ;;  %12854 = vmatpush3.bf16.msra.mxu0 %v13183_v58  ;;  %v11924_v61 = vadd.f32 %v11923_v29, %v11922_v19  ;;  %v12037_v1 = vpop.f32.mrf.mxu1 }
 0x150   : > { %2531 = vst [vmem:[#allocation3 + $0xf0] sm:$0xf] %v2499_v10  ;;  %2532 = vst [vmem:[#allocation3 + $0x114] sm:$0xf] %v2500_v5  ;;  %v2566_v14 = vld [vmem:[#allocation2 + $0x3c] sm:$0xf]  ;;  %v2343_v7 = vsel %vm13679_vm11, %v2341_v8, %v2342_v54  ;;  %v14064_v21 = vadd.f32 %v12033_v18, %v11921_v17  ;;  %v11925_v54 = vpop.f32.mrf.mxu0  ;;  %v12036_v0 = vadd.f32 %v12035_v39, %v12034_v27 }
 0x151   : > { %v2567_v15 = vld [vmem:[#allocation2 + $0x40] sm:$0xf]  ;;  %2194 = vst [vmem:[#allocation3 + $0xe8] sm:$0xf] %v1857_v63  ;;  %v2568_v20 = vld [vmem:[#allocation2 + $0x44] sm:$0x1]  ;;  %v1867_v28 = vsel %vm13658_vm8, %v1862_v13, %v1866_v53 }
 0x152   : > { %v2678_v42 = vshrl.u32 %v2566_v14, 16  ;;  %v2681_v23 = vshll.u32 %v2566_v14, 16  ;;  %v2687_v25 = vshll.u32 %v2567_v15, 16  ;;  %2467 = vst [vmem:[#allocation3 + $0x110] sm:$0xf] %v2343_v7  ;;  %v2691_v9 = vshrl.u32 %v2567_v15, 16  ;;  %v11926_v8 = vpop.f32.mrf.mxu0  ;;  %v12038_v14 = vpop.f32.mrf.mxu1 }
 0x153   : > { %v2697_v31 = vshll.u32 %v2568_v20, 16  ;;  %v1736_v32 = vld [vmem:[#allocation2 + $0x3c] sm:$0xf]  ;;  %v1737_v60 = vld [vmem:[#allocation2 + $0x40] sm:$0xf]  ;;  %v14068_v13 = vadd.f32 %v12036_v0, %v11924_v61  ;;  %v11927_v20 = vadd.f32 %v11926_v8, %v11925_v54 }
 0x154   : > { %2195 = vst [vmem:[#allocation3 + $0x10c] sm:$0xf] %v1867_v28  ;;  %v2680_v34 = vrot.slane %v2678_v42, 4  ;;  %v2683_v35 = vrot.slane %v2681_v23, 5  ;;  %v2689_v36 = vrot.slane %v2687_v25, 5  ;;  %v1869_v38 = vshrl.u32 %v1736_v32, 16  ;;  %v11928_v42 = vpop.f32.mrf.mxu0 }
 0x155   : > { %v1738_v37 = vld [vmem:[#allocation2 + $0x44] sm:$0x1]  ;;  %v2693_v40 = vrot.slane %v2691_v9, 4  ;;  %v2699_v43 = vrot.slane %v2697_v31, 5  ;;  %v1872_v45 = vshll.u32 %v1736_v32, 16  ;;  %v1878_v46 = vshll.u32 %v1737_v60, 16  ;;  %v12040_v31 = vpop.f32.mrf.mxu1 }
 0x156   : > { %v2232_v48 = vld [vmem:[#allocation2 + $0x3c] sm:$0xe]  ;;  %v2684_v30 = vor.u32 %v2683_v35, %v2680_v34  ;;  %v1871_v24 = vrot.slane %v1869_v38, 4  ;;  %v1882_v44 = vshrl.u32 %v1737_v60, 16  ;;  %v1888_v49 = vshll.u32 %v1738_v37, 16  ;;  %v11929_v37 = vpop.f32.mrf.mxu0 }
 0x157   : > { %v2233_v41 = vld [vmem:[#allocation2 + $0x40] sm:$0xf]  ;;  %v2694_v50 = vor.u32 %v2693_v40, %v2689_v36  ;;  %v1874_v51 = vrot.slane %v1872_v45, 5  ;;  %v1880_v52 = vrot.slane %v1878_v46, 5  ;;  %v2234_v53 = vld [vmem:[#allocation2 + $0x44] sm:$0x1]  ;;  %v12039_v9 = vadd.f32 %v12038_v14, %v12037_v1 }
 0x158   : > { %v11317_v47 = vrot.slane %v2232_v48, 9  ;;  %v13119_v56 = vld [vmem:[#allocation3 + $0xac] ss:$36 sps:$4 sm:$0xff]   ;;  %v2685_v55 = vrot.slane %v2684_v30, 4  ;;  %v1884_v58 = vrot.slane %v1882_v44, 4  ;;  %v1890_v6 = vrot.slane %v1888_v49, 5  ;;  %v11931_v54 = vpop.f32.mrf.mxu0 }
 0x159   : > { %v13121_v59 = vld [vmem:[#allocation3 + $0xa8] ss:$36 sps:$4 sm:$0xff]   ;;  %v2695_v2 = vrot.slane %v2694_v50, 4  ;;  %v1875_v4 = vor.u32 %v1874_v51, %v1871_v24  ;;  %5328 = vmatprep.mubr.bf16.mxu1 %v13119_v56  ;;  %v2346_v5 = vrot.slane %v2233_v41, 5  ;;  %v2349_v12 = vrot.slane %v2234_v53, 5  ;;  %v13196_v32 = vld [vmem:[#allocation4 + $0x200] sm:$0xff]  }
 0x15a   : > { %v2690_v10 = vsel %vm13658_vm8, %v2685_v55, %v2689_v36  ;;  %v2501_v63 = vld [vmem:[#allocation2 + $0x48] sm:$0xf]  ;;  %5329 = vmatmul.mubr.bf16.gmra.mxu1 %v13121_v59  ;;  %v1885_v7 = vor.u32 %v1884_v58, %v1880_v52  ;;  %v2502_v27 = vld [vmem:[#allocation2 + $0x4c] sm:$0xf]  ;;  %v2571_v35 = vld [vmem:[#allocation2 + $0x50] sm:$0x1]  ;;  %12855 = vmatprep.subr.bf16.mxu0 %v13196_v32  ;;  %v14080_v49 = vadd.f32 %v12039_v9, %v11927_v20  ;;  %v11932_v8 = vpop.f32.mrf.mxu0 }
 0x15b   : > { %v13122_v15 = vld [vmem:[#allocation3 + $0xec] ss:$36 sps:$4 sm:$0xff]   ;;  %v2700_v18 = vsel %vm13658_vm8, %v2695_v2, %v2699_v43  ;;  %3027 = vst [vmem:[#allocation3 + $0xf4] sm:$0xf] %v2690_v10  ;;  %v1876_v19 = vrot.slane %v1875_v4, 4  ;;  %v2347_v23 = vsel %vm13679_vm11, %v11317_v47, %v2346_v5  ;;  %v2348_v25 = vrot.slane %v2346_v5, 4  ;;  %12856 = vmatpush3.bf16.msra.mxu0 %v13196_v32  ;;  %v12041_v47 = vpop.f32.mrf.mxu1 }
 0x15c   : > { %v13124_v17 = vld [vmem:[#allocation3 + $0xe8] ss:$36 sps:$4 sm:$0xff]   ;;  %2533 = vst [vmem:[#allocation3 + $0x138] sm:$0xf] %v2501_v63  ;;  %3028 = vst [vmem:[#allocation3 + $0x118] sm:$0xf] %v2700_v18  ;;  %5175 = vmatprep.mubr.bf16.mxu0 %v13122_v15  ;;  %v11930_v63 = vadd.f32 %v11929_v37, %v11928_v42  ;;  %v12042_v14 = vadd.f32 %v12041_v47, %v12040_v31  ;;  %v14082_v15 = vadd.f32 %v11932_v8, %v11931_v54 }
 0x15d   : > { %v2569_v28 = vld [vmem:[#allocation2 + $0x48] sm:$0xf]  ;;  %v1881_v60 = vsel %vm13658_vm8, %v1876_v19, %v1880_v52  ;;  %v1886_v29 = vrot.slane %v1885_v7, 4  ;;  %2468 = vst [vmem:[#allocation3 + $0x134] sm:$0xf] %v2347_v23  ;;  %5176 = vmatmul.mubr.bf16.gmra.mxu0 %v13124_v17  ;;  %v2350_v38 = vsel %vm13679_vm11, %v2348_v25, %v2349_v12  ;;  %v2721_v30 = vshll.u32 %v2571_v35, 16  ;;  %v11934_v23 = vpop.f32.mrf.mxu0 }
 0x15e   : > { %2534 = vst [vmem:[#allocation3 + $0x15c] sm:$0xf] %v2502_v27  ;;  %v2570_v34 = vld [vmem:[#allocation2 + $0x4c] sm:$0xf]  ;;  %v2702_v36 = vshrl.u32 %v2569_v28, 16  ;;  %v2705_v39 = vshll.u32 %v2569_v28, 16 }
 0x15f   : > { %2196 = vst [vmem:[#allocation3 + $0x130] sm:$0xf] %v1881_v60  ;;  %v2711_v40 = vshll.u32 %v2570_v34, 16  ;;  %v2715_v43 = vshrl.u32 %v2570_v34, 16  ;;  %v1739_v45 = vld [vmem:[#allocation2 + $0x48] sm:$0xf]  ;;  %v1891_v46 = vsel %vm13658_vm8, %v1886_v29, %v1890_v6 }
 0x160   : > { %2469 = vst [vmem:[#allocation3 + $0x158] sm:$0xf] %v2350_v38  ;;  %v2704_v48 = vrot.slane %v2702_v36, 4  ;;  %v1740_v24 = vld [vmem:[#allocation2 + $0x4c] sm:$0xf]  ;;  %v2707_v41 = vrot.slane %v2705_v39, 5  ;;  %v11935_v36 = vpop.f32.mrf.mxu0 }
 0x161   : > { %v1741_v44 = vld [vmem:[#allocation2 + $0x50] sm:$0x1]  ;;  %2197 = vst [vmem:[#allocation3 + $0x154] sm:$0xf] %v1891_v46  ;;  %v2713_v50 = vrot.slane %v2711_v40, 5  ;;  %v2717_v51 = vrot.slane %v2715_v43, 4  ;;  %v14090_v43 = vadd.f32 %v12042_v14, %v11930_v63  ;;  %v14092_v46 = vadd.f32 %v11935_v36, %v11934_v23 }
 0x162   : > { %v1893_v52 = vshrl.u32 %v1739_v45, 16  ;;  %v2235_v53 = vld [vmem:[#allocation2 + $0x48] sm:$0xe]  ;;  %v2723_v56 = vrot.slane %v2721_v30, 5  ;;  %v1896_v59 = vshll.u32 %v1739_v45, 16  ;;  %v1902_v55 = vshll.u32 %v1740_v24, 16  ;;  %v12043_v45 = vpop.f32.mrf.mxu1 }
 0x163   : > { %v1906_v61 = vshrl.u32 %v1740_v24, 16  ;;  %v2236_v0 = vld [vmem:[#allocation2 + $0x4c] sm:$0xf]  ;;  %v2708_v1 = vor.u32 %v2707_v41, %v2704_v48  ;;  %v2718_v2 = vor.u32 %v2717_v51, %v2713_v50  ;;  %v1912_v58 = vshll.u32 %v1741_v44, 16  ;;  %v2237_v6 = vld [vmem:[#allocation2 + $0x50] sm:$0x1] }
 0x164   : > { %v1895_v4 = vrot.slane %v1893_v52, 4  ;;  %v13125_v10 = vld [vmem:[#allocation3 + $0xf4] ss:$36 sps:$4 sm:$0xff]   ;;  %v1898_v12 = vrot.slane %v1896_v59, 5  ;;  %v1904_v19 = vrot.slane %v1902_v55, 5  ;;  %v11318_v28 = vrot.slane %v2235_v53, 9  ;;  %v12044_v54 = vpop.f32.mrf.mxu1 }
 0x165   : > { %v13127_v5 = vld [vmem:[#allocation3 + $0xf0] ss:$36 sps:$4 sm:$0xff]   ;;  %v2709_v17 = vrot.slane %v2708_v1, 4  ;;  %v2719_v18 = vrot.slane %v2718_v2, 4  ;;  %v1908_v7 = vrot.slane %v1906_v61, 4  ;;  %5336 = vmatprep.mubr.bf16.mxu1 %v13125_v10  ;;  %v1914_v27 = vrot.slane %v1912_v58, 5 }
 0x166   : > { %v2503_v20 = vld [vmem:[#allocation2 + $0x54] sm:$0xf]  ;;  %v1899_v25 = vor.u32 %v1898_v12, %v1895_v4  ;;  %v2353_v9 = vrot.slane %v2236_v0, 5  ;;  %v2504_v32 = vld [vmem:[#allocation2 + $0x58] sm:$0xf]  ;;  %5337 = vmatmul.mubr.bf16.gmra.mxu1 %v13127_v5  ;;  %v2356_v29 = vrot.slane %v2237_v6, 5  ;;  %v12046_v10 = vpop.f32.mrf.mxu1 }
 0x167   : > { %2535 = vst [vmem:[#allocation3 + $0x180] sm:$0xf] %v2503_v20  ;;  %v2714_v42 = vsel %vm13658_vm8, %v2709_v17, %v2713_v50  ;;  %v2724_v31 = vsel %vm13658_vm8, %v2719_v18, %v2723_v56  ;;  %v1909_v60 = vor.u32 %v1908_v7, %v1904_v19  ;;  %2536 = vst [vmem:[#allocation3 + $0x1a4] sm:$0xf] %v2504_v32  ;;  %v2572_v34 = vld [vmem:[#allocation2 + $0x54] sm:$0xf] }
 0x168   : > { %v2573_v35 = vld [vmem:[#allocation2 + $0x58] sm:$0xf]  ;;  %v13128_v37 = vld [vmem:[#allocation3 + $0x134] ss:$36 sps:$4 sm:$0xff]   ;;  %3029 = vst [vmem:[#allocation3 + $0x13c] sm:$0xf] %v2714_v42  ;;  %v2354_v40 = vsel %vm13679_vm11, %v11318_v28, %v2353_v9  ;;  %v12045_v32 = vadd.f32 %v12044_v54, %v12043_v45 }
 0x169   : > { %v13130_v38 = vld [vmem:[#allocation3 + $0x130] ss:$36 sps:$4 sm:$0xff]   ;;  %3030 = vst [vmem:[#allocation3 + $0x160] sm:$0xf] %v2724_v31  ;;  %v1900_v39 = vrot.slane %v1899_v25, 4  ;;  %v1910_v48 = vrot.slane %v1909_v60, 4  ;;  %5183 = vmatprep.mubr.bf16.mxu0 %v13128_v37  ;;  %v12047_v25 = vpop.f32.mrf.mxu1 }
 0x16a   : > { %v2355_v30 = vrot.slane %v2353_v9, 4  ;;  %2470 = vst [vmem:[#allocation3 + $0x17c] sm:$0xf] %v2354_v40  ;;  %v2574_v24 = vld [vmem:[#allocation2 + $0x5c] sm:$0x1]  ;;  %v2726_v44 = vshrl.u32 %v2572_v34, 16  ;;  %5184 = vmatmul.mubr.bf16.gmra.mxu0 %v13130_v38  ;;  %v12048_v42 = vadd.f32 %v12047_v25, %v12046_v10 }
 0x16b   : > { %v2729_v41 = vshll.u32 %v2572_v34, 16  ;;  %v1905_v50 = vsel %vm13658_vm8, %v1900_v39, %v1904_v19  ;;  %v2735_v51 = vshll.u32 %v2573_v35, 16  ;;  %v2739_v52 = vshrl.u32 %v2573_v35, 16  ;;  %v1742_v47 = vld [vmem:[#allocation2 + $0x54] sm:$0xf]  ;;  %v12049_v36 = vpop.f32.mrf.mxu1 }
 0x16c   : > { %v2745_v53 = vshll.u32 %v2574_v24, 16  ;;  %v1915_v56 = vsel %vm13658_vm8, %v1910_v48, %v1914_v27  ;;  %2198 = vst [vmem:[#allocation3 + $0x178] sm:$0xf] %v1905_v50  ;;  %v2357_v59 = vsel %vm13679_vm11, %v2355_v30, %v2356_v29  ;;  %v2728_v55 = vrot.slane %v2726_v44, 4  ;;  %v1743_v0 = vld [vmem:[#allocation2 + $0x58] sm:$0xf]  ;;  %v11937_v50 = vpop.f32.mrf.mxu0 }
 0x16d   : > { %v2731_v61 = vrot.slane %v2729_v41, 5  ;;  %v1744_v1 = vld [vmem:[#allocation2 + $0x5c] sm:$0x1]  ;;  %2199 = vst [vmem:[#allocation3 + $0x19c] sm:$0xf] %v1915_v56  ;;  %v2737_v2 = vrot.slane %v2735_v51, 5  ;;  %v14105_v44 = vadd.f32 %v12045_v32, %v14082_v15  ;;  %v14108_v41 = vadd.f32 %v12048_v42, %v14092_v46  ;;  %v12050_v51 = vpop.f32.mrf.mxu1 }
 0x16e   : > { %2471 = vst [vmem:[#allocation3 + $0x1a0] sm:$0xf] %v2357_v59  ;;  %v2741_v4 = vrot.slane %v2739_v52, 4  ;;  %v2747_v58 = vrot.slane %v2745_v53, 5  ;;  %v1917_v6 = vshrl.u32 %v1742_v47, 16  ;;  %v1920_v12 = vshll.u32 %v1742_v47, 16  ;;  %v11938_v46 = vpop.f32.mrf.mxu0 }
 0x16f   : > { %v2238_v8 = vld [vmem:[#allocation2 + $0x54] sm:$0xe]  ;;  %v2732_v5 = vor.u32 %v2731_v61, %v2728_v55  ;;  %v1926_v63 = vshll.u32 %v1743_v0, 16  ;;  %v1930_v14 = vshrl.u32 %v1743_v0, 16  ;;  %v2239_v17 = vld [vmem:[#allocation2 + $0x58] sm:$0xf]  ;;  %v14112_v56 = vadd.f32 %v12050_v51, %v12049_v36  ;;  %v14114_v0 = vpop.f32.mrf.mxu1 }
 0x170   : > { %v2742_v18 = vor.u32 %v2741_v4, %v2737_v2  ;;  %v1919_v19 = vrot.slane %v1917_v6, 4  ;;  %v1936_v7 = vshll.u32 %v1744_v1, 16  ;;  %v2240_v20 = vld [vmem:[#allocation2 + $0x5c] sm:$0x1]  ;;  %v11319_v23 = vrot.slane %v2238_v8, 9 }
 0x171   : > { %v13132_v27 = vld [vmem:[#allocation3 + $0x13c] ss:$36 sps:$4 sm:$0xff]   ;;  %v2733_v28 = vrot.slane %v2732_v5, 4  ;;  %v1922_v9 = vrot.slane %v1920_v12, 5  ;;  %v1928_v29 = vrot.slane %v1926_v63, 5  ;;  %v1932_v34 = vrot.slane %v1930_v14, 4 }
 0x172   : > { %v13134_v31 = vld [vmem:[#allocation3 + $0x138] ss:$36 sps:$4 sm:$0xff]   ;;  %v2743_v60 = vrot.slane %v2742_v18, 4  ;;  %v1938_v35 = vrot.slane %v1936_v7, 5  ;;  %5344 = vmatprep.mubr.bf16.mxu1 %v13132_v27  ;;  %v2360_v39 = vrot.slane %v2239_v17, 5  ;;  %v2363_v40 = vrot.slane %v2240_v20, 5  ;;  %v11940_v17 = vpop.f32.mrf.mxu0  ;;  %v12053_v18 = vpop.f32.mrf.mxu1 }
 0x173   : > { %v2738_v37 = vsel %vm13658_vm8, %v2733_v28, %v2737_v2  ;;  %v1923_v38 = vor.u32 %v1922_v9, %v1919_v19  ;;  %5345 = vmatmul.mubr.bf16.gmra.mxu1 %v13134_v31  ;;  %v1933_v45 = vor.u32 %v1932_v34, %v1928_v29  ;;  %v2505_v30 = vld [vmem:[#allocation2 + $0x60] sm:$0xf]  ;;  %v2506_v24 = vld [vmem:[#allocation2 + $0x64] sm:$0xf]  ;;  %v2577_v2 = vld [vmem:[#allocation2 + $0x68] sm:$0x1] }
 0x174   : > { %v2748_v48 = vsel %vm13658_vm8, %v2743_v60, %v2747_v58  ;;  %3031 = vst [vmem:[#allocation3 + $0x184] sm:$0xf] %v2738_v37  ;;  %v13137_v53 = vld [vmem:[#allocation3 + $0x178] ss:$36 sps:$4 sm:$0xff]   ;;  %v2361_v54 = vsel %vm13679_vm11, %v11319_v23, %v2360_v39  ;;  %2537 = vst [vmem:[#allocation3 + $0x1c8] sm:$0xf] %v2505_v30  ;;  %v11941_v31 = vpop.f32.mrf.mxu0  ;;  %v12055_v60 = vpop.f32.mrf.mxu1 }
 0x175   : > { %v13135_v52 = vld [vmem:[#allocation3 + $0x17c] ss:$36 sps:$4 sm:$0xff]   ;;  %3032 = vst [vmem:[#allocation3 + $0x1a8] sm:$0xf] %v2748_v48  ;;  %v1924_v47 = vrot.slane %v1923_v38, 4  ;;  %v1934_v59 = vrot.slane %v1933_v45, 4  ;;  %v11939_v45 = vadd.f32 %v11938_v46, %v11937_v50  ;;  %v14122_v30 = vadd.f32 %v11941_v31, %v11940_v17 }
 0x176   : > { %2538 = vst [vmem:[#allocation3 + $0x1ec] sm:$0xf] %v2506_v24  ;;  %v2362_v55 = vrot.slane %v2360_v39, 4  ;;  %2472 = vst [vmem:[#allocation3 + $0x1c4] sm:$0xf] %v2361_v54  ;;  %5191 = vmatprep.mubr.bf16.mxu0 %v13135_v52  ;;  %v2769_v12 = vshll.u32 %v2577_v2, 16  ;;  %v11943_v24 = vpop.f32.mrf.mxu0 }
 0x177   : > { %v2575_v15 = vld [vmem:[#allocation2 + $0x60] sm:$0xf]  ;;  %v2576_v61 = vld [vmem:[#allocation2 + $0x64] sm:$0xf]  ;;  %v1929_v1 = vsel %vm13658_vm8, %v1924_v47, %v1928_v29  ;;  %5192 = vmatmul.mubr.bf16.gmra.mxu0 %v13137_v53  ;;  %v1939_v8 = vsel %vm13658_vm8, %v1934_v59, %v1938_v35  ;;  %v1747_v23 = vld [vmem:[#allocation2 + $0x68] sm:$0x1] }
 0x178   : > { %v2750_v4 = vshrl.u32 %v2575_v15, 16  ;;  %v2753_v58 = vshll.u32 %v2575_v15, 16  ;;  %v2759_v6 = vshll.u32 %v2576_v61, 16  ;;  %2200 = vst [vmem:[#allocation3 + $0x1c0] sm:$0xf] %v1929_v1  ;;  %v2364_v10 = vsel %vm13679_vm11, %v2362_v55, %v2363_v40  ;;  %v11944_v2 = vpop.f32.mrf.mxu0 }
 0x179   : > { %v2763_v5 = vshrl.u32 %v2576_v61, 16  ;;  %v1745_v63 = vld [vmem:[#allocation2 + $0x60] sm:$0xf]  ;;  %v1746_v14 = vld [vmem:[#allocation2 + $0x64] sm:$0xf]  ;;  %v2771_v28 = vrot.slane %v2769_v12, 5 }
 0x17a   : > { %2201 = vst [vmem:[#allocation3 + $0x1e4] sm:$0xf] %v1939_v8  ;;  %2473 = vst [vmem:[#allocation3 + $0x1e8] sm:$0xf] %v2364_v10  ;;  %v2752_v19 = vrot.slane %v2750_v4, 4  ;;  %v2755_v7 = vrot.slane %v2753_v58, 5  ;;  %v12056_v4 = vpop.f32.mrf.mxu1  ;;  %v14127_v10 = vadd.f32 %v14112_v56, %v11939_v45 }
 0x17b   : > { %v2761_v20 = vrot.slane %v2759_v6, 5  ;;  %v1941_v25 = vshrl.u32 %v1745_v63, 16  ;;  %v2765_v27 = vrot.slane %v2763_v5, 4  ;;  %v1944_v9 = vshll.u32 %v1745_v63, 16  ;;  %v2241_v42 = vld [vmem:[#allocation2 + $0x60] sm:$0xe] }
 0x17c   : > { %v1950_v32 = vshll.u32 %v1746_v14, 16  ;;  %v2756_v29 = vor.u32 %v2755_v7, %v2752_v19  ;;  %v1954_v35 = vshrl.u32 %v1746_v14, 16  ;;  %v1960_v36 = vshll.u32 %v1747_v23, 16  ;;  %v2242_v37 = vld [vmem:[#allocation2 + $0x64] sm:$0xf]  ;;  %v11946_v7 = vpop.f32.mrf.mxu0 }
 0x17d   : > { %v1943_v34 = vrot.slane %v1941_v25, 4  ;;  %v13138_v38 = vld [vmem:[#allocation3 + $0x184] ss:$36 sps:$4 sm:$0xff]   ;;  %v2766_v40 = vor.u32 %v2765_v27, %v2761_v20  ;;  %v1946_v48 = vrot.slane %v1944_v9, 5  ;;  %v2243_v54 = vld [vmem:[#allocation2 + $0x68] sm:$0x1]  ;;  %v12054_v19 = vadd.f32 %v12053_v18, %v14114_v0 }
 0x17e   : > { %v13140_v39 = vld [vmem:[#allocation3 + $0x180] ss:$36 sps:$4 sm:$0xff]   ;;  %v2757_v51 = vrot.slane %v2756_v29, 4  ;;  %v1952_v52 = vrot.slane %v1950_v32, 5  ;;  %v1956_v53 = vrot.slane %v1954_v35, 4  ;;  %v1962_v47 = vrot.slane %v1960_v36, 5  ;;  %5352 = vmatprep.mubr.bf16.mxu1 %v13138_v38  ;;  %v12058_v38 = vpop.f32.mrf.mxu1 }
 0x17f   : > { %v2767_v59 = vrot.slane %v2766_v40, 4  ;;  %v1947_v55 = vor.u32 %v1946_v48, %v1943_v34  ;;  %v11320_v15 = vrot.slane %v2241_v42, 9  ;;  %v2367_v61 = vrot.slane %v2242_v37, 5  ;;  %v2507_v1 = vld [vmem:[#allocation2 + $0x6c] sm:$0xf]  ;;  %5353 = vmatmul.mubr.bf16.gmra.mxu1 %v13140_v39  ;;  %v11947_v34 = vpop.f32.mrf.mxu0 }
 0x180   : > { %v2762_v50 = vsel %vm13658_vm8, %v2757_v51, %v2761_v20  ;;  %v1957_v46 = vor.u32 %v1956_v53, %v1952_v52  ;;  %v2370_v58 = vrot.slane %v2243_v54, 5  ;;  %v2508_v6 = vld [vmem:[#allocation2 + $0x70] sm:$0xf]  ;;  %2539 = vst [vmem:[#allocation3 + $0x210] sm:$0xf] %v2507_v1  ;;  %v11945_v27 = vadd.f32 %v11944_v2, %v11943_v24 }
 0x181   : > { %v2578_v8 = vld [vmem:[#allocation2 + $0x6c] sm:$0xf]  ;;  %v13141_v5 = vld [vmem:[#allocation3 + $0x1c4] ss:$36 sps:$4 sm:$0xff]   ;;  %v2772_v63 = vsel %vm13658_vm8, %v2767_v59, %v2771_v28  ;;  %3033 = vst [vmem:[#allocation3 + $0x1cc] sm:$0xf] %v2762_v50  ;;  %v2368_v17 = vsel %vm13679_vm11, %v11320_v15, %v2367_v61  ;;  %v12057_v9 = vadd.f32 %v12056_v4, %v12055_v60  ;;  %v11949_v51 = vpop.f32.mrf.mxu0 }
 0x182   : > { %v13143_v12 = vld [vmem:[#allocation3 + $0x1c0] ss:$36 sps:$4 sm:$0xff]   ;;  %v1948_v14 = vrot.slane %v1947_v55, 4  ;;  %2540 = vst [vmem:[#allocation3 + $0x234] sm:$0xf] %v2508_v6  ;;  %v1958_v20 = vrot.slane %v1957_v46, 4  ;;  %5199 = vmatprep.mubr.bf16.mxu0 %v13141_v5  ;;  %v12059_v6 = vpop.f32.mrf.mxu1 }
 0x183   : > { %3034 = vst [vmem:[#allocation3 + $0x1f0] sm:$0xf] %v2772_v63  ;;  %v2369_v23 = vrot.slane %v2367_v61, 4  ;;  %2474 = vst [vmem:[#allocation3 + $0x20c] sm:$0xf] %v2368_v17  ;;  %v2774_v32 = vshrl.u32 %v2578_v8, 16  ;;  %5200 = vmatmul.mubr.bf16.gmra.mxu0 %v13143_v12  ;;  %v14141_v63 = vadd.f32 %v12054_v19, %v14122_v30  ;;  %v11948_v17 = vadd.f32 %v11947_v34, %v11946_v7 }
 0x184   : > { %v2579_v56 = vld [vmem:[#allocation2 + $0x70] sm:$0xf]  ;;  %v2580_v25 = vld [vmem:[#allocation2 + $0x74] sm:$0x1]  ;;  %v1953_v28 = vsel %vm13658_vm8, %v1948_v14, %v1952_v52  ;;  %v2777_v42 = vshll.u32 %v2578_v8, 16  ;;  %v1963_v0 = vsel %vm13658_vm8, %v1958_v20, %v1962_v47  ;;  %v14143_v14 = vadd.f32 %v12057_v9, %v11945_v27  ;;  %v11950_v20 = vpop.f32.mrf.mxu0 }
 0x185   : > { %v2783_v31 = vshll.u32 %v2579_v56, 16  ;;  %v1748_v29 = vld [vmem:[#allocation2 + $0x6c] sm:$0xf]  ;;  %2202 = vst [vmem:[#allocation3 + $0x208] sm:$0xf] %v1953_v28  ;;  %v2371_v18 = vsel %vm13679_vm11, %v2369_v23, %v2370_v58  ;;  %v2787_v35 = vshrl.u32 %v2579_v56, 16  ;;  %v11951_v9 = vadd.f32 %v11950_v20, %v11949_v51 }
 0x186   : > { %v2793_v36 = vshll.u32 %v2580_v25, 16  ;;  %v1749_v60 = vld [vmem:[#allocation2 + $0x70] sm:$0xf]  ;;  %v1750_v37 = vld [vmem:[#allocation2 + $0x74] sm:$0x1]  ;;  %v2776_v39 = vrot.slane %v2774_v32, 4 }
 0x187   : > { %2203 = vst [vmem:[#allocation3 + $0x22c] sm:$0xf] %v1963_v0  ;;  %2475 = vst [vmem:[#allocation3 + $0x230] sm:$0xf] %v2371_v18  ;;  %v2779_v40 = vrot.slane %v2777_v42, 5  ;;  %v2785_v48 = vrot.slane %v2783_v31, 5  ;;  %v12060_v0 = vadd.f32 %v12059_v6, %v12058_v38  ;;  %v12061_v38 = vpop.f32.mrf.mxu1 }
 0x188   : > { %v1965_v45 = vshrl.u32 %v1748_v29, 16  ;;  %v2244_v24 = vld [vmem:[#allocation2 + $0x6c] sm:$0xe]  ;;  %v2789_v52 = vrot.slane %v2787_v35, 4  ;;  %v2795_v53 = vrot.slane %v2793_v36, 5  ;;  %v1968_v47 = vshll.u32 %v1748_v29, 16 }
 0x189   : > { %v1974_v54 = vshll.u32 %v1749_v60, 16  ;;  %v2245_v59 = vld [vmem:[#allocation2 + $0x70] sm:$0xf]  ;;  %v2780_v55 = vor.u32 %v2779_v40, %v2776_v39  ;;  %v1978_v61 = vshrl.u32 %v1749_v60, 16  ;;  %v1984_v1 = vshll.u32 %v1750_v37, 16  ;;  %v11952_v39 = vpop.f32.mrf.mxu0 }
 0x18a   : > { %v1967_v15 = vrot.slane %v1965_v45, 4  ;;  %v2246_v2 = vld [vmem:[#allocation2 + $0x74] sm:$0x1]  ;;  %v2790_v4 = vor.u32 %v2789_v52, %v2785_v48  ;;  %v1970_v50 = vrot.slane %v1968_v47, 5  ;;  %v11321_v58 = vrot.slane %v2244_v24, 9 }
 0x18b   : > { %v1976_v46 = vrot.slane %v1974_v54, 5  ;;  %v13145_v8 = vld [vmem:[#allocation3 + $0x1cc] ss:$36 sps:$4 sm:$0xff]   ;;  %v2781_v12 = vrot.slane %v2780_v55, 4  ;;  %v1980_v25 = vrot.slane %v1978_v61, 4  ;;  %v1986_v28 = vrot.slane %v1984_v1, 5  ;;  %v12062_v55 = vpop.f32.mrf.mxu1 }
 0x18c   : > { %v13147_v5 = vld [vmem:[#allocation3 + $0x1c8] ss:$36 sps:$4 sm:$0xff]   ;;  %v2791_v23 = vrot.slane %v2790_v4, 4  ;;  %v1971_v56 = vor.u32 %v1970_v50, %v1967_v15  ;;  %5360 = vmatprep.mubr.bf16.mxu1 %v13145_v8  ;;  %v2374_v42 = vrot.slane %v2245_v59, 5  ;;  %v2377_v31 = vrot.slane %v2246_v2, 5 }
 0x18d   : > { %v2786_v32 = vsel %vm13658_vm8, %v2781_v12, %v2785_v48  ;;  %v2509_v29 = vld [vmem:[#allocation2 + $0x78] sm:$0xf]  ;;  %5361 = vmatmul.mubr.bf16.gmra.mxu1 %v13147_v5  ;;  %v1981_v27 = vor.u32 %v1980_v25, %v1976_v46  ;;  %v2510_v36 = vld [vmem:[#allocation2 + $0x7c] sm:$0xf]  ;;  %v14151_v37 = vadd.f32 %v12060_v0, %v11948_v17  ;;  %v2583_v24 = vld [vmem:[#allocation2 + $0x80] sm:$0x1]  ;;  %v12063_v50 = vadd.f32 %v12062_v55, %v12061_v38  ;;  %v12064_v12 = vpop.f32.mrf.mxu1  ;;  %v11953_v17 = vpop.f32.mrf.mxu0 }
 0x18e   : > { %v13148_v18 = vld [vmem:[#allocation3 + $0x20c] ss:$36 sps:$4 sm:$0xff]   ;;  %v2796_v19 = vsel %vm13658_vm8, %v2791_v23, %v2795_v53  ;;  %3035 = vst [vmem:[#allocation3 + $0x214] sm:$0xf] %v2786_v32  ;;  %v1972_v7 = vrot.slane %v1971_v56, 4  ;;  %v2375_v34 = vsel %vm13679_vm11, %v11321_v58, %v2374_v42  ;;  %v2376_v35 = vrot.slane %v2374_v42, 4 }
 0x18f   : > { %v13150_v30 = vld [vmem:[#allocation3 + $0x208] ss:$36 sps:$4 sm:$0xff]   ;;  %2541 = vst [vmem:[#allocation3 + $0x258] sm:$0xf] %v2509_v29  ;;  %3036 = vst [vmem:[#allocation3 + $0x238] sm:$0xf] %v2796_v19  ;;  %5207 = vmatprep.mubr.bf16.mxu0 %v13148_v18  ;;  %v12065_v18 = vpop.f32.mrf.mxu1 }
 0x190   : > { %v2581_v60 = vld [vmem:[#allocation2 + $0x78] sm:$0xf]  ;;  %v1977_v40 = vsel %vm13658_vm8, %v1972_v7, %v1976_v46  ;;  %v1982_v48 = vrot.slane %v1981_v27, 4  ;;  %2476 = vst [vmem:[#allocation3 + $0x254] sm:$0xf] %v2375_v34  ;;  %5208 = vmatmul.mubr.bf16.gmra.mxu0 %v13150_v30  ;;  %v2378_v52 = vsel %vm13679_vm11, %v2376_v35, %v2377_v31  ;;  %v2817_v1 = vshll.u32 %v2583_v24, 16 }
 0x191   : > { %2542 = vst [vmem:[#allocation3 + $0x27c] sm:$0xf] %v2510_v36  ;;  %v2582_v45 = vld [vmem:[#allocation2 + $0x7c] sm:$0xf]  ;;  %v2798_v51 = vshrl.u32 %v2581_v60, 16  ;;  %v2801_v53 = vshll.u32 %v2581_v60, 16  ;;  %v14159_v27 = vadd.f32 %v12063_v50, %v11951_v9  ;;  %v11954_v34 = vadd.f32 %v11953_v17, %v11952_v39 }
 0x192   : > { %2204 = vst [vmem:[#allocation3 + $0x250] sm:$0xf] %v1977_v40  ;;  %v2807_v47 = vshll.u32 %v2582_v45, 16  ;;  %v2811_v54 = vshrl.u32 %v2582_v45, 16  ;;  %v1751_v59 = vld [vmem:[#allocation2 + $0x78] sm:$0xf]  ;;  %v1987_v15 = vsel %vm13658_vm8, %v1982_v48, %v1986_v28  ;;  %v12066_v35 = vadd.f32 %v12065_v18, %v12064_v12 }
 0x193   : > { %2477 = vst [vmem:[#allocation3 + $0x278] sm:$0xf] %v2378_v52  ;;  %v2800_v61 = vrot.slane %v2798_v51, 4  ;;  %v1752_v2 = vld [vmem:[#allocation2 + $0x7c] sm:$0xf]  ;;  %v2803_v46 = vrot.slane %v2801_v53, 5 }
 0x194   : > { %v1753_v4 = vld [vmem:[#allocation2 + $0x80] sm:$0x1]  ;;  %2205 = vst [vmem:[#allocation3 + $0x274] sm:$0xf] %v1987_v15  ;;  %v2809_v58 = vrot.slane %v2807_v47, 5  ;;  %v2813_v6 = vrot.slane %v2811_v54, 4  ;;  %v14161_v47 = vpop.f32.mrf.mxu1 }
 0x195   : > { %v1989_v8 = vshrl.u32 %v1751_v59, 16  ;;  %v2247_v5 = vld [vmem:[#allocation2 + $0x78] sm:$0xe]  ;;  %v2819_v20 = vrot.slane %v2817_v1, 5  ;;  %v1992_v23 = vshll.u32 %v1751_v59, 16  ;;  %v1998_v56 = vshll.u32 %v1752_v2, 16 }
 0x196   : > { %v2002_v25 = vshrl.u32 %v1752_v2, 16  ;;  %v2248_v32 = vld [vmem:[#allocation2 + $0x7c] sm:$0xf]  ;;  %v2804_v28 = vor.u32 %v2803_v46, %v2800_v61  ;;  %v2814_v42 = vor.u32 %v2813_v6, %v2809_v58  ;;  %v2008_v29 = vshll.u32 %v1753_v4, 16  ;;  %v2249_v0 = vld [vmem:[#allocation2 + $0x80] sm:$0x1]  ;;  %v11955_v61 = vpop.f32.mrf.mxu0 }
 0x197   : > { %v1991_v31 = vrot.slane %v1989_v8, 4  ;;  %v13151_v30 = vld [vmem:[#allocation3 + $0x214] ss:$36 sps:$4 sm:$0xff]   ;;  %v1994_v7 = vrot.slane %v1992_v23, 5  ;;  %v2000_v38 = vrot.slane %v1998_v56, 5  ;;  %v11322_v51 = vrot.slane %v2247_v5, 9 }
 0x198   : > { %v13153_v19 = vld [vmem:[#allocation3 + $0x210] ss:$36 sps:$4 sm:$0xff]   ;;  %v2805_v36 = vrot.slane %v2804_v28, 4  ;;  %v2815_v60 = vrot.slane %v2814_v42, 4  ;;  %v2004_v40 = vrot.slane %v2002_v25, 4  ;;  %5368 = vmatprep.mubr.bf16.mxu1 %v13151_v30  ;;  %v2010_v24 = vrot.slane %v2008_v29, 5 }
 0x199   : > { %v2511_v48 = vld [vmem:[#allocation2 + $0x84] sm:$0xf]  ;;  %v1995_v45 = vor.u32 %v1994_v7, %v1991_v31  ;;  %v2381_v52 = vrot.slane %v2248_v32, 5  ;;  %v2512_v53 = vld [vmem:[#allocation2 + $0x88] sm:$0xf]  ;;  %5369 = vmatmul.mubr.bf16.gmra.mxu1 %v13153_v19  ;;  %v2384_v59 = vrot.slane %v2249_v0, 5  ;;  %v14169_v46 = vadd.f32 %v12066_v35, %v11954_v34 }
 0x19a   : > { %2543 = vst [vmem:[#allocation3 + $0x2a0] sm:$0xf] %v2511_v48  ;;  %v2810_v9 = vsel %vm13658_vm8, %v2805_v36, %v2809_v58  ;;  %v2820_v39 = vsel %vm13658_vm8, %v2815_v60, %v2819_v20  ;;  %v2005_v54 = vor.u32 %v2004_v40, %v2000_v38  ;;  %2544 = vst [vmem:[#allocation3 + $0x2c4] sm:$0xf] %v2512_v53  ;;  %v2584_v55 = vld [vmem:[#allocation2 + $0x84] sm:$0xf]  ;;  %v12068_v58 = vpop.f32.mrf.mxu1  ;;  %v11956_v20 = vpop.f32.mrf.mxu0 }
 0x19b   : > { %v2585_v15 = vld [vmem:[#allocation2 + $0x88] sm:$0xf]  ;;  %v13154_v1 = vld [vmem:[#allocation3 + $0x254] ss:$36 sps:$4 sm:$0xff]   ;;  %3037 = vst [vmem:[#allocation3 + $0x25c] sm:$0xf] %v2810_v9  ;;  %v2382_v50 = vsel %vm13679_vm11, %v11322_v51, %v2381_v52 }
 0x19c   : > { %v13156_v2 = vld [vmem:[#allocation3 + $0x250] ss:$36 sps:$4 sm:$0xff]   ;;  %3038 = vst [vmem:[#allocation3 + $0x280] sm:$0xf] %v2820_v39  ;;  %v1996_v4 = vrot.slane %v1995_v45, 4  ;;  %v2006_v6 = vrot.slane %v2005_v54, 4  ;;  %5215 = vmatprep.mubr.bf16.mxu0 %v13154_v1  ;;  %v14173_v42 = vpop.f32.mrf.mxu1  ;;  %v11958_v7 = vpop.f32.mrf.mxu0 }
 0x19d   : > { %v2383_v8 = vrot.slane %v2381_v52, 4  ;;  %2478 = vst [vmem:[#allocation3 + $0x29c] sm:$0xf] %v2382_v50  ;;  %v2586_v5 = vld [vmem:[#allocation2 + $0x8c] sm:$0x1]  ;;  %v2822_v12 = vshrl.u32 %v2584_v55, 16  ;;  %5216 = vmatmul.mubr.bf16.gmra.mxu0 %v13156_v2  ;;  %v11957_v50 = vadd.f32 %v11956_v20, %v11955_v61 }
 0x19e   : > { %v2825_v17 = vshll.u32 %v2584_v55, 16  ;;  %v2001_v23 = vsel %vm13658_vm8, %v1996_v4, %v2000_v38  ;;  %v2831_v56 = vshll.u32 %v2585_v15, 16  ;;  %v2835_v25 = vshrl.u32 %v2585_v15, 16  ;;  %v1754_v28 = vld [vmem:[#allocation2 + $0x84] sm:$0xf]  ;;  %v12071_v40 = vpop.f32.mrf.mxu1  ;;  %v11959_v53 = vpop.f32.mrf.mxu0 }
 0x19f   : > { %v2841_v32 = vshll.u32 %v2586_v5, 16  ;;  %v2011_v31 = vsel %vm13658_vm8, %v2006_v6, %v2010_v24  ;;  %2206 = vst [vmem:[#allocation3 + $0x298] sm:$0xf] %v2001_v23  ;;  %v2385_v29 = vsel %vm13679_vm11, %v2383_v8, %v2384_v59  ;;  %v2824_v0 = vrot.slane %v2822_v12, 4  ;;  %v1755_v30 = vld [vmem:[#allocation2 + $0x88] sm:$0xf] }
 0x1a0   : > { %v2827_v18 = vrot.slane %v2825_v17, 5  ;;  %v1756_v19 = vld [vmem:[#allocation2 + $0x8c] sm:$0x1]  ;;  %2207 = vst [vmem:[#allocation3 + $0x2bc] sm:$0xf] %v2011_v31  ;;  %v2833_v34 = vrot.slane %v2831_v56, 5  ;;  %v12073_v15 = vpop.f32.mrf.mxu1  ;;  %v12069_v6 = vadd.f32 %v12068_v58, %v14161_v47  ;;  %v11961_v23 = vpop.f32.mrf.mxu0 }
 0x1a1   : > { %2479 = vst [vmem:[#allocation3 + $0x2c0] sm:$0xf] %v2385_v29  ;;  %v2837_v35 = vrot.slane %v2835_v25, 4  ;;  %v2843_v36 = vrot.slane %v2841_v32, 5  ;;  %v2013_v60 = vshrl.u32 %v1754_v28, 16  ;;  %v2016_v45 = vshll.u32 %v1754_v28, 16 }
 0x1a2   : > { %v2250_v38 = vld [vmem:[#allocation2 + $0x84] sm:$0xe]  ;;  %v2828_v48 = vor.u32 %v2827_v18, %v2824_v0  ;;  %v2022_v24 = vshll.u32 %v1755_v30, 16  ;;  %v2026_v51 = vshrl.u32 %v1755_v30, 16  ;;  %v2251_v52 = vld [vmem:[#allocation2 + $0x88] sm:$0xf]  ;;  %v12074_v31 = vpop.f32.mrf.mxu1  ;;  %v14184_v0 = vadd.f32 %v12069_v6, %v11957_v50  ;;  %v11962_v18 = vpop.f32.mrf.mxu0 }
 0x1a3   : > { %v2838_v9 = vor.u32 %v2837_v35, %v2833_v34  ;;  %v2015_v39 = vrot.slane %v2013_v60, 4  ;;  %v2032_v54 = vshll.u32 %v1756_v19, 16  ;;  %v2252_v59 = vld [vmem:[#allocation2 + $0x8c] sm:$0x1]  ;;  %v11323_v55 = vrot.slane %v2250_v38, 9 }
 0x1a4   : > { %v13158_v1 = vld [vmem:[#allocation3 + $0x25c] ss:$36 sps:$4 sm:$0xff]   ;;  %v2829_v2 = vrot.slane %v2828_v48, 4  ;;  %v2018_v4 = vrot.slane %v2016_v45, 5  ;;  %v2024_v12 = vrot.slane %v2022_v24, 5  ;;  %v2028_v17 = vrot.slane %v2026_v51, 4 }
 0x1a5   : > { %v13160_v8 = vld [vmem:[#allocation3 + $0x258] ss:$36 sps:$4 sm:$0xff]   ;;  %v2839_v5 = vrot.slane %v2838_v9, 4  ;;  %5376 = vmatprep.mubr.bf16.mxu1 %v13158_v1  ;;  %v2034_v32 = vrot.slane %v2032_v54, 5  ;;  %v2388_v28 = vrot.slane %v2251_v52, 5  ;;  %v2391_v47 = vrot.slane %v2252_v59, 5  ;;  %v14189_v9 = vpop.f32.mrf.mxu0 }
 0x1a6   : > { %v2834_v56 = vsel %vm13658_vm8, %v2829_v2, %v2833_v34  ;;  %v2019_v25 = vor.u32 %v2018_v4, %v2015_v39  ;;  %5377 = vmatmul.mubr.bf16.gmra.mxu1 %v13160_v8  ;;  %v2029_v61 = vor.u32 %v2028_v17, %v2024_v12  ;;  %v2513_v58 = vld [vmem:[#allocation2 + $0x90] sm:$0xf]  ;;  %v2514_v20 = vld [vmem:[#allocation2 + $0x94] sm:$0xf]  ;;  %v11960_v60 = vadd.f32 %v11959_v53, %v11958_v7  ;;  %v2589_v54 = vld [vmem:[#allocation2 + $0x98] sm:$0x1] }
 0x1a7   : > { %v2844_v29 = vsel %vm13658_vm8, %v2839_v5, %v2843_v36  ;;  %3039 = vst [vmem:[#allocation3 + $0x2a4] sm:$0xf] %v2834_v56  ;;  %v13163_v19 = vld [vmem:[#allocation3 + $0x298] ss:$36 sps:$4 sm:$0xff]   ;;  %v2389_v35 = vsel %vm13679_vm11, %v11323_v55, %v2388_v28  ;;  %2545 = vst [vmem:[#allocation3 + $0x2e8] sm:$0xf] %v2513_v58  ;;  %v11963_v38 = vadd.f32 %v11962_v18, %v11961_v23  ;;  %v11965_v4 = vpop.f32.mrf.mxu0 }
 0x1a8   : > { %v13161_v30 = vld [vmem:[#allocation3 + $0x29c] ss:$36 sps:$4 sm:$0xff]   ;;  %3040 = vst [vmem:[#allocation3 + $0x2c8] sm:$0xf] %v2844_v29  ;;  %v2020_v34 = vrot.slane %v2019_v25, 4  ;;  %v2030_v36 = vrot.slane %v2029_v61, 4  ;;  %v12072_v51 = vadd.f32 %v12071_v40, %v14173_v42  ;;  %v12075_v52 = vadd.f32 %v12074_v31, %v12073_v15 }
 0x1a9   : > { %2546 = vst [vmem:[#allocation3 + $0x30c] sm:$0xf] %v2514_v20  ;;  %v2390_v48 = vrot.slane %v2388_v28, 4  ;;  %2480 = vst [vmem:[#allocation3 + $0x2e4] sm:$0xf] %v2389_v35  ;;  %5223 = vmatprep.mubr.bf16.mxu0 %v13161_v30  ;;  %v2865_v40 = vshll.u32 %v2589_v54, 16  ;;  %v12076_v28 = vpop.f32.mrf.mxu1  ;;  %v11967_v31 = vpop.f32.mrf.mxu0 }
 0x1aa   : > { %v2587_v45 = vld [vmem:[#allocation2 + $0x90] sm:$0xf]  ;;  %v2588_v24 = vld [vmem:[#allocation2 + $0x94] sm:$0xf]  ;;  %v2025_v39 = vsel %vm13658_vm8, %v2020_v34, %v2024_v12  ;;  %5224 = vmatmul.mubr.bf16.gmra.mxu0 %v13163_v19  ;;  %v2035_v7 = vsel %vm13658_vm8, %v2030_v36, %v2034_v32  ;;  %v1759_v5 = vld [vmem:[#allocation2 + $0x98] sm:$0x1]  ;;  %v14197_v35 = vadd.f32 %v12072_v51, %v11960_v60  ;;  %v14199_v36 = vadd.f32 %v12075_v52, %v11963_v38 }
 0x1ab   : > { %v2846_v59 = vshrl.u32 %v2587_v45, 16  ;;  %v2849_v55 = vshll.u32 %v2587_v45, 16  ;;  %v2855_v1 = vshll.u32 %v2588_v24, 16  ;;  %2208 = vst [vmem:[#allocation3 + $0x2e0] sm:$0xf] %v2025_v39  ;;  %v2392_v53 = vsel %vm13679_vm11, %v2390_v48, %v2391_v47 }
 0x1ac   : > { %v2859_v42 = vshrl.u32 %v2588_v24, 16  ;;  %v1757_v15 = vld [vmem:[#allocation2 + $0x90] sm:$0xf]  ;;  %v1758_v2 = vld [vmem:[#allocation2 + $0x94] sm:$0xf]  ;;  %v2867_v23 = vrot.slane %v2865_v40, 5  ;;  %v12077_v40 = vpop.f32.mrf.mxu1 }
 0x1ad   : > { %2209 = vst [vmem:[#allocation3 + $0x304] sm:$0xf] %v2035_v7  ;;  %2481 = vst [vmem:[#allocation3 + $0x308] sm:$0xf] %v2392_v53  ;;  %v2848_v50 = vrot.slane %v2846_v59, 4  ;;  %v2851_v6 = vrot.slane %v2849_v55, 5  ;;  %v11968_v59 = vpop.f32.mrf.mxu0 }
 0x1ae   : > { %v2857_v8 = vrot.slane %v2855_v1, 5  ;;  %v2037_v12 = vshrl.u32 %v1757_v15, 16  ;;  %v2861_v17 = vrot.slane %v2859_v42, 4  ;;  %v2040_v56 = vshll.u32 %v1757_v15, 16  ;;  %v2253_v32 = vld [vmem:[#allocation2 + $0x90] sm:$0xe] }
 0x1af   : > { %v2046_v25 = vshll.u32 %v1758_v2, 16  ;;  %v2852_v29 = vor.u32 %v2851_v6, %v2848_v50  ;;  %v2050_v47 = vshrl.u32 %v1758_v2, 16  ;;  %v2056_v58 = vshll.u32 %v1759_v5, 16  ;;  %v2254_v20 = vld [vmem:[#allocation2 + $0x94] sm:$0xf] }
 0x1b0   : > { %v2039_v61 = vrot.slane %v2037_v12, 4  ;;  %v13164_v18 = vld [vmem:[#allocation3 + $0x2a4] ss:$36 sps:$4 sm:$0xff]   ;;  %v2862_v19 = vor.u32 %v2861_v17, %v2857_v8  ;;  %v2042_v34 = vrot.slane %v2040_v56, 5  ;;  %v2255_v54 = vld [vmem:[#allocation2 + $0x98] sm:$0x1]  ;;  %v11966_v17 = vadd.f32 %v11965_v4, %v14189_v9 }
 0x1b1   : > { %v13166_v30 = vld [vmem:[#allocation3 + $0x2a0] ss:$36 sps:$4 sm:$0xff]   ;;  %v2853_v48 = vrot.slane %v2852_v29, 4  ;;  %v2048_v45 = vrot.slane %v2046_v25, 5  ;;  %v2052_v24 = vrot.slane %v2050_v47, 4  ;;  %v2058_v39 = vrot.slane %v2056_v58, 5  ;;  %5384 = vmatprep.mubr.bf16.mxu1 %v13164_v18  ;;  %v11970_v47 = vpop.f32.mrf.mxu0 }
 0x1b2   : > { %v2863_v55 = vrot.slane %v2862_v19, 4  ;;  %v2043_v1 = vor.u32 %v2042_v34, %v2039_v61  ;;  %v11324_v7 = vrot.slane %v2253_v32, 9  ;;  %v2395_v53 = vrot.slane %v2254_v20, 5  ;;  %v2515_v42 = vld [vmem:[#allocation2 + $0x9c] sm:$0xf]  ;;  %5385 = vmatmul.mubr.bf16.gmra.mxu1 %v13166_v30  ;;  %v12079_v19 = vpop.f32.mrf.mxu1 }
 0x1b3   : > { %v2858_v60 = vsel %vm13658_vm8, %v2853_v48, %v2857_v8  ;;  %v2053_v51 = vor.u32 %v2052_v24, %v2048_v45  ;;  %v2398_v38 = vrot.slane %v2255_v54, 5  ;;  %v2516_v52 = vld [vmem:[#allocation2 + $0xa0] sm:$0xf]  ;;  %2547 = vst [vmem:[#allocation3 + $0x330] sm:$0xf] %v2515_v42  ;;  %v12078_v29 = vadd.f32 %v12077_v40, %v12076_v28 }
 0x1b4   : > { %v2590_v15 = vld [vmem:[#allocation2 + $0x9c] sm:$0xf]  ;;  %v2868_v6 = vsel %vm13658_vm8, %v2863_v55, %v2867_v23  ;;  %3041 = vst [vmem:[#allocation3 + $0x2ec] sm:$0xf] %v2858_v60  ;;  %v2044_v5 = vrot.slane %v2043_v1, 4  ;;  %v2396_v12 = vsel %vm13679_vm11, %v11324_v7, %v2395_v53  ;;  %v2397_v56 = vrot.slane %v2395_v53, 4  ;;  %v12080_v1 = vpop.f32.mrf.mxu1  ;;  %v11971_v60 = vpop.f32.mrf.mxu0 }
 0x1b5   : > { %v13167_v2 = vld [vmem:[#allocation3 + $0x2e4] ss:$36 sps:$4 sm:$0xff]   ;;  %2548 = vst [vmem:[#allocation3 + $0x354] sm:$0xf] %v2516_v52  ;;  %3042 = vst [vmem:[#allocation3 + $0x310] sm:$0xf] %v2868_v6  ;;  %v11969_v61 = vadd.f32 %v11968_v59, %v11967_v31 }
 0x1b6   : > { %v13169_v50 = vld [vmem:[#allocation3 + $0x2e0] ss:$36 sps:$4 sm:$0xff]   ;;  %v2054_v8 = vrot.slane %v2053_v51, 4  ;;  %2482 = vst [vmem:[#allocation3 + $0x32c] sm:$0xf] %v2396_v12  ;;  %5231 = vmatprep.mubr.bf16.mxu0 %v13167_v2  ;;  %v2049_v23 = vsel %vm13658_vm8, %v2044_v5, %v2048_v45  ;;  %v2870_v58 = vshrl.u32 %v2590_v15, 16  ;;  %v2399_v4 = vsel %vm13679_vm11, %v2397_v56, %v2398_v38 }
 0x1b7   : > { %v2591_v25 = vld [vmem:[#allocation2 + $0xa0] sm:$0xf]  ;;  %v2592_v32 = vld [vmem:[#allocation2 + $0xa4] sm:$0x1]  ;;  %v2873_v20 = vshll.u32 %v2590_v15, 16  ;;  %5232 = vmatmul.mubr.bf16.gmra.mxu0 %v13169_v50  ;;  %v12082_v50 = vpop.f32.mrf.mxu1 }
 0x1b8   : > { %v2879_v18 = vshll.u32 %v2591_v25, 16  ;;  %v1760_v30 = vld [vmem:[#allocation2 + $0x9c] sm:$0xf]  ;;  %v2059_v9 = vsel %vm13658_vm8, %v2054_v8, %v2058_v39  ;;  %2210 = vst [vmem:[#allocation3 + $0x328] sm:$0xf] %v2049_v23  ;;  %v2883_v28 = vshrl.u32 %v2591_v25, 16  ;;  %v14214_v23 = vadd.f32 %v12078_v29, %v11966_v17 }
 0x1b9   : > { %v2889_v31 = vshll.u32 %v2592_v32, 16  ;;  %v1761_v34 = vld [vmem:[#allocation2 + $0xa0] sm:$0xf]  ;;  %v1762_v48 = vld [vmem:[#allocation2 + $0xa4] sm:$0x1]  ;;  %v2872_v45 = vrot.slane %v2870_v58, 4  ;;  %v12081_v58 = vadd.f32 %v12080_v1, %v12079_v19 }
 0x1ba   : > { %2211 = vst [vmem:[#allocation3 + $0x34c] sm:$0xf] %v2059_v9  ;;  %2483 = vst [vmem:[#allocation3 + $0x350] sm:$0xf] %v2399_v4  ;;  %v2875_v24 = vrot.slane %v2873_v20, 5  ;;  %v2881_v54 = vrot.slane %v2879_v18, 5  ;;  %v11972_v20 = vadd.f32 %v11971_v60, %v11970_v47  ;;  %v12083_v18 = vpop.f32.mrf.mxu1 }
 0x1bb   : > { %v2061_v59 = vshrl.u32 %v1760_v30, 16  ;;  %v2256_v55 = vld [vmem:[#allocation2 + $0x9c] sm:$0xe]  ;;  %v2885_v7 = vrot.slane %v2883_v28, 4  ;;  %v2891_v53 = vrot.slane %v2889_v31, 5  ;;  %v2064_v42 = vshll.u32 %v1760_v30, 16 }
 0x1bc   : > { %v2070_v39 = vshll.u32 %v1761_v34, 16  ;;  %v2257_v40 = vld [vmem:[#allocation2 + $0xa0] sm:$0xf]  ;;  %v2876_v51 = vor.u32 %v2875_v24, %v2872_v45  ;;  %v2074_v52 = vshrl.u32 %v1761_v34, 16  ;;  %v2080_v15 = vshll.u32 %v1762_v48, 16 }
 0x1bd   : > { %v2063_v38 = vrot.slane %v2061_v59, 4  ;;  %v2258_v2 = vld [vmem:[#allocation2 + $0xa4] sm:$0x1]  ;;  %v2886_v6 = vor.u32 %v2885_v7, %v2881_v54  ;;  %v2066_v5 = vrot.slane %v2064_v42, 5  ;;  %v11325_v8 = vrot.slane %v2256_v55, 9  ;;  %v14220_v59 = vpop.f32.mrf.mxu1 }
 0x1be   : > { %v2072_v12 = vrot.slane %v2070_v39, 5  ;;  %v13171_v56 = vld [vmem:[#allocation3 + $0x2ec] ss:$36 sps:$4 sm:$0xff]   ;;  %v2877_v32 = vrot.slane %v2876_v51, 4  ;;  %v2076_v4 = vrot.slane %v2074_v52, 4  ;;  %v2082_v28 = vrot.slane %v2080_v15, 5 }
 0x1bf   : > { %v13173_v25 = vld [vmem:[#allocation3 + $0x2e8] ss:$36 sps:$4 sm:$0xff]   ;;  %v2887_v30 = vrot.slane %v2886_v6, 4  ;;  %v2067_v9 = vor.u32 %v2066_v5, %v2063_v38  ;;  %5392 = vmatprep.mubr.bf16.mxu1 %v13171_v56  ;;  %v2402_v34 = vrot.slane %v2257_v40, 5  ;;  %v2405_v48 = vrot.slane %v2258_v2, 5  ;;  %v11973_v40 = vpop.f32.mrf.mxu0  ;;  %v12086_v60 = vpop.f32.mrf.mxu1 }
 0x1c0   : > { %v2882_v31 = vsel %vm13658_vm8, %v2877_v32, %v2881_v54  ;;  %v2517_v45 = vld [vmem:[#allocation2 + $0xa8] sm:$0xf]  ;;  %v14218_v24 = vadd.f32 %v12081_v58, %v11969_v61  ;;  %5393 = vmatmul.mubr.bf16.gmra.mxu1 %v13173_v25  ;;  %v2077_v55 = vor.u32 %v2076_v4, %v2072_v12  ;;  %v12084_v1 = vadd.f32 %v12083_v18, %v12082_v50  ;;  %v2518_v42 = vld [vmem:[#allocation2 + $0xac] sm:$0xf]  ;;  %v2595_v52 = vld [vmem:[#allocation2 + $0xb0] sm:$0x1] }
 0x1c1   : > { %v13174_v17 = vld [vmem:[#allocation3 + $0x32c] ss:$36 sps:$4 sm:$0xff]   ;;  %v2892_v47 = vsel %vm13658_vm8, %v2887_v30, %v2891_v53  ;;  %3043 = vst [vmem:[#allocation3 + $0x334] sm:$0xf] %v2882_v31  ;;  %v2068_v19 = vrot.slane %v2067_v9, 4  ;;  %v2403_v61 = vsel %vm13679_vm11, %v11325_v8, %v2402_v34  ;;  %v2404_v7 = vrot.slane %v2402_v34, 4  ;;  %v11974_v25 = vpop.f32.mrf.mxu0  ;;  %v12088_v32 = vpop.f32.mrf.mxu1 }
 0x1c2   : > { %v13176_v29 = vld [vmem:[#allocation3 + $0x328] ss:$36 sps:$4 sm:$0xff]   ;;  %2549 = vst [vmem:[#allocation3 + $0x378] sm:$0xf] %v2517_v45  ;;  %3044 = vst [vmem:[#allocation3 + $0x358] sm:$0xf] %v2892_v47  ;;  %5239 = vmatprep.mubr.bf16.mxu0 %v13174_v17  ;;  %v14229_v2 = vadd.f32 %v12084_v1, %v11972_v20  ;;  %v11975_v9 = vadd.f32 %v11974_v25, %v11973_v40 }
 0x1c3   : > { %v2593_v39 = vld [vmem:[#allocation2 + $0xa8] sm:$0xf]  ;;  %v2073_v53 = vsel %vm13658_vm8, %v2068_v19, %v2072_v12  ;;  %v2078_v51 = vrot.slane %v2077_v55, 4  ;;  %2484 = vst [vmem:[#allocation3 + $0x374] sm:$0xf] %v2403_v61  ;;  %5240 = vmatmul.mubr.bf16.gmra.mxu0 %v13176_v29  ;;  %v2406_v50 = vsel %vm13679_vm11, %v2404_v7, %v2405_v48  ;;  %v2913_v18 = vshll.u32 %v2595_v52, 16  ;;  %v11976_v17 = vpop.f32.mrf.mxu0  ;;  %v12089_v29 = vpop.f32.mrf.mxu1 }
 0x1c4   : > { %2550 = vst [vmem:[#allocation3 + $0x39c] sm:$0xf] %v2518_v42  ;;  %v2594_v38 = vld [vmem:[#allocation2 + $0xac] sm:$0xf]  ;;  %v2894_v15 = vshrl.u32 %v2593_v39, 16  ;;  %v2897_v6 = vshll.u32 %v2593_v39, 16 }
 0x1c5   : > { %2212 = vst [vmem:[#allocation3 + $0x370] sm:$0xf] %v2073_v53  ;;  %v2903_v5 = vshll.u32 %v2594_v38, 16  ;;  %v2907_v8 = vshrl.u32 %v2594_v38, 16  ;;  %v1763_v56 = vld [vmem:[#allocation2 + $0xa8] sm:$0xf]  ;;  %v2083_v12 = vsel %vm13658_vm8, %v2078_v51, %v2082_v28  ;;  %v11977_v51 = vpop.f32.mrf.mxu0 }
 0x1c6   : > { %2485 = vst [vmem:[#allocation3 + $0x398] sm:$0xf] %v2406_v50  ;;  %v2896_v58 = vrot.slane %v2894_v15, 4  ;;  %v1764_v30 = vld [vmem:[#allocation2 + $0xac] sm:$0xf]  ;;  %v2899_v4 = vrot.slane %v2897_v6, 5  ;;  %v12087_v15 = vadd.f32 %v12086_v60, %v14220_v59  ;;  %v11978_v50 = vadd.f32 %v11977_v51, %v11976_v17 }
 0x1c7   : > { %v1765_v20 = vld [vmem:[#allocation2 + $0xb0] sm:$0x1]  ;;  %2213 = vst [vmem:[#allocation3 + $0x394] sm:$0xf] %v2083_v12  ;;  %v2905_v31 = vrot.slane %v2903_v5, 5  ;;  %v2909_v34 = vrot.slane %v2907_v8, 4  ;;  %v12090_v6 = vadd.f32 %v12089_v29, %v12088_v32  ;;  %v14236_v5 = vpop.f32.mrf.mxu1 }
 0x1c8   : > { %v2085_v48 = vshrl.u32 %v1763_v56, 16  ;;  %v2259_v45 = vld [vmem:[#allocation2 + $0xa8] sm:$0xe]  ;;  %v2915_v47 = vrot.slane %v2913_v18, 5  ;;  %v2088_v19 = vshll.u32 %v1763_v56, 16  ;;  %v2094_v55 = vshll.u32 %v1764_v30, 16 }
 0x1c9   : > { %v2098_v1 = vshrl.u32 %v1764_v30, 16  ;;  %v2260_v61 = vld [vmem:[#allocation2 + $0xac] sm:$0xf]  ;;  %v2900_v28 = vor.u32 %v2899_v4, %v2896_v58  ;;  %v2910_v7 = vor.u32 %v2909_v34, %v2905_v31  ;;  %v2104_v39 = vshll.u32 %v1765_v20, 16  ;;  %v2261_v53 = vld [vmem:[#allocation2 + $0xb0] sm:$0x1]  ;;  %v14238_v58 = vpop.f32.mrf.mxu0 }
 0x1ca   : > { %v2087_v42 = vrot.slane %v2085_v48, 4  ;;  %v13177_v40 = vld [vmem:[#allocation3 + $0x334] ss:$36 sps:$4 sm:$0xff]   ;;  %v2090_v52 = vrot.slane %v2088_v19, 5  ;;  %v2096_v25 = vrot.slane %v2094_v55, 5  ;;  %v11326_v4 = vrot.slane %v2259_v45, 9 }
 0x1cb   : > { %v13179_v38 = vld [vmem:[#allocation3 + $0x330] ss:$36 sps:$4 sm:$0xff]   ;;  %v2901_v8 = vrot.slane %v2900_v28, 4  ;;  %v2911_v56 = vrot.slane %v2910_v7, 4  ;;  %v2100_v12 = vrot.slane %v2098_v1, 4  ;;  %5400 = vmatprep.mubr.bf16.mxu1 %v13177_v40  ;;  %v2106_v20 = vrot.slane %v2104_v39, 5  ;;  %v11980_v55 = vpop.f32.mrf.mxu0 }
 0x1cc   : > { %v2519_v18 = vld [vmem:[#allocation2 + $0xb4] sm:$0xf]  ;;  %v2091_v30 = vor.u32 %v2090_v52, %v2087_v42  ;;  %v2409_v34 = vrot.slane %v2260_v61, 5  ;;  %v2520_v48 = vld [vmem:[#allocation2 + $0xb8] sm:$0xf]  ;;  %5401 = vmatmul.mubr.bf16.gmra.mxu1 %v13179_v38  ;;  %v2412_v17 = vrot.slane %v2261_v53, 5  ;;  %v14249_v7 = vadd.f32 %v12087_v15, %v11975_v9  ;;  %v12092_v42 = vpop.f32.mrf.mxu1 }
 0x1cd   : > { %2551 = vst [vmem:[#allocation3 + $0x3c0] sm:$0xf] %v2519_v18  ;;  %v2906_v59 = vsel %vm13658_vm8, %v2901_v8, %v2905_v31  ;;  %v2916_v60 = vsel %vm13658_vm8, %v2911_v56, %v2915_v47  ;;  %v2101_v32 = vor.u32 %v2100_v12, %v2096_v25  ;;  %2552 = vst [vmem:[#allocation3 + $0x3e4] sm:$0xf] %v2520_v48  ;;  %v2596_v29 = vld [vmem:[#allocation2 + $0xb4] sm:$0xf]  ;;  %v11982_v52 = vpop.f32.mrf.mxu0 }
 0x1ce   : > { %v2597_v19 = vld [vmem:[#allocation2 + $0xb8] sm:$0xf]  ;;  %v13180_v1 = vld [vmem:[#allocation3 + $0x374] ss:$36 sps:$4 sm:$0xff]   ;;  %3045 = vst [vmem:[#allocation3 + $0x37c] sm:$0xf] %v2906_v59  ;;  %v2410_v31 = vsel %vm13679_vm11, %v11326_v4, %v2409_v34  ;;  %v14251_v47 = vadd.f32 %v12090_v6, %v11978_v50 }
 0x1cf   : > { %v13221_v45 = vld [vmem:[%s16330_s4 + $0x78] sm:$0xff]   ;;  %v13182_v61 = vld [vmem:[#allocation3 + $0x370] ss:$36 sps:$4 sm:$0xff]   ;;  %3046 = vst [vmem:[#allocation3 + $0x3a0] sm:$0xf] %v2916_v60  ;;  %v2092_v28 = vrot.slane %v2091_v30, 4  ;;  %5247 = vmatprep.mubr.bf16.mxu0 %v13180_v1  ;;  %v11983_v48 = vpop.f32.mrf.mxu0 }
 0x1d0   : > { %v2102_v39 = vrot.slane %v2101_v32, 4  ;;  %v2411_v53 = vrot.slane %v2409_v34, 4  ;;  %2486 = vst [vmem:[#allocation3 + $0x3bc] sm:$0xf] %v2410_v31  ;;  %v2598_v51 = vld [vmem:[#allocation2 + $0xbc] sm:$0x1]  ;;  %12369 = vmatprep.subr.bf16.mxu1 %v13221_v45  ;;  %5248 = vmatmul.mubr.bf16.gmra.mxu0 %v13182_v61  ;;  %v12094_v45 = vpop.f32.mrf.mxu1 }
 0x1d1   : > { %v2918_v40 = vshrl.u32 %v2596_v29, 16  ;;  %v2921_v38 = vshll.u32 %v2596_v29, 16  ;;  %v2097_v8 = vsel %vm13658_vm8, %v2092_v28, %v2096_v25  ;;  %v2927_v56 = vshll.u32 %v2597_v19, 16  ;;  %v1766_v9 = vld [vmem:[#allocation2 + $0xb4] sm:$0xf]  ;;  %v13222_v15 = vld [vmem:[%s16330_s4 + $0x38] sm:$0xff]  }
 0x1d2   : > { %v2931_v12 = vshrl.u32 %v2597_v19, 16  ;;  %v2937_v18 = vshll.u32 %v2598_v51, 16  ;;  %v2107_v50 = vsel %vm13658_vm8, %v2102_v39, %v2106_v20  ;;  %2214 = vst [vmem:[#allocation3 + $0x3b8] sm:$0xf] %v2097_v8  ;;  %v2413_v6 = vsel %vm13679_vm11, %v2411_v53, %v2412_v17  ;;  %v1767_v34 = vld [vmem:[#allocation2 + $0xb8] sm:$0xf]  ;;  %12370 = vmatpush3.bf16.msra.mxu1 %v13222_v15  ;;  %v11985_v17 = vpop.f32.mrf.mxu0 }
 0x1d3   : > { %v2920_v30 = vrot.slane %v2918_v40, 4  ;;  %v2923_v4 = vrot.slane %v2921_v38, 5  ;;  %v1768_v25 = vld [vmem:[#allocation2 + $0xbc] sm:$0x1]  ;;  %2215 = vst [vmem:[#allocation3 + $0x3dc] sm:$0xf] %v2107_v50 }
 0x1d4   : > { %2487 = vst [vmem:[#allocation3 + $0x3e0] sm:$0xf] %v2413_v6  ;;  %v2929_v59 = vrot.slane %v2927_v56, 5  ;;  %v2933_v60 = vrot.slane %v2931_v12, 4  ;;  %v2939_v32 = vrot.slane %v2937_v18, 5  ;;  %v2109_v29 = vshrl.u32 %v1766_v9, 16  ;;  %v11986_v54 = vpop.f32.mrf.mxu0 }
 0x1d5   : > { %v2262_v19 = vld [vmem:[#allocation2 + $0xb4] sm:$0xe]  ;;  %v2924_v1 = vor.u32 %v2923_v4, %v2920_v30  ;;  %v2112_v20 = vshll.u32 %v1766_v9, 16  ;;  %v2118_v61 = vshll.u32 %v1767_v34, 16  ;;  %v2122_v28 = vshrl.u32 %v1767_v34, 16  ;;  %v12095_v34 = vpop.f32.mrf.mxu1 }
 0x1d6   : > { %v2263_v31 = vld [vmem:[#allocation2 + $0xb8] sm:$0xf]  ;;  %v2934_v39 = vor.u32 %v2933_v60, %v2929_v59  ;;  %v2111_v53 = vrot.slane %v2109_v29, 4  ;;  %v2128_v51 = vshll.u32 %v1768_v25, 16  ;;  %v2264_v40 = vld [vmem:[#allocation2 + $0xbc] sm:$0x1]  ;;  %v11981_v12 = vadd.f32 %v11980_v55, %v14238_v58 }
 0x1d7   : > { %v11327_v38 = vrot.slane %v2262_v19, 9  ;;  %v13184_v8 = vld [vmem:[#allocation3 + $0x37c] ss:$36 sps:$4 sm:$0xff]   ;;  %v2925_v50 = vrot.slane %v2924_v1, 4  ;;  %v2114_v56 = vrot.slane %v2112_v20, 5  ;;  %v12093_v18 = vadd.f32 %v12092_v42, %v14236_v5 }
 0x1d8   : > { %v13186_v6 = vld [vmem:[#allocation3 + $0x378] ss:$36 sps:$4 sm:$0xff]   ;;  %v2935_v15 = vrot.slane %v2934_v39, 4  ;;  %v2120_v30 = vrot.slane %v2118_v61, 5  ;;  %v2124_v9 = vrot.slane %v2122_v28, 4  ;;  %v2130_v4 = vrot.slane %v2128_v51, 5  ;;  %5408 = vmatprep.mubr.bf16.mxu1 %v13184_v8 }
 0x1d9   : > { %v2930_v25 = vsel %vm13658_vm8, %v2925_v50, %v2929_v59  ;;  %v2115_v60 = vor.u32 %v2114_v56, %v2111_v53  ;;  %v2416_v29 = vrot.slane %v2263_v31, 5  ;;  %v2419_v19 = vrot.slane %v2264_v40, 5  ;;  %5409 = vmatmul.mubr.bf16.gmra.mxu1 %v13186_v6  ;;  %v819_v55 = vld [vmem:[#allocation2 + $0xc8] sm:$0x1]  ;;  %v2521_v42 = vld [vmem:[#allocation2 + $0xc0] sm:$0xf]  ;;  %v11988_v50 = vpop.f32.mrf.mxu0 }
 0x1da   : > { %v2940_v58 = vsel %vm13658_vm8, %v2935_v15, %v2939_v32  ;;  %3047 = vst [vmem:[#allocation3 + $0x3c4] sm:$0xf] %v2930_v25  ;;  %v2125_v5 = vor.u32 %v2124_v9, %v2120_v30  ;;  %v14268_v1 = vadd.f32 %v12093_v18, %v11981_v12  ;;  %v11984_v20 = vadd.f32 %v11983_v48, %v11982_v52  ;;  %v13189_v28 = vld [vmem:[#allocation3 + $0x3b8] ss:$36 sps:$4 sm:$0xff]   ;;  %v2522_v8 = vld [vmem:[#allocation2 + $0xc4] sm:$0xf] }
 0x1db   : > { %v13187_v61 = vld [vmem:[#allocation3 + $0x3bc] ss:$36 sps:$4 sm:$0xff]   ;;  %3048 = vst [vmem:[#allocation3 + $0x3e8] sm:$0xf] %v2940_v58  ;;  %v2116_v39 = vrot.slane %v2115_v60, 4  ;;  %v2417_v59 = vsel %vm13679_vm11, %v11327_v38, %v2416_v29  ;;  %v16360_v31 = vrot.slane %v13990_v3, 4  ;;  %v12096_v32 = vadd.f32 %v12095_v34, %v12094_v45  ;;  %v12097_v45 = vpop.f32.mrf.mxu1 }
 0x1dc   : > { %2553 = vst [vmem:[#allocation3 + $0x408] sm:$0xf] %v2521_v42  ;;  %v2126_v51 = vrot.slane %v2125_v5, 4  ;;  %v2418_v40 = vrot.slane %v2416_v29, 4  ;;  %2488 = vst [vmem:[#allocation3 + $0x404] sm:$0xf] %v2417_v59  ;;  %v14276_v48 = vadd.f32 %v11986_v54, %v11985_v17  ;;  %5255 = vmatprep.mubr.bf16.mxu0 %v13187_v61 }
 0x1dd   : > { %v820_v53 = vsel %vm13695_vm13, %v16360_v31, %v819_v55  ;;  %v2599_v52 = vld [vmem:[#allocation2 + $0xc0] sm:$0xf]  ;;  %v2121_v38 = vsel %vm13658_vm8, %v2116_v39, %v2120_v30  ;;  %2554 = vst [vmem:[#allocation3 + $0x42c] sm:$0xf] %v2522_v8  ;;  %v2600_v3 = vld [vmem:[#allocation2 + $0xc4] sm:$0xf]  ;;  %v14280_v6 = vadd.f32 %v12096_v32, %v11984_v20  ;;  %5256 = vmatmul.mubr.bf16.gmra.mxu0 %v13189_v28  ;;  %v12098_v55 = vpop.f32.mrf.mxu1  ;;  %v11989_v39 = vpop.f32.mrf.mxu0 }
 0x1de   : > { %821 = vst [vmem:[#allocation2 + $0xc8] sm:$0x1] %v820_v53  ;;  %v2942_v56 = vshrl.u32 %v2599_v52, 16  ;;  %v2945_v12 = vshll.u32 %v2599_v52, 16  ;;  %v1769_v18 = vld [vmem:[#allocation2 + $0xc0] sm:$0xf]  ;;  %v2131_v15 = vsel %vm13658_vm8, %v2126_v51, %v2130_v4  ;;  %v2420_v54 = vsel %vm13679_vm11, %v2418_v40, %v2419_v19 }
 0x1df   : > { %2216 = vst [vmem:[#allocation3 + $0x400] sm:$0xf] %v2121_v38  ;;  %v2951_v17 = vshll.u32 %v2600_v3, 16  ;;  %v2955_v9 = vshrl.u32 %v2600_v3, 16  ;;  %v1770_v34 = vld [vmem:[#allocation2 + $0xc4] sm:$0xf]  ;;  %v12100_v51 = vpop.f32.mrf.mxu1  ;;  %v12099_v3 = vadd.f32 %v12098_v55, %v12097_v45 }
 0x1e0   : > { %v2265_v30 = vld [vmem:[#allocation2 + $0xc0] sm:$0xe]  ;;  %2217 = vst [vmem:[#allocation3 + $0x424] sm:$0xf] %v2131_v15  ;;  %2489 = vst [vmem:[#allocation3 + $0x428] sm:$0xf] %v2420_v54 }
 0x1e1   : > { %v2944_v25 = vrot.slane %v2942_v56, 4  ;;  %v2947_v60 = vrot.slane %v2945_v12, 5  ;;  %v2133_v29 = vshrl.u32 %v1769_v18, 16  ;;  %v2136_v58 = vshll.u32 %v1769_v18, 16  ;;  %v2266_v5 = vld [vmem:[#allocation2 + $0xc4] sm:$0xf] }
 0x1e2   : > { %v2953_v42 = vrot.slane %v2951_v17, 5  ;;  %v2957_v20 = vrot.slane %v2955_v9, 4  ;;  %v2142_v61 = vshll.u32 %v1770_v34, 16  ;;  %v2146_v4 = vshrl.u32 %v1770_v34, 16  ;;  %v2523_v28 = vld [vmem:[#allocation2 + $0xcc] sm:$0xf]  ;;  %v12101_v9 = vpop.f32.mrf.mxu1 }
 0x1e3   : > { %v2948_v59 = vor.u32 %v2947_v60, %v2944_v25  ;;  %v2135_v19 = vrot.slane %v2133_v29, 4  ;;  %v2138_v31 = vrot.slane %v2136_v58, 5  ;;  %v11328_v53 = vrot.slane %v2265_v30, 9  ;;  %v2524_v32 = vld [vmem:[#allocation2 + $0xd0] sm:$0xf] }
 0x1e4   : > { %2555 = vst [vmem:[#allocation3 + $0x450] sm:$0xf] %v2523_v28  ;;  %v13190_v40 = vld [vmem:[#allocation3 + $0x3c4] ss:$36 sps:$4 sm:$0xff]   ;;  %v2958_v52 = vor.u32 %v2957_v20, %v2953_v42  ;;  %v2144_v38 = vrot.slane %v2142_v61, 5  ;;  %v2148_v54 = vrot.slane %v2146_v4, 4  ;;  %v11990_v17 = vadd.f32 %v11989_v39, %v11988_v50 }
 0x1e5   : > { %v13192_v8 = vld [vmem:[#allocation3 + $0x3c0] ss:$36 sps:$4 sm:$0xff]   ;;  %2556 = vst [vmem:[#allocation3 + $0x474] sm:$0xf] %v2524_v32  ;;  %v2601_v56 = vld [vmem:[#allocation2 + $0xc8] sm:$0x1]  ;;  %v2139_v15 = vor.u32 %v2138_v31, %v2135_v19  ;;  %5416 = vmatprep.mubr.bf16.mxu1 %v13190_v40  ;;  %v12102_v19 = vadd.f32 %v12101_v9, %v12100_v51 }
 0x1e6   : > { %v2949_v12 = vrot.slane %v2948_v59, 4  ;;  %v1771_v18 = vld [vmem:[#allocation2 + $0xc8] sm:$0x1]  ;;  %v2959_v34 = vrot.slane %v2958_v52, 4  ;;  %v2961_v25 = vshll.u32 %v2601_v56, 16  ;;  %v2423_v29 = vrot.slane %v2266_v5, 5  ;;  %5417 = vmatmul.mubr.bf16.gmra.mxu1 %v13192_v8 }
 0x1e7   : > { %v2152_v30 = vshll.u32 %v1771_v18, 16  ;;  %v2267_v60 = vld [vmem:[#allocation2 + $0xc8] sm:$0x1]  ;;  %v2140_v20 = vrot.slane %v2139_v15, 4  ;;  %v2149_v61 = vor.u32 %v2148_v54, %v2144_v38  ;;  %v2602_v55 = vld [vmem:[#allocation2 + $0xcc] sm:$0xf]  ;;  %v14294_v5 = vadd.f32 %v12099_v3, %v14276_v48 }
 0x1e8   : > { %v2954_v58 = vsel %vm13658_vm8, %v2949_v12, %v2953_v42  ;;  %v2426_v45 = vrot.slane %v2267_v60, 5  ;;  %v13223_v4 = vld [vmem:[%s16330_s4 + $0x70] sm:$0xff]   ;;  %v13193_v50 = vld [vmem:[#allocation3 + $0x404] ss:$36 sps:$4 sm:$0xff]   ;;  %v2963_v39 = vrot.slane %v2961_v25, 5  ;;  %v2424_v59 = vsel %vm13679_vm11, %v11328_v53, %v2423_v29  ;;  %v11991_v42 = vpop.f32.mrf.mxu0  ;;  %v12103_v25 = vpop.f32.mrf.mxu1 }
 0x1e9   : > { %v13195_v28 = vld [vmem:[#allocation3 + $0x400] ss:$36 sps:$4 sm:$0xff]   ;;  %3049 = vst [vmem:[#allocation3 + $0x40c] sm:$0xf] %v2954_v58  ;;  %v2145_v31 = vsel %vm13658_vm8, %v2140_v20, %v2144_v38  ;;  %v2150_v32 = vrot.slane %v2149_v61, 4  ;;  %v2154_v40 = vrot.slane %v2152_v30, 5  ;;  %12371 = vmatprep.subr.bf16.mxu1 %v13223_v4  ;;  %5263 = vmatprep.mubr.bf16.mxu0 %v13193_v50  ;;  %v14307_v58 = vadd.f32 %v12102_v19, %v11990_v17 }
 0x1ea   : > { %v2425_v8 = vrot.slane %v2423_v29, 4  ;;  %2490 = vst [vmem:[#allocation3 + $0x44c] sm:$0xf] %v2424_v59  ;;  %v2603_v52 = vld [vmem:[#allocation2 + $0xd0] sm:$0xf]  ;;  %v2964_v48 = vsel %vm13658_vm8, %v2959_v34, %v2963_v39  ;;  %v2966_v51 = vshrl.u32 %v2602_v55, 16  ;;  %v11992_v38 = vpop.f32.mrf.mxu0  ;;  %5264 = vmatmul.mubr.bf16.gmra.mxu0 %v13195_v28  ;;  %v12104_v39 = vpop.f32.mrf.mxu1 }
 0x1eb   : > { %v13224_v56 = vld [vmem:[%s16330_s4 + $0x30] sm:$0xff]   ;;  %2218 = vst [vmem:[#allocation3 + $0x448] sm:$0xf] %v2145_v31  ;;  %v2969_v3 = vshll.u32 %v2602_v55, 16  ;;  %v2975_v12 = vshll.u32 %v2603_v52, 16  ;;  %v2155_v18 = vsel %vm13658_vm8, %v2150_v32, %v2154_v40  ;;  %v2979_v54 = vshrl.u32 %v2603_v52, 16 }
 0x1ec   : > { %v2604_v53 = vld [vmem:[#allocation2 + $0xd4] sm:$0x1]  ;;  %3050 = vst [vmem:[#allocation3 + $0x430] sm:$0xf] %v2964_v48  ;;  %v2427_v15 = vsel %vm13679_vm11, %v2425_v8, %v2426_v45  ;;  %12372 = vmatpush3.bf16.msra.mxu1 %v13224_v56  ;;  %2219 = vst [vmem:[#allocation3 + $0x46c] sm:$0xf] %v2155_v18  ;;  %v11994_v20 = vpop.f32.mrf.mxu0  ;;  %v11993_v28 = vadd.f32 %v11992_v38, %v11991_v42 }
 0x1ed   : > { %v2985_v9 = vshll.u32 %v2604_v53, 16  ;;  %2491 = vst [vmem:[#allocation3 + $0x470] sm:$0xf] %v2427_v15  ;;  %v2968_v34 = vrot.slane %v2966_v51, 4  ;;  %v2971_v30 = vrot.slane %v2969_v3, 5  ;;  %v2977_v60 = vrot.slane %v2975_v12, 5  ;;  %v12106_v51 = vpop.f32.mrf.mxu1 }
 0x1ee   : > { %v8013_v29 = vld [vmem:[#allocation2 + $0xcc] sm:$0xf]  ;;  %v2981_v61 = vrot.slane %v2979_v54, 4  ;;  %v8014_v4 = vld [vmem:[#allocation2 + $0xd0] sm:$0xf]  ;;  %v11995_v15 = vpop.f32.mrf.mxu0 }
 0x1ef   : > { %v2987_v55 = vrot.slane %v2985_v9, 5  ;;  %v8015_v50 = vld [vmem:[#allocation2 + $0xd4] sm:$0x1]  ;;  %v2972_v45 = vor.u32 %v2971_v30, %v2968_v34  ;;  %v8377_v59 = vshrl.u32 %v8013_v29, 16  ;;  %v8380_v31 = vshll.u32 %v8013_v29, 16  ;;  %v12107_v34 = vpop.f32.mrf.mxu1 }
 0x1f0   : > { %v8386_v32 = vshll.u32 %v8014_v4, 16  ;;  %v3053_v40 = vld [vmem:[#allocation2 + $0x18] sm:$0xe]  ;;  %v2982_v8 = vor.u32 %v2981_v61, %v2977_v60  ;;  %v8390_v52 = vshrl.u32 %v8014_v4, 16  ;;  %v8396_v56 = vshll.u32 %v8015_v50, 16 }
 0x1f1   : > { %v3054_v48 = vld [vmem:[#allocation2 + $0x1c] sm:$0xf]  ;;  %v11329_v53 = vrot.slane %v3053_v40, 9  ;;  %v2973_v17 = vrot.slane %v2972_v45, 4  ;;  %v8379_v19 = vrot.slane %v8377_v59, 4  ;;  %v8382_v3 = vrot.slane %v8380_v31, 5 }
 0x1f2   : > { %v14309_v12 = vrot.slane %v8386_v32, 5  ;;  %v3055_v18 = vld [vmem:[#allocation2 + $0x20] sm:$0x1]  ;;  %v2983_v42 = vrot.slane %v2982_v8, 4  ;;  %v8392_v38 = vrot.slane %v8390_v52, 4  ;;  %v14311_v54 = vrot.slane %v8396_v56, 5 }
 0x1f3   : > { %v3151_v9 = vrot.slane %v3054_v48, 5  ;;  %v13197_v30 = vld [vmem:[#allocation3 + $0x40c] ss:$36 sps:$4 sm:$0xff]   ;;  %v2978_v61 = vsel %vm13658_vm8, %v2973_v17, %v2977_v60  ;;  %v8383_v4 = vor.u32 %v8382_v3, %v8379_v19  ;;  %v3154_v50 = vrot.slane %v3055_v18, 5  ;;  %v11997_v19 = vpop.f32.mrf.mxu0  ;;  %v3058_v18 = vld [vmem:[#allocation2 + $0x2c] sm:$0x1] }
 0x1f4   : > { %v13199_v29 = vld [vmem:[#allocation3 + $0x408] ss:$36 sps:$4 sm:$0xff]   ;;  %v12105_v45 = vadd.f32 %v12104_v39, %v12103_v25  ;;  %v2988_v32 = vsel %vm13658_vm8, %v2983_v42, %v2987_v55  ;;  %3051 = vst [vmem:[#allocation3 + $0x454] sm:$0xf] %v2978_v61  ;;  %v8393_v40 = vor.u32 %v8392_v38, %v14309_v12  ;;  %5424 = vmatprep.mubr.bf16.mxu1 %v13197_v30  ;;  %v3057_v48 = vld [vmem:[#allocation2 + $0x28] sm:$0xf] }
 0x1f5   : > { %v13200_v59 = vld [vmem:[#allocation3 + $0x44c] ss:$36 sps:$4 sm:$0xff]   ;;  %v3152_v8 = vsel %vm13679_vm11, %v11329_v53, %v3151_v9  ;;  %v3153_v52 = vrot.slane %v3151_v9, 4  ;;  %3052 = vst [vmem:[#allocation3 + $0x478] sm:$0xf] %v2988_v32  ;;  %v8384_v56 = vrot.slane %v8383_v4, 4  ;;  %v11996_v25 = vadd.f32 %v11995_v15, %v11994_v20  ;;  %5425 = vmatmul.mubr.bf16.gmra.mxu1 %v13199_v29 }
 0x1f6   : > { %v13202_v31 = vld [vmem:[#allocation3 + $0x448] ss:$36 sps:$4 sm:$0xff]   ;;  %3293 = vst [vmem:[#allocation3 + $0x20] sm:$0xf] %v3152_v8  ;;  %v14320_v17 = vadd.f32 %v12105_v45, %v11993_v28  ;;  %v12108_v39 = vadd.f32 %v12107_v34, %v12106_v51  ;;  %5271 = vmatprep.mubr.bf16.mxu0 %v13200_v59  ;;  %v8394_v55 = vrot.slane %v8393_v40, 4  ;;  %v3158_v42 = vrot.slane %v3057_v48, 5  ;;  %v11998_v28 = vpop.f32.mrf.mxu0 }
 0x1f7   : > { %v3056_v60 = vld [vmem:[#allocation2 + $0x24] sm:$0xe]  ;;  %v3155_v3 = vsel %vm13679_vm11, %v3153_v52, %v3154_v50  ;;  %5272 = vmatmul.mubr.bf16.gmra.mxu0 %v13202_v31  ;;  %v3161_v38 = vrot.slane %v3058_v18, 5  ;;  %v3059_v9 = vld [vmem:[#allocation2 + $0x30] sm:$0xe]  ;;  %v8389_v15 = vsel %vm13658_vm8, %v8384_v56, %v14309_v12  ;;  %v11999_v52 = vadd.f32 %v11998_v28, %v11997_v19 }
 0x1f8   : > { %v11330_v53 = vrot.slane %v3056_v60, 9  ;;  %3294 = vst [vmem:[#allocation3 + $0x44] sm:$0xf] %v3155_v3  ;;  %v3060_v30 = vld [vmem:[#allocation2 + $0x34] sm:$0xf]  ;;  %v14324_v61 = vadd.f32 %v12108_v39, %v11996_v25  ;;  %v3160_v29 = vrot.slane %v3158_v42, 4  ;;  %v8399_v59 = vsel %vm13658_vm8, %v8394_v55, %v14311_v54  ;;  %v12000_v60 = vpop.f32.mrf.mxu0  ;;  %v12109_v3 = vpop.f32.mrf.mxu1 }
 0x1f9   : > { %v7934_v20 = vld [vmem:[#allocation2 + $0xcc] sm:$0xf]  ;;  %v7935_v51 = vld [vmem:[#allocation2 + $0xd0] sm:$0xf]  ;;  %v3061_v4 = vld [vmem:[#allocation2 + $0x38] sm:$0x1] }
 0x1fa   : > { %v3159_v34 = vsel %vm13679_vm11, %v11330_v53, %v3158_v42  ;;  %v11331_v50 = vrot.slane %v3059_v9, 9  ;;  %v3062_v45 = vld [vmem:[#allocation2 + $0x3c] sm:$0xe]  ;;  %v3165_v31 = vrot.slane %v3060_v30, 5  ;;  %v3168_v32 = vrot.slane %v3061_v4, 5  ;;  %v12110_v28 = vpop.f32.mrf.mxu1 }
 0x1fb   : > { %3295 = vst [vmem:[#allocation3 + $0x68] sm:$0xf] %v3159_v34  ;;  %v3063_v40 = vld [vmem:[#allocation2 + $0x40] sm:$0xf]  ;;  %v3064_v8 = vld [vmem:[#allocation2 + $0x44] sm:$0x1]  ;;  %v3162_v12 = vsel %vm13679_vm11, %v3160_v29, %v3161_v38 }
 0x1fc   : > { %v11332_v56 = vrot.slane %v3062_v45, 9  ;;  %v3172_v48 = vrot.slane %v3063_v40, 5  ;;  %v3175_v25 = vrot.slane %v3064_v8, 5  ;;  %v3065_v39 = vld [vmem:[#allocation2 + $0x48] sm:$0xe]  ;;  %v3166_v54 = vsel %vm13679_vm11, %v11331_v50, %v3165_v31  ;;  %v3483_v9 = vld [vmem:[#allocation3 + $0x474] sm:$0xff]  ;;  %v12001_v40 = vpop.f32.mrf.mxu0 }
 0x1fd   : > { %v3478_v18 = vld [vmem:[#allocation3 + $0x450] sm:$0xff]  ;;  %3296 = vst [vmem:[#allocation3 + $0x8c] sm:$0xf] %v3162_v12  ;;  %v3167_v55 = vrot.slane %v3165_v31, 4  ;;  %v3067_v42 = vld [vmem:[#allocation2 + $0x50] sm:$0x1] }
 0x1fe   : > { %v3066_v53 = vld [vmem:[#allocation2 + $0x4c] sm:$0xf]  ;;  %3297 = vst [vmem:[#allocation3 + $0xb0] sm:$0xf] %v3166_v54  ;;  %v3173_v19 = vsel %vm13679_vm11, %v11332_v56, %v3172_v48  ;;  %v3174_v38 = vrot.slane %v3172_v48, 4  ;;  %v11486_v34 = vcombine.low %v3478_v18, %v3483_v9  ;;  %v11333_v4 = vrot.slane %v3065_v39, 9 }
 0x1ff   : > { %v13203_v30 = vld [vmem:[#allocation3 + $0x454] ss:$36 sps:$4 sm:$0xff]   ;;  %7966 = vst [vmem:[#allocation3 + $0x450] sm:$0xf] %v7934_v20  ;;  %7967 = vst [vmem:[#allocation3 + $0x474] sm:$0xf] %v7935_v51  ;;  %v3169_v29 = vsel %vm13679_vm11, %v3167_v55, %v3168_v32 }
 0x200   : > { %8462 = vst [vmem:[#allocation3 + $0x454] sm:$0xf] %v8389_v15  ;;  %8463 = vst [vmem:[#allocation3 + $0x478] sm:$0xf] %v8399_v59  ;;  %v3179_v50 = vrot.slane %v3066_v53, 5  ;;  %5432 = vmatprep.mubr.bf16.mxu1 %v13203_v30  ;;  %v3176_v12 = vsel %vm13679_vm11, %v3174_v38, %v3175_v25  ;;  %v3182_v20 = vrot.slane %v3067_v42, 5  ;;  %v12111_v15 = vadd.f32 %v12110_v28, %v12109_v3  ;;  %v12112_v59 = vpop.f32.mrf.mxu1 }
 0x201   : > { %3299 = vst [vmem:[#allocation3 + $0xf8] sm:$0xf] %v3173_v19  ;;  %v3068_v45 = vld [vmem:[#allocation2 + $0x54] sm:$0xe]  ;;  %v3069_v31 = vld [vmem:[#allocation2 + $0x58] sm:$0xf]  ;;  %5433 = vmatmul.mubr.bf16.gmra.mxu1 %v11486_v34  ;;  %v12002_v25 = vadd.f32 %v12001_v40, %v12000_v60 }
 0x202   : > { %v13205_v8 = vld [vmem:[#allocation3 + $0x20] ss:$36 sps:$4 sm:$0xff]   ;;  %3298 = vst [vmem:[#allocation3 + $0xd4] sm:$0xf] %v3169_v29  ;;  %v11334_v51 = vrot.slane %v3068_v45, 9  ;;  %v3180_v32 = vsel %vm13679_vm11, %v11333_v4, %v3179_v50  ;;  %v3181_v56 = vrot.slane %v3179_v50, 4  ;;  %v14346_v9 = vadd.f32 %v12111_v15, %v11999_v52  ;;  %v12113_v42 = vpop.f32.mrf.mxu1 }
 0x203   : > { %3300 = vst [vmem:[#allocation3 + $0x11c] sm:$0xf] %v3176_v12  ;;  %v3070_v48 = vld [vmem:[#allocation2 + $0x5c] sm:$0x1]  ;;  %v3186_v39 = vrot.slane %v3069_v31, 5  ;;  %12857 = vmatprep.mubr.bf16.mxu0 %v13205_v8  ;;  %v12114_v45 = vadd.f32 %v12113_v42, %v12112_v59  ;;  %v13225_v8 = vld [vmem:[%s16330_s4 + $0x68] sm:$0xff]  }
 0x204   : > { %v3071_v18 = vld [vmem:[#allocation2 + $0x60] sm:$0xe]  ;;  %3301 = vst [vmem:[#allocation3 + $0x140] sm:$0xf] %v3180_v32  ;;  %v3189_v54 = vrot.slane %v3070_v48, 5  ;;  %v3183_v3 = vsel %vm13679_vm11, %v3181_v56, %v3182_v20  ;;  %v13226_v15 = vld [vmem:[%s16330_s4 + $0x28] sm:$0xff]   ;;  %v12003_v48 = vpop.f32.mrf.mxu0  ;;  %12373 = vmatprep.subr.bf16.mxu1 %v13225_v8 }
 0x205   : > { %v3072_v55 = vld [vmem:[#allocation2 + $0x64] sm:$0xf]  ;;  %v11335_v53 = vrot.slane %v3071_v18, 9  ;;  %v3187_v30 = vsel %vm13679_vm11, %v11334_v51, %v3186_v39  ;;  %v3188_v19 = vrot.slane %v3186_v39, 4  ;;  %v3073_v38 = vld [vmem:[#allocation2 + $0x68] sm:$0x1]  ;;  %v14359_v51 = vadd.f32 %v12114_v45, %v12002_v25  ;;  %12374 = vmatpush3.bf16.msra.mxu1 %v13226_v15 }
 0x206   : > { %v3193_v28 = vrot.slane %v3072_v55, 5  ;;  %v3074_v34 = vld [vmem:[#allocation2 + $0x6c] sm:$0xe]  ;;  %v13206_v29 = vld [vmem:[#allocation3 + $0x68] ss:$36 sps:$4 sm:$0xff]   ;;  %v3196_v4 = vrot.slane %v3073_v38, 5  ;;  %v12004_v25 = vpop.f32.mrf.mxu0 }
 0x207   : > { %3302 = vst [vmem:[#allocation3 + $0x164] sm:$0xf] %v3183_v3  ;;  %3303 = vst [vmem:[#allocation3 + $0x188] sm:$0xf] %v3187_v30  ;;  %v11336_v50 = vrot.slane %v3074_v34, 9  ;;  %v3190_v52 = vsel %vm13679_vm11, %v3188_v19, %v3189_v54  ;;  %12858 = vmatmul.mubr.bf16.vlgmr.msra.gmra.mxu0 %v13206_v29 }
 0x208   : > { %v3194_v60 = vsel %vm13679_vm11, %v11335_v53, %v3193_v28  ;;  %v3195_v31 = vrot.slane %v3193_v28, 4  ;;  %v3075_v40 = vld [vmem:[#allocation2 + $0x70] sm:$0xf]  ;;  %3304 = vst [vmem:[#allocation3 + $0x1ac] sm:$0xf] %v3190_v52  ;;  %v12005_v28 = vadd.f32 %v12004_v25, %v12003_v48  ;;  %v12006_v29 = vpop.f32.mrf.mxu0 }
 0x209   : > { %3305 = vst [vmem:[#allocation3 + $0x1d0] sm:$0xf] %v3194_v60  ;;  %v3076_v12 = vld [vmem:[#allocation2 + $0x74] sm:$0x1]  ;;  %v3200_v20 = vrot.slane %v3075_v40, 5 }
 0x20a   : > { %v13207_v59 = vld [vmem:[#allocation3 + $0xb0] ss:$36 sps:$4 sm:$0xff]   ;;  %v3197_v32 = vsel %vm13679_vm11, %v3195_v31, %v3196_v4  ;;  %v3203_v56 = vrot.slane %v3076_v12, 5  ;;  %v13208_v39 = vld [vmem:[#allocation3 + $0xf8] ss:$36 sps:$4 sm:$0xff]   ;;  %v12115_v31 = vpop.f32.mrf.mxu1  ;;  %v12007_v40 = vpop.f32.mrf.mxu0 }
 0x20b   : > { %3306 = vst [vmem:[#allocation3 + $0x1f4] sm:$0xf] %v3197_v32  ;;  %v3201_v18 = vsel %vm13679_vm11, %v11336_v50, %v3200_v20  ;;  %v3202_v54 = vrot.slane %v3200_v20, 4  ;;  %12861 = vmatprep.mubr.bf16.mxu0 %v13207_v59  ;;  %v3077_v55 = vld [vmem:[#allocation2 + $0x78] sm:$0xe] }
 0x20c   : > { %3307 = vst [vmem:[#allocation3 + $0x218] sm:$0xf] %v3201_v18  ;;  %v3078_v53 = vld [vmem:[#allocation2 + $0x7c] sm:$0xf]  ;;  %v3079_v3 = vld [vmem:[#allocation2 + $0x80] sm:$0x1]  ;;  %v12116_v32 = vpop.f32.mrf.mxu1 }
 0x20d   : > { %v3204_v42 = vsel %vm13679_vm11, %v3202_v54, %v3203_v56  ;;  %v11337_v30 = vrot.slane %v3077_v55, 9  ;;  %v3207_v19 = vrot.slane %v3078_v53, 5  ;;  %v3080_v38 = vld [vmem:[#allocation2 + $0x84] sm:$0xe]  ;;  %v3210_v45 = vrot.slane %v3079_v3, 5 }
 0x20e   : > { %v13209_v34 = vld [vmem:[#allocation3 + $0x140] ss:$36 sps:$4 sm:$0xff]   ;;  %3308 = vst [vmem:[#allocation3 + $0x23c] sm:$0xf] %v3204_v42  ;;  %v3081_v52 = vld [vmem:[#allocation2 + $0x88] sm:$0xf]  ;;  %v12117_v48 = vadd.f32 %v12116_v32, %v12115_v31  ;;  %v12137_v42 = vpop.f32.mrf.mxu0 }
 0x20f   : > { %v3208_v4 = vsel %vm13679_vm11, %v11337_v30, %v3207_v19  ;;  %v3209_v50 = vrot.slane %v3207_v19, 4  ;;  %v3082_v60 = vld [vmem:[#allocation2 + $0x8c] sm:$0x1]  ;;  %12862 = vmatmul.mubr.bf16.gmra.mxu0 %v13208_v39  ;;  %v11338_v12 = vrot.slane %v3080_v38, 9  ;;  %v3214_v20 = vrot.slane %v3081_v52, 5  ;;  %v12118_v39 = vpop.f32.mrf.mxu1 }
 0x210   : > { %3309 = vst [vmem:[#allocation3 + $0x260] sm:$0xf] %v3208_v4  ;;  %v3217_v15 = vrot.slane %v3082_v60, 5  ;;  %v3083_v59 = vld [vmem:[#allocation2 + $0x90] sm:$0xe]  ;;  %12865 = vmatprep.mubr.bf16.mxu0 %v13209_v34  ;;  %v14376_v4 = vadd.f32 %v12117_v48, %v12005_v28  ;;  %v12008_v52 = vadd.f32 %v12007_v40, %v12006_v29  ;;  %v12138_v31 = vpop.f32.mrf.mxu0 }
 0x211   : > { %v3211_v8 = vsel %vm13679_vm11, %v3209_v50, %v3210_v45  ;;  %v3084_v56 = vld [vmem:[#allocation2 + $0x94] sm:$0xf]  ;;  %v13210_v18 = vld [vmem:[#allocation3 + $0x188] ss:$36 sps:$4 sm:$0xff]   ;;  %v3215_v54 = vsel %vm13679_vm11, %v11338_v12, %v3214_v20  ;;  %v3216_v55 = vrot.slane %v3214_v20, 4  ;;  %v11339_v25 = vrot.slane %v3083_v59, 9  ;;  %v12119_v60 = vpop.f32.mrf.mxu1 }
 0x212   : > { %3310 = vst [vmem:[#allocation3 + $0x284] sm:$0xf] %v3211_v8  ;;  %v3085_v53 = vld [vmem:[#allocation2 + $0x98] sm:$0x1]  ;;  %3311 = vst [vmem:[#allocation3 + $0x2a8] sm:$0xf] %v3215_v54  ;;  %v12120_v54 = vadd.f32 %v12119_v60, %v12118_v39  ;;  %v12140_v57 = vpop.f32.mrf.mxu0 }
 0x213   : > { %v3221_v3 = vrot.slane %v3084_v56, 5  ;;  %v3224_v30 = vrot.slane %v3085_v53, 5  ;;  %v3086_v19 = vld [vmem:[#allocation2 + $0x9c] sm:$0xe]  ;;  %v3087_v38 = vld [vmem:[#allocation2 + $0xa0] sm:$0xf]  ;;  %v3218_v50 = vsel %vm13679_vm11, %v3216_v55, %v3217_v15  ;;  %v12139_v53 = vadd.f32 %v12138_v31, %v12137_v42 }
 0x214   : > { %v13211_v34 = vld [vmem:[#allocation3 + $0x1d0] ss:$36 sps:$4 sm:$0xff]   ;;  %v3088_v45 = vld [vmem:[#allocation2 + $0xa4] sm:$0x1]  ;;  %3312 = vst [vmem:[#allocation3 + $0x2cc] sm:$0xf] %v3218_v50  ;;  %v14386_v50 = vadd.f32 %v12120_v54, %v12008_v52  ;;  %v12141_v42 = vpop.f32.mrf.mxu0 }
 0x215   : > { %v3222_v8 = vsel %vm13679_vm11, %v11339_v25, %v3221_v3  ;;  %v3223_v12 = vrot.slane %v3221_v3, 4  ;;  %v11340_v20 = vrot.slane %v3086_v19, 9  ;;  %v3228_v59 = vrot.slane %v3087_v38, 5  ;;  %v3089_v32 = vld [vmem:[#allocation2 + $0xa8] sm:$0xe]  ;;  %v13227_v52 = vld [vmem:[%s16330_s4 + $0x60] sm:$0xff]  }
 0x216   : > { %3313 = vst [vmem:[#allocation3 + $0x2f0] sm:$0xf] %v3222_v8  ;;  %v3231_v56 = vrot.slane %v3088_v45, 5  ;;  %v3090_v28 = vld [vmem:[#allocation2 + $0xac] sm:$0xf]  ;;  %v11341_v48 = vrot.slane %v3089_v32, 9  ;;  %v14389_v39 = vadd.f32 %v12139_v53, %v14048_v62  ;;  %v12142_v8 = vadd.f32 %v12141_v42, %v12140_v57  ;;  %12375 = vmatprep.subr.bf16.mxu1 %v13227_v52 }
 0x217   : > { %v3225_v29 = vsel %vm13679_vm11, %v3223_v12, %v3224_v30  ;;  %v3229_v40 = vsel %vm13679_vm11, %v11340_v20, %v3228_v59  ;;  %v3230_v15 = vrot.slane %v3228_v59, 4  ;;  %v3091_v55 = vld [vmem:[#allocation2 + $0xb0] sm:$0x1]  ;;  %v3235_v25 = vrot.slane %v3090_v28, 5  ;;  %v3092_v3 = vld [vmem:[#allocation2 + $0xb4] sm:$0xe]  ;;  %12866 = vmatmul.mubr.bf16.gmra.mxu0 %v13210_v18 }
 0x218   : > { %3314 = vst [vmem:[#allocation3 + $0x314] sm:$0xf] %v3225_v29  ;;  %3315 = vst [vmem:[#allocation3 + $0x338] sm:$0xf] %v3229_v40  ;;  %v3238_v19 = vrot.slane %v3091_v55, 5  ;;  %v11342_v38 = vrot.slane %v3092_v3, 9  ;;  %12869 = vmatprep.mubr.bf16.mxu0 %v13211_v34  ;;  %v14403_v57 = vadd.f32 %v12142_v8, %v14055_v11 }
 0x219   : > { %v3232_v30 = vsel %vm13679_vm11, %v3230_v15, %v3231_v56  ;;  %v3236_v45 = vsel %vm13679_vm11, %v11341_v48, %v3235_v25  ;;  %v3237_v60 = vrot.slane %v3235_v25, 4  ;;  %v3093_v31 = vld [vmem:[#allocation2 + $0xb8] sm:$0xf]  ;;  %v3094_v18 = vld [vmem:[#allocation2 + $0xbc] sm:$0x1]  ;;  %v14400_v48 = vpop.f32.mrf.mxu1  ;;  %v13228_v54 = vld [vmem:[%s16330_s4 + $0x20] sm:$0xff]  }
 0x21a   : > { %v13212_v12 = vld [vmem:[#allocation3 + $0x218] ss:$36 sps:$4 sm:$0xff]   ;;  %3316 = vst [vmem:[#allocation3 + $0x35c] sm:$0xf] %v3232_v30  ;;  %3317 = vst [vmem:[#allocation3 + $0x380] sm:$0xf] %v3236_v45  ;;  %12376 = vmatpush3.bf16.msra.mxu1 %v13228_v54 }
 0x21b   : > { %v3242_v62 = vrot.slane %v3093_v31, 5  ;;  %v3245_v20 = vrot.slane %v3094_v18, 5  ;;  %v3095_v34 = vld [vmem:[#allocation2 + $0xc0] sm:$0xe]  ;;  %v3239_v59 = vsel %vm13679_vm11, %v3237_v60, %v3238_v19  ;;  %v3096_v32 = vld [vmem:[#allocation2 + $0xc4] sm:$0xf]  ;;  %v14410_v3 = vpop.f32.mrf.mxu1  ;;  %v12143_v19 = vpop.f32.mrf.mxu0 }
 0x21c   : > { %v3097_v56 = vld [vmem:[#allocation2 + $0xc8] sm:$0x1]  ;;  %v11343_v28 = vrot.slane %v3095_v34, 9  ;;  %v13213_v53 = vld [vmem:[#allocation3 + $0x260] ss:$36 sps:$4 sm:$0xff]   ;;  %v3249_v15 = vrot.slane %v3096_v32, 5 }
 0x21d   : > { %3318 = vst [vmem:[#allocation3 + $0x3a4] sm:$0xf] %v3239_v59  ;;  %v3243_v29 = vsel %vm13679_vm11, %v11342_v38, %v3242_v62  ;;  %v3244_v40 = vrot.slane %v3242_v62, 4  ;;  %v3252_v55 = vrot.slane %v3097_v56, 5  ;;  %v3098_v25 = vld [vmem:[#allocation2 + $0xcc] sm:$0xe]  ;;  %v14416_v38 = vpop.f32.mrf.mxu1  ;;  %v12144_v18 = vpop.f32.mrf.mxu0 }
 0x21e   : > { %3319 = vst [vmem:[#allocation3 + $0x3c8] sm:$0xf] %v3243_v29  ;;  %v3250_v42 = vsel %vm13679_vm11, %v11343_v28, %v3249_v15  ;;  %v3251_v30 = vrot.slane %v3249_v15, 4  ;;  %v3099_v45 = vld [vmem:[#allocation2 + $0xd0] sm:$0xf]  ;;  %v11344_v31 = vrot.slane %v3098_v25, 9 }
 0x21f   : > { %v3246_v11 = vsel %vm13679_vm11, %v3244_v40, %v3245_v20  ;;  %v3100_v60 = vld [vmem:[#allocation2 + $0xd4] sm:$0x1]  ;;  %3321 = vst [vmem:[#allocation3 + $0x410] sm:$0xf] %v3250_v42  ;;  %12870 = vmatmul.mubr.bf16.gmra.mxu0 %v13212_v12  ;;  %v3256_v52 = vrot.slane %v3099_v45, 5  ;;  %v12145_v20 = vadd.f32 %v12144_v18, %v12143_v19  ;;  %v14420_v32 = vpop.f32.mrf.mxu1  ;;  %v12146_v56 = vpop.f32.mrf.mxu0 }
 0x220   : > { %3320 = vst [vmem:[#allocation3 + $0x3ec] sm:$0xf] %v3246_v11  ;;  %v3253_v8 = vsel %vm13679_vm11, %v3251_v30, %v3252_v55  ;;  %v3259_v62 = vrot.slane %v3100_v60, 5  ;;  %v8510_v34 = vld [vmem:[#allocation2 + $0xd0] sm:$0xf]  ;;  %12873 = vmatprep.mubr.bf16.mxu0 %v13213_v53 }
 0x221   : > { %3322 = vst [vmem:[#allocation3 + $0x434] sm:$0xf] %v3253_v8  ;;  %v8509_v59 = vld [vmem:[#allocation2 + $0xcc] sm:$0xe]  ;;  %v13214_v28 = vld [vmem:[#allocation3 + $0x2a8] ss:$36 sps:$4 sm:$0xff]   ;;  %v3257_v54 = vsel %vm13679_vm11, %v11344_v31, %v3256_v52  ;;  %v14425_v55 = vadd.f32 %v12145_v20, %v14064_v21  ;;  %v12147_v25 = vpop.f32.mrf.mxu0  ;;  %v14429_v42 = vpop.f32.mrf.mxu1 }
 0x222   : > { %v3258_v29 = vrot.slane %v3256_v52, 4  ;;  %v8667_v40 = vrot.slane %v8510_v34, 5  ;;  %v13215_v12 = vld [vmem:[#allocation3 + $0x2f0] ss:$36 sps:$4 sm:$0xff]   ;;  %3323 = vst [vmem:[#allocation3 + $0x458] sm:$0xf] %v3257_v54  ;;  %v12148_v11 = vadd.f32 %v12147_v25, %v12146_v56 }
 0x223   : > { %v8511_v15 = vld [vmem:[#allocation2 + $0xd4] sm:$0x1]  ;;  %v11642_v19 = vrot.slane %v8509_v59, 9  ;;  %v14434_v31 = vpop.f32.mrf.mxu1  ;;  %v12149_v18 = vpop.f32.mrf.mxu0 }
 0x224   : > { %v3260_v53 = vsel %vm13679_vm11, %v3258_v29, %v3259_v62  ;;  %v8669_v30 = vrot.slane %v8667_v40, 4  ;;  %v8670_v45 = vrot.slane %v8511_v15, 5  ;;  %v14432_v60 = vadd.f32 %v12148_v11, %v14068_v13  ;;  %v13216_v8 = vld [vmem:[#allocation3 + $0x338] ss:$36 sps:$4 sm:$0xff]   ;;  %v13217_v20 = vld [vmem:[#allocation3 + $0x380] ss:$36 sps:$4 sm:$0xff]  }
 0x225   : > { %3324 = vst [vmem:[#allocation3 + $0x47c] sm:$0xf] %v3260_v53  ;;  %v14436_v21 = vpop.f32.mrf.mxu1  ;;  %v8668_v52 = vsel %vm13679_vm11, %v11642_v19, %v8667_v40  ;;  %v12150_v34 = vpop.f32.mrf.mxu0  ;;  %v13229_v40 = vld [vmem:[%s16330_s4 + $0x58] sm:$0xff]  }
 0x226   : > { %v8671_v62 = vsel %vm13679_vm11, %v8669_v30, %v8670_v45  ;;  %v12151_v59 = vadd.f32 %v12150_v34, %v12149_v18  ;;  %v13230_v15 = vld [vmem:[%s16330_s4 + $0x18] sm:$0xff]   ;;  %12377 = vmatprep.subr.bf16.mxu1 %v13229_v40 }
 0x227   : > { %12874 = vmatmul.mubr.bf16.gmra.mxu0 %v13214_v28  ;;  %v12152_v13 = vpop.f32.mrf.mxu0  ;;  %v14442_v54 = vpop.f32.mrf.mxu1  ;;  %12378 = vmatpush3.bf16.msra.mxu1 %v13230_v15 }
 0x228   : > { %12877 = vmatprep.mubr.bf16.mxu0 %v13215_v12  ;;  %v14445_v28 = vadd.f32 %v12151_v59, %v14080_v49  ;;  %v13218_v49 = vld [vmem:[#allocation3 + $0x3c8] ss:$36 sps:$4 sm:$0xff]   ;;  %v13219_v19 = vld [vmem:[#allocation3 + $0x410] ss:$36 sps:$4 sm:$0xff]  }
 0x229   : > { %v12153_v29 = vpop.f32.mrf.mxu0  ;;  %v14453_v25 = vpop.f32.mrf.mxu1 }
 0x22a   : > { %v12154_v12 = vadd.f32 %v12153_v29, %v12152_v13 }
 0x22b   : > { %v14458_v11 = vpop.f32.mrf.mxu1  ;;  %v12155_v30 = vpop.f32.mrf.mxu0 }
 0x22c   : > { %v13220_v56 = vld [vmem:[#allocation3 + $0x458] ss:$36 sps:$4 sm:$0xff]   ;;  %v14456_v53 = vadd.f32 %v12154_v12, %v14090_v43 }
 0x22d   : > { %8734 = vst [vmem:[#allocation3 + $0x458] sm:$0xf] %v8668_v52  ;;  %8735 = vst [vmem:[#allocation3 + $0x47c] sm:$0xf] %v8671_v62  ;;  %v14460_v45 = vpop.f32.mrf.mxu1  ;;  %v12156_v18 = vpop.f32.mrf.mxu0 }
 0x22e   : > { %16361 = vst [vmem:[#allocation12_spill] sm:$0xff] %v14456_v53  ;;  %v12157_v52 = vadd.f32 %v12156_v18, %v12155_v30  ;;  %v13247_v53 = vld [vmem:[%s16330_s4 + $0xd0] sm:$0xff]  }
 0x22f   : > { %12878 = vmatmul.mubr.bf16.gmra.mxu0 %v13216_v8  ;;  %v14462_v62 = vpop.f32.mrf.mxu1  ;;  %v12158_v8 = vpop.f32.mrf.mxu0 }
 0x230   : > { %12881 = vmatprep.mubr.bf16.mxu0 %v13217_v20  ;;  %v14465_v34 = vadd.f32 %v12157_v52, %v14105_v44 }
 0x231   : > { %v12159_v43 = vpop.f32.mrf.mxu0  ;;  %v14467_v59 = vpop.f32.mrf.mxu1 }
 0x232   : > { %16362 = vst [vmem:[#allocation13_spill] sm:$0xff] %v14465_v34  ;;  %v12160_v20 = vadd.f32 %v12159_v43, %v12158_v8 }
 0x233   : > { %v14472_v29 = vpop.f32.mrf.mxu1  ;;  %v12161_v40 = vpop.f32.mrf.mxu0 }
 0x234   : > { %v14470_v13 = vadd.f32 %v12160_v20, %v14108_v41  ;;  %v13231_v41 = vld [vmem:[%s16330_s4 + $0x50] sm:$0xff]  }
 0x235   : > { %v14474_v12 = vpop.f32.mrf.mxu1  ;;  %v12162_v15 = vpop.f32.mrf.mxu0  ;;  %12379 = vmatprep.subr.bf16.mxu1 %v13231_v41 }
 0x236   : > { %16363 = vst [vmem:[#allocation14_spill] sm:$0xff] %v14470_v13  ;;  %v13244_v13 = vld [vmem:[%s16330_s4 + $0x40] sm:$0xff]  }
 0x237   : > { %12882 = vmatmul.mubr.bf16.gmra.mxu0 %v13218_v49  ;;  %v14476_v49 = vpop.f32.mrf.mxu1  ;;  %v12164_v30 = vpop.f32.mrf.mxu0 }
 0x238   : > { %12885 = vmatprep.mubr.bf16.mxu0 %v13219_v19  ;;  %v12163_v19 = vadd.f32 %v12162_v15, %v12161_v40 }
 0x239   : > { %v12165_v18 = vpop.f32.mrf.mxu0  ;;  %v14487_v52 = vpop.f32.mrf.mxu1 }
 0x23a   : > { %v14479_v44 = vadd.f32 %v12163_v19, %v14127_v10  ;;  %v12166_v8 = vadd.f32 %v12165_v18, %v12164_v30 }
 0x23b   : > { %v14489_v43 = vpop.f32.mrf.mxu1  ;;  %v12167_v40 = vpop.f32.mrf.mxu0 }
 0x23c   : > { %16364 = vst [vmem:[#allocation15_spill] sm:$0xff] %v14479_v44  ;;  %v14492_v20 = vadd.f32 %v12166_v8, %v14141_v63  ;;  %v13233_v63 = vld [vmem:[%s16330_s4 + $0xf8] sm:$0xff]  }
 0x23d   : > { %v14494_v10 = vpop.f32.mrf.mxu1  ;;  %v12168_v15 = vpop.f32.mrf.mxu0  ;;  %12481 = vmatprep.subr.bf16.mxu0 %v13233_v63  ;;  %v13235_v8 = vld [vmem:[%s16330_s4 + $0xb8] sm:$0xff]   ;;  %v13238_v63 = vld [vmem:[%s16330_s4 + $0xb0] sm:$0xff]  }
 0x23e   : > { %16365 = vst [vmem:[#allocation16_spill] sm:$0xff] %v14492_v20  ;;  %v12169_v22 = vadd.f32 %v12168_v15, %v12167_v40  ;;  %12482 = vmatpush3.bf16.msra.mxu0 %v13235_v8 }
 0x23f   : > { %12886 = vmatmul.mubr.bf16.gmra.mxu0 %v13220_v56  ;;  %v13232_v56 = vld [vmem:[%s16330_s4 + $0x10] sm:$0xff]   ;;  %v14496_v19 = vpop.f32.mrf.mxu1  ;;  %v12170_v33 = vpop.f32.mrf.mxu0 }
 0x240   : > { %12380 = vmatpush3.bf16.msra.mxu1 %v13232_v56  ;;  %v14499_v26 = vadd.f32 %v12169_v22, %v14143_v14 }
 0x241   : > { %v12171_v16 = vpop.f32.mrf.mxu0  ;;  %v14501_v30 = vpop.f32.mrf.mxu1 }
 0x242   : > { %16366 = vst [vmem:[#allocation17_spill] sm:$0xff] %v14499_v26  ;;  %v12172_v18 = vadd.f32 %v12171_v16, %v12170_v33 }
 0x243   : > { %v14506_v41 = vpop.f32.mrf.mxu1  ;;  %v12173_v14 = vpop.f32.mrf.mxu0 }
 0x244   : > { %v14509_v56 = vadd.f32 %v12172_v18, %v14151_v37  ;;  %v13237_v37 = vld [vmem:[%s16330_s4 + $0xf0] sm:$0xff]  }
 0x245   : > { %v14514_v22 = vpop.f32.mrf.mxu1  ;;  %v12174_v40 = vpop.f32.mrf.mxu0  ;;  %12483 = vmatprep.subr.bf16.mxu0 %v13237_v37 }
 0x246   : > { %16367 = vst [vmem:[#allocation18_spill] sm:$0xff] %v14509_v56  ;;  %v12175_v16 = vadd.f32 %v12174_v40, %v12173_v14  ;;  %12484 = vmatpush3.bf16.msra.mxu0 %v13238_v63 }
 0x247   : > { %v14516_v33 = vpop.f32.mrf.mxu1  ;;  %v12176_v15 = vpop.f32.mrf.mxu0 }
 0x248   : > { %v14519_v20 = vadd.f32 %v12175_v16, %v14159_v27  ;;  %v13239_v27 = vld [vmem:[%s16330_s4 + $0xe8] sm:$0xff]  }
 0x249   : > { %v12177_v18 = vpop.f32.mrf.mxu0  ;;  %12485 = vmatprep.subr.bf16.mxu0 %v13239_v27 }
 0x24a   : > { %16368 = vst [vmem:[#allocation19_spill] sm:$0xff] %v14519_v20  ;;  %v12178_v56 = vadd.f32 %v12177_v18, %v12176_v15  ;;  %v13240_v20 = vld [vmem:[%s16330_s4 + $0xa8] sm:$0xff]  }
 0x24b   : > { %12486 = vmatpush3.bf16.msra.mxu0 %v13240_v20  ;;  %v13234_v20 = vld [vmem:[%s16330_s4 + $0x48] sm:$0xff]  }
 0x24c   : > { %v14530_v14 = vadd.f32 %v12178_v56, %v14169_v46  ;;  %v13241_v46 = vld [vmem:[%s16330_s4 + $0xe0] sm:$0xff]   ;;  %12381 = vmatprep.subr.bf16.mxu1 %v13234_v20 }
 0x24d   : > { %v14527_v8 = vpop.f32.mrf.mxu1  ;;  %12487 = vmatprep.subr.bf16.mxu0 %v13241_v46  ;;  %v13243_v46 = vld [vmem:[%s16330_s4 + $0xd8] sm:$0xff]  }
 0x24e   : > { %16369 = vst [vmem:[#allocation20_spill] sm:$0xff] %v14530_v14  ;;  %v13242_v14 = vld [vmem:[%s16330_s4 + $0xa0] sm:$0xff]  }
 0x24f   : > { %v14532_v40 = vpop.f32.mrf.mxu1  ;;  %12488 = vmatpush3.bf16.msra.mxu0 %v13242_v14  ;;  %v13245_v14 = vld [vmem:[%s16330_s4 + $0x98] sm:$0xff]  }
 0x250   : > { %v12179_v16 = vpop.f32.mrf.mxu0  ;;  %12489 = vmatprep.subr.bf16.mxu0 %v13243_v46 }
 0x251   : > { %v14540_v26 = vpop.f32.mrf.mxu1 }
 0x252   : > { %v12180_v15 = vpop.f32.mrf.mxu0 }
 0x253   : > { %v12181_v37 = vadd.f32 %v12180_v15, %v12179_v16  ;;  %v14545_v56 = vpop.f32.mrf.mxu1  ;;  %v13236_v16 = vld [vmem:[%s16330_s4 + $0x8] sm:$0xff]   ;;  %12490 = vmatpush3.bf16.msra.mxu0 %v13245_v14 }
 0x254   : > { %v12182_v18 = vpop.f32.mrf.mxu0  ;;  %12382 = vmatpush3.bf16.msra.mxu1 %v13236_v16  ;;  %12491 = vmatprep.subr.bf16.mxu0 %v13247_v53  ;;  %v13253_v53 = vld [vmem:[#allocation3 + $0x4] ss:$36 sps:$4 sm:$0xff]  }
 0x255   : > { %v14548_v63 = vadd.f32 %v12181_v37, %v14184_v0  ;;  %12383 = vmatprep.subr.bf16.mxu1 %v13244_v13  ;;  %10240 = vmatprep.mubr.bf16.mxu1 %v13253_v53 }
 0x256   : > { %v12183_v44 = vpop.f32.mrf.mxu0 }
 0x257   : > { %16370 = vst [vmem:[#allocation21_spill] sm:$0xff] %v14548_v63  ;;  %v12184_v27 = vadd.f32 %v12183_v44, %v12182_v18 }
 0x259   : > { %v14559_v15 = vpop.f32.mrf.mxu1  ;;  %v14562_v0 = vadd.f32 %v12184_v27, %v14197_v35 }
 0x25b   : > { %16371 = vst [vmem:[#allocation22_spill] sm:$0xff] %v14562_v0  ;;  %v14564_v37 = vpop.f32.mrf.mxu1 }
 0x25d   : > { %v14569_v63 = vpop.f32.mrf.mxu1  ;;  %v12185_v44 = vpop.f32.mrf.mxu0 }
 0x25f   : > { %v12186_v18 = vpop.f32.mrf.mxu0  ;;  %v14574_v20 = vpop.f32.mrf.mxu1 }
 0x260   : > { %v12187_v35 = vadd.f32 %v12186_v18, %v12185_v44  ;;  %v13246_v44 = vld [vmem:[%s16330_s4] sm:$0xff]  }
 0x261   : > { %v12188_v27 = vpop.f32.mrf.mxu0  ;;  %12384 = vmatpush3.bf16.msra.mxu1 %v13246_v44  ;;  %v13254_v44 = vld [vmem:[%s16330_s4 + $0xc0] sm:$0xff]  }
 0x262   : > { %v14577_v16 = vadd.f32 %v12187_v35, %v14199_v36  ;;  %v13248_v36 = vld [vmem:[%s16330_s4 + $0x90] sm:$0xff]  }
 0x263   : > { %v12189_v0 = vpop.f32.mrf.mxu0  ;;  %12492 = vmatpush3.bf16.msra.mxu0 %v13248_v36 }
 0x264   : > { %16372 = vst [vmem:[#allocation23_spill] sm:$0xff] %v14577_v16  ;;  %v12190_v46 = vadd.f32 %v12189_v0, %v12188_v27  ;;  %v13249_v0 = vld [vmem:[%s16330_s4 + $0xc8] sm:$0xff]  }
 0x265   : > { %v13250_v16 = vld [vmem:[%s16330_s4 + $0x88] sm:$0xff]   ;;  %12493 = vmatprep.subr.bf16.mxu0 %v13249_v0 }
 0x266   : > { %v14585_v34 = vpop.f32.mrf.mxu1  ;;  %v14596_v18 = vadd.f32 %v12190_v46, %v14214_v23 }
 0x267   : > { %16373 = vst [vmem:[#allocation24_spill] sm:$0xff] %v14585_v34  ;;  %12494 = vmatpush3.bf16.msra.mxu0 %v13250_v16  ;;  %v13255_v16 = vld [vmem:[%s16330_s4 + $0x80] sm:$0xff]  }
 0x268   : > { %v14593_v14 = vpop.f32.mrf.mxu1  ;;  %16375 = vst [vmem:[#allocation26_spill] sm:$0xff] %v14596_v18  ;;  %12495 = vmatprep.subr.bf16.mxu0 %v13254_v44 }
 0x269   : > { %16374 = vst [vmem:[#allocation25_spill] sm:$0xff] %v14593_v14  ;;  %v13251_v14 = vld [vmem:[#allocation3] ss:$36 sps:$4 sm:$0xff]  }
 0x26a   : > { %v14601_v35 = vpop.f32.mrf.mxu1  ;;  %v12191_v27 = vpop.f32.mrf.mxu0  ;;  %10241 = vmatmul.mubr.bf16.vlgmr.msra.gmra.mxu1 %v13251_v14 }
 0x26b   : > { %16376 = vst [vmem:[#allocation27_spill] sm:$0xff] %v14601_v35  ;;  %12496 = vmatpush3.bf16.msra.mxu0 %v13255_v16 }
 0x26c   : > { %v12192_v13 = vpop.f32.mrf.mxu0  ;;  %v14606_v23 = vpop.f32.mrf.mxu1 }
 0x26d   : > { %16377 = vst [vmem:[#allocation28_spill] sm:$0xff] %v14606_v23  ;;  %v12193_v46 = vadd.f32 %v12192_v13, %v12191_v27 }
 0x26e   : > { %v12194_v36 = vpop.f32.mrf.mxu0 }
 0x26f   : > { %v14612_v18 = vadd.f32 %v12193_v46, %v14218_v24 }
 0x270   : > { %v12195_v35 = vpop.f32.mrf.mxu0 }
 0x271   : > { %16378 = vst [vmem:[#allocation29_spill] sm:$0xff] %v14612_v18  ;;  %v12196_v34 = vadd.f32 %v12195_v35, %v12194_v36 }
 0x272   : > { %v14614_v0 = vpop.f32.mrf.mxu1 }
 0x273   : > { %16379 = vst [vmem:[#allocation30_spill] sm:$0xff] %v14614_v0  ;;  %v14622_v53 = vadd.f32 %v12196_v34, %v14229_v2 }
 0x274   : > { %v14619_v27 = vpop.f32.mrf.mxu1 }
 0x275   : > { %16380 = vst [vmem:[#allocation31_spill] sm:$0xff] %v14619_v27  ;;  %16381 = vst [vmem:[#allocation32_spill] sm:$0xff] %v14622_v53 }
 0x276   : > { %v14624_v13 = vpop.f32.mrf.mxu1 }
 0x277   : > { %v12197_v14 = vpop.f32.mrf.mxu0 }
 0x278   : > { %v14626_v44 = vpop.f32.mrf.mxu1 }
 0x279   : > { %v12198_v24 = vpop.f32.mrf.mxu0  ;;  %16382 = vst [vmem:[#allocation33_spill] sm:$0xff] %v14626_v44 }
 0x27a   : > { %v12199_v46 = vadd.f32 %v12198_v24, %v12197_v14 }
 0x27b   : > { %v12200_v18 = vpop.f32.mrf.mxu0 }
 0x27c   : > { %v14629_v35 = vadd.f32 %v12199_v46, %v14249_v7 }
 0x27d   : > { %v12201_v36 = vpop.f32.mrf.mxu0 }
 0x27e   : > { %16383 = vst [vmem:[#allocation34_spill] sm:$0xff] %v14629_v35  ;;  %v12202_v0 = vadd.f32 %v12201_v36, %v12200_v18 }
 0x280   : > { %v14631_v23 = vpop.f32.mrf.mxu1  ;;  %v14634_v27 = vadd.f32 %v12202_v0, %v14251_v47 }
 0x282   : > { %16384 = vst [vmem:[#allocation35_spill] sm:$0xff] %v14634_v27  ;;  %v14636_v2 = vpop.f32.mrf.mxu1  ;;  %v13259_v27 = vld [vmem:[%s16330_s4 + $0x178] sm:$0xff]  }
 0x283   : > { %v12203_v34 = vpop.f32.mrf.mxu0  ;;  %12593 = vmatprep.subr.bf16.mxu1 %v13259_v27 }
 0x284   : > { %v14638_v16 = vpop.f32.mrf.mxu1 }
 0x285   : > { %v12204_v53 = vpop.f32.mrf.mxu0 }
 0x286   : > { %v12205_v14 = vadd.f32 %v12204_v53, %v12203_v34  ;;  %v14640_v24 = vpop.f32.mrf.mxu1  ;;  %v13260_v53 = vld [vmem:[%s16330_s4 + $0x138] sm:$0xff]  }
 0x287   : > { %16385 = vst [vmem:[#allocation36_spill] sm:$0xff] %v14640_v24  ;;  %v12206_v44 = vpop.f32.mrf.mxu0  ;;  %12594 = vmatpush3.bf16.msra.mxu1 %v13260_v53 }
 0x288   : > { %v14643_v7 = vadd.f32 %v12205_v14, %v14268_v1 }
 0x289   : > { %v12207_v46 = vpop.f32.mrf.mxu0 }
 0x28a   : > { %16386 = vst [vmem:[#allocation37_spill] sm:$0xff] %v14643_v7  ;;  %v12208_v18 = vadd.f32 %v12207_v46, %v12206_v44 }
 0x28c   : > { %v14645_v36 = vpop.f32.mrf.mxu1  ;;  %v14648_v47 = vadd.f32 %v12208_v18, %v14280_v6 }
 0x28d   : > { %16387 = vst [vmem:[#allocation38_spill] sm:$0xff] %v14645_v36 }
 0x28e   : > { %16388 = vst [vmem:[#allocation39_spill] sm:$0xff] %v14648_v47  ;;  %v14650_v0 = vpop.f32.mrf.mxu1 }
 0x28f   : > { %16389 = vst [vmem:[#allocation40_spill] sm:$0xff] %v14650_v0 }
 0x290   : > { %v14658_v34 = vpop.f32.mrf.mxu1  ;;  %v12209_v1 = vpop.f32.mrf.mxu0 }
 0x291   : > { %16390 = vst [vmem:[#allocation41_spill] sm:$0xff] %v14658_v34 }
 0x292   : > { %v12210_v44 = vpop.f32.mrf.mxu0  ;;  %v14660_v14 = vpop.f32.mrf.mxu1 }
 0x293   : > { %v12211_v6 = vadd.f32 %v12210_v44, %v12209_v1 }
 0x294   : > { %v12212_v46 = vpop.f32.mrf.mxu0 }
 0x295   : > { %v14663_v18 = vadd.f32 %v12211_v6, %v14294_v5 }
 0x296   : > { %v12213_v47 = vpop.f32.mrf.mxu0 }
 0x297   : > { %16391 = vst [vmem:[#allocation42_spill] sm:$0xff] %v14663_v18  ;;  %v12214_v35 = vadd.f32 %v12213_v47, %v12212_v46 }
 0x299   : > { %v14665_v7 = vpop.f32.mrf.mxu1  ;;  %v14670_v36 = vadd.f32 %v12214_v35, %v14307_v58 }
 0x29b   : > { %v14667_v0 = vpop.f32.mrf.mxu1  ;;  %16393 = vst [vmem:[#allocation44_spill] sm:$0xff] %v14670_v36 }
 0x29c   : > { %16392 = vst [vmem:[#allocation43_spill] sm:$0xff] %v14667_v0 }
 0x29d   : > { %v14672_v34 = vpop.f32.mrf.mxu1  ;;  %v12215_v27 = vpop.f32.mrf.mxu0 }
 0x29e   : > { %16394 = vst [vmem:[#allocation45_spill] sm:$0xff] %v14672_v34 }
 0x29f   : > { %v12216_v53 = vpop.f32.mrf.mxu0  ;;  %v14674_v24 = vpop.f32.mrf.mxu1 }
 0x2a0   : > { %16395 = vst [vmem:[#allocation46_spill] sm:$0xff] %v14674_v24  ;;  %v12217_v1 = vadd.f32 %v12216_v53, %v12215_v27 }
 0x2a1   : > { %v12218_v44 = vpop.f32.mrf.mxu0 }
 0x2a2   : > { %v14677_v5 = vadd.f32 %v12217_v1, %v14320_v17 }
 0x2a3   : > { %v12219_v6 = vpop.f32.mrf.mxu0 }
 0x2a4   : > { %v12220_v47 = vadd.f32 %v12219_v6, %v12218_v44 }
 0x2a6   : > { %v14679_v18 = vpop.f32.mrf.mxu1  ;;  %v14684_v58 = vadd.f32 %v12220_v47, %v14324_v61  ;;  %v12251_v47 = vadd.f32 %v14410_v3, %v14400_v48  ;;  %v12263_v48 = vadd.f32 %v14458_v11, %v14453_v25  ;;  %v12272_v25 = vadd.f32 %v14476_v49, %v14474_v12 }
 0x2a8   : > { %v14681_v46 = vpop.f32.mrf.mxu1  ;;  %16396 = vst [vmem:[#allocation47_spill] sm:$0xff] %v14684_v58 }
 0x2aa   : > { %v12221_v35 = vpop.f32.mrf.mxu0  ;;  %v14686_v36 = vpop.f32.mrf.mxu1 }
 0x2ac   : > { %v12222_v34 = vpop.f32.mrf.mxu0  ;;  %v14691_v17 = vpop.f32.mrf.mxu1 }
 0x2ad   : > { %v12223_v0 = vadd.f32 %v12222_v34, %v12221_v35  ;;  %v12260_v34 = vadd.f32 %v14442_v54, %v14436_v21 }
 0x2ae   : > { %v12224_v24 = vpop.f32.mrf.mxu0 }
 0x2af   : > { %v14689_v27 = vadd.f32 %v12223_v0, %v14346_v9  ;;  %v13276_v9 = vld [vmem:[%s16330_s4 + $0x170] sm:$0xff]   ;;  %v12254_v0 = vadd.f32 %v14420_v32, %v14416_v38  ;;  %v5315_v38 = vadd.f32 %v12251_v47, %v14389_v39  ;;  %v12266_v32 = vadd.f32 %v14462_v62, %v14460_v45 }
 0x2b0   : > { %v12225_v53 = vpop.f32.mrf.mxu0  ;;  %12595 = vmatprep.subr.bf16.mxu1 %v13276_v9  ;;  %v5326_v39 = vadd.f32 %v12260_v34, %v14432_v60  ;;  %v12278_v45 = vadd.f32 %v14496_v19, %v14494_v10  ;;  %v12281_v62 = vadd.f32 %v14506_v41, %v14501_v30  ;;  %v12293_v60 = vadd.f32 %v14564_v37, %v14559_v15  ;;  %v16399_v10 = vld [vmem:[#allocation25_spill] sm:$0xff]  ;;  %v16401_v41 = vld [vmem:[#allocation12_spill] sm:$0xff] }
 0x2b1   : > { %v12226_v1 = vadd.f32 %v12225_v53, %v12224_v24  ;;  %v12257_v24 = vadd.f32 %v14434_v31, %v14429_v42  ;;  %v12269_v42 = vadd.f32 %v14472_v29, %v14467_v59  ;;  %v14727_v54 = vadd.f32 %v12254_v0, %v14403_v57  ;;  %v16400_v19 = vld [vmem:[#allocation13_spill] sm:$0xff] }
 0x2b2   : > { %v14741_v57 = vadd.f32 %v12263_v48, %v14445_v28  ;;  %v12287_v59 = vadd.f32 %v14532_v40, %v14527_v8  ;;  %v12290_v29 = vadd.f32 %v14545_v56, %v14540_v26  ;;  %v16402_v26 = vld [vmem:[#allocation27_spill] sm:$0xff]  ;;  %v16404_v40 = vld [vmem:[#allocation30_spill] sm:$0xff]  ;;  %v12311_v9 = vadd.f32 %v14636_v2, %v14631_v23  ;;  %v16409_v0 = vld [vmem:[#allocation17_spill] sm:$0xff] }
 0x2b3   : > { %v14694_v44 = vadd.f32 %v12226_v1, %v14359_v51  ;;  %v5323_v21 = vadd.f32 %v12257_v24, %v14425_v55  ;;  %v12284_v55 = vadd.f32 %v14516_v33, %v14514_v22  ;;  %v14757_v30 = vadd.f32 %v12269_v42, %v16400_v19  ;;  %v16403_v33 = vld [vmem:[#allocation28_spill] sm:$0xff]  ;;  %v16405_v56 = vld [vmem:[#allocation31_spill] sm:$0xff] }
 0x2b4   : > { %v14760_v22 = vadd.f32 %v12266_v32, %v16401_v41  ;;  %v12302_v8 = vadd.f32 %v16403_v33, %v16402_v26  ;;  %v12305_v15 = vadd.f32 %v16405_v56, %v16404_v40  ;;  %v14777_v24 = vadd.f32 %v12281_v62, %v16409_v0  ;;  %v16411_v32 = vld [vmem:[#allocation18_spill] sm:$0xff]  ;;  %v16413_v23 = vld [vmem:[#allocation19_spill] sm:$0xff]  ;;  %v16420_v33 = vld [vmem:[#allocation41_spill] sm:$0xff] }
 0x2b5   : > { %16397 = vst [vmem:[#allocation48_spill] sm:$0xff] %v14694_v44  ;;  %v14696_v6 = vpop.f32.mrf.mxu1  ;;  %v14788_v42 = vadd.f32 %v12284_v55, %v16411_v32  ;;  %v14794_v2 = vadd.f32 %v12287_v59, %v16413_v23  ;;  %v16417_v19 = vld [vmem:[#allocation23_spill] sm:$0xff]  ;;  %v13280_v55 = vld [vmem:[%s16330_s4 + $0x130] sm:$0xff]   ;;  %v16419_v59 = vld [vmem:[#allocation40_spill] sm:$0xff] }
 0x2b6   : > { %12596 = vmatpush3.bf16.msra.mxu1 %v13280_v55  ;;  %v16427_v23 = vld [vmem:[#allocation46_spill] sm:$0xff] }
 0x2b7   : > { %v12227_v61 = vpop.f32.mrf.mxu0  ;;  %v14700_v58 = vpop.f32.mrf.mxu1 }
 0x2b9   : > { %v12228_v51 = vpop.f32.mrf.mxu0  ;;  %v14711_v35 = vpop.f32.mrf.mxu1 }
 0x2ba   : > { %v12229_v53 = vadd.f32 %v12228_v51, %v12227_v61  ;;  %v16407_v61 = vld [vmem:[#allocation15_spill] sm:$0xff]  ;;  %v16410_v51 = vld [vmem:[#allocation16_spill] sm:$0xff] }
 0x2bb   : > { %v12230_v3 = vpop.f32.mrf.mxu0  ;;  %v14715_v1 = vpop.f32.mrf.mxu1  ;;  %v14780_v34 = vadd.f32 %v12278_v45, %v16410_v51  ;;  %v16424_v51 = vld [vmem:[#allocation34_spill] sm:$0xff] }
 0x2bc   : > { %v14718_v44 = vadd.f32 %v12229_v53, %v14376_v4  ;;  %v12275_v4 = vadd.f32 %v14489_v43, %v14487_v52  ;;  %v12296_v52 = vadd.f32 %v14574_v20, %v14569_v63  ;;  %v16398_v43 = vld [vmem:[#allocation24_spill] sm:$0xff]  ;;  %v16408_v20 = vld [vmem:[#allocation33_spill] sm:$0xff] }
 0x2bd   : > { %v12231_v31 = vpop.f32.mrf.mxu0  ;;  %v12299_v28 = vadd.f32 %v16399_v10, %v16398_v43  ;;  %v12308_v47 = vadd.f32 %v16408_v20, %v14624_v13  ;;  %v16412_v13 = vld [vmem:[#allocation21_spill] sm:$0xff]  ;;  %v16416_v43 = vld [vmem:[#allocation22_spill] sm:$0xff]  ;;  %v16423_v20 = vld [vmem:[#allocation32_spill] sm:$0xff] }
 0x2be   : > { %v12232_v11 = vadd.f32 %v12231_v31, %v12230_v3  ;;  %v14770_v63 = vadd.f32 %v12275_v4, %v16407_v61  ;;  %v14785_v3 = vld [vmem:[%s16328_s2] ss:$0 sm:$0xff]  ;;  %v14791_v31 = vadd.f32 %v12293_v60, %v16412_v13  ;;  %v14802_v10 = vadd.f32 %v12296_v52, %v16416_v43  ;;  %v16418_v60 = vld [vmem:[#allocation38_spill] sm:$0xff]  ;;  %v16421_v52 = vld [vmem:[#allocation29_spill] sm:$0xff] }
 0x2bf   : > { %v14805_v41 = vadd.f32 %v12299_v28, %v16417_v19  ;;  %v12317_v26 = vadd.f32 %v16419_v59, %v16418_v60  ;;  %v14820_v40 = vadd.f32 %v12305_v15, %v16421_v52  ;;  %v16422_v28 = vld [vmem:[#allocation26_spill] sm:$0xff]  ;;  %v14827_v0 = vadd.f32 %v12308_v47, %v16423_v20  ;;  %v16426_v13 = vld [vmem:[#allocation45_spill] sm:$0xff]  ;;  %v16428_v43 = vld [vmem:[#allocation35_spill] sm:$0xff] }
 0x2c0   : > { %v14750_v49 = vadd.f32 %v12232_v11, %v14386_v50  ;;  %v16406_v50 = vld [vmem:[#allocation14_spill] sm:$0xff]  ;;  %v16415_v11 = vld [vmem:[#allocation36_spill] sm:$0xff]  ;;  %v14823_v56 = vadd.f32 %v12302_v8, %v16422_v28  ;;  %v12326_v15 = vadd.f32 %v16427_v23, %v16426_v13  ;;  %v12329_v8 = vadd.f32 %v14681_v46, %v14679_v18  ;;  %v16429_v59 = vld [vmem:[#allocation37_spill] sm:$0xff] }
 0x2c1   : > { %v12339_v12 = vpop.f32.mrf.mxu1  ;;  %v14767_v37 = vadd.f32 %v12272_v25, %v16406_v50  ;;  %v16414_v25 = vld [vmem:[#allocation20_spill] sm:$0xff]  ;;  %v12314_v45 = vadd.f32 %v16415_v11, %v14638_v16  ;;  %v14848_v18 = vadd.f32 %v12317_v26, %v16429_v59  ;;  %v16430_v46 = vld [vmem:[#allocation39_spill] sm:$0xff]  ;;  %v13290_v23 = vld [vmem:[%s16330_s4 + $0x168] sm:$0xff]  }
 0x2c2   : > { %v14797_v4 = vadd.f32 %v12290_v29, %v16414_v25  ;;  %v12320_v29 = vadd.f32 %v14660_v14, %v16420_v33  ;;  %v14817_v16 = vld [vmem:[%s16329_s3] ss:$0 sm:$0xff]  ;;  %v14830_v14 = vadd.f32 %v12311_v9, %v16424_v51  ;;  %v12332_v25 = vadd.f32 %v14691_v17, %v14686_v36  ;;  %12597 = vmatprep.subr.bf16.mxu1 %v13290_v23 }
 0x2c3   : > { %v12340_v53 = vpop.f32.mrf.mxu1  ;;  %v14843_v19 = vadd.f32 %v12314_v45, %v16428_v43  ;;  %v14857_v28 = vadd.f32 %v12329_v8, %v14677_v5  ;;  %v16433_v26 = vld [vmem:[#allocation44_spill] sm:$0xff]  ;;  %v14872_v51 = vadd.f32 %v14715_v1, %v14711_v35 }
 0x2c4   : > { %v12341_v55 = vadd.f32 %v12340_v53, %v12339_v12  ;;  %v14851_v36 = vadd.f32 %v12320_v29, %v16430_v46  ;;  %v16432_v12 = vld [vmem:[#allocation47_spill] sm:$0xff]  ;;  %v14866_v29 = vadd.f32 %v12326_v15, %v16433_v26 }
 0x2c5   : > { %v14863_v53 = vadd.f32 %v12332_v25, %v16432_v12 }
 0x2c7   : > { %v12859_v48 = vpop.f32.mrf.mxu0 }
 0x2c8   : > { %v5484_v62 = vadd.f32 %v12859_v48, %v5323_v21  ;;  %v16425_v48 = vld [vmem:[#allocation43_spill] sm:$0xff] }
 0x2c9   : > { %v5475_v21 = vpop.f32.mrf.mxu0  ;;  %v12323_v32 = vadd.f32 %v16425_v48, %v14665_v7  ;;  %v12335_v7 = vadd.f32 %v14700_v58, %v14696_v6  ;;  %v16431_v58 = vld [vmem:[#allocation42_spill] sm:$0xff] }
 0x2ca   : > { %v5611_v50 = vmul.f32 %v14785_v3, %v5484_v62  ;;  %v5476_v61 = vadd.f32 %v5475_v21, %v5315_v38  ;;  %v12342_v38 = vpop.f32.mrf.mxu1 }
 0x2cb   : > { %v12860_v11 = vpop.f32.mrf.mxu0  ;;  %v14860_v6 = vadd.f32 %v12323_v32, %v16431_v58  ;;  %v14876_v32 = vadd.f32 %v12341_v55, %v14718_v44  ;;  %v14879_v13 = vadd.f32 %v12335_v7, %v14689_v27  ;;  %v6135_v7 = vld [vmem:[#allocation2 + $0x18] sm:$0xf] }
 0x2cc   : > { %v5650_v47 = vadd.f32 %v14817_v16, %v5611_v50  ;;  %v5609_v9 = vmul.f32 %v14785_v3, %v5476_v61  ;;  %v5487_v62 = vadd.f32 %v12860_v11, %v5326_v39  ;;  %v12343_v45 = vpop.f32.mrf.mxu1 }
 0x2cd   : > { %v5478_v60 = vpop.f32.mrf.mxu0  ;;  %v14884_v15 = vadd.f32 %v12343_v45, %v12342_v38 }
 0x2ce   : > { %v5682_v17 = vmax.f32 %v5650_v47, 0.0  ;;  %v5648_v33 = vadd.f32 %v14817_v16, %v5609_v9  ;;  %v5612_v21 = vmul.f32 %v14785_v3, %v5487_v62  ;;  %v5479_v39 = vadd.f32 %v5478_v60, %v14727_v54 }
 0x2cf   : > { %v12863_v52 = vpop.f32.mrf.mxu0 }
 0x2d0   : > { %v11867_v50 = vpack.c.bf16 %v5682_v17, %v5682_v17  ;;  %v5680_v61 = vmax.f32 %v5648_v33, 0.0  ;;  %v5651_v20 = vadd.f32 %v14817_v16, %v5612_v21  ;;  %v5610_v54 = vmul.f32 %v14785_v3, %v5479_v39 }
 0x2d1   : > { %v5500_v5 = vadd.f32 %v12863_v52, %v14757_v30  ;;  %v5491_v48 = vpop.f32.mrf.mxu0 }
 0x2d2   : > { %v5826_v8 = vshrl.u32 %v11867_v50, 16  ;;  %v11865_v25 = vpack.c.bf16 %v5680_v61, %v5680_v61  ;;  %v5683_v11 = vmax.f32 %v5651_v20, 0.0  ;;  %v5829_v35 = vshll.u32 %v11867_v50, 16  ;;  %v13386_v50 = vld [vmem:[%s16330_s4 + $0x180] sm:$0xff]  }
 0x2d3   : > { %v5649_v1 = vadd.f32 %v14817_v16, %v5610_v54  ;;  %v5615_v30 = vmul.f32 %v14785_v3, %v5500_v5  ;;  %v5492_v44 = vadd.f32 %v5491_v48, %v14741_v57  ;;  %v12864_v47 = vpop.f32.mrf.mxu0  ;;  %v6128_v57 = vld [vmem:[#allocation2 + $0xc] sm:$0xf]  ;;  %v6139_v48 = vld [vmem:[#allocation2 + $0x20] sm:$0x1] }
 0x2d4   : > { %v5828_v27 = vrot.slane %v5826_v8, 7  ;;  %v5809_v9 = vshrl.u32 %v11865_v25, 16  ;;  %v5812_v62 = vshll.u32 %v11865_v25, 16  ;;  %v11868_v43 = vpack.c.bf16 %v5683_v11, %v5683_v11 }
 0x2d5   : > { %v5681_v55 = vmax.f32 %v5649_v1, 0.0  ;;  %v5654_v38 = vadd.f32 %v14817_v16, %v5615_v30  ;;  %v5613_v60 = vmul.f32 %v14785_v3, %v5492_v44  ;;  %v5503_v59 = vadd.f32 %v12864_v47, %v14767_v37  ;;  %v5494_v46 = vpop.f32.mrf.mxu0  ;;  %v13294_v37 = vld [vmem:[%s16330_s4 + $0x128] sm:$0xff]  }
 0x2d6   : > { %v5831_v17 = vor.u32 %v5829_v35, %v5828_v27  ;;  %v5832_v33 = vrot.slane %v5828_v27, 4  ;;  %v5811_v21 = vrot.slane %v5809_v9, 7  ;;  %v5834_v39 = vshrl.u32 %v11868_v43, 16  ;;  %12598 = vmatpush3.bf16.msra.mxu1 %v13294_v37 }
 0x2d7   : > { %v5837_v45 = vshll.u32 %v11868_v43, 16  ;;  %v11866_v52 = vpack.c.bf16 %v5681_v55, %v5681_v55  ;;  %v5686_v58 = vmax.f32 %v5654_v38, 0.0  ;;  %v5652_v12 = vadd.f32 %v14817_v16, %v5613_v60  ;;  %v12867_v26 = vpop.f32.mrf.mxu0 }
 0x2d8   : > { %v6136_v61 = vsel %vm13673_vm10, %v5831_v17, %v6135_v7  ;;  %v5814_v20 = vor.u32 %v5812_v62, %v5811_v21  ;;  %v5815_v54 = vrot.slane %v5811_v21, 4  ;;  %v5836_v5 = vrot.slane %v5834_v39, 7  ;;  %v6132_v21 = vld [vmem:[#allocation2 + $0x14] sm:$0x1] }
 0x2d9   : > { %6137 = vst [vmem:[#allocation2 + $0x18] sm:$0xf] %v6136_v61  ;;  %v5817_v23 = vshrl.u32 %v11866_v52, 16  ;;  %v5820_v8 = vshll.u32 %v11866_v52, 16  ;;  %v11871_v25 = vpack.c.bf16 %v5686_v58, %v5686_v58  ;;  %v5684_v11 = vmax.f32 %v5652_v12, 0.0  ;;  %v5507_v35 = vpop.f32.mrf.mxu0 }
 0x2da   : > { %v6129_v1 = vsel %vm13673_vm10, %v5814_v20, %v6128_v57  ;;  %v5839_v30 = vor.u32 %v5837_v45, %v5836_v5  ;;  %v5841_v44 = vrot.slane %v5836_v5, 4  ;;  %v5616_v47 = vmul.f32 %v14785_v3, %v5503_v59  ;;  %v6149_v61 = vld [vmem:[#allocation2 + $0x30] sm:$0xf] }
 0x2db   : > { %6130 = vst [vmem:[#allocation2 + $0xc] sm:$0xf] %v6129_v1  ;;  %v5819_v27 = vrot.slane %v5817_v23, 7  ;;  %v5860_v9 = vshrl.u32 %v11871_v25, 16  ;;  %v5863_v62 = vshll.u32 %v11871_v25, 16  ;;  %v11869_v43 = vpack.c.bf16 %v5684_v11, %v5684_v11  ;;  %v12868_v7 = vpop.f32.mrf.mxu0 }
 0x2dc   : > { %v5840_v38 = vsel %vm13687_vm12, %v5832_v33, %v5839_v30  ;;  %v6140_v17 = vsel %vm13695_vm13, %v5841_v44, %v6139_v48  ;;  %v5655_v39 = vadd.f32 %v14817_v16, %v5616_v47  ;;  %v5495_v57 = vadd.f32 %v5494_v46, %v14760_v22  ;;  %v6142_v30 = vld [vmem:[#allocation2 + $0x24] sm:$0xf] }
 0x2dd   : > { %6138 = vst [vmem:[#allocation2 + $0x1c] sm:$0xf] %v5840_v38  ;;  %6141 = vst [vmem:[#allocation2 + $0x20] sm:$0x1] %v6140_v17  ;;  %v5822_v59 = vor.u32 %v5820_v8, %v5819_v27  ;;  %v5824_v45 = vrot.slane %v5819_v27, 4  ;;  %v14907_v52 = vrot.slane %v5860_v9, 7  ;;  %v5510_v12 = vpop.f32.mrf.mxu0  ;;  %v5516_v37 = vadd.f32 %v12867_v26, %v14777_v24 }
 0x2de   : > { %v5843_v58 = vshrl.u32 %v11869_v43, 16  ;;  %v5846_v20 = vshll.u32 %v11869_v43, 16  ;;  %v5687_v5 = vmax.f32 %v5655_v39, 0.0  ;;  %v5614_v33 = vmul.f32 %v14785_v3, %v5495_v57  ;;  %v13304_v43 = vld [vmem:[%s16330_s4 + $0x160] sm:$0xff]  }
 0x2df   : > { %v5823_v48 = vsel %vm13687_vm12, %v5815_v54, %v5822_v59  ;;  %v6133_v22 = vsel %vm13695_vm13, %v5824_v45, %v6132_v21  ;;  %v5865_v46 = vor.u32 %v5863_v62, %v14907_v52  ;;  %v5866_v23 = vrot.slane %v14907_v52, 4  ;;  %v12871_v8 = vpop.f32.mrf.mxu0  ;;  %12599 = vmatprep.subr.bf16.mxu1 %v13304_v43  ;;  %v13308_v45 = vld [vmem:[%s16330_s4 + $0x120] sm:$0xff]  }
 0x2e0   : > { %6131 = vst [vmem:[#allocation2 + $0x10] sm:$0xf] %v5823_v48  ;;  %6134 = vst [vmem:[#allocation2 + $0x14] sm:$0x1] %v6133_v22  ;;  %v14917_v25 = vrot.slane %v5843_v58, 7  ;;  %v11872_v11 = vpack.c.bf16 %v5687_v5, %v5687_v5  ;;  %v5653_v1 = vadd.f32 %v14817_v16, %v5614_v33  ;;  %v5619_v24 = vmul.f32 %v14785_v3, %v5516_v37 }
 0x2e1   : > { %v7074_v26 = vld [vmem:[#allocation2 + $0x18] sm:$0xf]  ;;  %v6150_v54 = vsel %vm13673_vm10, %v5865_v46, %v6149_v61  ;;  %v5508_v44 = vadd.f32 %v5507_v35, %v14770_v63  ;;  %v5519_v47 = vadd.f32 %v12868_v7, %v14788_v42  ;;  %v5511_v27 = vadd.f32 %v5510_v12, %v14780_v34  ;;  %v14926_v9 = vpop.f32.mrf.mxu0  ;;  %12600 = vmatpush3.bf16.msra.mxu1 %v13308_v45 }
 0x2e2   : > { %7106 = vst [vmem:[#allocation3 + $0x54] sm:$0xf] %v7074_v26  ;;  %v6244_v62 = vld [vmem:[#allocation2 + $0x18] sm:$0xf]  ;;  %6151 = vst [vmem:[#allocation2 + $0x30] sm:$0xf] %v6150_v54  ;;  %v5848_v38 = vor.u32 %v5846_v20, %v14917_v25  ;;  %v5658_v34 = vadd.f32 %v14817_v16, %v5619_v24  ;;  %v5532_v61 = vadd.f32 %v12871_v8, %v14791_v31 }
 0x2e3   : > { %v5849_v17 = vrot.slane %v14917_v25, 4  ;;  %v5868_v21 = vshrl.u32 %v11872_v11, 16  ;;  %v5871_v39 = vshll.u32 %v11872_v11, 16  ;;  %v7072_v63 = vld [vmem:[#allocation2 + $0xc] sm:$0xf]  ;;  %v5685_v42 = vmax.f32 %v5653_v1, 0.0  ;;  %v14936_v57 = vpop.f32.mrf.mxu0 }
 0x2e4   : > { %6276 = vst [vmem:[#allocation3 + $0x90] sm:$0xf] %v6244_v62  ;;  %v5617_v35 = vmul.f32 %v14785_v3, %v5508_v44  ;;  %v5620_v7 = vmul.f32 %v14785_v3, %v5519_v47  ;;  %7104 = vst [vmem:[#allocation3 + $0xc] sm:$0xf] %v7072_v63  ;;  %v6242_v59 = vld [vmem:[#allocation2 + $0xc] sm:$0xf]  ;;  %v6143_v52 = vsel %vm13673_vm10, %v5848_v38, %v6142_v30 }
 0x2e5   : > { %v5870_v58 = vrot.slane %v5868_v21, 7  ;;  %v5618_v12 = vmul.f32 %v14785_v3, %v5511_v27  ;;  %v7075_v20 = vld [vmem:[#allocation2 + $0x1c] sm:$0xf]  ;;  %6274 = vst [vmem:[#allocation3 + $0x48] sm:$0xf] %v6242_v59  ;;  %v11870_v33 = vpack.c.bf16 %v5685_v42, %v5685_v42  ;;  %v5690_v37 = vmax.f32 %v5658_v34, 0.0  ;;  %v14947_v46 = vpop.f32.mrf.mxu0 }
 0x2e6   : > { %6144 = vst [vmem:[#allocation2 + $0x24] sm:$0xf] %v6143_v52  ;;  %v6153_v5 = vld [vmem:[#allocation2 + $0x38] sm:$0x1]  ;;  %v5656_v48 = vadd.f32 %v14817_v16, %v5617_v35  ;;  %v5659_v22 = vadd.f32 %v14817_v16, %v5620_v7  ;;  %7107 = vst [vmem:[#allocation3 + $0x78] sm:$0xf] %v7075_v20  ;;  %v5623_v31 = vmul.f32 %v14785_v3, %v5532_v61 }
 0x2e7   : > { %v5873_v11 = vor.u32 %v5871_v39, %v5870_v58  ;;  %v5875_v1 = vrot.slane %v5870_v58, 4  ;;  %v5657_v24 = vadd.f32 %v14817_v16, %v5618_v12  ;;  %v6245_v8 = vld [vmem:[#allocation2 + $0x1c] sm:$0xf]  ;;  %v5851_v26 = vshrl.u32 %v11870_v33, 16  ;;  %v14951_v47 = vpop.f32.mrf.mxu0  ;;  %v7073_v27 = vld [vmem:[#allocation2 + $0x10] sm:$0xf] }
 0x2e8   : > { %v5854_v54 = vshll.u32 %v11870_v33, 16  ;;  %v11875_v30 = vpack.c.bf16 %v5690_v37, %v5690_v37  ;;  %v5688_v44 = vmax.f32 %v5656_v48, 0.0  ;;  %6277 = vst [vmem:[#allocation3 + $0xb4] sm:$0xf] %v6245_v8  ;;  %v5691_v38 = vmax.f32 %v5659_v22, 0.0  ;;  %v13315_v37 = vld [vmem:[%s16330_s4 + $0x1f8] sm:$0xff]  }
 0x2e9   : > { %v5874_v62 = vsel %vm13687_vm12, %v5866_v23, %v5873_v11  ;;  %v6154_v43 = vsel %vm13695_vm13, %v5875_v1, %v6153_v5  ;;  %v5689_v21 = vmax.f32 %v5657_v24, 0.0  ;;  %7105 = vst [vmem:[#allocation3 + $0x30] sm:$0xf] %v7073_v27  ;;  %v5853_v39 = vrot.slane %v5851_v26, 7  ;;  %v6243_v35 = vld [vmem:[#allocation2 + $0x10] sm:$0xf]  ;;  %v14960_v58 = vpop.f32.mrf.mxu0  ;;  %12705 = vmatprep.subr.bf16.mxu0 %v13315_v37 }
 0x2ea   : > { %6152 = vst [vmem:[#allocation2 + $0x34] sm:$0xf] %v5874_v62  ;;  %6155 = vst [vmem:[#allocation2 + $0x38] sm:$0x1] %v6154_v43  ;;  %v5894_v63 = vshrl.u32 %v11875_v30, 16  ;;  %v5897_v42 = vshll.u32 %v11875_v30, 16  ;;  %v11873_v34 = vpack.c.bf16 %v5688_v44, %v5688_v44  ;;  %v11876_v59 = vpack.c.bf16 %v5691_v38, %v5691_v38 }
 0x2eb   : > { %v6146_v7 = vld [vmem:[#allocation2 + $0x2c] sm:$0x1]  ;;  %v11874_v45 = vpack.c.bf16 %v5689_v21, %v5689_v21  ;;  %v5662_v52 = vadd.f32 %v14817_v16, %v5623_v31  ;;  %v5524_v23 = vadd.f32 %v14926_v9, %v14794_v2  ;;  %6275 = vst [vmem:[#allocation3 + $0x6c] sm:$0xf] %v6243_v35  ;;  %v5856_v12 = vor.u32 %v5854_v54, %v5853_v39  ;;  %v6163_v5 = vld [vmem:[#allocation2 + $0x48] sm:$0xf]  ;;  %v12876_v43 = vpop.f32.mrf.mxu0 }
 0x2ec   : > { %v5858_v61 = vrot.slane %v5853_v39, 4  ;;  %v5896_v20 = vrot.slane %v5894_v63, 7  ;;  %v5877_v33 = vshrl.u32 %v11873_v34, 16  ;;  %v5880_v48 = vshll.u32 %v11873_v34, 16  ;;  %v6156_v26 = vld [vmem:[#allocation2 + $0x3c] sm:$0xf] }
 0x2ed   : > { %v5902_v22 = vshrl.u32 %v11876_v59, 16  ;;  %v5905_v11 = vshll.u32 %v11876_v59, 16  ;;  %v5885_v1 = vshrl.u32 %v11874_v45, 16  ;;  %v7076_v24 = vld [vmem:[#allocation2 + $0x24] sm:$0xf]  ;;  %v5857_v2 = vsel %vm13687_vm12, %v5849_v17, %v5856_v12  ;;  %v13316_v44 = vld [vmem:[%s16330_s4 + $0x1b8] sm:$0xff]  }
 0x2ee   : > { %v6147_v9 = vsel %vm13695_vm13, %v5858_v61, %v6146_v7  ;;  %v5899_v31 = vor.u32 %v5897_v42, %v5896_v20  ;;  %v5900_v8 = vrot.slane %v5896_v20, 4  ;;  %v6167_v54 = vld [vmem:[#allocation2 + $0x50] sm:$0x1]  ;;  %7108 = vst [vmem:[#allocation3 + $0x9c] sm:$0xf] %v7076_v24  ;;  %v5879_v25 = vrot.slane %v5877_v33, 7 }
 0x2ef   : > { %v7078_v30 = vld [vmem:[#allocation2 + $0x30] sm:$0xf]  ;;  %6145 = vst [vmem:[#allocation2 + $0x28] sm:$0xf] %v5857_v2  ;;  %6148 = vst [vmem:[#allocation2 + $0x2c] sm:$0x1] %v6147_v9  ;;  %v5621_v63 = vmul.f32 %v14785_v3, %v5524_v23  ;;  %v5535_v42 = vadd.f32 %v14936_v57, %v14802_v10 }
 0x2f0   : > { %v5904_v27 = vrot.slane %v5902_v22, 7  ;;  %v5887_v62 = vrot.slane %v5885_v1, 7  ;;  %v5888_v17 = vshll.u32 %v11874_v45, 16  ;;  %7110 = vst [vmem:[#allocation3 + $0xe4] sm:$0xf] %v7078_v30  ;;  %v6164_v21 = vsel %vm13673_vm10, %v5899_v31, %v6163_v5  ;;  %v13320_v10 = vld [vmem:[%s16330_s4 + $0x158] sm:$0xff]  }
 0x2f1   : > { %v6246_v38 = vld [vmem:[#allocation2 + $0x24] sm:$0xf]  ;;  %v5694_v39 = vmax.f32 %v5662_v52, 0.0  ;;  %6165 = vst [vmem:[#allocation2 + $0x48] sm:$0xf] %v6164_v21  ;;  %v5882_v7 = vor.u32 %v5880_v48, %v5879_v25  ;;  %v5883_v59 = vrot.slane %v5879_v25, 4  ;;  %v5660_v52 = vadd.f32 %v14817_v16, %v5621_v63  ;;  %12601 = vmatprep.subr.bf16.mxu1 %v13320_v10 }
 0x2f2   : > { %v13256_v34 = vld [vmem:[#allocation3 + $0x8] ss:$36 sps:$4 sm:$0xff]   ;;  %6278 = vst [vmem:[#allocation3 + $0xd8] sm:$0xf] %v6246_v38  ;;  %v5907_v12 = vor.u32 %v5905_v11, %v5904_v27  ;;  %v5909_v45 = vrot.slane %v5904_v27, 4  ;;  %v5890_v33 = vor.u32 %v5888_v17, %v5887_v62  ;;  %v5892_v37 = vrot.slane %v5887_v62, 4  ;;  %v5542_v11 = vpop.f32.mrf.mxu0 }
 0x2f3   : > { %v13258_v35 = vld [vmem:[#allocation3 + $0xc] ss:$36 sps:$4 sm:$0xff]   ;;  %v7079_v20 = vld [vmem:[#allocation2 + $0x34] sm:$0xf]  ;;  %v11879_v22 = vpack.c.bf16 %v5694_v39, %v5694_v39  ;;  %v6157_v57 = vsel %vm13673_vm10, %v5882_v7, %v6156_v26  ;;  %v5624_v48 = vmul.f32 %v14785_v3, %v5535_v42  ;;  %v6248_v1 = vld [vmem:[#allocation2 + $0x30] sm:$0xf]  ;;  %v5527_v30 = vadd.f32 %v14947_v46, %v14797_v4 }
 0x2f4   : > { %v6160_v61 = vld [vmem:[#allocation2 + $0x44] sm:$0x1]  ;;  %10401 = vmatprep.mubr.bf16.mxu0 %v13258_v35  ;;  %7111 = vst [vmem:[#allocation3 + $0x108] sm:$0xf] %v7079_v20  ;;  %v5908_v23 = vsel %vm13687_vm12, %v5900_v8, %v5907_v12  ;;  %v6168_v5 = vsel %vm13695_vm13, %v5909_v45, %v6167_v54  ;;  %v6249_v24 = vld [vmem:[#allocation2 + $0x34] sm:$0xf]  ;;  %v5891_v2 = vsel %vm13687_vm12, %v5883_v59, %v5890_v33 }
 0x2f5   : > { %10402 = vmatmul.mubr.bf16.vlgmr.msra.gmra.mxu0 %v13256_v34  ;;  %6158 = vst [vmem:[#allocation2 + $0x3c] sm:$0xf] %v6157_v57  ;;  %6166 = vst [vmem:[#allocation2 + $0x4c] sm:$0xf] %v5908_v23  ;;  %v6161_v9 = vsel %vm13695_vm13, %v5892_v37, %v6160_v61  ;;  %v5928_v31 = vshrl.u32 %v11879_v22, 16  ;;  %v5931_v8 = vshll.u32 %v11879_v22, 16  ;;  %v5663_v54 = vadd.f32 %v14817_v16, %v5624_v48 }
 0x2f6   : > { %6169 = vst [vmem:[#allocation2 + $0x50] sm:$0x1] %v6168_v5  ;;  %6280 = vst [vmem:[#allocation3 + $0x120] sm:$0xf] %v6248_v1  ;;  %12706 = vmatpush3.bf16.msra.mxu0 %v13316_v44  ;;  %v5692_v26 = vmax.f32 %v5660_v52, 0.0  ;;  %v5548_v25 = vadd.f32 %v14951_v47, %v14820_v40  ;;  %v13324_v27 = vld [vmem:[%s16330_s4 + $0x118] sm:$0xff]   ;;  %v5540_v44 = vadd.f32 %v14960_v58, %v14805_v41  ;;  %v15014_v58 = vpop.f32.mrf.mxu0 }
 0x2f7   : > { %6281 = vst [vmem:[#allocation3 + $0x144] sm:$0xf] %v6249_v24  ;;  %6159 = vst [vmem:[#allocation2 + $0x40] sm:$0xf] %v5891_v2  ;;  %v7904_v62 = vld [vmem:[#allocation2 + $0x18] sm:$0xf]  ;;  %v5551_v38 = vadd.f32 %v12876_v43, %v14827_v0  ;;  %v5543_v21 = vadd.f32 %v5542_v11, %v14823_v56  ;;  %v5622_v40 = vmul.f32 %v14785_v3, %v5527_v30  ;;  %12602 = vmatpush3.bf16.msra.mxu1 %v13324_v27 }
 0x2f8   : > { %6162 = vst [vmem:[#allocation2 + $0x44] sm:$0x1] %v6161_v9  ;;  %v15002_v17 = vrot.slane %v5928_v31, 7  ;;  %v7077_v39 = vld [vmem:[#allocation2 + $0x28] sm:$0xf]  ;;  %v11877_v46 = vpack.c.bf16 %v5692_v26, %v5692_v26  ;;  %v5695_v63 = vmax.f32 %v5663_v54, 0.0  ;;  %v5627_v47 = vmul.f32 %v14785_v3, %v5548_v25  ;;  %v15025_v9 = vpop.f32.mrf.mxu0 }
 0x2f9   : > { %7936 = vst [vmem:[#allocation3 + $0x18] sm:$0xf] %v7904_v62  ;;  %v6177_v4 = vld [vmem:[#allocation2 + $0x60] sm:$0xf]  ;;  %7109 = vst [vmem:[#allocation3 + $0xc0] sm:$0xf] %v7077_v39  ;;  %v5625_v0 = vmul.f32 %v14785_v3, %v5540_v44  ;;  %v5628_v56 = vmul.f32 %v14785_v3, %v5551_v38  ;;  %v5661_v59 = vadd.f32 %v14817_v16, %v5622_v40 }
 0x2fa   : > { %v6247_v42 = vld [vmem:[#allocation2 + $0x28] sm:$0xf]  ;;  %v5933_v34 = vor.u32 %v5931_v8, %v15002_v17  ;;  %v5934_v41 = vrot.slane %v15002_v17, 4  ;;  %v5911_v43 = vshrl.u32 %v11877_v46, 16  ;;  %v5914_v35 = vshll.u32 %v11877_v46, 16  ;;  %v13331_v8 = vld [vmem:[%s16330_s4 + $0x1f0] sm:$0xff]  }
 0x2fb   : > { %6279 = vst [vmem:[#allocation3 + $0xfc] sm:$0xf] %v6247_v42  ;;  %v11880_v7 = vpack.c.bf16 %v5695_v63, %v5695_v63  ;;  %v7082_v12 = vld [vmem:[#allocation2 + $0x48] sm:$0xf]  ;;  %v6170_v61 = vld [vmem:[#allocation2 + $0x54] sm:$0xf]  ;;  %v5666_v20 = vadd.f32 %v14817_v16, %v5627_v47  ;;  %v5664_v33 = vadd.f32 %v14817_v16, %v5625_v0  ;;  %v5667_v37 = vadd.f32 %v14817_v16, %v5628_v56 }
 0x2fc   : > { %v6178_v45 = vsel %vm13673_vm10, %v5933_v34, %v6177_v4  ;;  %7114 = vst [vmem:[#allocation3 + $0x174] sm:$0xf] %v7082_v12  ;;  %v6252_v22 = vld [vmem:[#allocation2 + $0x48] sm:$0xf]  ;;  %v7905_v52 = vld [vmem:[#allocation2 + $0x1c] sm:$0xf]  ;;  %v5626_v2 = vmul.f32 %v14785_v3, %v5543_v21  ;;  %12707 = vmatprep.subr.bf16.mxu0 %v13331_v8 }
 0x2fd   : > { %6179 = vst [vmem:[#allocation2 + $0x60] sm:$0xf] %v6178_v45  ;;  %v15022_v10 = vrot.slane %v5911_v43, 7  ;;  %v5936_v57 = vshrl.u32 %v11880_v7, 16  ;;  %v5939_v23 = vshll.u32 %v11880_v7, 16  ;;  %v5693_v5 = vmax.f32 %v5661_v59, 0.0  ;;  %v12880_v43 = vpop.f32.mrf.mxu0 }
 0x2fe   : > { %v7080_v48 = vld [vmem:[#allocation2 + $0x3c] sm:$0xf]  ;;  %6284 = vst [vmem:[#allocation3 + $0x1b0] sm:$0xf] %v6252_v22  ;;  %7937 = vst [vmem:[#allocation3 + $0x3c] sm:$0xf] %v7905_v52  ;;  %v5665_v38 = vadd.f32 %v14817_v16, %v5626_v2 }
 0x2ff   : > { %v5698_v11 = vmax.f32 %v5666_v20, 0.0  ;;  %v5696_v1 = vmax.f32 %v5664_v33, 0.0  ;;  %v5699_v24 = vmax.f32 %v5667_v37, 0.0  ;;  %v7081_v31 = vld [vmem:[#allocation2 + $0x40] sm:$0xf]  ;;  %v5916_v26 = vor.u32 %v5914_v35, %v15022_v10  ;;  %v5558_v2 = vpop.f32.mrf.mxu0 }
 0x300   : > { %7112 = vst [vmem:[#allocation3 + $0x12c] sm:$0xf] %v7080_v48  ;;  %v5917_v54 = vrot.slane %v15022_v10, 4  ;;  %v5938_v30 = vrot.slane %v5936_v57, 7  ;;  %v11878_v25 = vpack.c.bf16 %v5693_v5, %v5693_v5  ;;  %7113 = vst [vmem:[#allocation3 + $0x150] sm:$0xf] %v7081_v31 }
 0x301   : > { %v6181_v27 = vld [vmem:[#allocation2 + $0x68] sm:$0x1]  ;;  %v11883_v62 = vpack.c.bf16 %v5698_v11, %v5698_v11  ;;  %v11881_v17 = vpack.c.bf16 %v5696_v1, %v5696_v1  ;;  %v15032_v44 = vpack.c.bf16 %v5699_v24, %v5699_v24  ;;  %v7083_v21 = vld [vmem:[#allocation2 + $0x4c] sm:$0xf]  ;;  %v6250_v39 = vld [vmem:[#allocation2 + $0x3c] sm:$0xf]  ;;  %v6171_v4 = vsel %vm13673_vm10, %v5916_v26, %v6170_v61 }
 0x302   : > { %v5941_v46 = vor.u32 %v5939_v23, %v5938_v30  ;;  %v5943_v63 = vrot.slane %v5938_v30, 4  ;;  %v5919_v40 = vshrl.u32 %v11878_v25, 16  ;;  %7115 = vst [vmem:[#allocation3 + $0x198] sm:$0xf] %v7083_v21  ;;  %v6251_v47 = vld [vmem:[#allocation2 + $0x40] sm:$0xf]  ;;  %v5564_v23 = vadd.f32 %v15014_v58, %v14848_v18 }
 0x303   : > { %6282 = vst [vmem:[#allocation3 + $0x168] sm:$0xf] %v6250_v39  ;;  %6172 = vst [vmem:[#allocation2 + $0x54] sm:$0xf] %v6171_v4  ;;  %v5922_v42 = vshll.u32 %v11878_v25, 16  ;;  %v5962_v34 = vshrl.u32 %v11883_v62, 16 }
 0x304   : > { %v5965_v0 = vshll.u32 %v11883_v62, 16  ;;  %v5945_v56 = vshrl.u32 %v11881_v17, 16  ;;  %6283 = vst [vmem:[#allocation3 + $0x18c] sm:$0xf] %v6251_v47  ;;  %v5942_v35 = vsel %vm13687_vm12, %v5934_v41, %v5941_v46  ;;  %v6182_v7 = vsel %vm13695_vm13, %v5943_v63, %v6181_v27  ;;  %v6174_v12 = vld [vmem:[#allocation2 + $0x5c] sm:$0x1] }
 0x305   : > { %v5921_v59 = vrot.slane %v5919_v40, 7  ;;  %v5948_v45 = vshll.u32 %v11881_v17, 16  ;;  %6180 = vst [vmem:[#allocation2 + $0x64] sm:$0xf] %v5942_v35  ;;  %6183 = vst [vmem:[#allocation2 + $0x68] sm:$0x1] %v6182_v7  ;;  %v5631_v17 = vmul.f32 %v14785_v3, %v5564_v23  ;;  %v12883_v35 = vpop.f32.mrf.mxu0 }
 0x306   : > { %v5964_v61 = vrot.slane %v5962_v34, 7  ;;  %v6191_v20 = vld [vmem:[#allocation2 + $0x78] sm:$0xf]  ;;  %v15041_v33 = vrot.slane %v5945_v56, 7  ;;  %v5970_v37 = vshrl.u32 %v15032_v44, 16  ;;  %v5973_v22 = vshll.u32 %v15032_v44, 16 }
 0x307   : > { %v5924_v52 = vor.u32 %v5922_v42, %v5921_v59  ;;  %v5926_v10 = vrot.slane %v5921_v59, 4  ;;  %v6184_v57 = vld [vmem:[#allocation2 + $0x6c] sm:$0xf]  ;;  %v5697_v41 = vmax.f32 %v5665_v38, 0.0  ;;  %v7086_v31 = vld [vmem:[#allocation2 + $0x60] sm:$0xf]  ;;  %v5556_v44 = vadd.f32 %v15025_v9, %v14830_v14 }
 0x308   : > { %v6253_v5 = vld [vmem:[#allocation2 + $0x4c] sm:$0xf]  ;;  %v5967_v48 = vor.u32 %v5965_v0, %v5964_v61  ;;  %v5968_v11 = vrot.slane %v5964_v61, 4  ;;  %v5950_v1 = vor.u32 %v5948_v45, %v15041_v33  ;;  %v5951_v24 = vrot.slane %v15041_v33, 4  ;;  %v6195_v25 = vld [vmem:[#allocation2 + $0x80] sm:$0x1] }
 0x309   : > { %6285 = vst [vmem:[#allocation3 + $0x1d4] sm:$0xf] %v6253_v5  ;;  %v5925_v8 = vsel %vm13687_vm12, %v5917_v54, %v5924_v52  ;;  %v6175_v26 = vsel %vm13695_vm13, %v5926_v10, %v6174_v12  ;;  %v5972_v30 = vrot.slane %v5970_v37, 7  ;;  %v11882_v27 = vpack.c.bf16 %v5697_v41, %v5697_v41  ;;  %7118 = vst [vmem:[#allocation3 + $0x204] sm:$0xf] %v7086_v31  ;;  %v13332_v58 = vld [vmem:[%s16330_s4 + $0x1b0] sm:$0xff]   ;;  %v5571_v31 = vpop.f32.mrf.mxu0 }
 0x30a   : > { %v6256_v18 = vld [vmem:[#allocation2 + $0x60] sm:$0xf]  ;;  %6173 = vst [vmem:[#allocation2 + $0x58] sm:$0xf] %v5925_v8  ;;  %6176 = vst [vmem:[#allocation2 + $0x5c] sm:$0x1] %v6175_v26  ;;  %v6192_v62 = vsel %vm13673_vm10, %v5967_v48, %v6191_v20  ;;  %v6185_v54 = vsel %vm13673_vm10, %v5950_v1, %v6184_v57  ;;  %12708 = vmatpush3.bf16.msra.mxu0 %v13332_v58  ;;  %v5670_v14 = vadd.f32 %v14817_v16, %v5631_v17 }
 0x30b   : > { %v6803_v38 = vld [vmem:[#allocation2 + $0xc] sm:$0xe]  ;;  %6288 = vst [vmem:[#allocation3 + $0x240] sm:$0xf] %v6256_v18  ;;  %v13336_v21 = vld [vmem:[%s16330_s4 + $0x150] sm:$0xff]   ;;  %v5975_v4 = vor.u32 %v5973_v22, %v5972_v30  ;;  %v5977_v46 = vrot.slane %v5972_v30, 4  ;;  %v5629_v9 = vmul.f32 %v14785_v3, %v5556_v44  ;;  %v5567_v42 = vadd.f32 %v12880_v43, %v14851_v36 }
 0x30c   : > { %v13340_v39 = vld [vmem:[%s16330_s4 + $0x110] sm:$0xff]   ;;  %6193 = vst [vmem:[#allocation2 + $0x78] sm:$0xf] %v6192_v62  ;;  %6186 = vst [vmem:[#allocation2 + $0x6c] sm:$0xf] %v6185_v54  ;;  %v5953_v63 = vshrl.u32 %v11882_v27, 16  ;;  %v5559_v34 = vadd.f32 %v5558_v2, %v14843_v19  ;;  %12603 = vmatprep.subr.bf16.mxu1 %v13336_v21  ;;  %v5580_v21 = vadd.f32 %v12883_v35, %v14857_v28 }
 0x30d   : > { %v5956_v40 = vshll.u32 %v11882_v27, 16  ;;  %v7084_v47 = vld [vmem:[#allocation2 + $0x54] sm:$0xf]  ;;  %v6804_v0 = vld [vmem:[#allocation2 + $0x10] sm:$0xf]  ;;  %v5976_v59 = vsel %vm13687_vm12, %v5968_v11, %v5975_v4  ;;  %v6196_v12 = vsel %vm13695_vm13, %v5977_v46, %v6195_v25  ;;  %v11596_v61 = vrot.slane %v6803_v38, 9  ;;  %12604 = vmatpush3.bf16.msra.mxu1 %v13340_v39 }
 0x30e   : > { %v6805_v56 = vld [vmem:[#allocation2 + $0x14] sm:$0x1]  ;;  %7116 = vst [vmem:[#allocation3 + $0x1bc] sm:$0xf] %v7084_v47  ;;  %v5955_v45 = vrot.slane %v5953_v63, 7  ;;  %v5702_v36 = vmax.f32 %v5670_v14, 0.0  ;;  %v5668_v43 = vadd.f32 %v14817_v16, %v5629_v9  ;;  %v5632_v37 = vmul.f32 %v14785_v3, %v5567_v42 }
 0x30f   : > { %v6254_v7 = vld [vmem:[#allocation2 + $0x54] sm:$0xf]  ;;  %v7087_v20 = vld [vmem:[#allocation2 + $0x64] sm:$0xf]  ;;  %6194 = vst [vmem:[#allocation2 + $0x7c] sm:$0xf] %v5976_v59  ;;  %v5630_v22 = vmul.f32 %v14785_v3, %v5559_v34  ;;  %v5572_v39 = vadd.f32 %v5571_v31, %v14860_v6  ;;  %v5635_v34 = vmul.f32 %v14785_v3, %v5580_v21 }
 0x310   : > { %6286 = vst [vmem:[#allocation3 + $0x1f8] sm:$0xf] %v6254_v7  ;;  %6197 = vst [vmem:[#allocation2 + $0x80] sm:$0x1] %v6196_v12  ;;  %v6188_v19 = vld [vmem:[#allocation2 + $0x74] sm:$0x1]  ;;  %v5958_v10 = vor.u32 %v5956_v40, %v5955_v45  ;;  %v11887_v48 = vpack.c.bf16 %v5702_v36, %v5702_v36  ;;  %v5671_v1 = vadd.f32 %v14817_v16, %v5632_v37 }
 0x311   : > { %7119 = vst [vmem:[#allocation3 + $0x228] sm:$0xf] %v7087_v20  ;;  %v6257_v52 = vld [vmem:[#allocation2 + $0x64] sm:$0xf]  ;;  %v5960_v57 = vrot.slane %v5955_v45, 4  ;;  %v6905_v41 = vrot.slane %v6804_v0, 5  ;;  %v5669_v2 = vadd.f32 %v14817_v16, %v5630_v22  ;;  %v5633_v0 = vmul.f32 %v14785_v3, %v5572_v39 }
 0x312   : > { %v6908_v23 = vrot.slane %v6805_v56, 5  ;;  %6289 = vst [vmem:[#allocation3 + $0x264] sm:$0xf] %v6257_v52  ;;  %v13347_v5 = vld [vmem:[%s16330_s4 + $0x1e8] sm:$0xff]   ;;  %v5700_v11 = vmax.f32 %v5668_v43, 0.0  ;;  %v5959_v26 = vsel %vm13687_vm12, %v5951_v24, %v5958_v10  ;;  %v5996_v62 = vshrl.u32 %v11887_v48, 16  ;;  %v12884_v43 = vpop.f32.mrf.mxu0 }
 0x313   : > { %v13348_v8 = vld [vmem:[%s16330_s4 + $0x1a8] sm:$0xff]   ;;  %v6189_v30 = vsel %vm13695_vm13, %v5960_v57, %v6188_v19  ;;  %v6906_v27 = vsel %vm13679_vm11, %v11596_v61, %v6905_v41  ;;  %v6907_v18 = vrot.slane %v6905_v41, 4  ;;  %v7085_v58 = vld [vmem:[#allocation2 + $0x58] sm:$0xf]  ;;  %12709 = vmatprep.subr.bf16.mxu0 %v13347_v5  ;;  %6187 = vst [vmem:[#allocation2 + $0x70] sm:$0xf] %v5959_v26  ;;  %v5674_v36 = vadd.f32 %v14817_v16, %v5635_v34 }
 0x314   : > { %6190 = vst [vmem:[#allocation2 + $0x74] sm:$0x1] %v6189_v30  ;;  %v5999_v54 = vshll.u32 %v11887_v48, 16  ;;  %v11885_v17 = vpack.c.bf16 %v5700_v11, %v5700_v11  ;;  %v5703_v44 = vmax.f32 %v5671_v1, 0.0  ;;  %7042 = vst [vmem:[#allocation3 + $0x50] sm:$0xf] %v6906_v27  ;;  %12710 = vmatpush3.bf16.msra.mxu0 %v13348_v8  ;;  %v5672_v11 = vadd.f32 %v14817_v16, %v5633_v0 }
 0x315   : > { %v15096_v33 = vld [vmem:[#allocation2 + $0xc] sm:$0xf]  ;;  %7117 = vst [vmem:[#allocation3 + $0x1e0] sm:$0xf] %v7085_v58  ;;  %v5701_v24 = vmax.f32 %v5669_v2, 0.0  ;;  %v6909_v38 = vsel %vm13679_vm11, %v6907_v18, %v6908_v23  ;;  %v5998_v46 = vrot.slane %v5996_v62, 7 }
 0x316   : > { %v6255_v4 = vld [vmem:[#allocation2 + $0x58] sm:$0xf]  ;;  %v6205_v63 = vld [vmem:[#allocation2 + $0x90] sm:$0xf]  ;;  %v5979_v40 = vshrl.u32 %v11885_v17, 16  ;;  %v5982_v47 = vshll.u32 %v11885_v17, 16  ;;  %v11888_v14 = vpack.c.bf16 %v5703_v44, %v5703_v44  ;;  %v5583_v44 = vadd.f32 %v12884_v43, %v14863_v53 }
 0x317   : > { %7043 = vst [vmem:[#allocation3 + $0x74] sm:$0xf] %v6909_v38  ;;  %6287 = vst [vmem:[#allocation3 + $0x21c] sm:$0xf] %v6255_v4  ;;  %v6198_v9 = vld [vmem:[#allocation2 + $0x84] sm:$0xf]  ;;  %v11886_v42 = vpack.c.bf16 %v5701_v24, %v5701_v24  ;;  %v6001_v28 = vor.u32 %v5999_v54, %v5998_v46  ;;  %v15119_v24 = vpop.f32.mrf.mxu0 }
 0x318   : > { %v6377_v56 = vshrl.u32 %v15096_v33, 16  ;;  %v7088_v7 = vld [vmem:[#allocation2 + $0x6c] sm:$0xf]  ;;  %v6002_v35 = vrot.slane %v5998_v46, 4  ;;  %v5981_v6 = vrot.slane %v5979_v40, 7  ;;  %v6004_v59 = vshrl.u32 %v11888_v14, 16 }
 0x319   : > { %7120 = vst [vmem:[#allocation3 + $0x24c] sm:$0xf] %v7088_v7  ;;  %v7090_v12 = vld [vmem:[#allocation2 + $0x78] sm:$0xf]  ;;  %v13352_v45 = vld [vmem:[%s16330_s4 + $0x148] sm:$0xff]   ;;  %v6007_v61 = vshll.u32 %v11888_v14, 16  ;;  %v6206_v22 = vsel %vm13673_vm10, %v6001_v28, %v6205_v63  ;;  %v15131_v14 = vadd.f32 %v14884_v15, %v14750_v49 }
 0x31a   : > { %v5987_v20 = vshrl.u32 %v11886_v42, 16  ;;  %v5990_v19 = vshll.u32 %v11886_v42, 16  ;;  %v7091_v3 = vld [vmem:[#allocation2 + $0x7c] sm:$0xf]  ;;  %7122 = vst [vmem:[#allocation3 + $0x294] sm:$0xf] %v7090_v12  ;;  %v5984_v52 = vor.u32 %v5982_v47, %v5981_v6  ;;  %12605 = vmatprep.subr.bf16.mxu1 %v13352_v45  ;;  %v15143_v12 = vpop.f32.mrf.mxu0 }
 0x31b   : > { %v13356_v37 = vld [vmem:[%s16330_s4 + $0x108] sm:$0xff]   ;;  %v5985_v10 = vrot.slane %v5981_v6, 4  ;;  %v6006_v57 = vrot.slane %v6004_v59, 7  ;;  %v6209_v41 = vld [vmem:[#allocation2 + $0x98] sm:$0x1]  ;;  %v5706_v48 = vmax.f32 %v5674_v36, 0.0 }
 0x31c   : > { %7123 = vst [vmem:[#allocation3 + $0x2b8] sm:$0xf] %v7091_v3  ;;  %v6258_v23 = vld [vmem:[#allocation2 + $0x6c] sm:$0xf]  ;;  %6207 = vst [vmem:[#allocation2 + $0x90] sm:$0xf] %v6206_v22  ;;  %12606 = vmatpush3.bf16.msra.mxu1 %v13356_v37  ;;  %v6199_v31 = vsel %vm13673_vm10, %v5984_v52, %v6198_v9 }
 0x31d   : > { %v5989_v5 = vrot.slane %v5987_v20, 7  ;;  %v6379_v1 = vrot.slane %v6377_v56, 4  ;;  %v7089_v2 = vld [vmem:[#allocation2 + $0x70] sm:$0xf]  ;;  %6290 = vst [vmem:[#allocation3 + $0x288] sm:$0xf] %v6258_v23  ;;  %v6009_v8 = vor.u32 %v6007_v61, %v6006_v57  ;;  %v11891_v17 = vpack.c.bf16 %v5706_v48, %v5706_v48 }
 0x31e   : > { %v6011_v26 = vrot.slane %v6006_v57, 4  ;;  %v6202_v30 = vld [vmem:[#allocation2 + $0x8c] sm:$0x1]  ;;  %v6308_v27 = vld [vmem:[#allocation2 + $0x10] sm:$0xf]  ;;  %v6380_v18 = vshll.u32 %v15096_v33, 16 }
 0x31f   : > { %7121 = vst [vmem:[#allocation3 + $0x270] sm:$0xf] %v7089_v2  ;;  %6200 = vst [vmem:[#allocation2 + $0x84] sm:$0xf] %v6199_v31  ;;  %v5992_v58 = vor.u32 %v5990_v19, %v5989_v5  ;;  %v5994_v62 = vrot.slane %v5989_v5, 4  ;;  %v6010_v38 = vsel %vm13687_vm12, %v6002_v35, %v6009_v8  ;;  %v5704_v4 = vmax.f32 %v5672_v11, 0.0 }
 0x320   : > { %v13263_v54 = vld [vmem:[#allocation3 + $0x54] ss:$36 sps:$4 sm:$0xff]   ;;  %v6309_v16 = vld [vmem:[#allocation2 + $0x14] sm:$0x1]  ;;  %v6210_v21 = vsel %vm13695_vm13, %v6011_v26, %v6209_v41  ;;  %v6382_v33 = vrot.slane %v6380_v18, 5  ;;  %v6030_v40 = vshrl.u32 %v11891_v17, 16 }
 0x321   : > { %v13261_v39 = vld [vmem:[#allocation3 + $0x50] ss:$36 sps:$4 sm:$0xff]   ;;  %v6259_v46 = vld [vmem:[#allocation2 + $0x70] sm:$0xf]  ;;  %6208 = vst [vmem:[#allocation2 + $0x94] sm:$0xf] %v6010_v38  ;;  %v5993_v63 = vsel %vm13687_vm12, %v5985_v10, %v5992_v58  ;;  %v6203_v53 = vsel %vm13695_vm13, %v5994_v62, %v6202_v30  ;;  %10409 = vmatprep.mubr.bf16.mxu0 %v13263_v54  ;;  %v11889_v42 = vpack.c.bf16 %v5704_v4, %v5704_v4  ;;  %v5587_v54 = vpop.f32.mrf.mxu0 }
 0x322   : > { %6211 = vst [vmem:[#allocation2 + $0x98] sm:$0x1] %v6210_v21  ;;  %v6806_v47 = vld [vmem:[#allocation2 + $0x18] sm:$0xe]  ;;  %6291 = vst [vmem:[#allocation3 + $0x2ac] sm:$0xf] %v6259_v46  ;;  %v6383_v34 = vor.u32 %v6382_v33, %v6379_v1  ;;  %10410 = vmatmul.mubr.bf16.gmra.mxu0 %v13261_v39 }
 0x323   : > { %6201 = vst [vmem:[#allocation2 + $0x88] sm:$0xf] %v5993_v63  ;;  %6204 = vst [vmem:[#allocation2 + $0x8c] sm:$0x1] %v6203_v53  ;;  %v6219_v9 = vld [vmem:[#allocation2 + $0xa8] sm:$0xf] }
 0x324   : > { %v6386_v0 = vshll.u32 %v6308_v27, 16  ;;  %v6390_v56 = vshrl.u32 %v6308_v27, 16  ;;  %v6807_v7 = vld [vmem:[#allocation2 + $0x1c] sm:$0xf]  ;;  %v15133_v28 = vld [vmem:[#allocation2 + $0x18] sm:$0xf] }
 0x325   : > { %v15135_v35 = vrot.slane %v6030_v40, 7  ;;  %v6033_v6 = vshll.u32 %v11891_v17, 16  ;;  %v6396_v59 = vshll.u32 %v6309_v16, 16  ;;  %v15140_v49 = vld [vmem:[%s16328_s2] ss:$0 sm:$0xff]  ;;  %v6013_v20 = vshrl.u32 %v11889_v42, 16 }
 0x326   : > { %v5636_v15 = vmul.f32 %v15140_v49, %v5583_v44  ;;  %v6260_v45 = vld [vmem:[#allocation2 + $0x78] sm:$0xf]  ;;  %v13363_v61 = vld [vmem:[%s16330_s4 + $0x1e0] sm:$0xff]   ;;  %v6384_v19 = vrot.slane %v6383_v34, 4  ;;  %v6388_v36 = vrot.slane %v6386_v0, 5  ;;  %v11597_v43 = vrot.slane %v6806_v47, 9 }
 0x327   : > { %v6261_v3 = vld [vmem:[#allocation2 + $0x7c] sm:$0xf]  ;;  %6292 = vst [vmem:[#allocation3 + $0x2d0] sm:$0xf] %v6260_v45  ;;  %v6035_v37 = vor.u32 %v6033_v6, %v15135_v35  ;;  %v6036_v22 = vrot.slane %v15135_v35, 4  ;;  %v6016_v52 = vshll.u32 %v11889_v42, 16  ;;  %12711 = vmatprep.subr.bf16.mxu0 %v13363_v61 }
 0x328   : > { %v6392_v10 = vrot.slane %v6390_v56, 4  ;;  %v6808_v57 = vld [vmem:[#allocation2 + $0x20] sm:$0x1]  ;;  %6293 = vst [vmem:[#allocation3 + $0x2f4] sm:$0xf] %v6261_v3  ;;  %v15153_v23 = vrot.slane %v6013_v20, 7  ;;  %v6389_v11 = vsel %vm13658_vm8, %v6384_v19, %v6388_v36  ;;  %v5596_v3 = vadd.f32 %v15143_v12, %v14876_v32 }
 0x329   : > { %v13364_v41 = vld [vmem:[%s16330_s4 + $0x1a0] sm:$0xff]   ;;  %v6212_v5 = vld [vmem:[#allocation2 + $0x9c] sm:$0xf]  ;;  %v6912_v31 = vrot.slane %v6807_v7, 5  ;;  %v6220_v26 = vsel %vm13673_vm10, %v6035_v37, %v6219_v9  ;;  %v6398_v27 = vrot.slane %v6396_v59, 5  ;;  %v6401_v62 = vshrl.u32 %v15133_v28, 16 }
 0x32a   : > { %v15160_v1 = vld [vmem:[%s16329_s3] ss:$0 sm:$0xff]  ;;  %v7092_v8 = vld [vmem:[#allocation2 + $0x84] sm:$0xf]  ;;  %v6393_v30 = vor.u32 %v6392_v10, %v6388_v36  ;;  %6770 = vst [vmem:[#allocation3 + $0x4c] sm:$0xf] %v6389_v11  ;;  %12712 = vmatpush3.bf16.msra.mxu0 %v13364_v41  ;;  %v6018_v17 = vor.u32 %v6016_v52, %v15153_v23 }
 0x32b   : > { %v5675_v2 = vadd.f32 %v15160_v1, %v5636_v15  ;;  %v6311_v18 = vld [vmem:[#allocation2 + $0x1c] sm:$0xf]  ;;  %v6312_v58 = vld [vmem:[#allocation2 + $0x20] sm:$0x1]  ;;  %7124 = vst [vmem:[#allocation3 + $0x2dc] sm:$0xf] %v7092_v8  ;;  %v6913_v44 = vsel %vm13679_vm11, %v11597_v43, %v6912_v31  ;;  %v5575_v43 = vadd.f32 %v15119_v24, %v14866_v29  ;;  %v5639_v29 = vmul.f32 %v15140_v49, %v5596_v3 }
 0x32c   : > { %6221 = vst [vmem:[#allocation2 + $0xa8] sm:$0xf] %v6220_v26  ;;  %v6915_v38 = vrot.slane %v6808_v57, 5  ;;  %v7094_v21 = vld [vmem:[#allocation2 + $0x90] sm:$0xf]  ;;  %v6394_v4 = vrot.slane %v6393_v30, 4  ;;  %v6213_v40 = vsel %vm13673_vm10, %v6018_v17, %v6212_v5  ;;  %v5588_v57 = vadd.f32 %v5587_v54, %v14879_v13 }
 0x32d   : > { %v5707_v16 = vmax.f32 %v5675_v2, 0.0  ;;  %v7095_v39 = vld [vmem:[#allocation2 + $0x94] sm:$0xf]  ;;  %v6914_v33 = vrot.slane %v6912_v31, 4  ;;  %7044 = vst [vmem:[#allocation3 + $0x98] sm:$0xf] %v6913_v44  ;;  %v5634_v31 = vmul.f32 %v15140_v49, %v5575_v43 }
 0x32e   : > { %v6403_v46 = vrot.slane %v6401_v62, 4  ;;  %v6404_v63 = vshll.u32 %v15133_v28, 16  ;;  %v7093_v53 = vld [vmem:[#allocation2 + $0x88] sm:$0xf]  ;;  %7126 = vst [vmem:[#allocation3 + $0x324] sm:$0xf] %v7094_v21  ;;  %v6399_v34 = vsel %vm13658_vm8, %v6394_v4, %v6398_v27  ;;  %v12888_v28 = vpop.f32.mrf.mxu0  ;;  %v5637_v26 = vmul.f32 %v15140_v49, %v5588_v57 }
 0x32f   : > { %7127 = vst [vmem:[#allocation3 + $0x348] sm:$0xf] %v7095_v39  ;;  %v11892_v47 = vpack.c.bf16 %v5707_v16, %v5707_v16  ;;  %v6410_v9 = vshll.u32 %v6311_v18, 16  ;;  %v6414_v42 = vshrl.u32 %v6311_v18, 16  ;;  %7125 = vst [vmem:[#allocation3 + $0x300] sm:$0xf] %v7093_v53  ;;  %v6916_v0 = vsel %vm13679_vm11, %v6914_v33, %v6915_v38 }
 0x330   : > { %6214 = vst [vmem:[#allocation2 + $0x9c] sm:$0xf] %v6213_v40  ;;  %v6406_v56 = vrot.slane %v6404_v63, 5  ;;  %v6420_v7 = vshll.u32 %v6312_v58, 16  ;;  %v6262_v6 = vld [vmem:[#allocation2 + $0x84] sm:$0xf]  ;;  %v5599_v41 = vadd.f32 %v12888_v28, %v15131_v14  ;;  %v5673_v27 = vadd.f32 %v15160_v1, %v5634_v31  ;;  %v5590_v53 = vpop.f32.mrf.mxu0 }
 0x331   : > { %v6263_v59 = vld [vmem:[#allocation2 + $0x88] sm:$0xf]  ;;  %v6019_v15 = vrot.slane %v15153_v23, 4  ;;  %6771 = vst [vmem:[#allocation3 + $0x70] sm:$0xf] %v6399_v34  ;;  %v6038_v45 = vshrl.u32 %v11892_v47, 16  ;;  %v5678_v18 = vadd.f32 %v15160_v1, %v5639_v29  ;;  %v5676_v38 = vadd.f32 %v15160_v1, %v5637_v26 }
 0x332   : > { %7045 = vst [vmem:[#allocation3 + $0xbc] sm:$0xf] %v6916_v0  ;;  %v6412_v61 = vrot.slane %v6410_v9, 5  ;;  %v6416_v20 = vrot.slane %v6414_v42, 4  ;;  %6294 = vst [vmem:[#allocation3 + $0x318] sm:$0xf] %v6262_v6  ;;  %v6407_v36 = vor.u32 %v6406_v56, %v6403_v46  ;;  %v5640_v58 = vmul.f32 %v15140_v49, %v5599_v41 }
 0x333   : > { %6295 = vst [vmem:[#allocation3 + $0x33c] sm:$0xf] %v6263_v59  ;;  %v6041_v19 = vshll.u32 %v11892_v47, 16  ;;  %v13365_v37 = vld [vmem:[%s16330_s4 + $0x1d8] sm:$0xff]   ;;  %v6040_v52 = vrot.slane %v6038_v45, 7  ;;  %v6422_v2 = vrot.slane %v6420_v7, 5 }
 0x334   : > { %v6417_v10 = vor.u32 %v6416_v20, %v6412_v61  ;;  %v6223_v5 = vld [vmem:[#allocation2 + $0xb0] sm:$0x1]  ;;  %v6408_v11 = vrot.slane %v6407_v36, 4  ;;  %12713 = vmatprep.subr.bf16.mxu0 %v13365_v37  ;;  %v6265_v30 = vld [vmem:[#allocation2 + $0x94] sm:$0xf]  ;;  %v13369_v13 = vld [vmem:[%s16330_s4 + $0x140] sm:$0xff]   ;;  %v5679_v63 = vadd.f32 %v15160_v1, %v5640_v58 }
 0x335   : > { %v6264_v24 = vld [vmem:[#allocation2 + $0x90] sm:$0xf]  ;;  %v6043_v32 = vor.u32 %v6041_v19, %v6040_v52  ;;  %v6045_v12 = vrot.slane %v6040_v52, 4  ;;  %v6809_v62 = vld [vmem:[#allocation2 + $0x24] sm:$0xe]  ;;  %12607 = vmatprep.subr.bf16.mxu1 %v13369_v13  ;;  %v5710_v9 = vmax.f32 %v5678_v18, 0.0 }
 0x336   : > { %v6418_v8 = vrot.slane %v6417_v10, 4  ;;  %6296 = vst [vmem:[#allocation3 + $0x360] sm:$0xf] %v6264_v24  ;;  %v6413_v14 = vsel %vm13658_vm8, %v6408_v11, %v6412_v61  ;;  %v6810_v54 = vld [vmem:[#allocation2 + $0x28] sm:$0xf]  ;;  %v16439_v42 = vld [vmem:[#allocation48_spill] sm:$0xff] }
 0x337   : > { %6297 = vst [vmem:[#allocation3 + $0x384] sm:$0xf] %v6265_v30  ;;  %v6044_v17 = vsel %vm13687_vm12, %v6036_v22, %v6043_v32  ;;  %v6224_v16 = vsel %vm13695_vm13, %v6045_v12, %v6223_v5  ;;  %6772 = vst [vmem:[#allocation3 + $0x94] sm:$0xf] %v6413_v14  ;;  %v15206_v21 = vld [vmem:[#allocation2 + $0x2c] sm:$0x1]  ;;  %v5430_v34 = vadd.f32 %v14872_v51, %v16439_v42 }
 0x338   : > { %v6423_v44 = vsel %vm13658_vm8, %v6418_v8, %v6422_v2  ;;  %v15208_v39 = vld [vmem:[#allocation2 + $0x24] sm:$0xf]  ;;  %v7096_v4 = vld [vmem:[#allocation2 + $0x9c] sm:$0xf]  ;;  %v7098_v33 = vld [vmem:[#allocation2 + $0xa8] sm:$0xf]  ;;  %v11895_v45 = vpack.c.bf16 %v5710_v9, %v5710_v9 }
 0x339   : > { %v13264_v35 = vld [vmem:[#allocation3 + $0x48] ss:$36 sps:$4 sm:$0xff]   ;;  %6222 = vst [vmem:[#allocation2 + $0xac] sm:$0xf] %v6044_v17  ;;  %6225 = vst [vmem:[#allocation2 + $0xb0] sm:$0x1] %v6224_v16  ;;  %v5591_v19 = vadd.f32 %v5590_v53, %v5430_v34 }
 0x33a   : > { %v13266_v46 = vld [vmem:[#allocation3 + $0x4c] ss:$36 sps:$4 sm:$0xff]   ;;  %6773 = vst [vmem:[#allocation3 + $0xb8] sm:$0xf] %v6423_v44  ;;  %v5705_v22 = vmax.f32 %v5673_v27, 0.0  ;;  %v5708_v56 = vmax.f32 %v5676_v38, 0.0 }
 0x33b   : > { %7128 = vst [vmem:[#allocation3 + $0x36c] sm:$0xf] %v7096_v4  ;;  %7130 = vst [vmem:[#allocation3 + $0x3b4] sm:$0xf] %v7098_v33  ;;  %v13267_v40 = vld [vmem:[#allocation3 + $0x98] ss:$36 sps:$4 sm:$0xff]   ;;  %10248 = vmatprep.mubr.bf16.mxu1 %v13266_v46  ;;  %v5638_v46 = vmul.f32 %v15140_v49, %v5591_v19 }
 0x33c   : > { %v13269_v47 = vld [vmem:[#allocation3 + $0x9c] ss:$36 sps:$4 sm:$0xff]   ;;  %v11890_v0 = vpack.c.bf16 %v5705_v22, %v5705_v22  ;;  %v5711_v7 = vmax.f32 %v5679_v63, 0.0  ;;  %v6919_v28 = vrot.slane %v6810_v54, 5  ;;  %v6266_v6 = vld [vmem:[#allocation2 + $0x9c] sm:$0xf]  ;;  %10249 = vmatmul.mubr.bf16.gmra.mxu1 %v13264_v35  ;;  %v11893_v43 = vpack.c.bf16 %v5708_v56, %v5708_v56 }
 0x33d   : > { %v13370_v59 = vld [vmem:[%s16330_s4 + $0x198] sm:$0xff]   ;;  %10417 = vmatprep.mubr.bf16.mxu0 %v13269_v47  ;;  %v11598_v61 = vrot.slane %v6809_v62, 9  ;;  %v6922_v20 = vrot.slane %v15206_v21, 5  ;;  %6298 = vst [vmem:[#allocation3 + $0x3a8] sm:$0xf] %v6266_v6  ;;  %v13374_v51 = vld [vmem:[%s16330_s4 + $0x100] sm:$0xff]  }
 0x33e   : > { %v6021_v36 = vshrl.u32 %v11890_v0, 16  ;;  %10418 = vmatmul.mubr.bf16.gmra.mxu0 %v13267_v40  ;;  %v11896_v3 = vpack.c.bf16 %v5711_v7, %v5711_v7  ;;  %v6425_v37 = vshrl.u32 %v15208_v39, 16  ;;  %v6268_v52 = vld [vmem:[#allocation2 + $0xa8] sm:$0xf]  ;;  %v6216_v10 = vld [vmem:[#allocation2 + $0xa4] sm:$0x1]  ;;  %12608 = vmatpush3.bf16.msra.mxu1 %v13374_v51 }
 0x33f   : > { %v6064_v57 = vshrl.u32 %v11895_v45, 16  ;;  %v6920_v41 = vsel %vm13679_vm11, %v11598_v61, %v6919_v28  ;;  %v6921_v5 = vrot.slane %v6919_v28, 4  ;;  %v6428_v11 = vshll.u32 %v15208_v39, 16  ;;  %6300 = vst [vmem:[#allocation3 + $0x3f0] sm:$0xf] %v6268_v52  ;;  %12714 = vmatpush3.bf16.msra.mxu0 %v13370_v59  ;;  %v13375_v2 = vld [vmem:[%s16330_s4 + $0x1d0] sm:$0xff]  }
 0x340   : > { %v6023_v31 = vrot.slane %v6021_v36, 7  ;;  %v6024_v29 = vshll.u32 %v11890_v0, 16  ;;  %v6233_v24 = vld [vmem:[#allocation2 + $0xc0] sm:$0xf]  ;;  %v6047_v32 = vshrl.u32 %v11893_v43, 16  ;;  %v6072_v12 = vshrl.u32 %v11896_v3, 16  ;;  %12715 = vmatprep.subr.bf16.mxu0 %v13375_v2 }
 0x341   : > { %7046 = vst [vmem:[#allocation3 + $0xe0] sm:$0xf] %v6920_v41  ;;  %v13376_v8 = vld [vmem:[%s16330_s4 + $0x190] sm:$0xff]   ;;  %v6066_v30 = vrot.slane %v6064_v57, 7  ;;  %v6067_v13 = vshll.u32 %v11895_v45, 16  ;;  %v6050_v14 = vshll.u32 %v11893_v43, 16  ;;  %v6923_v18 = vsel %vm13679_vm11, %v6921_v5, %v6922_v20 }
 0x342   : > { %v13272_v26 = vld [vmem:[#allocation3 + $0x94] ss:$36 sps:$4 sm:$0xff]   ;;  %v6226_v27 = vld [vmem:[#allocation2 + $0xb4] sm:$0xf]  ;;  %v6314_v58 = vld [vmem:[#allocation2 + $0x28] sm:$0xf]  ;;  %v6026_v54 = vor.u32 %v6024_v29, %v6023_v31  ;;  %v5677_v36 = vadd.f32 %v15160_v1, %v5638_v46 }
 0x343   : > { %v6315_v62 = vld [vmem:[#allocation2 + $0x2c] sm:$0x1]  ;;  %v6028_v17 = vrot.slane %v6023_v31, 4  ;;  %v15232_v16 = vrot.slane %v6047_v32, 7  ;;  %v6074_v44 = vrot.slane %v6072_v12, 7  ;;  %10256 = vmatprep.mubr.bf16.mxu1 %v13272_v26  ;;  %v6069_v4 = vor.u32 %v6067_v13, %v6066_v30  ;;  %12716 = vmatpush3.bf16.msra.mxu0 %v13376_v8  ;;  %v13385_v49 = vld [vmem:[%s16330_s4 + $0x1c0] sm:$0xff]  }
 0x344   : > { %7047 = vst [vmem:[#allocation3 + $0x104] sm:$0xf] %v6923_v18  ;;  %v7099_v38 = vld [vmem:[#allocation2 + $0xac] sm:$0xf]  ;;  %v6075_v33 = vshll.u32 %v11896_v3, 16  ;;  %v6427_v35 = vrot.slane %v6425_v37, 4  ;;  %v6027_v63 = vsel %vm13687_vm12, %v6019_v15, %v6026_v54 }
 0x345   : > { %v13377_v21 = vld [vmem:[%s16330_s4 + $0x1c8] sm:$0xff]   ;;  %7131 = vst [vmem:[#allocation3 + $0x3d8] sm:$0xf] %v7099_v38  ;;  %v6217_v53 = vsel %vm13695_vm13, %v6028_v17, %v6216_v10  ;;  %v6070_v40 = vrot.slane %v6066_v30, 4  ;;  %v6052_v47 = vor.u32 %v6050_v14, %v15232_v16  ;;  %6215 = vst [vmem:[#allocation2 + $0xa0] sm:$0xf] %v6027_v63  ;;  %v6234_v23 = vsel %vm13673_vm10, %v6069_v4, %v6233_v24 }
 0x346   : > { %v13270_v39 = vld [vmem:[#allocation3 + $0x90] ss:$36 sps:$4 sm:$0xff]   ;;  %12717 = vmatprep.subr.bf16.mxu0 %v13377_v21  ;;  %6218 = vst [vmem:[#allocation2 + $0xa4] sm:$0x1] %v6217_v53  ;;  %v6077_v34 = vor.u32 %v6075_v33, %v6074_v44  ;;  %v6079_v15 = vrot.slane %v6074_v44, 4  ;;  %v6430_v0 = vrot.slane %v6428_v11, 5 }
 0x347   : > { %v13378_v22 = vld [vmem:[%s16330_s4 + $0x188] sm:$0xff]   ;;  %10257 = vmatmul.mubr.bf16.gmra.mxu1 %v13270_v39  ;;  %v6812_v56 = vld [vmem:[#allocation2 + $0x30] sm:$0xe]  ;;  %v6813_v7 = vld [vmem:[#allocation2 + $0x34] sm:$0xf]  ;;  %v6227_v28 = vsel %vm13673_vm10, %v6052_v47, %v6226_v27  ;;  %v6434_v6 = vshll.u32 %v6314_v58, 16 }
 0x348   : > { %v6237_v9 = vld [vmem:[#allocation2 + $0xc8] sm:$0x1]  ;;  %v6269_v42 = vld [vmem:[#allocation2 + $0xac] sm:$0xf]  ;;  %6235 = vst [vmem:[#allocation2 + $0xc0] sm:$0xf] %v6234_v23  ;;  %v6078_v20 = vsel %vm13687_vm12, %v6070_v40, %v6077_v34  ;;  %v6431_v51 = vor.u32 %v6430_v0, %v6427_v35  ;;  %12718 = vmatpush3.bf16.msra.mxu0 %v13378_v22 }
 0x349   : > { %6301 = vst [vmem:[#allocation3 + $0x414] sm:$0xf] %v6269_v42  ;;  %v6438_v59 = vshrl.u32 %v6314_v58, 16  ;;  %v6444_v45 = vshll.u32 %v6315_v62, 16  ;;  %v6814_v61 = vld [vmem:[#allocation2 + $0x38] sm:$0x1]  ;;  %v6238_v19 = vsel %vm13695_vm13, %v6079_v15, %v6237_v9  ;;  %12719 = vmatprep.subr.bf16.mxu0 %v13385_v49 }
 0x34a   : > { %6228 = vst [vmem:[#allocation2 + $0xb4] sm:$0xf] %v6227_v28  ;;  %v6316_v43 = vld [vmem:[#allocation2 + $0x30] sm:$0xf]  ;;  %v6053_v3 = vrot.slane %v15232_v16, 4  ;;  %v6436_v37 = vrot.slane %v6434_v6, 5 }
 0x34b   : > { %6236 = vst [vmem:[#allocation2 + $0xc4] sm:$0xf] %v6078_v20  ;;  %6239 = vst [vmem:[#allocation2 + $0xc8] sm:$0x1] %v6238_v19  ;;  %v6440_v52 = vrot.slane %v6438_v59, 4  ;;  %v6432_v41 = vrot.slane %v6431_v51, 4 }
 0x34c   : > { %v6317_v10 = vld [vmem:[#allocation2 + $0x34] sm:$0xf]  ;;  %v13275_v57 = vld [vmem:[#allocation3 + $0xe4] ss:$36 sps:$4 sm:$0xff]   ;;  %v6446_v5 = vrot.slane %v6444_v45, 5  ;;  %v11599_v11 = vrot.slane %v6812_v56, 9  ;;  %12720 = vmatpush3.bf16.msra.mxu0 %v13386_v50 }
 0x34d   : > { %v13273_v2 = vld [vmem:[#allocation3 + $0xe0] ss:$36 sps:$4 sm:$0xff]   ;;  %v6441_v1 = vor.u32 %v6440_v52, %v6436_v37  ;;  %v5709_v31 = vmax.f32 %v5677_v36, 0.0  ;;  %v6926_v29 = vrot.slane %v6813_v7, 5  ;;  %v6929_v24 = vrot.slane %v6814_v61, 5  ;;  %10425 = vmatprep.mubr.bf16.mxu0 %v13275_v57 }
 0x34e   : > { %v6318_v32 = vld [vmem:[#allocation2 + $0x38] sm:$0x1]  ;;  %v6815_v12 = vld [vmem:[#allocation2 + $0x3c] sm:$0xe]  ;;  %v6437_v26 = vsel %vm13658_vm8, %v6432_v41, %v6436_v37  ;;  %v6449_v30 = vshrl.u32 %v6316_v43, 16  ;;  %v6452_v13 = vshll.u32 %v6316_v43, 16  ;;  %10426 = vmatmul.mubr.bf16.gmra.mxu0 %v13273_v2 }
 0x34f   : > { %v13390_v8 = vld [vmem:[%s16330_s4 + $0x238] sm:$0xff]   ;;  %v6458_v14 = vshll.u32 %v6317_v10, 16  ;;  %v6816_v27 = vld [vmem:[#allocation2 + $0x40] sm:$0xf]  ;;  %v6442_v18 = vrot.slane %v6441_v1, 4  ;;  %v11894_v58 = vpack.c.bf16 %v5709_v31, %v5709_v31  ;;  %v6927_v62 = vsel %vm13679_vm11, %v11599_v11, %v6926_v29 }
 0x350   : > { %6774 = vst [vmem:[#allocation3 + $0xdc] sm:$0xf] %v6437_v26  ;;  %v6928_v54 = vrot.slane %v6926_v29, 4  ;;  %v6817_v17 = vld [vmem:[#allocation2 + $0x44] sm:$0x1]  ;;  %12889 = vmatprep.subr.bf16.mxu1 %v13390_v8  ;;  %v6451_v38 = vrot.slane %v6449_v30, 4 }
 0x351   : > { %v7097_v44 = vld [vmem:[#allocation2 + $0xa0] sm:$0xf]  ;;  %7048 = vst [vmem:[#allocation3 + $0x128] sm:$0xf] %v6927_v62  ;;  %v6454_v21 = vrot.slane %v6452_v13, 5  ;;  %v6460_v39 = vrot.slane %v6458_v14, 5  ;;  %v6447_v35 = vsel %vm13658_vm8, %v6442_v18, %v6446_v5 }
 0x352   : > { %v6462_v4 = vshrl.u32 %v6317_v10, 16  ;;  %v6319_v33 = vld [vmem:[#allocation2 + $0x3c] sm:$0xf]  ;;  %7129 = vst [vmem:[#allocation3 + $0x390] sm:$0xf] %v7097_v44  ;;  %v6055_v46 = vshrl.u32 %v11894_v58, 16  ;;  %v6930_v63 = vsel %vm13679_vm11, %v6928_v54, %v6929_v24 }
 0x353   : > { %v6058_v22 = vshll.u32 %v11894_v58, 16  ;;  %v6267_v53 = vld [vmem:[#allocation2 + $0xa0] sm:$0xf]  ;;  %6775 = vst [vmem:[#allocation3 + $0x100] sm:$0xf] %v6447_v35  ;;  %v6455_v47 = vor.u32 %v6454_v21, %v6451_v38  ;;  %v6468_v42 = vshll.u32 %v6318_v32, 16 }
 0x354   : > { %v6230_v40 = vld [vmem:[#allocation2 + $0xbc] sm:$0x1]  ;;  %7049 = vst [vmem:[#allocation3 + $0x14c] sm:$0xf] %v6930_v63  ;;  %v6464_v9 = vrot.slane %v6462_v4, 4  ;;  %v11600_v49 = vrot.slane %v6815_v12, 9 }
 0x355   : > { %6299 = vst [vmem:[#allocation3 + $0x3cc] sm:$0xf] %v6267_v53  ;;  %v6057_v23 = vrot.slane %v6055_v46, 7  ;;  %v6933_v34 = vrot.slane %v6816_v27, 5  ;;  %v6936_v15 = vrot.slane %v6817_v17, 5  ;;  %v6473_v0 = vshrl.u32 %v6319_v33, 16 }
 0x356   : > { %v7100_v56 = vld [vmem:[#allocation2 + $0xb4] sm:$0xf]  ;;  %v6456_v7 = vrot.slane %v6455_v47, 4  ;;  %v6465_v28 = vor.u32 %v6464_v9, %v6460_v39  ;;  %v6470_v6 = vrot.slane %v6468_v42, 5  ;;  %v6320_v59 = vld [vmem:[#allocation2 + $0x40] sm:$0xf] }
 0x357   : > { %v6476_v45 = vshll.u32 %v6319_v33, 16  ;;  %7132 = vst [vmem:[#allocation3 + $0x3fc] sm:$0xf] %v7100_v56  ;;  %v6060_v61 = vor.u32 %v6058_v22, %v6057_v23  ;;  %v6062_v20 = vrot.slane %v6057_v23, 4  ;;  %v6934_v19 = vsel %vm13679_vm11, %v11600_v49, %v6933_v34  ;;  %v7102_v36 = vld [vmem:[#allocation2 + $0xc0] sm:$0xf] }
 0x358   : > { %v6935_v51 = vrot.slane %v6933_v34, 4  ;;  %v7103_v43 = vld [vmem:[#allocation2 + $0xc4] sm:$0xf]  ;;  %v6461_v50 = vsel %vm13658_vm8, %v6456_v7, %v6460_v39  ;;  %v6466_v37 = vrot.slane %v6465_v28, 4  ;;  %7050 = vst [vmem:[#allocation3 + $0x170] sm:$0xf] %v6934_v19 }
 0x359   : > { %v15279_v52 = vld [vmem:[#allocation2 + $0x44] sm:$0x1]  ;;  %v6475_v10 = vrot.slane %v6473_v0, 4  ;;  %v6478_v57 = vrot.slane %v6476_v45, 5  ;;  %v6818_v41 = vld [vmem:[#allocation2 + $0x48] sm:$0xe]  ;;  %v6061_v11 = vsel %vm13687_vm12, %v6053_v3, %v6060_v61  ;;  %v6231_v2 = vsel %vm13695_vm13, %v6062_v20, %v6230_v40 }
 0x35a   : > { %7134 = vst [vmem:[#allocation3 + $0x444] sm:$0xf] %v7102_v36  ;;  %7135 = vst [vmem:[#allocation3 + $0x468] sm:$0xf] %v7103_v43  ;;  %v6270_v5 = vld [vmem:[#allocation2 + $0xb4] sm:$0xf]  ;;  %v6937_v1 = vsel %vm13679_vm11, %v6935_v51, %v6936_v15  ;;  %v6471_v16 = vsel %vm13658_vm8, %v6466_v37, %v6470_v6 }
 0x35b   : > { %6776 = vst [vmem:[#allocation3 + $0x124] sm:$0xf] %v6461_v50  ;;  %v6482_v31 = vshll.u32 %v6320_v59, 16  ;;  %v6819_v29 = vld [vmem:[#allocation2 + $0x4c] sm:$0xf]  ;;  %v6479_v55 = vor.u32 %v6478_v57, %v6475_v10  ;;  %v6486_v3 = vshrl.u32 %v6320_v59, 16 }
 0x35c   : > { %v6820_v24 = vld [vmem:[#allocation2 + $0x50] sm:$0x1]  ;;  %v6322_v32 = vld [vmem:[#allocation2 + $0x48] sm:$0xf]  ;;  %6302 = vst [vmem:[#allocation3 + $0x438] sm:$0xf] %v6270_v5 }
 0x35d   : > { %6229 = vst [vmem:[#allocation2 + $0xb8] sm:$0xf] %v6061_v11  ;;  %6232 = vst [vmem:[#allocation2 + $0xbc] sm:$0x1] %v6231_v2  ;;  %v6323_v12 = vld [vmem:[#allocation2 + $0x4c] sm:$0xf] }
 0x35e   : > { %7051 = vst [vmem:[#allocation3 + $0x194] sm:$0xf] %v6937_v1  ;;  %v7906_v60 = vld [vmem:[#allocation2 + $0x24] sm:$0xf]  ;;  %v13277_v8 = vld [vmem:[#allocation3 + $0xd8] ss:$36 sps:$4 sm:$0xff]  }
 0x35f   : > { %v13279_v26 = vld [vmem:[#allocation3 + $0xdc] ss:$36 sps:$4 sm:$0xff]   ;;  %6777 = vst [vmem:[#allocation3 + $0x148] sm:$0xf] %v6471_v16  ;;  %v6484_v30 = vrot.slane %v6482_v31, 5  ;;  %v6480_v18 = vrot.slane %v6479_v55, 4 }
 0x360   : > { %v6324_v13 = vld [vmem:[#allocation2 + $0x50] sm:$0x1]  ;;  %7938 = vst [vmem:[#allocation3 + $0x60] sm:$0xf] %v7906_v60  ;;  %v13281_v14 = vld [vmem:[#allocation3 + $0x128] ss:$36 sps:$4 sm:$0xff]   ;;  %10264 = vmatprep.mubr.bf16.mxu1 %v13279_v26 }
 0x361   : > { %v13283_v27 = vld [vmem:[#allocation3 + $0x12c] ss:$36 sps:$4 sm:$0xff]   ;;  %v6488_v58 = vrot.slane %v6486_v3, 4  ;;  %v6492_v62 = vshll.u32 %v15279_v52, 16  ;;  %v11601_v54 = vrot.slane %v6818_v41, 9  ;;  %v6940_v17 = vrot.slane %v6819_v29, 5  ;;  %10265 = vmatmul.mubr.bf16.gmra.mxu1 %v13277_v8 }
 0x362   : > { %v7907_v44 = vld [vmem:[#allocation2 + $0x28] sm:$0xf]  ;;  %10433 = vmatprep.mubr.bf16.mxu0 %v13283_v27  ;;  %v6485_v38 = vsel %vm13658_vm8, %v6480_v18, %v6484_v30  ;;  %v6943_v21 = vrot.slane %v6820_v24, 5  ;;  %v6497_v39 = vshrl.u32 %v6322_v32, 16  ;;  %v6500_v4 = vshll.u32 %v6322_v32, 16 }
 0x363   : > { %v6821_v33 = vld [vmem:[#allocation2 + $0x54] sm:$0xe]  ;;  %7939 = vst [vmem:[#allocation3 + $0x84] sm:$0xf] %v7907_v44  ;;  %10434 = vmatmul.mubr.bf16.gmra.mxu0 %v13281_v14  ;;  %v6489_v35 = vor.u32 %v6488_v58, %v6484_v30  ;;  %6778 = vst [vmem:[#allocation3 + $0x16c] sm:$0xf] %v6485_v38  ;;  %v6941_v46 = vsel %vm13679_vm11, %v11601_v54, %v6940_v17 }
 0x364   : > { %v6942_v22 = vrot.slane %v6940_v17, 4  ;;  %v6506_v63 = vshll.u32 %v6323_v12, 16  ;;  %v6822_v53 = vld [vmem:[#allocation2 + $0x58] sm:$0xf]  ;;  %v6823_v40 = vld [vmem:[#allocation2 + $0x5c] sm:$0x1] }
 0x365   : > { %v6325_v47 = vld [vmem:[#allocation2 + $0x54] sm:$0xf]  ;;  %7052 = vst [vmem:[#allocation3 + $0x1b8] sm:$0xf] %v6941_v46  ;;  %v6499_v9 = vrot.slane %v6497_v39, 4  ;;  %v6502_v42 = vrot.slane %v6500_v4, 5 }
 0x366   : > { %v6510_v49 = vshrl.u32 %v6323_v12, 16  ;;  %v6516_v23 = vshll.u32 %v6324_v13, 16  ;;  %v13289_v34 = vld [vmem:[#allocation3 + $0x174] ss:$36 sps:$4 sm:$0xff]   ;;  %v6490_v15 = vrot.slane %v6489_v35, 4  ;;  %v6494_v0 = vrot.slane %v6492_v62, 5 }
 0x367   : > { %v6944_v56 = vsel %vm13679_vm11, %v6942_v22, %v6943_v21  ;;  %v13286_v7 = vld [vmem:[#allocation3 + $0x124] ss:$36 sps:$4 sm:$0xff]   ;;  %v6503_v28 = vor.u32 %v6502_v42, %v6499_v9  ;;  %v6508_v6 = vrot.slane %v6506_v63, 5  ;;  %v6326_v59 = vld [vmem:[#allocation2 + $0x58] sm:$0xf]  ;;  %10441 = vmatprep.mubr.bf16.mxu0 %v13289_v34  ;;  %v11602_v19 = vrot.slane %v6821_v33, 9 }
 0x368   : > { %7053 = vst [vmem:[#allocation3 + $0x1dc] sm:$0xf] %v6944_v56  ;;  %v6495_v45 = vsel %vm13658_vm8, %v6490_v15, %v6494_v0  ;;  %v6512_v61 = vrot.slane %v6510_v49, 4  ;;  %v6518_v20 = vrot.slane %v6516_v23, 5  ;;  %v6327_v51 = vld [vmem:[#allocation2 + $0x5c] sm:$0x1]  ;;  %10272 = vmatprep.mubr.bf16.mxu1 %v13286_v7 }
 0x369   : > { %v6824_v36 = vld [vmem:[#allocation2 + $0x60] sm:$0xe]  ;;  %v6825_v43 = vld [vmem:[#allocation2 + $0x64] sm:$0xf]  ;;  %v7101_v50 = vld [vmem:[#allocation2 + $0xb8] sm:$0xf] }
 0x36a   : > { %v13284_v37 = vld [vmem:[#allocation3 + $0x120] ss:$36 sps:$4 sm:$0xff]   ;;  %6779 = vst [vmem:[#allocation3 + $0x190] sm:$0xf] %v6495_v45  ;;  %v6504_v52 = vrot.slane %v6503_v28, 4  ;;  %v6947_v10 = vrot.slane %v6822_v53, 5  ;;  %v6513_v11 = vor.u32 %v6512_v61, %v6508_v6 }
 0x36b   : > { %v6950_v57 = vrot.slane %v6823_v40, 5  ;;  %v6521_v41 = vshrl.u32 %v6325_v47, 16  ;;  %7133 = vst [vmem:[#allocation3 + $0x420] sm:$0xf] %v7101_v50  ;;  %v13287_v5 = vld [vmem:[#allocation3 + $0x170] ss:$36 sps:$4 sm:$0xff]   ;;  %10273 = vmatmul.mubr.bf16.gmra.mxu1 %v13284_v37 }
 0x36c   : > { %v6524_v2 = vshll.u32 %v6325_v47, 16  ;;  %v6530_v1 = vshll.u32 %v6326_v59, 16  ;;  %v6534_v31 = vshrl.u32 %v6326_v59, 16  ;;  %v6826_v29 = vld [vmem:[#allocation2 + $0x68] sm:$0x1]  ;;  %v6509_v32 = vsel %vm13658_vm8, %v6504_v52, %v6508_v6  ;;  %10442 = vmatmul.mubr.bf16.gmra.mxu0 %v13287_v5 }
 0x36d   : > { %v6328_v24 = vld [vmem:[#allocation2 + $0x60] sm:$0xf]  ;;  %v6948_v16 = vsel %vm13679_vm11, %v11602_v19, %v6947_v10  ;;  %v6949_v55 = vrot.slane %v6947_v10, 4  ;;  %v6523_v3 = vrot.slane %v6521_v41, 4  ;;  %v6271_v12 = vld [vmem:[#allocation2 + $0xb8] sm:$0xf] }
 0x36e   : > { %v6514_v60 = vrot.slane %v6513_v11, 4  ;;  %6780 = vst [vmem:[#allocation3 + $0x1b4] sm:$0xf] %v6509_v32  ;;  %7054 = vst [vmem:[#allocation3 + $0x200] sm:$0xf] %v6948_v16  ;;  %v6526_v8 = vrot.slane %v6524_v2, 5 }
 0x36f   : > { %v6532_v26 = vrot.slane %v6530_v1, 5  ;;  %v6536_v30 = vrot.slane %v6534_v31, 4  ;;  %6303 = vst [vmem:[#allocation3 + $0x45c] sm:$0xf] %v6271_v12  ;;  %v6951_v13 = vsel %vm13679_vm11, %v6949_v55, %v6950_v57  ;;  %v6540_v14 = vshll.u32 %v6327_v51, 16 }
 0x370   : > { %v11603_v27 = vrot.slane %v6824_v36, 9  ;;  %v6954_v18 = vrot.slane %v6825_v43, 5  ;;  %v6329_v58 = vld [vmem:[#allocation2 + $0x64] sm:$0xf]  ;;  %v6330_v62 = vld [vmem:[#allocation2 + $0x68] sm:$0x1]  ;;  %v6519_v17 = vsel %vm13658_vm8, %v6514_v60, %v6518_v20  ;;  %v6527_v44 = vor.u32 %v6526_v8, %v6523_v3 }
 0x371   : > { %v13297_v54 = vld [vmem:[#allocation3 + $0x1bc] ss:$36 sps:$4 sm:$0xff]   ;;  %7055 = vst [vmem:[#allocation3 + $0x224] sm:$0xf] %v6951_v13  ;;  %v6537_v38 = vor.u32 %v6536_v30, %v6532_v26  ;;  %v6827_v21 = vld [vmem:[#allocation2 + $0x6c] sm:$0xe] }
 0x372   : > { %6781 = vst [vmem:[#allocation3 + $0x1d8] sm:$0xf] %v6519_v17  ;;  %v6955_v39 = vsel %vm13679_vm11, %v11603_v27, %v6954_v18  ;;  %v6956_v4 = vrot.slane %v6954_v18, 4  ;;  %v6957_v33 = vrot.slane %v6826_v29, 5  ;;  %v6545_v35 = vshrl.u32 %v6328_v24, 16  ;;  %10449 = vmatprep.mubr.bf16.mxu0 %v13297_v54 }
 0x373   : > { %v6828_v46 = vld [vmem:[#allocation2 + $0x70] sm:$0xf]  ;;  %v13293_v22 = vld [vmem:[#allocation3 + $0x16c] ss:$36 sps:$4 sm:$0xff]   ;;  %v6528_v63 = vrot.slane %v6527_v44, 4  ;;  %v6542_v53 = vrot.slane %v6540_v14, 5 }
 0x374   : > { %7056 = vst [vmem:[#allocation3 + $0x248] sm:$0xf] %v6955_v39  ;;  %v6829_v40 = vld [vmem:[#allocation2 + $0x74] sm:$0x1]  ;;  %v13291_v47 = vld [vmem:[#allocation3 + $0x168] ss:$36 sps:$4 sm:$0xff]   ;;  %v6958_v42 = vsel %vm13679_vm11, %v6956_v4, %v6957_v33  ;;  %10280 = vmatprep.mubr.bf16.mxu1 %v13293_v22 }
 0x375   : > { %v6538_v9 = vrot.slane %v6537_v38, 4  ;;  %v6547_v49 = vrot.slane %v6545_v35, 4  ;;  %v6548_v23 = vshll.u32 %v6328_v24, 16  ;;  %v6331_v34 = vld [vmem:[#allocation2 + $0x6c] sm:$0xf]  ;;  %v6533_v0 = vsel %vm13658_vm8, %v6528_v63, %v6532_v26  ;;  %10281 = vmatmul.mubr.bf16.gmra.mxu1 %v13291_v47 }
 0x376   : > { %v13295_v15 = vld [vmem:[#allocation3 + $0x1b8] ss:$36 sps:$4 sm:$0xff]   ;;  %7057 = vst [vmem:[#allocation3 + $0x26c] sm:$0xf] %v6958_v42  ;;  %v6554_v56 = vshll.u32 %v6329_v58, 16  ;;  %v6558_v7 = vshrl.u32 %v6329_v58, 16 }
 0x377   : > { %v6564_v28 = vshll.u32 %v6330_v62, 16  ;;  %v6543_v6 = vsel %vm13658_vm8, %v6538_v9, %v6542_v53  ;;  %6782 = vst [vmem:[#allocation3 + $0x1fc] sm:$0xf] %v6533_v0  ;;  %v6550_v59 = vrot.slane %v6548_v23, 5  ;;  %v11604_v45 = vrot.slane %v6827_v21, 9  ;;  %10450 = vmatmul.mubr.bf16.gmra.mxu0 %v13295_v15 }
 0x378   : > { %v6961_v61 = vrot.slane %v6828_v46, 5  ;;  %6783 = vst [vmem:[#allocation3 + $0x220] sm:$0xf] %v6543_v6  ;;  %v6556_v20 = vrot.slane %v6554_v56, 5  ;;  %v6560_v19 = vrot.slane %v6558_v7, 4  ;;  %v6964_v10 = vrot.slane %v6829_v40, 5 }
 0x379   : > { %v6332_v51 = vld [vmem:[#allocation2 + $0x70] sm:$0xf]  ;;  %v6333_v36 = vld [vmem:[#allocation2 + $0x74] sm:$0x1]  ;;  %v13303_v43 = vld [vmem:[#allocation3 + $0x204] ss:$36 sps:$4 sm:$0xff]   ;;  %v6551_v50 = vor.u32 %v6550_v59, %v6547_v49 }
 0x37a   : > { %v6962_v37 = vsel %vm13679_vm11, %v11604_v45, %v6961_v61  ;;  %v6963_v52 = vrot.slane %v6961_v61, 4  ;;  %v13300_v57 = vld [vmem:[#allocation3 + $0x1b4] ss:$36 sps:$4 sm:$0xff]   ;;  %v6561_v41 = vor.u32 %v6560_v19, %v6556_v20  ;;  %v6566_v5 = vrot.slane %v6564_v28, 5  ;;  %v6830_v2 = vld [vmem:[#allocation2 + $0x78] sm:$0xe]  ;;  %10457 = vmatprep.mubr.bf16.mxu0 %v13303_v43 }
 0x37b   : > { %7058 = vst [vmem:[#allocation3 + $0x290] sm:$0xf] %v6962_v37  ;;  %v6569_v11 = vshrl.u32 %v6331_v34, 16  ;;  %v6552_v1 = vrot.slane %v6551_v50, 4  ;;  %v6572_v29 = vshll.u32 %v6331_v34, 16  ;;  %v6578_v24 = vshll.u32 %v6332_v51, 16  ;;  %10288 = vmatprep.mubr.bf16.mxu1 %v13300_v57 }
 0x37c   : > { %v6965_v31 = vsel %vm13679_vm11, %v6963_v52, %v6964_v10  ;;  %v6831_v32 = vld [vmem:[#allocation2 + $0x7c] sm:$0xf]  ;;  %v6832_v16 = vld [vmem:[#allocation2 + $0x80] sm:$0x1]  ;;  %v6334_v55 = vld [vmem:[#allocation2 + $0x78] sm:$0xf] }
 0x37d   : > { %v6562_v3 = vrot.slane %v6561_v41, 4  ;;  %7059 = vst [vmem:[#allocation3 + $0x2b4] sm:$0xf] %v6965_v31  ;;  %v6571_v12 = vrot.slane %v6569_v11, 4  ;;  %v6582_v60 = vshrl.u32 %v6332_v51, 16  ;;  %v6588_v8 = vshll.u32 %v6333_v36, 16 }
 0x37e   : > { %v6335_v26 = vld [vmem:[#allocation2 + $0x7c] sm:$0xf]  ;;  %v13298_v30 = vld [vmem:[#allocation3 + $0x1b0] ss:$36 sps:$4 sm:$0xff]   ;;  %v6557_v14 = vsel %vm13658_vm8, %v6552_v1, %v6556_v20  ;;  %v6574_v27 = vrot.slane %v6572_v29, 5  ;;  %v6580_v62 = vrot.slane %v6578_v24, 5 }
 0x37f   : > { %v13301_v13 = vld [vmem:[#allocation3 + $0x200] ss:$36 sps:$4 sm:$0xff]   ;;  %v13311_v18 = vld [vmem:[#allocation3 + $0x24c] ss:$36 sps:$4 sm:$0xff]   ;;  %v6567_v58 = vsel %vm13658_vm8, %v6562_v3, %v6566_v5  ;;  %6784 = vst [vmem:[#allocation3 + $0x244] sm:$0xf] %v6557_v14  ;;  %10289 = vmatmul.mubr.bf16.gmra.mxu1 %v13298_v30 }
 0x380   : > { %v6584_v54 = vrot.slane %v6582_v60, 4  ;;  %v13307_v17 = vld [vmem:[#allocation3 + $0x1fc] ss:$36 sps:$4 sm:$0xff]   ;;  %6785 = vst [vmem:[#allocation3 + $0x268] sm:$0xf] %v6567_v58  ;;  %v6575_v44 = vor.u32 %v6574_v27, %v6571_v12  ;;  %v6590_v38 = vrot.slane %v6588_v8, 5  ;;  %10458 = vmatmul.mubr.bf16.gmra.mxu0 %v13301_v13 }
 0x381   : > { %v11605_v21 = vrot.slane %v6830_v2, 9  ;;  %v6968_v4 = vrot.slane %v6831_v32, 5  ;;  %v6971_v33 = vrot.slane %v6832_v16, 5  ;;  %v6336_v35 = vld [vmem:[#allocation2 + $0x80] sm:$0x1]  ;;  %v6593_v46 = vshrl.u32 %v6334_v55, 16  ;;  %10296 = vmatprep.mubr.bf16.mxu1 %v13307_v17  ;;  %10465 = vmatprep.mubr.bf16.mxu0 %v13311_v18 }
 0x382   : > { %v6585_v39 = vor.u32 %v6584_v54, %v6580_v62  ;;  %v6833_v22 = vld [vmem:[#allocation2 + $0x84] sm:$0xe]  ;;  %v6834_v63 = vld [vmem:[#allocation2 + $0x88] sm:$0xf]  ;;  %v6576_v53 = vrot.slane %v6575_v44, 4  ;;  %v6596_v40 = vshll.u32 %v6334_v55, 16 }
 0x383   : > { %v6602_v47 = vshll.u32 %v6335_v26, 16  ;;  %v6606_v9 = vshrl.u32 %v6335_v26, 16  ;;  %v6835_v42 = vld [vmem:[#allocation2 + $0x8c] sm:$0x1]  ;;  %v6969_v23 = vsel %vm13679_vm11, %v11605_v21, %v6968_v4  ;;  %v6970_v34 = vrot.slane %v6968_v4, 4 }
 0x384   : > { %v6586_v49 = vrot.slane %v6585_v39, 4  ;;  %v6595_v15 = vrot.slane %v6593_v46, 4  ;;  %v7908_v0 = vld [vmem:[#allocation2 + $0x30] sm:$0xf]  ;;  %v6581_v56 = vsel %vm13658_vm8, %v6576_v53, %v6580_v62  ;;  %7060 = vst [vmem:[#allocation3 + $0x2d8] sm:$0xf] %v6969_v23 }
 0x385   : > { %v6598_v7 = vrot.slane %v6596_v40, 5  ;;  %v6337_v28 = vld [vmem:[#allocation2 + $0x84] sm:$0xf]  ;;  %v6338_v6 = vld [vmem:[#allocation2 + $0x88] sm:$0xf]  ;;  %v6972_v45 = vsel %vm13679_vm11, %v6970_v34, %v6971_v33  ;;  %v6604_v61 = vrot.slane %v6602_v47, 5 }
 0x386   : > { %7940 = vst [vmem:[#allocation3 + $0xa8] sm:$0xf] %v7908_v0  ;;  %v6591_v59 = vsel %vm13658_vm8, %v6586_v49, %v6590_v38  ;;  %6786 = vst [vmem:[#allocation3 + $0x28c] sm:$0xf] %v6581_v56  ;;  %v6608_v20 = vrot.slane %v6606_v9, 4  ;;  %v6612_v50 = vshll.u32 %v6336_v35, 16 }
 0x387   : > { %v6339_v19 = vld [vmem:[#allocation2 + $0x8c] sm:$0x1]  ;;  %v7909_v51 = vld [vmem:[#allocation2 + $0x34] sm:$0xf]  ;;  %6787 = vst [vmem:[#allocation3 + $0x2b0] sm:$0xf] %v6591_v59  ;;  %v6599_v43 = vor.u32 %v6598_v7, %v6595_v15 }
 0x388   : > { %v13305_v36 = vld [vmem:[#allocation3 + $0x1f8] ss:$36 sps:$4 sm:$0xff]   ;;  %7061 = vst [vmem:[#allocation3 + $0x2fc] sm:$0xf] %v6972_v45  ;;  %v11606_v37 = vrot.slane %v6833_v22, 9  ;;  %v6975_v52 = vrot.slane %v6834_v63, 5  ;;  %v6609_v41 = vor.u32 %v6608_v20, %v6604_v61 }
 0x389   : > { %7941 = vst [vmem:[#allocation3 + $0xcc] sm:$0xf] %v7909_v51  ;;  %v13309_v10 = vld [vmem:[#allocation3 + $0x248] ss:$36 sps:$4 sm:$0xff]   ;;  %v6978_v5 = vrot.slane %v6835_v42, 5  ;;  %10297 = vmatmul.mubr.bf16.gmra.mxu1 %v13305_v36  ;;  %v6600_v1 = vrot.slane %v6599_v43, 4 }
 0x38a   : > { %v13314_v57 = vld [vmem:[#allocation3 + $0x244] ss:$36 sps:$4 sm:$0xff]   ;;  %v6836_v11 = vld [vmem:[#allocation2 + $0x90] sm:$0xe]  ;;  %v6614_v31 = vrot.slane %v6612_v50, 5  ;;  %v6976_v29 = vsel %vm13679_vm11, %v11606_v37, %v6975_v52  ;;  %v6977_v24 = vrot.slane %v6975_v52, 4  ;;  %10466 = vmatmul.mubr.bf16.gmra.mxu0 %v13309_v10 }
 0x38b   : > { %v13319_v2 = vld [vmem:[#allocation3 + $0x294] ss:$36 sps:$4 sm:$0xff]   ;;  %10304 = vmatprep.mubr.bf16.mxu1 %v13314_v57  ;;  %v6610_v32 = vrot.slane %v6609_v41, 4  ;;  %7062 = vst [vmem:[#allocation3 + $0x320] sm:$0xf] %v6976_v29  ;;  %v6617_v16 = vshrl.u32 %v6337_v28, 16  ;;  %v6605_v60 = vsel %vm13658_vm8, %v6600_v1, %v6604_v61  ;;  %v12385_v41 = vpop.f32.mrf.mxu1 }
 0x38c   : > { %v6620_v55 = vshll.u32 %v6337_v28, 16  ;;  %v6626_v3 = vshll.u32 %v6338_v6, 16  ;;  %v6837_v12 = vld [vmem:[#allocation2 + $0x94] sm:$0xf]  ;;  %10473 = vmatprep.mubr.bf16.mxu0 %v13319_v2  ;;  %v6979_v8 = vsel %vm13679_vm11, %v6977_v24, %v6978_v5  ;;  %v6630_v26 = vshrl.u32 %v6338_v6, 16 }
 0x38d   : > { %v6636_v30 = vshll.u32 %v6339_v19, 16  ;;  %v6838_v13 = vld [vmem:[#allocation2 + $0x98] sm:$0x1]  ;;  %v6615_v14 = vsel %vm13658_vm8, %v6610_v32, %v6614_v31  ;;  %6788 = vst [vmem:[#allocation3 + $0x2d4] sm:$0xf] %v6605_v60  ;;  %v6619_v27 = vrot.slane %v6617_v16, 4 }
 0x38e   : > { %7063 = vst [vmem:[#allocation3 + $0x344] sm:$0xf] %v6979_v8  ;;  %v6622_v18 = vrot.slane %v6620_v55, 5  ;;  %v6628_v58 = vrot.slane %v6626_v3, 5  ;;  %v6340_v62 = vld [vmem:[#allocation2 + $0x90] sm:$0xf] }
 0x38f   : > { %6789 = vst [vmem:[#allocation3 + $0x2f8] sm:$0xf] %v6615_v14  ;;  %v6632_v54 = vrot.slane %v6630_v26, 4  ;;  %v11607_v17 = vrot.slane %v6836_v11, 9  ;;  %v6982_v44 = vrot.slane %v6837_v12, 5  ;;  %v6638_v4 = vrot.slane %v6636_v30, 5 }
 0x390   : > { %v6341_v38 = vld [vmem:[#allocation2 + $0x94] sm:$0xf]  ;;  %v13317_v21 = vld [vmem:[#allocation3 + $0x290] ss:$36 sps:$4 sm:$0xff]   ;;  %v6623_v39 = vor.u32 %v6622_v18, %v6619_v27  ;;  %v6342_v33 = vld [vmem:[#allocation2 + $0x98] sm:$0x1] }
 0x391   : > { %v13312_v35 = vld [vmem:[#allocation3 + $0x240] ss:$36 sps:$4 sm:$0xff]   ;;  %v6633_v46 = vor.u32 %v6632_v54, %v6628_v58  ;;  %v6983_v22 = vsel %vm13679_vm11, %v11607_v17, %v6982_v44  ;;  %v6984_v63 = vrot.slane %v6982_v44, 4  ;;  %v6985_v53 = vrot.slane %v6838_v13, 5  ;;  %v13323_v47 = vld [vmem:[#allocation3 + $0x28c] ss:$36 sps:$4 sm:$0xff]   ;;  %v12386_v17 = vpop.f32.mrf.mxu1 }
 0x392   : > { %v6839_v40 = vld [vmem:[#allocation2 + $0x9c] sm:$0xe]  ;;  %v6624_v9 = vrot.slane %v6623_v39, 4  ;;  %7064 = vst [vmem:[#allocation3 + $0x368] sm:$0xf] %v6983_v22  ;;  %v6641_v42 = vshrl.u32 %v6340_v62, 16  ;;  %10305 = vmatmul.mubr.bf16.gmra.mxu1 %v13312_v35  ;;  %10474 = vmatmul.mubr.bf16.gmra.mxu0 %v13317_v21 }
 0x393   : > { %v6644_v49 = vshll.u32 %v6340_v62, 16  ;;  %v6650_v23 = vshll.u32 %v6341_v38, 16  ;;  %v6840_v34 = vld [vmem:[#allocation2 + $0xa0] sm:$0xf]  ;;  %v6841_v15 = vld [vmem:[#allocation2 + $0xa4] sm:$0x1]  ;;  %v6986_v28 = vsel %vm13679_vm11, %v6984_v63, %v6985_v53  ;;  %10312 = vmatprep.mubr.bf16.mxu1 %v13323_v47 }
 0x394   : > { %v6343_v0 = vld [vmem:[#allocation2 + $0x9c] sm:$0xf]  ;;  %v13327_v56 = vld [vmem:[#allocation3 + $0x2dc] ss:$36 sps:$4 sm:$0xff]   ;;  %v6634_v7 = vrot.slane %v6633_v46, 4  ;;  %v6654_v6 = vshrl.u32 %v6341_v38, 16  ;;  %v6629_v45 = vsel %vm13658_vm8, %v6624_v9, %v6628_v58 }
 0x395   : > { %v6660_v59 = vshll.u32 %v6342_v33, 16  ;;  %7065 = vst [vmem:[#allocation3 + $0x38c] sm:$0xf] %v6986_v28  ;;  %v6643_v61 = vrot.slane %v6641_v42, 4  ;;  %v6646_v20 = vrot.slane %v6644_v49, 5  ;;  %v6652_v19 = vrot.slane %v6650_v23, 5  ;;  %10481 = vmatprep.mubr.bf16.mxu0 %v13327_v56 }
 0x396   : > { %v7910_v51 = vld [vmem:[#allocation2 + $0x3c] sm:$0xf]  ;;  %v6639_v36 = vsel %vm13658_vm8, %v6634_v7, %v6638_v4  ;;  %6790 = vst [vmem:[#allocation3 + $0x31c] sm:$0xf] %v6629_v45  ;;  %v6656_v43 = vrot.slane %v6654_v6, 4  ;;  %v11608_v10 = vrot.slane %v6839_v40, 9  ;;  %v15356_v33 = vadd.f32 %v12386_v17, %v12385_v41 }
 0x397   : > { %v6344_v50 = vld [vmem:[#allocation2 + $0xa0] sm:$0xf]  ;;  %7942 = vst [vmem:[#allocation3 + $0xf0] sm:$0xf] %v7910_v51  ;;  %6791 = vst [vmem:[#allocation3 + $0x340] sm:$0xf] %v6639_v36  ;;  %v6647_v37 = vor.u32 %v6646_v20, %v6643_v61 }
 0x398   : > { %v6662_v52 = vrot.slane %v6660_v59, 5  ;;  %v6345_v57 = vld [vmem:[#allocation2 + $0xa4] sm:$0x1]  ;;  %v6657_v11 = vor.u32 %v6656_v43, %v6652_v19  ;;  %v6989_v2 = vrot.slane %v6840_v34, 5  ;;  %v6992_v1 = vrot.slane %v6841_v15, 5 }
 0x399   : > { %v13321_v5 = vld [vmem:[#allocation3 + $0x288] ss:$36 sps:$4 sm:$0xff]   ;;  %v6665_v31 = vshrl.u32 %v6343_v0, 16  ;;  %v6842_v29 = vld [vmem:[#allocation2 + $0xa8] sm:$0xe]  ;;  %v6648_v32 = vrot.slane %v6647_v37, 4 }
 0x39a   : > { %v6843_v24 = vld [vmem:[#allocation2 + $0xac] sm:$0xf]  ;;  %v6668_v16 = vshll.u32 %v6343_v0, 16  ;;  %v6674_v55 = vshll.u32 %v6344_v50, 16  ;;  %v6678_v3 = vshrl.u32 %v6344_v50, 16  ;;  %v6658_v8 = vrot.slane %v6657_v11, 4  ;;  %10313 = vmatmul.mubr.bf16.gmra.mxu1 %v13321_v5 }
 0x39b   : > { %v7911_v12 = vld [vmem:[#allocation2 + $0x40] sm:$0xf]  ;;  %v13325_v60 = vld [vmem:[#allocation3 + $0x2d8] ss:$36 sps:$4 sm:$0xff]   ;;  %v6990_v26 = vsel %vm13679_vm11, %v11608_v10, %v6989_v2  ;;  %v6991_v30 = vrot.slane %v6989_v2, 4  ;;  %v6667_v13 = vrot.slane %v6665_v31, 4  ;;  %v6653_v27 = vsel %vm13658_vm8, %v6648_v32, %v6652_v19 }
 0x39c   : > { %7943 = vst [vmem:[#allocation3 + $0x114] sm:$0xf] %v7911_v12  ;;  %v13330_v14 = vld [vmem:[#allocation3 + $0x2d4] ss:$36 sps:$4 sm:$0xff]   ;;  %7066 = vst [vmem:[#allocation3 + $0x3b0] sm:$0xf] %v6990_v26  ;;  %v6663_v38 = vsel %vm13658_vm8, %v6658_v8, %v6662_v52  ;;  %10482 = vmatmul.mubr.bf16.gmra.mxu0 %v13325_v60 }
 0x39d   : > { %v6670_v18 = vrot.slane %v6668_v16, 5  ;;  %v6676_v58 = vrot.slane %v6674_v55, 5  ;;  %v6680_v62 = vrot.slane %v6678_v3, 4  ;;  %v6346_v54 = vld [vmem:[#allocation2 + $0xa8] sm:$0xf]  ;;  %v6993_v21 = vsel %vm13679_vm11, %v6991_v30, %v6992_v1  ;;  %10320 = vmatprep.mubr.bf16.mxu1 %v13330_v14 }
 0x39e   : > { %v13335_v44 = vld [vmem:[#allocation3 + $0x324] ss:$36 sps:$4 sm:$0xff]   ;;  %6792 = vst [vmem:[#allocation3 + $0x364] sm:$0xf] %v6653_v27  ;;  %v6684_v39 = vshll.u32 %v6345_v57, 16  ;;  %v11609_v22 = vrot.slane %v6842_v29, 9 }
 0x39f   : > { %v6844_v4 = vld [vmem:[#allocation2 + $0xb0] sm:$0x1]  ;;  %6793 = vst [vmem:[#allocation3 + $0x388] sm:$0xf] %v6663_v38  ;;  %7067 = vst [vmem:[#allocation3 + $0x3d4] sm:$0xf] %v6993_v21  ;;  %v6671_v35 = vor.u32 %v6670_v18, %v6667_v13  ;;  %v6681_v46 = vor.u32 %v6680_v62, %v6676_v58  ;;  %10489 = vmatprep.mubr.bf16.mxu0 %v13335_v44 }
 0x3a0   : > { %v6996_v63 = vrot.slane %v6843_v24, 5  ;;  %v6347_v53 = vld [vmem:[#allocation2 + $0xac] sm:$0xf]  ;;  %v6686_v40 = vrot.slane %v6684_v39, 5  ;;  %v6348_v47 = vld [vmem:[#allocation2 + $0xb0] sm:$0x1] }
 0x3a1   : > { %v6845_v9 = vld [vmem:[#allocation2 + $0xb4] sm:$0xe]  ;;  %v6672_v42 = vrot.slane %v6671_v35, 4  ;;  %v6682_v49 = vrot.slane %v6681_v46, 4  ;;  %v6846_v15 = vld [vmem:[#allocation2 + $0xb8] sm:$0xf] }
 0x3a2   : > { %v6997_v23 = vsel %vm13679_vm11, %v11609_v22, %v6996_v63  ;;  %v6998_v34 = vrot.slane %v6996_v63, 4  ;;  %v6999_v0 = vrot.slane %v6844_v4, 5  ;;  %v6689_v56 = vshrl.u32 %v6346_v54, 16  ;;  %v6847_v6 = vld [vmem:[#allocation2 + $0xbc] sm:$0x1] }
 0x3a3   : > { %7068 = vst [vmem:[#allocation3 + $0x3f8] sm:$0xf] %v6997_v23  ;;  %v6692_v7 = vshll.u32 %v6346_v54, 16  ;;  %v6698_v28 = vshll.u32 %v6347_v53, 16  ;;  %v13333_v59 = vld [vmem:[#allocation3 + $0x320] ss:$36 sps:$4 sm:$0xff]   ;;  %v6677_v45 = vsel %vm13658_vm8, %v6672_v42, %v6676_v58  ;;  %v6687_v61 = vsel %vm13658_vm8, %v6682_v49, %v6686_v40 }
 0x3a4   : > { %v6702_v20 = vshrl.u32 %v6347_v53, 16  ;;  %v6708_v19 = vshll.u32 %v6348_v47, 16  ;;  %v6349_v51 = vld [vmem:[#allocation2 + $0xb4] sm:$0xf]  ;;  %v6350_v36 = vld [vmem:[#allocation2 + $0xb8] sm:$0xf]  ;;  %v7000_v50 = vsel %vm13679_vm11, %v6998_v34, %v6999_v0  ;;  %10490 = vmatmul.mubr.bf16.gmra.mxu0 %v13333_v59 }
 0x3a5   : > { %v13328_v43 = vld [vmem:[#allocation3 + $0x2d0] ss:$36 sps:$4 sm:$0xff]   ;;  %6794 = vst [vmem:[#allocation3 + $0x3ac] sm:$0xf] %v6677_v45  ;;  %6795 = vst [vmem:[#allocation3 + $0x3d0] sm:$0xf] %v6687_v61 }
 0x3a6   : > { %v6691_v37 = vrot.slane %v6689_v56, 4  ;;  %v6694_v52 = vrot.slane %v6692_v7, 5  ;;  %v6700_v10 = vrot.slane %v6698_v28, 5  ;;  %v13339_v57 = vld [vmem:[#allocation3 + $0x31c] ss:$36 sps:$4 sm:$0xff]   ;;  %v6704_v41 = vrot.slane %v6702_v20, 4  ;;  %10321 = vmatmul.mubr.bf16.gmra.mxu1 %v13328_v43 }
 0x3a7   : > { %7069 = vst [vmem:[#allocation3 + $0x41c] sm:$0xf] %v7000_v50  ;;  %v11610_v5 = vrot.slane %v6845_v9, 9  ;;  %v7003_v11 = vrot.slane %v6846_v15, 5  ;;  %v13343_v2 = vld [vmem:[#allocation3 + $0x36c] ss:$36 sps:$4 sm:$0xff]   ;;  %10328 = vmatprep.mubr.bf16.mxu1 %v13339_v57 }
 0x3a8   : > { %v6695_v1 = vor.u32 %v6694_v52, %v6691_v37  ;;  %v6710_v31 = vrot.slane %v6708_v19, 5  ;;  %v6351_v29 = vld [vmem:[#allocation2 + $0xbc] sm:$0x1]  ;;  %v6705_v24 = vor.u32 %v6704_v41, %v6700_v10  ;;  %v7006_v55 = vrot.slane %v6847_v6, 5  ;;  %v7968_v3 = vld [vmem:[#allocation2 + $0x18] sm:$0xf]  ;;  %10497 = vmatprep.mubr.bf16.mxu0 %v13343_v2 }
 0x3a9   : > { %v7004_v32 = vsel %vm13679_vm11, %v11610_v5, %v7003_v11  ;;  %v7005_v16 = vrot.slane %v7003_v11, 4  ;;  %v6713_v60 = vshrl.u32 %v6349_v51, 16  ;;  %v6716_v8 = vshll.u32 %v6349_v51, 16  ;;  %v7969_v30 = vld [vmem:[#allocation2 + $0x1c] sm:$0xf] }
 0x3aa   : > { %v6696_v12 = vrot.slane %v6695_v1, 4  ;;  %7070 = vst [vmem:[#allocation3 + $0x440] sm:$0xf] %v7004_v32  ;;  %v6722_v26 = vshll.u32 %v6350_v36, 16  ;;  %v6706_v13 = vrot.slane %v6705_v24, 4  ;;  %v6726_v27 = vshrl.u32 %v6350_v36, 16 }
 0x3ab   : > { %v7007_v14 = vsel %vm13679_vm11, %v7005_v16, %v7006_v55  ;;  %v6732_v18 = vshll.u32 %v6351_v29, 16  ;;  %v7970_v58 = vld [vmem:[#allocation2 + $0x20] sm:$0x1]  ;;  %v7136_v62 = vld [vmem:[#allocation2 + $0xc] sm:$0xf]  ;;  %v6715_v44 = vrot.slane %v6713_v60, 4 }
 0x3ac   : > { %v7912_v54 = vld [vmem:[#allocation2 + $0x48] sm:$0xf]  ;;  %v6701_v17 = vsel %vm13658_vm8, %v6696_v12, %v6700_v10  ;;  %7071 = vst [vmem:[#allocation3 + $0x464] sm:$0xf] %v7007_v14  ;;  %v6718_v38 = vrot.slane %v6716_v8, 5  ;;  %v6724_v21 = vrot.slane %v6722_v26, 5  ;;  %v6711_v35 = vsel %vm13658_vm8, %v6706_v13, %v6710_v31 }
 0x3ad   : > { %v7913_v39 = vld [vmem:[#allocation2 + $0x4c] sm:$0xf]  ;;  %7944 = vst [vmem:[#allocation3 + $0x138] sm:$0xf] %v7912_v54  ;;  %v13341_v4 = vld [vmem:[#allocation3 + $0x368] ss:$36 sps:$4 sm:$0xff]  }
 0x3ae   : > { %6796 = vst [vmem:[#allocation3 + $0x3f4] sm:$0xf] %v6701_v17  ;;  %v6728_v46 = vrot.slane %v6726_v27, 4  ;;  %7945 = vst [vmem:[#allocation3 + $0x15c] sm:$0xf] %v7913_v39  ;;  %v6719_v63 = vor.u32 %v6718_v38, %v6715_v44  ;;  %v6734_v53 = vrot.slane %v6732_v18, 5  ;;  %10498 = vmatmul.mubr.bf16.gmra.mxu0 %v13341_v4 }
 0x3af   : > { %v13337_v22 = vld [vmem:[#allocation3 + $0x318] ss:$36 sps:$4 sm:$0xff]   ;;  %6797 = vst [vmem:[#allocation3 + $0x418] sm:$0xf] %v6711_v35  ;;  %v8017_v40 = vshrl.u32 %v7968_v3, 16  ;;  %v8020_v49 = vshll.u32 %v7968_v3, 16 }
 0x3b0   : > { %v7137_v47 = vld [vmem:[#allocation2 + $0x10] sm:$0xf]  ;;  %v13346_v9 = vld [vmem:[#allocation3 + $0x364] ss:$36 sps:$4 sm:$0xff]   ;;  %v6729_v42 = vor.u32 %v6728_v46, %v6724_v21  ;;  %v8026_v23 = vshll.u32 %v7969_v30, 16  ;;  %v8030_v34 = vshrl.u32 %v7969_v30, 16  ;;  %10329 = vmatmul.mubr.bf16.gmra.mxu1 %v13337_v22 }
 0x3b1   : > { %v7138_v15 = vld [vmem:[#allocation2 + $0x14] sm:$0x1]  ;;  %v13351_v0 = vld [vmem:[#allocation3 + $0x3b4] ss:$36 sps:$4 sm:$0xff]   ;;  %v6720_v56 = vrot.slane %v6719_v63, 4  ;;  %v8019_v7 = vrot.slane %v8017_v40, 4  ;;  %10336 = vmatprep.mubr.bf16.mxu1 %v13346_v9 }
 0x3b2   : > { %v8036_v28 = vshll.u32 %v7970_v58, 16  ;;  %v7185_v6 = vshrl.u32 %v7136_v62, 16  ;;  %v6730_v59 = vrot.slane %v6729_v42, 4  ;;  %v8022_v45 = vrot.slane %v8020_v49, 5  ;;  %10505 = vmatprep.mubr.bf16.mxu0 %v13351_v0  ;;  %v7632_v43 = vld [vmem:[#allocation2 + $0xc] sm:$0xe] }
 0x3b3   : > { %v8028_v61 = vrot.slane %v8026_v23, 5  ;;  %v8032_v20 = vrot.slane %v8030_v34, 4  ;;  %v6725_v19 = vsel %vm13658_vm8, %v6720_v56, %v6724_v21  ;;  %v7188_v36 = vshll.u32 %v7136_v62, 16  ;;  %v7633_v50 = vld [vmem:[#allocation2 + $0x10] sm:$0xf] }
 0x3b4   : > { %v7187_v51 = vrot.slane %v7185_v6, 4  ;;  %v6735_v37 = vsel %vm13658_vm8, %v6730_v59, %v6734_v53  ;;  %6798 = vst [vmem:[#allocation3 + $0x43c] sm:$0xf] %v6725_v19  ;;  %v8023_v52 = vor.u32 %v8022_v45, %v8019_v7  ;;  %v7194_v57 = vshll.u32 %v7137_v47, 16  ;;  %v7634_v41 = vld [vmem:[#allocation2 + $0x14] sm:$0x1] }
 0x3b5   : > { %v8033_v10 = vor.u32 %v8032_v20, %v8028_v61  ;;  %v7971_v5 = vld [vmem:[#allocation2 + $0x24] sm:$0xf]  ;;  %6799 = vst [vmem:[#allocation3 + $0x460] sm:$0xf] %v6735_v37  ;;  %v7190_v11 = vrot.slane %v7188_v36, 5  ;;  %v7198_v2 = vshrl.u32 %v7137_v47, 16 }
 0x3b6   : > { %v7204_v1 = vshll.u32 %v7138_v15, 16  ;;  %v7972_v31 = vld [vmem:[#allocation2 + $0x28] sm:$0xf]  ;;  %v13344_v29 = vld [vmem:[#allocation3 + $0x360] ss:$36 sps:$4 sm:$0xff]   ;;  %v8024_v24 = vrot.slane %v8023_v52, 4 }
 0x3b7   : > { %v8038_v32 = vrot.slane %v8036_v28, 5  ;;  %v11611_v16 = vrot.slane %v7632_v43, 9  ;;  %v13349_v55 = vld [vmem:[#allocation3 + $0x3b0] ss:$36 sps:$4 sm:$0xff]   ;;  %v8034_v3 = vrot.slane %v8033_v10, 4  ;;  %v7191_v12 = vor.u32 %v7190_v11, %v7187_v51 }
 0x3b8   : > { %v7196_v60 = vrot.slane %v7194_v57, 5  ;;  %v7200_v8 = vrot.slane %v7198_v2, 4  ;;  %v13355_v26 = vld [vmem:[#allocation3 + $0x3ac] ss:$36 sps:$4 sm:$0xff]   ;;  %v8029_v30 = vsel %vm13658_vm8, %v8024_v24, %v8028_v61  ;;  %v7206_v13 = vrot.slane %v7204_v1, 5  ;;  %10337 = vmatmul.mubr.bf16.gmra.mxu1 %v13344_v29  ;;  %10506 = vmatmul.mubr.bf16.gmra.mxu0 %v13349_v55 }
 0x3b9   : > { %v7730_v14 = vrot.slane %v7633_v50, 5  ;;  %v7733_v27 = vrot.slane %v7634_v41, 5  ;;  %v13359_v18 = vld [vmem:[#allocation3 + $0x3fc] ss:$36 sps:$4 sm:$0xff]   ;;  %v8039_v58 = vsel %vm13658_vm8, %v8034_v3, %v8038_v32  ;;  %8432 = vst [vmem:[#allocation3 + $0x1c] sm:$0xf] %v8029_v30  ;;  %10344 = vmatprep.mubr.bf16.mxu1 %v13355_v26 }
 0x3ba   : > { %v7192_v62 = vrot.slane %v7191_v12, 4  ;;  %v7201_v54 = vor.u32 %v7200_v8, %v7196_v60  ;;  %v7973_v17 = vld [vmem:[#allocation2 + $0x2c] sm:$0x1]  ;;  %v8041_v44 = vshrl.u32 %v7971_v5, 16  ;;  %8433 = vst [vmem:[#allocation3 + $0x40] sm:$0xf] %v8039_v58  ;;  %10513 = vmatprep.mubr.bf16.mxu0 %v13359_v18 }
 0x3bb   : > { %v7731_v38 = vsel %vm13679_vm11, %v11611_v16, %v7730_v14  ;;  %v7732_v21 = vrot.slane %v7730_v14, 4  ;;  %v8044_v39 = vshll.u32 %v7971_v5, 16  ;;  %v8050_v4 = vshll.u32 %v7972_v31, 16  ;;  %v7139_v35 = vld [vmem:[#allocation2 + $0x18] sm:$0xf] }
 0x3bc   : > { %v7197_v46 = vsel %vm13658_vm8, %v7192_v62, %v7196_v60  ;;  %v7202_v22 = vrot.slane %v7201_v54, 4  ;;  %7872 = vst [vmem:[#allocation3 + $0x14] sm:$0xf] %v7731_v38  ;;  %v8043_v63 = vrot.slane %v8041_v44, 4  ;;  %v8054_v53 = vshrl.u32 %v7972_v31, 16 }
 0x3bd   : > { %v7140_v40 = vld [vmem:[#allocation2 + $0x1c] sm:$0xf]  ;;  %7600 = vst [vmem:[#allocation3 + $0x10] sm:$0xf] %v7197_v46  ;;  %v7734_v47 = vsel %vm13679_vm11, %v7732_v21, %v7733_v27  ;;  %v8046_v9 = vrot.slane %v8044_v39, 5  ;;  %v8052_v34 = vrot.slane %v8050_v4, 5 }
 0x3be   : > { %v7141_v42 = vld [vmem:[#allocation2 + $0x20] sm:$0x1]  ;;  %v7207_v23 = vsel %vm13658_vm8, %v7202_v22, %v7206_v13  ;;  %7873 = vst [vmem:[#allocation3 + $0x38] sm:$0xf] %v7734_v47  ;;  %v8056_v15 = vrot.slane %v8054_v53, 4  ;;  %v8060_v0 = vshll.u32 %v7973_v17, 16 }
 0x3bf   : > { %v13353_v49 = vld [vmem:[#allocation3 + $0x3a8] ss:$36 sps:$4 sm:$0xff]   ;;  %v13357_v56 = vld [vmem:[#allocation3 + $0x3f8] ss:$36 sps:$4 sm:$0xff]   ;;  %7601 = vst [vmem:[#allocation3 + $0x34] sm:$0xf] %v7207_v23  ;;  %v8047_v7 = vor.u32 %v8046_v9, %v8043_v63 }
 0x3c0   : > { %v7209_v28 = vshrl.u32 %v7139_v35, 16  ;;  %v7212_v6 = vshll.u32 %v7139_v35, 16  ;;  %v7218_v59 = vshll.u32 %v7140_v40, 16  ;;  %v7635_v45 = vld [vmem:[#allocation2 + $0x18] sm:$0xe]  ;;  %v8057_v51 = vor.u32 %v8056_v15, %v8052_v34  ;;  %10345 = vmatmul.mubr.bf16.gmra.mxu1 %v13353_v49  ;;  %10514 = vmatmul.mubr.bf16.gmra.mxu0 %v13357_v56 }
 0x3c1   : > { %v7636_v61 = vld [vmem:[#allocation2 + $0x1c] sm:$0xf]  ;;  %v7914_v20 = vld [vmem:[#allocation2 + $0x54] sm:$0xf]  ;;  %v13362_v19 = vld [vmem:[#allocation3 + $0x3f4] ss:$36 sps:$4 sm:$0xff]  }
 0x3c2   : > { %v7222_v36 = vshrl.u32 %v7140_v40, 16  ;;  %v7974_v43 = vld [vmem:[#allocation2 + $0x30] sm:$0xf]  ;;  %v7915_v50 = vld [vmem:[#allocation2 + $0x58] sm:$0xf]  ;;  %v8048_v37 = vrot.slane %v8047_v7, 4  ;;  %10352 = vmatprep.mubr.bf16.mxu1 %v13362_v19 }
 0x3c3   : > { %7946 = vst [vmem:[#allocation3 + $0x180] sm:$0xf] %v7914_v20  ;;  %v7211_v52 = vrot.slane %v7209_v28, 4  ;;  %v7214_v10 = vrot.slane %v7212_v6, 5  ;;  %v7220_v57 = vrot.slane %v7218_v59, 5  ;;  %v8058_v5 = vrot.slane %v8057_v51, 4 }
 0x3c4   : > { %7947 = vst [vmem:[#allocation3 + $0x1a4] sm:$0xf] %v7915_v50  ;;  %v13368_v41 = vld [vmem:[#allocation3 + $0x444] ss:$36 sps:$4 sm:$0xff]   ;;  %v8062_v11 = vrot.slane %v8060_v0, 5  ;;  %v7228_v2 = vshll.u32 %v7141_v42, 16  ;;  %v8053_v1 = vsel %vm13658_vm8, %v8048_v37, %v8052_v34 }
 0x3c5   : > { %v7215_v31 = vor.u32 %v7214_v10, %v7211_v52  ;;  %v7224_v29 = vrot.slane %v7222_v36, 4  ;;  %v7637_v24 = vld [vmem:[#allocation2 + $0x20] sm:$0x1]  ;;  %10521 = vmatprep.mubr.bf16.mxu0 %v13368_v41  ;;  %8434 = vst [vmem:[#allocation3 + $0x64] sm:$0xf] %v8053_v1  ;;  %v11612_v16 = vrot.slane %v7635_v45, 9 }
 0x3c6   : > { %v8063_v32 = vsel %vm13658_vm8, %v8058_v5, %v8062_v11  ;;  %v7737_v55 = vrot.slane %v7636_v61, 5  ;;  %v7975_v3 = vld [vmem:[#allocation2 + $0x34] sm:$0xf]  ;;  %v7976_v8 = vld [vmem:[#allocation2 + $0x38] sm:$0x1]  ;;  %v8065_v26 = vshrl.u32 %v7974_v43, 16 }
 0x3c7   : > { %8435 = vst [vmem:[#allocation3 + $0x88] sm:$0xf] %v8063_v32  ;;  %v7216_v12 = vrot.slane %v7215_v31, 4  ;;  %v7225_v60 = vor.u32 %v7224_v29, %v7220_v57  ;;  %v8068_v30 = vshll.u32 %v7974_v43, 16  ;;  %v7230_v13 = vrot.slane %v7228_v2, 5 }
 0x3c8   : > { %v7738_v14 = vsel %vm13679_vm11, %v11612_v16, %v7737_v55  ;;  %v7739_v27 = vrot.slane %v7737_v55, 4  ;;  %v7740_v18 = vrot.slane %v7637_v24, 5  ;;  %v7142_v58 = vld [vmem:[#allocation2 + $0x24] sm:$0xf]  ;;  %v8067_v17 = vrot.slane %v8065_v26, 4 }
 0x3c9   : > { %v7221_v62 = vsel %vm13658_vm8, %v7216_v12, %v7220_v57  ;;  %v7226_v54 = vrot.slane %v7225_v60, 4  ;;  %7874 = vst [vmem:[#allocation3 + $0x5c] sm:$0xf] %v7738_v14  ;;  %v8070_v44 = vrot.slane %v8068_v30, 5  ;;  %v7143_v38 = vld [vmem:[#allocation2 + $0x28] sm:$0xf] }
 0x3ca   : > { %v13360_v21 = vld [vmem:[#allocation3 + $0x3f0] ss:$36 sps:$4 sm:$0xff]   ;;  %7602 = vst [vmem:[#allocation3 + $0x58] sm:$0xf] %v7221_v62  ;;  %v7741_v39 = vsel %vm13679_vm11, %v7739_v27, %v7740_v18  ;;  %v8074_v4 = vshll.u32 %v7975_v3, 16  ;;  %v8078_v35 = vshrl.u32 %v7975_v3, 16 }
 0x3cb   : > { %v7144_v46 = vld [vmem:[#allocation2 + $0x2c] sm:$0x1]  ;;  %v13366_v22 = vld [vmem:[#allocation3 + $0x440] ss:$36 sps:$4 sm:$0xff]   ;;  %v7231_v53 = vsel %vm13658_vm8, %v7226_v54, %v7230_v13  ;;  %7875 = vst [vmem:[#allocation3 + $0x80] sm:$0xf] %v7741_v39  ;;  %v8071_v40 = vor.u32 %v8070_v44, %v8067_v17  ;;  %10353 = vmatmul.mubr.bf16.gmra.mxu1 %v13360_v21 }
 0x3cc   : > { %v13373_v63 = vld [vmem:[#allocation3 + $0x43c] ss:$36 sps:$4 sm:$0xff]   ;;  %v7233_v47 = vshrl.u32 %v7142_v58, 16  ;;  %v7236_v9 = vshll.u32 %v7142_v58, 16  ;;  %v7638_v42 = vld [vmem:[#allocation2 + $0x24] sm:$0xe]  ;;  %10522 = vmatmul.mubr.bf16.gmra.mxu0 %v13366_v22 }
 0x3cd   : > { %v7639_v49 = vld [vmem:[#allocation2 + $0x28] sm:$0xf]  ;;  %v13381_v23 = vld [vmem:[#allocation3 + $0x1c] ss:$36 sps:$4 sm:$0xff]   ;;  %7603 = vst [vmem:[#allocation3 + $0x7c] sm:$0xf] %v7231_v53  ;;  %10360 = vmatprep.mubr.bf16.mxu1 %v13373_v63 }
 0x3ce   : > { %v8076_v34 = vrot.slane %v8074_v4, 5  ;;  %v8080_v15 = vrot.slane %v8078_v35, 4  ;;  %v8084_v0 = vshll.u32 %v7976_v8, 16  ;;  %v7242_v56 = vshll.u32 %v7143_v38, 16  ;;  %10723 = vmatprep.mubr.bf16.mxu0 %v13381_v23  ;;  %v7640_v20 = vld [vmem:[#allocation2 + $0x2c] sm:$0x1] }
 0x3cf   : > { %v8072_v7 = vrot.slane %v8071_v40, 4  ;;  %v7235_v28 = vrot.slane %v7233_v47, 4  ;;  %v7238_v6 = vrot.slane %v7236_v9, 5  ;;  %v7246_v59 = vshrl.u32 %v7143_v38, 16  ;;  %v7977_v19 = vld [vmem:[#allocation2 + $0x3c] sm:$0xf]  ;;  %v12388_v47 = vpop.f32.mrf.mxu1 }
 0x3d0   : > { %v8081_v45 = vor.u32 %v8080_v15, %v8076_v34  ;;  %v7244_v61 = vrot.slane %v7242_v56, 5  ;;  %v7252_v50 = vshll.u32 %v7144_v46, 16  ;;  %v7978_v37 = vld [vmem:[#allocation2 + $0x40] sm:$0xf]  ;;  %v7917_v10 = vld [vmem:[#allocation2 + $0x64] sm:$0xf] }
 0x3d1   : > { %v8077_v51 = vsel %vm13658_vm8, %v8072_v7, %v8076_v34  ;;  %v7239_v36 = vor.u32 %v7238_v6, %v7235_v28  ;;  %v7248_v43 = vrot.slane %v7246_v59, 4  ;;  %v7916_v52 = vld [vmem:[#allocation2 + $0x60] sm:$0xf]  ;;  %v8086_v41 = vrot.slane %v8084_v0, 5  ;;  %v15404_v2 = vld [vmem:[#allocation2 + $0x44] sm:$0x1] }
 0x3d2   : > { %v8082_v57 = vrot.slane %v8081_v45, 4  ;;  %8436 = vst [vmem:[#allocation3 + $0xac] sm:$0xf] %v8077_v51  ;;  %v11613_v5 = vrot.slane %v7638_v42, 9  ;;  %v7744_v11 = vrot.slane %v7639_v49, 5  ;;  %v7747_v24 = vrot.slane %v7640_v20, 5 }
 0x3d3   : > { %v7145_v1 = vld [vmem:[#allocation2 + $0x30] sm:$0xf]  ;;  %7948 = vst [vmem:[#allocation3 + $0x1c8] sm:$0xf] %v7916_v52  ;;  %7949 = vst [vmem:[#allocation3 + $0x1ec] sm:$0xf] %v7917_v10  ;;  %v7249_v29 = vor.u32 %v7248_v43, %v7244_v61  ;;  %v12389_v10 = vpop.f32.mrf.mxu1 }
 0x3d4   : > { %v7240_v31 = vrot.slane %v7239_v36, 4  ;;  %v8089_v32 = vshrl.u32 %v7977_v19, 16  ;;  %v7146_v16 = vld [vmem:[#allocation2 + $0x34] sm:$0xf]  ;;  %v8087_v12 = vsel %vm13658_vm8, %v8082_v57, %v8086_v41  ;;  %v7745_v60 = vsel %vm13679_vm11, %v11613_v5, %v7744_v11  ;;  %v13384_v30 = vld [vmem:[#allocation3 + $0x14] ss:$36 sps:$4 sm:$0xff]  }
 0x3d5   : > { %v13371_v55 = vld [vmem:[#allocation3 + $0x438] ss:$36 sps:$4 sm:$0xff]   ;;  %v7746_v8 = vrot.slane %v7744_v11, 4  ;;  %v8092_v26 = vshll.u32 %v7977_v19, 16  ;;  %8437 = vst [vmem:[#allocation3 + $0xd0] sm:$0xf] %v8087_v12 }
 0x3d6   : > { %v13379_v3 = vld [vmem:[#allocation3 + $0x18] ss:$36 sps:$4 sm:$0xff]   ;;  %v7245_v13 = vsel %vm13658_vm8, %v7240_v31, %v7244_v61  ;;  %v7250_v14 = vrot.slane %v7249_v29, 4  ;;  %v7254_v27 = vrot.slane %v7252_v50, 5  ;;  %7876 = vst [vmem:[#allocation3 + $0xa4] sm:$0xf] %v7745_v60  ;;  %10361 = vmatmul.mubr.bf16.gmra.mxu1 %v13371_v55 }
 0x3d7   : > { %v15412_v18 = vld [vmem:[#allocation2 + $0x38] sm:$0x1]  ;;  %v13389_v58 = vld [vmem:[#allocation3 + $0x64] ss:$36 sps:$4 sm:$0xff]   ;;  %7604 = vst [vmem:[#allocation3 + $0xa0] sm:$0xf] %v7245_v13  ;;  %v7748_v62 = vsel %vm13679_vm11, %v7746_v8, %v7747_v24  ;;  %10562 = vmatprep.mubr.bf16.mxu1 %v13384_v30  ;;  %10724 = vmatmul.mubr.bf16.vlgmr.msra.gmra.mxu0 %v13379_v3  ;;  %v12497_v13 = vpop.f32.mrf.mxu0 }
 0x3d8   : > { %v8091_v54 = vrot.slane %v8089_v32, 4  ;;  %v8094_v17 = vrot.slane %v8092_v26, 5  ;;  %v8098_v44 = vshll.u32 %v7978_v37, 16  ;;  %v7255_v38 = vsel %vm13658_vm8, %v7250_v14, %v7254_v27  ;;  %7877 = vst [vmem:[#allocation3 + $0xc8] sm:$0xf] %v7748_v62  ;;  %10731 = vmatprep.mubr.bf16.mxu0 %v13389_v58  ;;  %v15423_v59 = vld [vmem:[%s16330_s4 + $0x230] sm:$0xff]  }
 0x3d9   : > { %v8102_v21 = vshrl.u32 %v7978_v37, 16  ;;  %v8108_v39 = vshll.u32 %v15404_v2, 16  ;;  %v7257_v4 = vshrl.u32 %v7145_v1, 16  ;;  %v7641_v35 = vld [vmem:[#allocation2 + $0x30] sm:$0xe]  ;;  %v7260_v63 = vshll.u32 %v7145_v1, 16 }
 0x3da   : > { %7605 = vst [vmem:[#allocation3 + $0xc4] sm:$0xf] %v7255_v38  ;;  %v8095_v46 = vor.u32 %v8094_v17, %v8091_v54  ;;  %v8100_v22 = vrot.slane %v8098_v44, 5  ;;  %v7266_v53 = vshll.u32 %v7146_v16, 16  ;;  %v7642_v40 = vld [vmem:[#allocation2 + $0x34] sm:$0xf]  ;;  %v15437_v14 = vadd.f32 %v12389_v10, %v12388_v47 }
 0x3db   : > { %v8104_v9 = vrot.slane %v8102_v21, 4  ;;  %v7259_v42 = vrot.slane %v7257_v4, 4  ;;  %v7270_v49 = vshrl.u32 %v7146_v16, 16  ;;  %v7643_v23 = vld [vmem:[#allocation2 + $0x38] sm:$0x1]  ;;  %v7262_v15 = vrot.slane %v7260_v63, 5 }
 0x3dc   : > { %v8096_v34 = vrot.slane %v8095_v46, 4  ;;  %v7268_v0 = vrot.slane %v7266_v53, 5  ;;  %v7276_v56 = vshll.u32 %v15412_v18, 16  ;;  %v7980_v7 = vld [vmem:[#allocation2 + $0x48] sm:$0xf]  ;;  %v11614_v61 = vrot.slane %v7641_v35, 9  ;;  %v12498_v35 = vpop.f32.mrf.mxu0 }
 0x3dd   : > { %v13382_v28 = vld [vmem:[#allocation3 + $0x10] ss:$36 sps:$4 sm:$0xff]   ;;  %v8105_v6 = vor.u32 %v8104_v9, %v8100_v22  ;;  %v7272_v45 = vrot.slane %v7270_v49, 4  ;;  %v7751_v20 = vrot.slane %v7642_v40, 5  ;;  %v13387_v19 = vld [vmem:[#allocation3 + $0x60] ss:$36 sps:$4 sm:$0xff]   ;;  %v7263_v50 = vor.u32 %v7262_v15, %v7259_v42 }
 0x3de   : > { %v13393_v51 = vld [vmem:[#allocation3 + $0x5c] ss:$36 sps:$4 sm:$0xff]   ;;  %v8101_v36 = vsel %vm13658_vm8, %v8096_v34, %v8100_v22  ;;  %v8110_v43 = vrot.slane %v8108_v39, 5  ;;  %v7981_v37 = vld [vmem:[#allocation2 + $0x4c] sm:$0xf]  ;;  %10563 = vmatmul.mubr.bf16.vlgmr.msra.gmra.mxu1 %v13382_v28  ;;  %v7754_v24 = vrot.slane %v7643_v23, 5  ;;  %v12500_v34 = vpop.f32.mrf.mxu0 }
 0x3df   : > { %v7982_v52 = vld [vmem:[#allocation2 + $0x50] sm:$0x1]  ;;  %v8106_v57 = vrot.slane %v8105_v6, 4  ;;  %8438 = vst [vmem:[#allocation3 + $0xf4] sm:$0xf] %v8101_v36  ;;  %v7273_v41 = vor.u32 %v7272_v45, %v7268_v0  ;;  %v7752_v5 = vsel %vm13679_vm11, %v11614_v61, %v7751_v20  ;;  %v7753_v11 = vrot.slane %v7751_v20, 4  ;;  %10570 = vmatprep.mubr.bf16.mxu1 %v13393_v51  ;;  %10732 = vmatmul.mubr.bf16.gmra.mxu0 %v13387_v19 }
 0x3e0   : > { %v7148_v2 = vld [vmem:[#allocation2 + $0x3c] sm:$0xf]  ;;  %v7149_v1 = vld [vmem:[#allocation2 + $0x40] sm:$0xf]  ;;  %v7918_v31 = vld [vmem:[#allocation2 + $0x6c] sm:$0xf] }
 0x3e1   : > { %v7264_v29 = vrot.slane %v7263_v50, 4  ;;  %7878 = vst [vmem:[#allocation3 + $0xec] sm:$0xf] %v7752_v5  ;;  %v8113_v32 = vshrl.u32 %v7980_v7, 16  ;;  %v8116_v16 = vshll.u32 %v7980_v7, 16  ;;  %v13503_v3 = vld [vmem:[%s16330_s4 + $0x238] sm:$0xff]   ;;  %v8111_v60 = vsel %vm13658_vm8, %v8106_v57, %v8110_v43 }
 0x3e2   : > { %v7919_v55 = vld [vmem:[#allocation2 + $0x70] sm:$0xf]  ;;  %7950 = vst [vmem:[#allocation3 + $0x210] sm:$0xf] %v7918_v31  ;;  %12890 = vmatpush3.bf16.msra.mxu1 %v13503_v3  ;;  %v13396_v12 = vld [vmem:[#allocation3 + $0xac] ss:$36 sps:$4 sm:$0xff]   ;;  %v7755_v18 = vsel %vm13679_vm11, %v7753_v11, %v7754_v24 }
 0x3e3   : > { %v7274_v8 = vrot.slane %v7273_v41, 4  ;;  %v7278_v26 = vrot.slane %v7276_v56, 5  ;;  %v13416_v30 = vld [vmem:[%s16330_s4 + $0x228] sm:$0xff]   ;;  %7951 = vst [vmem:[#allocation3 + $0x234] sm:$0xf] %v7919_v55  ;;  %12891 = vmatprep.subr.bf16.mxu1 %v15423_v59  ;;  %v7269_v27 = vsel %vm13658_vm8, %v7264_v29, %v7268_v0  ;;  %v8115_v58 = vrot.slane %v8113_v32, 4  ;;  %10739 = vmatprep.mubr.bf16.mxu0 %v13396_v12 }
 0x3e4   : > { %8439 = vst [vmem:[#allocation3 + $0x118] sm:$0xf] %v8111_v60  ;;  %v8118_v62 = vrot.slane %v8116_v16, 5  ;;  %v7150_v54 = vld [vmem:[#allocation2 + $0x44] sm:$0x1]  ;;  %v8122_v38 = vshll.u32 %v7981_v37, 16 }
 0x3e5   : > { %v7644_v17 = vld [vmem:[#allocation2 + $0x3c] sm:$0xe]  ;;  %v7279_v44 = vsel %vm13658_vm8, %v7274_v8, %v7278_v26  ;;  %7606 = vst [vmem:[#allocation3 + $0xe8] sm:$0xf] %v7269_v27  ;;  %7879 = vst [vmem:[#allocation3 + $0x110] sm:$0xf] %v7755_v18 }
 0x3e6   : > { %v8126_v21 = vshrl.u32 %v7981_v37, 16  ;;  %v8132_v39 = vshll.u32 %v7982_v52, 16  ;;  %v7645_v4 = vld [vmem:[#allocation2 + $0x40] sm:$0xf]  ;;  %7607 = vst [vmem:[#allocation3 + $0x10c] sm:$0xf] %v7279_v44  ;;  %v8119_v46 = vor.u32 %v8118_v62, %v8115_v58  ;;  %12892 = vmatpush3.bf16.msra.mxu1 %v15423_v59  ;;  %v12501_v59 = vpop.f32.mrf.mxu0 }
 0x3e7   : > { %v7281_v22 = vshrl.u32 %v7148_v2, 16  ;;  %v7284_v63 = vshll.u32 %v7148_v2, 16  ;;  %v7290_v53 = vshll.u32 %v7149_v1, 16  ;;  %v7646_v40 = vld [vmem:[#allocation2 + $0x44] sm:$0x1]  ;;  %v8124_v9 = vrot.slane %v8122_v38, 5  ;;  %12893 = vmatprep.subr.bf16.mxu1 %v13416_v30 }
 0x3e8   : > { %v13391_v47 = vld [vmem:[#allocation3 + $0x58] ss:$36 sps:$4 sm:$0xff]   ;;  %v8128_v42 = vrot.slane %v8126_v21, 4  ;;  %v8134_v49 = vrot.slane %v8132_v39, 5  ;;  %v7294_v23 = vshrl.u32 %v7149_v1, 16  ;;  %v8120_v15 = vrot.slane %v8119_v46, 4 }
 0x3e9   : > { %v7283_v0 = vrot.slane %v7281_v22, 4  ;;  %v7286_v56 = vrot.slane %v7284_v63, 5  ;;  %v7292_v7 = vrot.slane %v7290_v53, 5  ;;  %v13429_v28 = vld [vmem:[%s16330_s4 + $0x220] sm:$0xff]   ;;  %v7300_v20 = vshll.u32 %v7150_v54, 16  ;;  %10571 = vmatmul.mubr.bf16.gmra.mxu1 %v13391_v47  ;;  %v15455_v10 = vld [vmem:[%s16330_s4 + $0x218] sm:$0xff]  }
 0x3ea   : > { %v13399_v6 = vld [vmem:[#allocation3 + $0xa4] ss:$36 sps:$4 sm:$0xff]   ;;  %v8129_v45 = vor.u32 %v8128_v42, %v8124_v9  ;;  %v7296_v61 = vrot.slane %v7294_v23, 4  ;;  %v11615_v19 = vrot.slane %v7644_v17, 9  ;;  %v8125_v36 = vsel %vm13658_vm8, %v8120_v15, %v8124_v9  ;;  %v7983_v52 = vld [vmem:[#allocation2 + $0x54] sm:$0xf]  ;;  %12894 = vmatpush3.bf16.msra.mxu1 %v13416_v30 }
 0x3eb   : > { %v13394_v51 = vld [vmem:[#allocation3 + $0xa8] ss:$36 sps:$4 sm:$0xff]   ;;  %v7287_v43 = vor.u32 %v7286_v56, %v7283_v0  ;;  %v7758_v50 = vrot.slane %v7645_v4, 5  ;;  %v7761_v37 = vrot.slane %v7646_v40, 5  ;;  %10578 = vmatprep.mubr.bf16.mxu1 %v13399_v6  ;;  %v13402_v57 = vld [vmem:[#allocation3 + $0xf4] ss:$36 sps:$4 sm:$0xff]   ;;  %v12499_v2 = vadd.f32 %v12498_v35, %v12497_v13  ;;  %12895 = vmatprep.subr.bf16.mxu1 %v13429_v28 }
 0x3ec   : > { %v8130_v41 = vrot.slane %v8129_v45, 4  ;;  %8440 = vst [vmem:[#allocation3 + $0x13c] sm:$0xf] %v8125_v36  ;;  %v7297_v5 = vor.u32 %v7296_v61, %v7292_v7  ;;  %v7984_v11 = vld [vmem:[#allocation2 + $0x58] sm:$0xf]  ;;  %v12502_v1 = vadd.f32 %v12501_v59, %v12500_v34  ;;  %10740 = vmatmul.mubr.bf16.gmra.mxu0 %v13394_v51  ;;  %v7302_v29 = vrot.slane %v7300_v20, 5 }
 0x3ed   : > { %v7288_v31 = vrot.slane %v7287_v43, 4  ;;  %v7759_v24 = vsel %vm13679_vm11, %v11615_v19, %v7758_v50  ;;  %v7760_v32 = vrot.slane %v7758_v50, 4  ;;  %v15459_v16 = vld [vmem:[#allocation2 + $0x5c] sm:$0x1]  ;;  %10747 = vmatprep.mubr.bf16.mxu0 %v13402_v57  ;;  %v7151_v12 = vld [vmem:[#allocation2 + $0x48] sm:$0xf]  ;;  %v15464_v8 = vadd.f32 %v12499_v2, %v15356_v33 }
 0x3ee   : > { %v8135_v55 = vsel %vm13658_vm8, %v8130_v41, %v8134_v49  ;;  %v7298_v3 = vrot.slane %v7297_v5, 4  ;;  %7880 = vst [vmem:[#allocation3 + $0x134] sm:$0xf] %v7759_v24  ;;  %v7152_v60 = vld [vmem:[#allocation2 + $0x4c] sm:$0xf]  ;;  %v15467_v26 = vadd.f32 %v12502_v1, %v15437_v14  ;;  %v8137_v27 = vshrl.u32 %v7983_v52, 16  ;;  %12896 = vmatpush3.bf16.msra.mxu1 %v13429_v28 }
 0x3ef   : > { %8441 = vst [vmem:[#allocation3 + $0x160] sm:$0xf] %v8135_v55  ;;  %v7293_v30 = vsel %vm13658_vm8, %v7288_v31, %v7292_v7  ;;  %v7762_v13 = vsel %vm13679_vm11, %v7760_v32, %v7761_v37  ;;  %v8140_v18 = vshll.u32 %v7983_v52, 16  ;;  %v7920_v58 = vld [vmem:[#allocation2 + $0x78] sm:$0xf]  ;;  %v13455_v54 = vld [vmem:[%s16330_s4 + $0x210] sm:$0xff]   ;;  %12897 = vmatprep.subr.bf16.mxu1 %v15455_v10 }
 0x3f0   : > { %v7921_v62 = vld [vmem:[#allocation2 + $0x7c] sm:$0xf]  ;;  %v7303_v33 = vsel %vm13658_vm8, %v7298_v3, %v7302_v29  ;;  %7608 = vst [vmem:[#allocation3 + $0x130] sm:$0xf] %v7293_v30  ;;  %7881 = vst [vmem:[#allocation3 + $0x158] sm:$0xf] %v7762_v13 }
 0x3f1   : > { %v8146_v14 = vshll.u32 %v7984_v11, 16  ;;  %v8150_v17 = vshrl.u32 %v7984_v11, 16  ;;  %v7153_v44 = vld [vmem:[#allocation2 + $0x50] sm:$0x1]  ;;  %v7648_v38 = vld [vmem:[#allocation2 + $0x4c] sm:$0xf] }
 0x3f2   : > { %7952 = vst [vmem:[#allocation3 + $0x258] sm:$0xf] %v7920_v58  ;;  %7953 = vst [vmem:[#allocation3 + $0x27c] sm:$0xf] %v7921_v62  ;;  %v13397_v21 = vld [vmem:[#allocation3 + $0xa0] ss:$36 sps:$4 sm:$0xff]   ;;  %12898 = vmatpush3.bf16.msra.mxu1 %v15455_v10 }
 0x3f3   : > { %7609 = vst [vmem:[#allocation3 + $0x154] sm:$0xf] %v7303_v33  ;;  %v8139_v39 = vrot.slane %v8137_v27, 4  ;;  %v8142_v4 = vrot.slane %v8140_v18, 5  ;;  %v7305_v35 = vshrl.u32 %v7151_v12, 16  ;;  %v7308_v46 = vshll.u32 %v7151_v12, 16  ;;  %10579 = vmatmul.mubr.bf16.gmra.mxu1 %v13397_v21  ;;  %12899 = vmatprep.subr.bf16.mxu1 %v13455_v54 }
 0x3f4   : > { %v7647_v22 = vld [vmem:[#allocation2 + $0x48] sm:$0xe]  ;;  %v8148_v53 = vrot.slane %v8146_v14, 5  ;;  %v8152_v40 = vrot.slane %v8150_v17, 4  ;;  %v8156_v47 = vshll.u32 %v15459_v16, 16  ;;  %v7314_v9 = vshll.u32 %v7152_v60, 16 }
 0x3f5   : > { %v13406_v63 = vld [vmem:[#allocation3 + $0xec] ss:$36 sps:$4 sm:$0xff]   ;;  %v8143_v49 = vor.u32 %v8142_v4, %v8139_v39  ;;  %v7307_v23 = vrot.slane %v7305_v35, 4  ;;  %v7310_v34 = vrot.slane %v7308_v46, 5  ;;  %v7318_v15 = vshrl.u32 %v7152_v60, 16 }
 0x3f6   : > { %v13400_v42 = vld [vmem:[#allocation3 + $0xf0] ss:$36 sps:$4 sm:$0xff]   ;;  %10586 = vmatprep.mubr.bf16.mxu1 %v13406_v63  ;;  %v8153_v0 = vor.u32 %v8152_v40, %v8148_v53  ;;  %v7316_v56 = vrot.slane %v7314_v9, 5  ;;  %v7324_v7 = vshll.u32 %v7153_v44, 16  ;;  %v7649_v28 = vld [vmem:[#allocation2 + $0x50] sm:$0x1]  ;;  %12900 = vmatpush3.bf16.msra.mxu1 %v13455_v54 }
 0x3f7   : > { %v7986_v6 = vld [vmem:[#allocation2 + $0x60] sm:$0xf]  ;;  %10748 = vmatmul.mubr.bf16.gmra.mxu0 %v13400_v42  ;;  %v8144_v45 = vrot.slane %v8143_v49, 4  ;;  %v7311_v61 = vor.u32 %v7310_v34, %v7307_v23  ;;  %v7320_v20 = vrot.slane %v7318_v15, 4  ;;  %v7765_v19 = vrot.slane %v7648_v38, 5  ;;  %v13468_v51 = vld [vmem:[%s16330_s4 + $0x208] sm:$0xff]  }
 0x3f8   : > { %v7987_v59 = vld [vmem:[#allocation2 + $0x64] sm:$0xf]  ;;  %v13409_v36 = vld [vmem:[#allocation3 + $0x13c] ss:$36 sps:$4 sm:$0xff]   ;;  %v8154_v43 = vrot.slane %v8153_v0, 4  ;;  %v8158_v50 = vrot.slane %v8156_v47, 5  ;;  %12901 = vmatprep.subr.bf16.mxu1 %v13468_v51 }
 0x3f9   : > { %v11616_v37 = vrot.slane %v7647_v22, 9  ;;  %v8149_v52 = vsel %vm13658_vm8, %v8144_v45, %v8148_v53  ;;  %v7312_v57 = vrot.slane %v7311_v61, 4  ;;  %v7321_v10 = vor.u32 %v7320_v20, %v7316_v56  ;;  %v15486_v41 = vld [vmem:[#allocation2 + $0x68] sm:$0x1]  ;;  %v7154_v5 = vld [vmem:[#allocation2 + $0x54] sm:$0xf]  ;;  %10755 = vmatprep.mubr.bf16.mxu0 %v13409_v36 }
 0x3fa   : > { %v13404_v11 = vld [vmem:[#allocation3 + $0xe8] ss:$36 sps:$4 sm:$0xff]   ;;  %v8159_v2 = vsel %vm13658_vm8, %v8154_v43, %v8158_v50  ;;  %8442 = vst [vmem:[#allocation3 + $0x184] sm:$0xf] %v8149_v52  ;;  %v7326_v1 = vrot.slane %v7324_v7, 5  ;;  %v7767_v29 = vrot.slane %v7765_v19, 4  ;;  %12902 = vmatpush3.bf16.msra.mxu1 %v13468_v51 }
 0x3fb   : > { %v7766_v31 = vsel %vm13679_vm11, %v11616_v37, %v7765_v19  ;;  %v7155_v24 = vld [vmem:[#allocation2 + $0x58] sm:$0xf]  ;;  %v13407_v32 = vld [vmem:[#allocation3 + $0x138] ss:$36 sps:$4 sm:$0xff]   ;;  %8443 = vst [vmem:[#allocation3 + $0x1a8] sm:$0xf] %v8159_v2  ;;  %v7317_v16 = vsel %vm13658_vm8, %v7312_v57, %v7316_v56  ;;  %10587 = vmatmul.mubr.bf16.gmra.mxu1 %v13404_v11 }
 0x3fc   : > { %v7322_v55 = vrot.slane %v7321_v10, 4  ;;  %v7768_v3 = vrot.slane %v7649_v28, 5  ;;  %7882 = vst [vmem:[#allocation3 + $0x17c] sm:$0xf] %v7766_v31  ;;  %v8161_v12 = vshrl.u32 %v7986_v6, 16  ;;  %v13478_v30 = vld [vmem:[%s16330_s4 + $0x200] sm:$0xff]  }
 0x3fd   : > { %v15494_v60 = vld [vmem:[#allocation2 + $0x5c] sm:$0x1]  ;;  %v13412_v13 = vld [vmem:[#allocation3 + $0x134] ss:$36 sps:$4 sm:$0xff]   ;;  %7610 = vst [vmem:[#allocation3 + $0x178] sm:$0xf] %v7317_v16  ;;  %12903 = vmatprep.subr.bf16.mxu1 %v13478_v30 }
 0x3fe   : > { %v8164_v27 = vshll.u32 %v7986_v6, 16  ;;  %v8170_v18 = vshll.u32 %v7987_v59, 16  ;;  %v8174_v58 = vshrl.u32 %v7987_v59, 16  ;;  %v7327_v62 = vsel %vm13658_vm8, %v7322_v55, %v7326_v1  ;;  %v7922_v17 = vld [vmem:[#allocation2 + $0x84] sm:$0xf]  ;;  %10594 = vmatprep.mubr.bf16.mxu1 %v13412_v13  ;;  %12904 = vmatpush3.bf16.msra.mxu1 %v13478_v30 }
 0x3ff   : > { %v7769_v54 = vsel %vm13679_vm11, %v7767_v29, %v7768_v3  ;;  %v8163_v33 = vrot.slane %v8161_v12, 4  ;;  %v7329_v14 = vshrl.u32 %v7154_v5, 16  ;;  %v7923_v44 = vld [vmem:[#allocation2 + $0x88] sm:$0xf]  ;;  %7611 = vst [vmem:[#allocation3 + $0x19c] sm:$0xf] %v7327_v62  ;;  %10756 = vmatmul.mubr.bf16.gmra.mxu0 %v13407_v32 }
 0x400   : > { %7883 = vst [vmem:[#allocation3 + $0x1a0] sm:$0xf] %v7769_v54  ;;  %v8166_v38 = vrot.slane %v8164_v27, 5  ;;  %v8172_v21 = vrot.slane %v8170_v18, 5  ;;  %v8176_v39 = vrot.slane %v8174_v58, 4  ;;  %v8180_v4 = vshll.u32 %v15486_v41, 16 }
 0x401   : > { %v7651_v35 = vld [vmem:[#allocation2 + $0x58] sm:$0xf]  ;;  %7954 = vst [vmem:[#allocation3 + $0x2a0] sm:$0xf] %v7922_v17  ;;  %7955 = vst [vmem:[#allocation3 + $0x2c4] sm:$0xf] %v7923_v44 }
 0x402   : > { %v7331_v46 = vrot.slane %v7329_v14, 4  ;;  %v7332_v22 = vshll.u32 %v7154_v5, 16  ;;  %v7338_v63 = vshll.u32 %v7155_v24, 16  ;;  %v7342_v53 = vshrl.u32 %v7155_v24, 16  ;;  %v7650_v40 = vld [vmem:[#allocation2 + $0x54] sm:$0xe] }
 0x403   : > { %v8167_v47 = vor.u32 %v8166_v38, %v8163_v33  ;;  %v8177_v9 = vor.u32 %v8176_v39, %v8172_v21  ;;  %v7348_v42 = vshll.u32 %v15494_v60, 16  ;;  %v7652_v49 = vld [vmem:[#allocation2 + $0x5c] sm:$0x1]  ;;  %v7772_v0 = vrot.slane %v7651_v35, 5  ;;  %v7989_v56 = vld [vmem:[#allocation2 + $0x6c] sm:$0xf] }
 0x404   : > { %v7334_v23 = vrot.slane %v7332_v22, 5  ;;  %v7340_v34 = vrot.slane %v7338_v63, 5  ;;  %v7344_v15 = vrot.slane %v7342_v53, 4  ;;  %v13415_v7 = vld [vmem:[#allocation3 + $0x184] ss:$36 sps:$4 sm:$0xff]   ;;  %v11617_v6 = vrot.slane %v7650_v40, 9 }
 0x405   : > { %v8168_v28 = vrot.slane %v8167_v47, 4  ;;  %v7990_v45 = vld [vmem:[#allocation2 + $0x70] sm:$0xf]  ;;  %v13410_v61 = vld [vmem:[#allocation3 + $0x130] ss:$36 sps:$4 sm:$0xff]   ;;  %v8178_v20 = vrot.slane %v8177_v9, 4  ;;  %10763 = vmatprep.mubr.bf16.mxu0 %v13415_v7  ;;  %v12503_v7 = vpop.f32.mrf.mxu0 }
 0x406   : > { %v8182_v19 = vrot.slane %v8180_v4, 5  ;;  %v7335_v59 = vor.u32 %v7334_v23, %v7331_v46  ;;  %v7345_v51 = vor.u32 %v7344_v15, %v7340_v34  ;;  %v13413_v36 = vld [vmem:[#allocation3 + $0x180] ss:$36 sps:$4 sm:$0xff]   ;;  %v7773_v50 = vsel %vm13679_vm11, %v11617_v6, %v7772_v0  ;;  %v7991_v57 = vld [vmem:[#allocation2 + $0x74] sm:$0x1]  ;;  %10595 = vmatmul.mubr.bf16.gmra.mxu1 %v13410_v61 }
 0x407   : > { %v8173_v43 = vsel %vm13658_vm8, %v8168_v28, %v8172_v21  ;;  %v7774_v37 = vrot.slane %v7772_v0, 4  ;;  %v7775_v52 = vrot.slane %v7652_v49, 5  ;;  %v7157_v10 = vld [vmem:[#allocation2 + $0x60] sm:$0xf]  ;;  %v13419_v41 = vld [vmem:[#allocation3 + $0x17c] ss:$36 sps:$4 sm:$0xff]   ;;  %10764 = vmatmul.mubr.bf16.gmra.mxu0 %v13413_v36 }
 0x408   : > { %v8183_v5 = vsel %vm13658_vm8, %v8178_v20, %v8182_v19  ;;  %8444 = vst [vmem:[#allocation3 + $0x1cc] sm:$0xf] %v8173_v43  ;;  %v7336_v11 = vrot.slane %v7335_v59, 4  ;;  %v7350_v2 = vrot.slane %v7348_v42, 5  ;;  %7884 = vst [vmem:[#allocation3 + $0x1c4] sm:$0xf] %v7773_v50  ;;  %10602 = vmatprep.mubr.bf16.mxu1 %v13419_v41 }
 0x409   : > { %v7158_v1 = vld [vmem:[#allocation2 + $0x64] sm:$0xf]  ;;  %8445 = vst [vmem:[#allocation3 + $0x1f0] sm:$0xf] %v8183_v5  ;;  %v7346_v31 = vrot.slane %v7345_v51, 4  ;;  %v7776_v29 = vsel %vm13679_vm11, %v7774_v37, %v7775_v52  ;;  %v8185_v24 = vshrl.u32 %v7989_v56, 16  ;;  %v12504_v37 = vpop.f32.mrf.mxu0 }
 0x40a   : > { %v8188_v32 = vshll.u32 %v7989_v56, 16  ;;  %v15513_v16 = vld [vmem:[#allocation2 + $0x68] sm:$0x1]  ;;  %v7341_v55 = vsel %vm13658_vm8, %v7336_v11, %v7340_v34  ;;  %7885 = vst [vmem:[#allocation3 + $0x1e8] sm:$0xf] %v7776_v29  ;;  %v8194_v3 = vshll.u32 %v7990_v45, 16  ;;  %v15526_v41 = vadd.f32 %v12504_v37, %v12503_v7 }
 0x40b   : > { %v8198_v12 = vshrl.u32 %v7990_v45, 16  ;;  %v7653_v60 = vld [vmem:[#allocation2 + $0x60] sm:$0xe]  ;;  %v7654_v30 = vld [vmem:[#allocation2 + $0x64] sm:$0xf]  ;;  %v7351_v13 = vsel %vm13658_vm8, %v7346_v31, %v7350_v2  ;;  %v8187_v27 = vrot.slane %v8185_v24, 4 }
 0x40c   : > { %7612 = vst [vmem:[#allocation3 + $0x1c0] sm:$0xf] %v7341_v55  ;;  %v8190_v18 = vrot.slane %v8188_v32, 5  ;;  %v7353_v58 = vshrl.u32 %v7157_v10, 16  ;;  %v7924_v62 = vld [vmem:[#allocation2 + $0x90] sm:$0xf] }
 0x40d   : > { %7613 = vst [vmem:[#allocation3 + $0x1e4] sm:$0xf] %v7351_v13  ;;  %v8196_v54 = vrot.slane %v8194_v3, 5  ;;  %v8200_v33 = vrot.slane %v8198_v12, 4  ;;  %v8204_v14 = vshll.u32 %v7991_v57, 16  ;;  %v7356_v17 = vshll.u32 %v7157_v10, 16 }
 0x40e   : > { %v7925_v44 = vld [vmem:[#allocation2 + $0x94] sm:$0xf]  ;;  %7956 = vst [vmem:[#allocation3 + $0x2e8] sm:$0xf] %v7924_v62  ;;  %v8191_v38 = vor.u32 %v8190_v18, %v8187_v27  ;;  %v7355_v21 = vrot.slane %v7353_v58, 4  ;;  %v7362_v39 = vshll.u32 %v7158_v1, 16 }
 0x40f   : > { %v7366_v4 = vshrl.u32 %v7158_v1, 16  ;;  %v7655_v35 = vld [vmem:[#allocation2 + $0x68] sm:$0x1]  ;;  %7957 = vst [vmem:[#allocation3 + $0x30c] sm:$0xf] %v7925_v44  ;;  %v8201_v22 = vor.u32 %v8200_v33, %v8196_v54  ;;  %v7358_v63 = vrot.slane %v7356_v17, 5 }
 0x410   : > { %v13417_v46 = vld [vmem:[#allocation3 + $0x178] ss:$36 sps:$4 sm:$0xff]   ;;  %v7372_v53 = vshll.u32 %v15513_v16, 16  ;;  %v11618_v40 = vrot.slane %v7653_v60, 9  ;;  %v8192_v47 = vrot.slane %v8191_v38, 4  ;;  %v7364_v9 = vrot.slane %v7362_v39, 5 }
 0x411   : > { %v7368_v42 = vrot.slane %v7366_v4, 4  ;;  %v7779_v49 = vrot.slane %v7654_v30, 5  ;;  %v7992_v23 = vld [vmem:[#allocation2 + $0x78] sm:$0xf]  ;;  %10603 = vmatmul.mubr.bf16.gmra.mxu1 %v13417_v46  ;;  %v13422_v34 = vld [vmem:[#allocation3 + $0x1cc] ss:$36 sps:$4 sm:$0xff]   ;;  %v7359_v56 = vor.u32 %v7358_v63, %v7355_v21 }
 0x412   : > { %v8202_v15 = vrot.slane %v8201_v22, 4  ;;  %v8206_v0 = vrot.slane %v8204_v14, 5  ;;  %v13420_v28 = vld [vmem:[#allocation3 + $0x1c8] ss:$36 sps:$4 sm:$0xff]   ;;  %v8197_v6 = vsel %vm13658_vm8, %v8192_v47, %v8196_v54  ;;  %v7993_v20 = vld [vmem:[#allocation2 + $0x7c] sm:$0xf]  ;;  %10771 = vmatprep.mubr.bf16.mxu0 %v13422_v34 }
 0x413   : > { %v7369_v45 = vor.u32 %v7368_v42, %v7364_v9  ;;  %v7780_v61 = vsel %vm13679_vm11, %v11618_v40, %v7779_v49  ;;  %v7994_v19 = vld [vmem:[#allocation2 + $0x80] sm:$0x1]  ;;  %8446 = vst [vmem:[#allocation3 + $0x214] sm:$0xf] %v8197_v6  ;;  %v7360_v51 = vrot.slane %v7359_v56, 4  ;;  %v7781_v36 = vrot.slane %v7779_v49, 4  ;;  %10772 = vmatmul.mubr.bf16.gmra.mxu0 %v13420_v28 }
 0x414   : > { %v8207_v59 = vsel %vm13658_vm8, %v8202_v15, %v8206_v0  ;;  %v7782_v43 = vrot.slane %v7655_v35, 5  ;;  %7886 = vst [vmem:[#allocation3 + $0x20c] sm:$0xf] %v7780_v61  ;;  %v7160_v50 = vld [vmem:[#allocation2 + $0x6c] sm:$0xf]  ;;  %v7374_v10 = vrot.slane %v7372_v53, 5 }
 0x415   : > { %v13425_v52 = vld [vmem:[#allocation3 + $0x1c4] ss:$36 sps:$4 sm:$0xff]   ;;  %8447 = vst [vmem:[#allocation3 + $0x238] sm:$0xf] %v8207_v59  ;;  %v7370_v57 = vrot.slane %v7369_v45, 4  ;;  %v7365_v5 = vsel %vm13658_vm8, %v7360_v51, %v7364_v9  ;;  %v8209_v2 = vshrl.u32 %v7992_v23, 16 }
 0x416   : > { %v7783_v11 = vsel %vm13679_vm11, %v7781_v36, %v7782_v43  ;;  %v8212_v1 = vshll.u32 %v7992_v23, 16  ;;  %v7161_v31 = vld [vmem:[#allocation2 + $0x70] sm:$0xf]  ;;  %v7162_v29 = vld [vmem:[#allocation2 + $0x74] sm:$0x1]  ;;  %10610 = vmatprep.mubr.bf16.mxu1 %v13425_v52  ;;  %v8218_v32 = vshll.u32 %v7993_v20, 16 }
 0x417   : > { %v7375_v24 = vsel %vm13658_vm8, %v7370_v57, %v7374_v10  ;;  %7614 = vst [vmem:[#allocation3 + $0x208] sm:$0xf] %v7365_v5  ;;  %7887 = vst [vmem:[#allocation3 + $0x230] sm:$0xf] %v7783_v11  ;;  %v8222_v16 = vshrl.u32 %v7993_v20, 16  ;;  %v8228_v55 = vshll.u32 %v7994_v19, 16 }
 0x418   : > { %v7656_v3 = vld [vmem:[#allocation2 + $0x6c] sm:$0xe]  ;;  %v13423_v12 = vld [vmem:[#allocation3 + $0x1c0] ss:$36 sps:$4 sm:$0xff]   ;;  %7615 = vst [vmem:[#allocation3 + $0x22c] sm:$0xf] %v7375_v24 }
 0x419   : > { %v8211_v60 = vrot.slane %v8209_v2, 4  ;;  %v8214_v30 = vrot.slane %v8212_v1, 5  ;;  %v7377_v13 = vshrl.u32 %v7160_v50, 16  ;;  %v7380_v27 = vshll.u32 %v7160_v50, 16  ;;  %v7657_v18 = vld [vmem:[#allocation2 + $0x70] sm:$0xf]  ;;  %10611 = vmatmul.mubr.bf16.gmra.mxu1 %v13423_v12  ;;  %v12506_v50 = vpop.f32.mrf.mxu0 }
 0x41a   : > { %v8220_v58 = vrot.slane %v8218_v32, 5  ;;  %v8224_v62 = vrot.slane %v8222_v16, 4  ;;  %v7386_v54 = vshll.u32 %v7161_v31, 16  ;;  %v7658_v33 = vld [vmem:[#allocation2 + $0x74] sm:$0x1]  ;;  %v7390_v39 = vshrl.u32 %v7161_v31, 16 }
 0x41b   : > { %v7995_v14 = vld [vmem:[#allocation2 + $0x84] sm:$0xf]  ;;  %v7926_v17 = vld [vmem:[#allocation2 + $0x9c] sm:$0xf]  ;;  %v8215_v44 = vor.u32 %v8214_v30, %v8211_v60  ;;  %v7379_v38 = vrot.slane %v7377_v13, 4  ;;  %v7382_v21 = vrot.slane %v7380_v27, 5 }
 0x41c   : > { %v7927_v4 = vld [vmem:[#allocation2 + $0xa0] sm:$0xf]  ;;  %7958 = vst [vmem:[#allocation3 + $0x330] sm:$0xf] %v7926_v17  ;;  %v8225_v35 = vor.u32 %v8224_v62, %v8220_v58  ;;  %v7388_v46 = vrot.slane %v7386_v54, 5  ;;  %v7396_v22 = vshll.u32 %v7162_v29, 16 }
 0x41d   : > { %v7996_v63 = vld [vmem:[#allocation2 + $0x88] sm:$0xf]  ;;  %7959 = vst [vmem:[#allocation3 + $0x354] sm:$0xf] %v7927_v4  ;;  %v13428_v53 = vld [vmem:[#allocation3 + $0x214] ss:$36 sps:$4 sm:$0xff]   ;;  %v7383_v9 = vor.u32 %v7382_v21, %v7379_v38 }
 0x41e   : > { %v8216_v40 = vrot.slane %v8215_v44, 4  ;;  %v8230_v47 = vrot.slane %v8228_v55, 5  ;;  %v11619_v42 = vrot.slane %v7656_v3, 9  ;;  %v7997_v49 = vld [vmem:[#allocation2 + $0x8c] sm:$0x1]  ;;  %v8226_v34 = vrot.slane %v8225_v35, 4  ;;  %10779 = vmatprep.mubr.bf16.mxu0 %v13428_v53 }
 0x41f   : > { %v13426_v23 = vld [vmem:[#allocation3 + $0x210] ss:$36 sps:$4 sm:$0xff]   ;;  %v7392_v15 = vrot.slane %v7390_v39, 4  ;;  %v7398_v0 = vrot.slane %v7396_v22, 5  ;;  %v7786_v56 = vrot.slane %v7657_v18, 5  ;;  %v7384_v28 = vrot.slane %v7383_v9, 4  ;;  %v12507_v18 = vpop.f32.mrf.mxu0 }
 0x420   : > { %v8221_v7 = vsel %vm13658_vm8, %v8216_v40, %v8220_v58  ;;  %v7789_v6 = vrot.slane %v7658_v33, 5  ;;  %v8233_v45 = vshrl.u32 %v7995_v14, 16  ;;  %v7163_v61 = vld [vmem:[#allocation2 + $0x78] sm:$0xf]  ;;  %v13432_v20 = vld [vmem:[#allocation3 + $0x20c] ss:$36 sps:$4 sm:$0xff]   ;;  %10780 = vmatmul.mubr.bf16.gmra.mxu0 %v13426_v23  ;;  %v8231_v19 = vsel %vm13658_vm8, %v8226_v34, %v8230_v47 }
 0x421   : > { %8448 = vst [vmem:[#allocation3 + $0x25c] sm:$0xf] %v8221_v7  ;;  %v7393_v59 = vor.u32 %v7392_v15, %v7388_v46  ;;  %v7787_v51 = vsel %vm13679_vm11, %v11619_v42, %v7786_v56  ;;  %v7788_v36 = vrot.slane %v7786_v56, 4  ;;  %v7164_v43 = vld [vmem:[#allocation2 + $0x7c] sm:$0xf]  ;;  %v7389_v52 = vsel %vm13658_vm8, %v7384_v28, %v7388_v46  ;;  %10618 = vmatprep.mubr.bf16.mxu1 %v13432_v20  ;;  %v12509_v23 = vpop.f32.mrf.mxu0 }
 0x422   : > { %v13430_v37 = vld [vmem:[#allocation3 + $0x208] ss:$36 sps:$4 sm:$0xff]   ;;  %8449 = vst [vmem:[#allocation3 + $0x280] sm:$0xf] %v8231_v19  ;;  %7888 = vst [vmem:[#allocation3 + $0x254] sm:$0xf] %v7787_v51 }
 0x423   : > { %v8235_v57 = vrot.slane %v8233_v45, 4  ;;  %v8236_v10 = vshll.u32 %v7995_v14, 16  ;;  %v8242_v5 = vshll.u32 %v7996_v63, 16  ;;  %v7394_v11 = vrot.slane %v7393_v59, 4  ;;  %7616 = vst [vmem:[#allocation3 + $0x250] sm:$0xf] %v7389_v52  ;;  %10619 = vmatmul.mubr.bf16.gmra.mxu1 %v13430_v37  ;;  %v12510_v51 = vpop.f32.mrf.mxu0 }
 0x424   : > { %v7790_v2 = vsel %vm13679_vm11, %v7788_v36, %v7789_v6  ;;  %v8246_v1 = vshrl.u32 %v7996_v63, 16  ;;  %v8252_v31 = vshll.u32 %v7997_v49, 16  ;;  %v7165_v29 = vld [vmem:[#allocation2 + $0x80] sm:$0x1]  ;;  %v7401_v16 = vshrl.u32 %v7163_v61, 16  ;;  %v12391_v63 = vpop.f32.mrf.mxu1 }
 0x425   : > { %7889 = vst [vmem:[#allocation3 + $0x278] sm:$0xf] %v7790_v2  ;;  %v8238_v24 = vrot.slane %v8236_v10, 5  ;;  %v8244_v32 = vrot.slane %v8242_v5, 5  ;;  %v7404_v55 = vshll.u32 %v7163_v61, 16  ;;  %v7399_v12 = vsel %vm13658_vm8, %v7394_v11, %v7398_v0 }
 0x426   : > { %v7659_v3 = vld [vmem:[#allocation2 + $0x78] sm:$0xe]  ;;  %v8248_v60 = vrot.slane %v8246_v1, 4  ;;  %v8254_v30 = vrot.slane %v8252_v31, 5  ;;  %v7410_v13 = vshll.u32 %v7164_v43, 16  ;;  %v7403_v62 = vrot.slane %v7401_v16, 4  ;;  %v12392_v7 = vpop.f32.mrf.mxu1 }
 0x427   : > { %v7660_v27 = vld [vmem:[#allocation2 + $0x7c] sm:$0xf]  ;;  %7617 = vst [vmem:[#allocation3 + $0x274] sm:$0xf] %v7399_v12  ;;  %v8239_v58 = vor.u32 %v8238_v24, %v8235_v57  ;;  %v7406_v54 = vrot.slane %v7404_v55, 5  ;;  %v7414_v33 = vshrl.u32 %v7164_v43, 16  ;;  %v15546_v49 = vadd.f32 %v12507_v18, %v12506_v50  ;;  %v12512_v18 = vpop.f32.mrf.mxu0 }
 0x428   : > { %v7661_v14 = vld [vmem:[#allocation2 + $0x80] sm:$0x1]  ;;  %v8249_v17 = vor.u32 %v8248_v60, %v8244_v32  ;;  %v7412_v44 = vrot.slane %v7410_v13, 5  ;;  %v7420_v38 = vshll.u32 %v7165_v29, 16  ;;  %v11620_v21 = vrot.slane %v7659_v3, 9  ;;  %v12394_v57 = vpop.f32.mrf.mxu1 }
 0x429   : > { %v7998_v39 = vld [vmem:[#allocation2 + $0x90] sm:$0xf]  ;;  %v8240_v4 = vrot.slane %v8239_v58, 4  ;;  %v7407_v35 = vor.u32 %v7406_v54, %v7403_v62  ;;  %v7416_v46 = vrot.slane %v7414_v33, 4  ;;  %v7793_v22 = vrot.slane %v7660_v27, 5 }
 0x42a   : > { %v7999_v53 = vld [vmem:[#allocation2 + $0x94] sm:$0xf]  ;;  %v7928_v40 = vld [vmem:[#allocation2 + $0xa8] sm:$0xf]  ;;  %v8250_v42 = vrot.slane %v8249_v17, 4  ;;  %v7422_v56 = vrot.slane %v7420_v38, 5  ;;  %v12393_v1 = vadd.f32 %v12392_v7, %v12391_v63  ;;  %v15558_v31 = vadd.f32 %v12510_v51, %v12509_v23  ;;  %v12395_v3 = vpop.f32.mrf.mxu1 }
 0x42b   : > { %v13433_v47 = vld [vmem:[#allocation3 + $0x258] ss:$36 sps:$4 sm:$0xff]   ;;  %7960 = vst [vmem:[#allocation3 + $0x378] sm:$0xf] %v7928_v40  ;;  %v8245_v34 = vsel %vm13658_vm8, %v8240_v4, %v8244_v32  ;;  %v7408_v15 = vrot.slane %v7407_v35, 4  ;;  %v7417_v0 = vor.u32 %v7416_v46, %v7412_v44  ;;  %v7794_v45 = vsel %vm13679_vm11, %v11620_v21, %v7793_v22 }
 0x42c   : > { %v13435_v9 = vld [vmem:[#allocation3 + $0x25c] ss:$36 sps:$4 sm:$0xff]   ;;  %v7929_v28 = vld [vmem:[#allocation2 + $0xac] sm:$0xf]  ;;  %v8255_v6 = vsel %vm13658_vm8, %v8250_v42, %v8254_v30  ;;  %8450 = vst [vmem:[#allocation3 + $0x2a4] sm:$0xf] %v8245_v34  ;;  %v12397_v17 = vpop.f32.mrf.mxu1  ;;  %v15563_v42 = vadd.f32 %v15526_v41, %v12393_v1  ;;  %v12396_v23 = vadd.f32 %v12395_v3, %v12394_v57 }
 0x42d   : > { %10787 = vmatprep.mubr.bf16.mxu0 %v13435_v9  ;;  %v7795_v61 = vrot.slane %v7793_v22, 4  ;;  %v7796_v20 = vrot.slane %v7661_v14, 5  ;;  %v8000_v19 = vld [vmem:[#allocation2 + $0x98] sm:$0x1]  ;;  %v7166_v59 = vld [vmem:[#allocation2 + $0x84] sm:$0xf]  ;;  %v7413_v36 = vsel %vm13658_vm8, %v7408_v15, %v7412_v44 }
 0x42e   : > { %7961 = vst [vmem:[#allocation3 + $0x39c] sm:$0xf] %v7929_v28  ;;  %10788 = vmatmul.mubr.bf16.gmra.mxu0 %v13433_v47  ;;  %8451 = vst [vmem:[#allocation3 + $0x2c8] sm:$0xf] %v8255_v6  ;;  %v7418_v43 = vrot.slane %v7417_v0, 4  ;;  %v8257_v50 = vshrl.u32 %v7998_v39, 16  ;;  %v12398_v15 = vpop.f32.mrf.mxu1  ;;  %v12513_v0 = vpop.f32.mrf.mxu0  ;;  %v15568_v41 = vadd.f32 %v15546_v49, %v12396_v23 }
 0x42f   : > { %7890 = vst [vmem:[#allocation3 + $0x29c] sm:$0xf] %v7794_v45  ;;  %v8260_v37 = vshll.u32 %v7998_v39, 16  ;;  %v7167_v52 = vld [vmem:[#allocation2 + $0x88] sm:$0xf]  ;;  %v7797_v5 = vsel %vm13679_vm11, %v7795_v61, %v7796_v20  ;;  %v8266_v11 = vshll.u32 %v7999_v53, 16  ;;  %v12399_v57 = vadd.f32 %v12398_v15, %v12397_v17 }
 0x430   : > { %v13438_v10 = vld [vmem:[#allocation3 + $0x254] ss:$36 sps:$4 sm:$0xff]   ;;  %7618 = vst [vmem:[#allocation3 + $0x298] sm:$0xf] %v7413_v36  ;;  %v7423_v24 = vsel %vm13658_vm8, %v7418_v43, %v7422_v56  ;;  %7891 = vst [vmem:[#allocation3 + $0x2c0] sm:$0xf] %v7797_v5 }
 0x431   : > { %v7168_v2 = vld [vmem:[#allocation2 + $0x8c] sm:$0x1]  ;;  %v8259_v32 = vrot.slane %v8257_v50, 4  ;;  %v8262_v16 = vrot.slane %v8260_v37, 5  ;;  %v8270_v55 = vshrl.u32 %v7999_v53, 16  ;;  %10626 = vmatprep.mubr.bf16.mxu1 %v13438_v10  ;;  %v8268_v12 = vrot.slane %v8266_v11, 5 }
 0x432   : > { %v13436_v29 = vld [vmem:[#allocation3 + $0x250] ss:$36 sps:$4 sm:$0xff]   ;;  %7619 = vst [vmem:[#allocation3 + $0x2bc] sm:$0xf] %v7423_v24  ;;  %v8276_v60 = vshll.u32 %v8000_v19, 16  ;;  %v7425_v30 = vshrl.u32 %v7166_v59, 16  ;;  %v15572_v10 = vadd.f32 %v12513_v0, %v12512_v18  ;;  %v15578_v24 = vpop.f32.mrf.mxu0 }
 0x433   : > { %v7428_v13 = vshll.u32 %v7166_v59, 16  ;;  %v7662_v27 = vld [vmem:[#allocation2 + $0x84] sm:$0xe]  ;;  %10627 = vmatmul.mubr.bf16.gmra.mxu1 %v13436_v29  ;;  %v8263_v58 = vor.u32 %v8262_v16, %v8259_v32  ;;  %v8272_v62 = vrot.slane %v8270_v55, 4  ;;  %v7434_v54 = vshll.u32 %v7167_v52, 16  ;;  %v12400_v29 = vpop.f32.mrf.mxu1 }
 0x434   : > { %v7438_v33 = vshrl.u32 %v7167_v52, 16  ;;  %v7663_v14 = vld [vmem:[#allocation2 + $0x88] sm:$0xf]  ;;  %v8278_v44 = vrot.slane %v8276_v60, 5  ;;  %v7427_v38 = vrot.slane %v7425_v30, 4  ;;  %v7444_v39 = vshll.u32 %v7168_v2, 16 }
 0x435   : > { %v7430_v21 = vrot.slane %v7428_v13, 5  ;;  %v7664_v4 = vld [vmem:[#allocation2 + $0x8c] sm:$0x1]  ;;  %v8264_v35 = vrot.slane %v8263_v58, 4  ;;  %v8273_v46 = vor.u32 %v8272_v62, %v8268_v12  ;;  %v7436_v22 = vrot.slane %v7434_v54, 5  ;;  %v12516_v62 = vpop.f32.mrf.mxu0 }
 0x436   : > { %v7440_v63 = vrot.slane %v7438_v33, 4  ;;  %v8001_v53 = vld [vmem:[#allocation2 + $0x9c] sm:$0xf]  ;;  %v7446_v9 = vrot.slane %v7444_v39, 5  ;;  %v8002_v34 = vld [vmem:[#allocation2 + $0xa0] sm:$0xf] }
 0x437   : > { %v13441_v40 = vld [vmem:[#allocation3 + $0x2a4] ss:$36 sps:$4 sm:$0xff]   ;;  %v7431_v47 = vor.u32 %v7430_v21, %v7427_v38  ;;  %v8269_v7 = vsel %vm13658_vm8, %v8264_v35, %v8268_v12  ;;  %v8274_v28 = vrot.slane %v8273_v46, 4  ;;  %v11621_v45 = vrot.slane %v7662_v27, 9  ;;  %v8003_v61 = vld [vmem:[#allocation2 + $0xa4] sm:$0x1]  ;;  %v12401_v35 = vpop.f32.mrf.mxu1  ;;  %v15584_v0 = vpop.f32.mrf.mxu0 }
 0x438   : > { %v13439_v56 = vld [vmem:[#allocation3 + $0x2a0] ss:$36 sps:$4 sm:$0xff]   ;;  %v7441_v6 = vor.u32 %v7440_v63, %v7436_v22  ;;  %v7169_v20 = vld [vmem:[#allocation2 + $0x90] sm:$0xf]  ;;  %10795 = vmatprep.mubr.bf16.mxu0 %v13441_v40  ;;  %8452 = vst [vmem:[#allocation3 + $0x2ec] sm:$0xf] %v8269_v7 }
 0x439   : > { %v7432_v19 = vrot.slane %v7431_v47, 4  ;;  %v7800_v59 = vrot.slane %v7663_v14, 5  ;;  %v7803_v51 = vrot.slane %v7664_v4, 5  ;;  %v7930_v36 = vld [vmem:[#allocation2 + $0xb4] sm:$0xf]  ;;  %10796 = vmatmul.mubr.bf16.gmra.mxu0 %v13439_v56  ;;  %v8279_v50 = vsel %vm13658_vm8, %v8274_v28, %v8278_v44 }
 0x43a   : > { %v13445_v43 = vld [vmem:[#allocation3 + $0x29c] ss:$36 sps:$4 sm:$0xff]   ;;  %v7442_v37 = vrot.slane %v7441_v6, 4  ;;  %7962 = vst [vmem:[#allocation3 + $0x3c0] sm:$0xf] %v7930_v36  ;;  %v8281_v1 = vshrl.u32 %v8001_v53, 16  ;;  %v15587_v6 = vadd.f32 %v15558_v31, %v12399_v57 }
 0x43b   : > { %v7170_v52 = vld [vmem:[#allocation2 + $0x94] sm:$0xf]  ;;  %8453 = vst [vmem:[#allocation3 + $0x310] sm:$0xf] %v8279_v50  ;;  %v7437_v11 = vsel %vm13658_vm8, %v7432_v19, %v7436_v22  ;;  %v7801_v49 = vsel %vm13679_vm11, %v11621_v45, %v7800_v59  ;;  %v7802_v2 = vrot.slane %v7800_v59, 4  ;;  %10634 = vmatprep.mubr.bf16.mxu1 %v13445_v43  ;;  %v8284_v55 = vshll.u32 %v8001_v53, 16 }
 0x43c   : > { %v13443_v5 = vld [vmem:[#allocation3 + $0x298] ss:$36 sps:$4 sm:$0xff]   ;;  %v7931_v32 = vld [vmem:[#allocation2 + $0xb8] sm:$0xf]  ;;  %v7447_v16 = vsel %vm13658_vm8, %v7442_v37, %v7446_v9  ;;  %7620 = vst [vmem:[#allocation3 + $0x2e0] sm:$0xf] %v7437_v11  ;;  %v12402_v45 = vadd.f32 %v12401_v35, %v12400_v29 }
 0x43d   : > { %7892 = vst [vmem:[#allocation3 + $0x2e4] sm:$0xf] %v7801_v49  ;;  %v8290_v3 = vshll.u32 %v8002_v34, 16  ;;  %v8294_v12 = vshrl.u32 %v8002_v34, 16  ;;  %v7171_v60 = vld [vmem:[#allocation2 + $0x98] sm:$0x1]  ;;  %10635 = vmatmul.mubr.bf16.gmra.mxu1 %v13443_v5  ;;  %v7804_v30 = vsel %vm13679_vm11, %v7802_v2, %v7803_v51 }
 0x43e   : > { %7963 = vst [vmem:[#allocation3 + $0x3e4] sm:$0xf] %v7931_v32  ;;  %7621 = vst [vmem:[#allocation3 + $0x304] sm:$0xf] %v7447_v16  ;;  %v8283_v13 = vrot.slane %v8281_v1, 4  ;;  %v8300_v27 = vshll.u32 %v8003_v61, 16  ;;  %v15596_v29 = vadd.f32 %v15572_v10, %v12402_v45  ;;  %v15599_v32 = vadd.f32 %v12516_v62, %v15578_v24  ;;  %v12519_v16 = vpop.f32.mrf.mxu0  ;;  %v12403_v62 = vpop.f32.mrf.mxu1 }
 0x43f   : > { %v7449_v18 = vshrl.u32 %v7169_v20, 16  ;;  %v7665_v58 = vld [vmem:[#allocation2 + $0x90] sm:$0xe]  ;;  %7893 = vst [vmem:[#allocation3 + $0x308] sm:$0xf] %v7804_v30  ;;  %v8286_v54 = vrot.slane %v8284_v55, 5 }
 0x440   : > { %v8292_v33 = vrot.slane %v8290_v3, 5  ;;  %v8296_v14 = vrot.slane %v8294_v12, 4  ;;  %v7452_v17 = vshll.u32 %v7169_v20, 16  ;;  %v7666_v44 = vld [vmem:[#allocation2 + $0x94] sm:$0xf]  ;;  %v8302_v38 = vrot.slane %v8300_v27, 5 }
 0x441   : > { %v7451_v21 = vrot.slane %v7449_v18, 4  ;;  %v7458_v39 = vshll.u32 %v7170_v52, 16  ;;  %v7462_v4 = vshrl.u32 %v7170_v52, 16  ;;  %v8287_v46 = vor.u32 %v8286_v54, %v8283_v13  ;;  %v7667_v40 = vld [vmem:[#allocation2 + $0x98] sm:$0x1] }
 0x442   : > { %v8297_v22 = vor.u32 %v8296_v14, %v8292_v33  ;;  %v7454_v63 = vrot.slane %v7452_v17, 5  ;;  %v7468_v53 = vshll.u32 %v7171_v60, 16  ;;  %v11622_v23 = vrot.slane %v7665_v58, 9  ;;  %v8004_v15 = vld [vmem:[#allocation2 + $0xa8] sm:$0xf] }
 0x443   : > { %v7460_v47 = vrot.slane %v7458_v39, 5  ;;  %v7464_v9 = vrot.slane %v7462_v4, 4  ;;  %v7807_v34 = vrot.slane %v7666_v44, 5  ;;  %v13448_v56 = vld [vmem:[#allocation3 + $0x2ec] ss:$36 sps:$4 sm:$0xff]   ;;  %v8288_v7 = vrot.slane %v8287_v46, 4  ;;  %v12521_v46 = vpop.f32.mrf.mxu0 }
 0x444   : > { %v7455_v28 = vor.u32 %v7454_v63, %v7451_v21  ;;  %v8005_v61 = vld [vmem:[#allocation2 + $0xac] sm:$0xf]  ;;  %v8006_v20 = vld [vmem:[#allocation2 + $0xb0] sm:$0x1]  ;;  %v13446_v19 = vld [vmem:[#allocation3 + $0x2e8] ss:$36 sps:$4 sm:$0xff]   ;;  %10803 = vmatprep.mubr.bf16.mxu0 %v13448_v56 }
 0x445   : > { %v8298_v59 = vrot.slane %v8297_v22, 4  ;;  %v7465_v51 = vor.u32 %v7464_v9, %v7460_v47  ;;  %v7470_v36 = vrot.slane %v7468_v53, 5  ;;  %v7808_v43 = vsel %vm13679_vm11, %v11622_v23, %v7807_v34  ;;  %v7172_v50 = vld [vmem:[#allocation2 + $0x9c] sm:$0xf]  ;;  %v7173_v31 = vld [vmem:[#allocation2 + $0xa0] sm:$0xf]  ;;  %10804 = vmatmul.mubr.bf16.gmra.mxu0 %v13446_v19 }
 0x446   : > { %v8293_v37 = vsel %vm13658_vm8, %v8288_v7, %v8292_v33  ;;  %v7456_v52 = vrot.slane %v7455_v28, 4  ;;  %v7809_v5 = vrot.slane %v7807_v34, 4  ;;  %v7810_v11 = vrot.slane %v7667_v40, 5  ;;  %7894 = vst [vmem:[#allocation3 + $0x32c] sm:$0xf] %v7808_v43  ;;  %v12522_v7 = vpop.f32.mrf.mxu0 }
 0x447   : > { %v13449_v57 = vld [vmem:[#allocation3 + $0x2e0] ss:$36 sps:$4 sm:$0xff]   ;;  %v8303_v2 = vsel %vm13658_vm8, %v8298_v59, %v8302_v38  ;;  %8454 = vst [vmem:[#allocation3 + $0x334] sm:$0xf] %v8293_v37  ;;  %v7466_v1 = vrot.slane %v7465_v51, 4  ;;  %v8305_v12 = vshrl.u32 %v8004_v15, 16 }
 0x448   : > { %v13451_v49 = vld [vmem:[#allocation3 + $0x2e4] ss:$36 sps:$4 sm:$0xff]   ;;  %8455 = vst [vmem:[#allocation3 + $0x358] sm:$0xf] %v8303_v2  ;;  %v7461_v55 = vsel %vm13658_vm8, %v7456_v52, %v7460_v47  ;;  %v7811_v3 = vsel %vm13679_vm11, %v7809_v5, %v7810_v11  ;;  %v8308_v60 = vshll.u32 %v8004_v15, 16  ;;  %v8314_v24 = vshll.u32 %v8005_v61, 16  ;;  %v12404_v47 = vpop.f32.mrf.mxu1  ;;  %v15610_v5 = vpop.f32.mrf.mxu0 }
 0x449   : > { %v7932_v30 = vld [vmem:[#allocation2 + $0xc0] sm:$0xf]  ;;  %v7933_v13 = vld [vmem:[#allocation2 + $0xc4] sm:$0xf]  ;;  %10642 = vmatprep.mubr.bf16.mxu1 %v13451_v49  ;;  %v7471_v10 = vsel %vm13658_vm8, %v7466_v1, %v7470_v36  ;;  %7622 = vst [vmem:[#allocation3 + $0x328] sm:$0xf] %v7461_v55  ;;  %v12405_v43 = vadd.f32 %v12404_v47, %v12403_v62  ;;  %v15608_v52 = vadd.f32 %v12522_v7, %v12521_v46 }
 0x44a   : > { %7895 = vst [vmem:[#allocation3 + $0x350] sm:$0xf] %v7811_v3  ;;  %v8318_v27 = vshrl.u32 %v8005_v61, 16  ;;  %v8324_v18 = vshll.u32 %v8006_v20, 16  ;;  %v7174_v58 = vld [vmem:[#allocation2 + $0xa4] sm:$0x1]  ;;  %10643 = vmatmul.mubr.bf16.gmra.mxu1 %v13449_v57  ;;  %v12406_v19 = vpop.f32.mrf.mxu1 }
 0x44b   : > { %7964 = vst [vmem:[#allocation3 + $0x408] sm:$0xf] %v7932_v30  ;;  %7965 = vst [vmem:[#allocation3 + $0x42c] sm:$0xf] %v7933_v13  ;;  %v8307_v54 = vrot.slane %v8305_v12, 4  ;;  %v8310_v33 = vrot.slane %v8308_v60, 5  ;;  %v15619_v12 = vadd.f32 %v15599_v32, %v12405_v43  ;;  %v12525_v30 = vpop.f32.mrf.mxu0 }
 0x44c   : > { %7623 = vst [vmem:[#allocation3 + $0x34c] sm:$0xf] %v7471_v10  ;;  %v7473_v14 = vshrl.u32 %v7172_v50, 16  ;;  %v7476_v17 = vshll.u32 %v7172_v50, 16  ;;  %v7668_v44 = vld [vmem:[#allocation2 + $0x9c] sm:$0xe]  ;;  %v12520_v50 = vadd.f32 %v12519_v16, %v15584_v0  ;;  %v12407_v1 = vpop.f32.mrf.mxu1 }
 0x44d   : > { %v8316_v38 = vrot.slane %v8314_v24, 5  ;;  %v8320_v21 = vrot.slane %v8318_v27, 4  ;;  %v8326_v39 = vrot.slane %v8324_v18, 5  ;;  %v7482_v4 = vshll.u32 %v7173_v31, 16  ;;  %v7669_v35 = vld [vmem:[#allocation2 + $0xa0] sm:$0xf] }
 0x44e   : > { %v8311_v22 = vor.u32 %v8310_v33, %v8307_v54  ;;  %v7475_v63 = vrot.slane %v7473_v14, 4  ;;  %v7478_v53 = vrot.slane %v7476_v17, 5  ;;  %v7486_v40 = vshrl.u32 %v7173_v31, 16  ;;  %v7670_v15 = vld [vmem:[#allocation2 + $0xa4] sm:$0x1] }
 0x44f   : > { %v8321_v9 = vor.u32 %v8320_v21, %v8316_v38  ;;  %v7484_v23 = vrot.slane %v7482_v4, 5  ;;  %v7492_v34 = vshll.u32 %v7174_v58, 16  ;;  %v11623_v56 = vrot.slane %v7668_v44, 9  ;;  %v8007_v59 = vld [vmem:[#allocation2 + $0xb4] sm:$0xf]  ;;  %v12409_v58 = vpop.f32.mrf.mxu1  ;;  %v15623_v44 = vpop.f32.mrf.mxu0 }
 0x450   : > { %v8312_v28 = vrot.slane %v8311_v22, 4  ;;  %v7479_v45 = vor.u32 %v7478_v53, %v7475_v63  ;;  %v7488_v61 = vrot.slane %v7486_v40, 4  ;;  %v7814_v20 = vrot.slane %v7669_v35, 5  ;;  %v13454_v51 = vld [vmem:[#allocation3 + $0x334] ss:$36 sps:$4 sm:$0xff]  }
 0x451   : > { %v8322_v36 = vrot.slane %v8321_v9, 4  ;;  %v8008_v37 = vld [vmem:[#allocation2 + $0xb8] sm:$0xf]  ;;  %v13452_v11 = vld [vmem:[#allocation3 + $0x330] ss:$36 sps:$4 sm:$0xff]   ;;  %v7494_v2 = vrot.slane %v7492_v34, 5  ;;  %10811 = vmatprep.mubr.bf16.mxu0 %v13454_v51  ;;  %v12408_v18 = vadd.f32 %v12407_v1, %v12406_v19  ;;  %v12410_v46 = vpop.f32.mrf.mxu1  ;;  %v15631_v9 = vpop.f32.mrf.mxu0 }
 0x452   : > { %v8317_v31 = vsel %vm13658_vm8, %v8312_v28, %v8316_v38  ;;  %v7480_v57 = vrot.slane %v7479_v45, 4  ;;  %v7489_v49 = vor.u32 %v7488_v61, %v7484_v23  ;;  %v13458_v55 = vld [vmem:[#allocation3 + $0x32c] ss:$36 sps:$4 sm:$0xff]   ;;  %v7815_v0 = vsel %vm13679_vm11, %v11623_v56, %v7814_v20  ;;  %v8009_v60 = vld [vmem:[#allocation2 + $0xbc] sm:$0x1]  ;;  %10812 = vmatmul.mubr.bf16.gmra.mxu0 %v13452_v11 }
 0x453   : > { %v8327_v3 = vsel %vm13658_vm8, %v8322_v36, %v8326_v39  ;;  %8456 = vst [vmem:[#allocation3 + $0x37c] sm:$0xf] %v8317_v31  ;;  %v7816_v16 = vrot.slane %v7814_v20, 4  ;;  %v13456_v13 = vld [vmem:[#allocation3 + $0x328] ss:$36 sps:$4 sm:$0xff]   ;;  %v7817_v27 = vrot.slane %v7670_v15, 5  ;;  %10650 = vmatprep.mubr.bf16.mxu1 %v13458_v55  ;;  %v15629_v39 = vadd.f32 %v12520_v50, %v12408_v18  ;;  %v12412_v7 = vpop.f32.mrf.mxu1  ;;  %v15633_v51 = vpop.f32.mrf.mxu0 }
 0x454   : > { %8457 = vst [vmem:[#allocation3 + $0x3a0] sm:$0xf] %v8327_v3  ;;  %v7485_v10 = vsel %vm13658_vm8, %v7480_v57, %v7484_v23  ;;  %v7490_v24 = vrot.slane %v7489_v49, 4  ;;  %7896 = vst [vmem:[#allocation3 + $0x374] sm:$0xf] %v7815_v0  ;;  %v8329_v54 = vshrl.u32 %v8007_v59, 16  ;;  %10651 = vmatmul.mubr.bf16.gmra.mxu1 %v13456_v13  ;;  %v12411_v49 = vadd.f32 %v12410_v46, %v12409_v58 }
 0x455   : > { %v7175_v62 = vld [vmem:[#allocation2 + $0xa8] sm:$0xf]  ;;  %7624 = vst [vmem:[#allocation3 + $0x370] sm:$0xf] %v7485_v10  ;;  %v8332_v33 = vshll.u32 %v8007_v59, 16  ;;  %v8338_v32 = vshll.u32 %v8008_v37, 16  ;;  %v7818_v21 = vsel %vm13679_vm11, %v7816_v16, %v7817_v27  ;;  %v12413_v11 = vpop.f32.mrf.mxu1  ;;  %v15636_v3 = vpop.f32.mrf.mxu0 }
 0x456   : > { %v8342_v14 = vshrl.u32 %v8008_v37, 16  ;;  %v7176_v17 = vld [vmem:[#allocation2 + $0xac] sm:$0xf]  ;;  %v7495_v38 = vsel %vm13658_vm8, %v7490_v24, %v7494_v2  ;;  %v8348_v4 = vshll.u32 %v8009_v60, 16  ;;  %v7177_v35 = vld [vmem:[#allocation2 + $0xb0] sm:$0x1]  ;;  %v12526_v2 = vadd.f32 %v12525_v30, %v15610_v5 }
 0x457   : > { %7625 = vst [vmem:[#allocation3 + $0x394] sm:$0xf] %v7495_v38  ;;  %7897 = vst [vmem:[#allocation3 + $0x398] sm:$0xf] %v7818_v21  ;;  %v8331_v22 = vrot.slane %v8329_v54, 4  ;;  %v8334_v63 = vrot.slane %v8332_v33, 5  ;;  %v12414_v1 = vadd.f32 %v12413_v11, %v12412_v7  ;;  %v15638_v24 = vpop.f32.mrf.mxu1  ;;  %v15643_v58 = vadd.f32 %v15608_v52, %v12411_v49  ;;  %v15645_v54 = vpop.f32.mrf.mxu0 }
 0x458   : > { %v8340_v53 = vrot.slane %v8338_v32, 5  ;;  %v8344_v40 = vrot.slane %v8342_v14, 4  ;;  %v7671_v47 = vld [vmem:[#allocation2 + $0xa8] sm:$0xe]  ;;  %v8350_v23 = vrot.slane %v8348_v4, 5  ;;  %v7497_v34 = vshrl.u32 %v7175_v62, 16 }
 0x459   : > { %v7500_v15 = vshll.u32 %v7175_v62, 16  ;;  %v7506_v56 = vshll.u32 %v7176_v17, 16  ;;  %v8335_v28 = vor.u32 %v8334_v63, %v8331_v22  ;;  %v7510_v61 = vshrl.u32 %v7176_v17, 16  ;;  %v7672_v19 = vld [vmem:[#allocation2 + $0xac] sm:$0xf]  ;;  %v12416_v4 = vpop.f32.mrf.mxu1 }
 0x45a   : > { %v8345_v45 = vor.u32 %v8344_v40, %v8340_v53  ;;  %v7516_v20 = vshll.u32 %v7177_v35, 16  ;;  %v7673_v59 = vld [vmem:[#allocation2 + $0xb0] sm:$0x1]  ;;  %v7499_v36 = vrot.slane %v7497_v34, 4  ;;  %v11624_v37 = vrot.slane %v7671_v47, 9 }
 0x45b   : > { %v7502_v43 = vrot.slane %v7500_v15, 5  ;;  %v7508_v50 = vrot.slane %v7506_v56, 5  ;;  %v13461_v31 = vld [vmem:[#allocation3 + $0x37c] ss:$36 sps:$4 sm:$0xff]   ;;  %v8336_v57 = vrot.slane %v8335_v28, 4  ;;  %v7512_v13 = vrot.slane %v7510_v61, 4  ;;  %v12418_v56 = vpop.f32.mrf.mxu1 }
 0x45c   : > { %v8010_v55 = vld [vmem:[#allocation2 + $0xc0] sm:$0xf]  ;;  %v13459_v0 = vld [vmem:[#allocation3 + $0x378] ss:$36 sps:$4 sm:$0xff]   ;;  %v8346_v16 = vrot.slane %v8345_v45, 4  ;;  %v7518_v10 = vrot.slane %v7516_v20, 5  ;;  %10819 = vmatprep.mubr.bf16.mxu0 %v13461_v31  ;;  %v15649_v38 = vadd.f32 %v12526_v2, %v12414_v1 }
 0x45d   : > { %v7503_v60 = vor.u32 %v7502_v43, %v7499_v36  ;;  %v8341_v27 = vsel %vm13658_vm8, %v8336_v57, %v8340_v53  ;;  %v7821_v18 = vrot.slane %v7672_v19, 5  ;;  %v7824_v62 = vrot.slane %v7673_v59, 5  ;;  %v8011_v5 = vld [vmem:[#allocation2 + $0xc4] sm:$0xf]  ;;  %v8012_v30 = vld [vmem:[#allocation2 + $0xc8] sm:$0x1]  ;;  %10820 = vmatmul.mubr.bf16.gmra.mxu0 %v13459_v0  ;;  %v15653_v53 = vpop.f32.mrf.mxu0  ;;  %v12419_v11 = vpop.f32.mrf.mxu1 }
 0x45e   : > { %v13464_v33 = vld [vmem:[#allocation3 + $0x374] ss:$36 sps:$4 sm:$0xff]   ;;  %v8351_v32 = vsel %vm13658_vm8, %v8346_v16, %v8350_v23  ;;  %8458 = vst [vmem:[#allocation3 + $0x3c4] sm:$0xf] %v8341_v27  ;;  %v7513_v17 = vor.u32 %v7512_v13, %v7508_v50  ;;  %v7178_v21 = vld [vmem:[#allocation2 + $0xb4] sm:$0xf] }
 0x45f   : > { %v7504_v14 = vrot.slane %v7503_v60, 4  ;;  %v13462_v35 = vld [vmem:[#allocation3 + $0x370] ss:$36 sps:$4 sm:$0xff]   ;;  %8459 = vst [vmem:[#allocation3 + $0x3e8] sm:$0xf] %v8351_v32  ;;  %v7822_v52 = vsel %vm13679_vm11, %v11624_v37, %v7821_v18  ;;  %v7823_v46 = vrot.slane %v7821_v18, 4  ;;  %10658 = vmatprep.mubr.bf16.mxu1 %v13464_v33  ;;  %v15659_v19 = vpop.f32.mrf.mxu0  ;;  %v12421_v27 = vpop.f32.mrf.mxu1  ;;  %v12417_v32 = vadd.f32 %v12416_v4, %v15638_v24 }
 0x460   : > { %v8353_v22 = vshrl.u32 %v8010_v55, 16  ;;  %v8356_v63 = vshll.u32 %v8010_v55, 16  ;;  %v7514_v47 = vrot.slane %v7513_v17, 4  ;;  %7898 = vst [vmem:[#allocation3 + $0x3bc] sm:$0xf] %v7822_v52  ;;  %v8362_v23 = vshll.u32 %v8011_v5, 16  ;;  %10659 = vmatmul.mubr.bf16.gmra.mxu1 %v13462_v35 }
 0x461   : > { %v7509_v40 = vsel %vm13658_vm8, %v7504_v14, %v7508_v50  ;;  %v8366_v34 = vshrl.u32 %v8011_v5, 16  ;;  %v7179_v15 = vld [vmem:[#allocation2 + $0xb8] sm:$0xf]  ;;  %v7825_v7 = vsel %vm13679_vm11, %v7823_v46, %v7824_v62  ;;  %v8372_v61 = vshll.u32 %v8012_v30, 16  ;;  %v7180_v20 = vld [vmem:[#allocation2 + $0xbc] sm:$0x1]  ;;  %v15665_v55 = vpop.f32.mrf.mxu0 }
 0x462   : > { %7626 = vst [vmem:[#allocation3 + $0x3b8] sm:$0xf] %v7509_v40  ;;  %v8355_v28 = vrot.slane %v8353_v22, 4  ;;  %v8358_v45 = vrot.slane %v8356_v63, 5  ;;  %v7519_v59 = vsel %vm13658_vm8, %v7514_v47, %v7518_v10  ;;  %7899 = vst [vmem:[#allocation3 + $0x3e0] sm:$0xf] %v7825_v7  ;;  %v12529_v50 = vadd.f32 %v15631_v9, %v15623_v44 }
 0x463   : > { %v8364_v36 = vrot.slane %v8362_v23, 5  ;;  %v8368_v43 = vrot.slane %v8366_v34, 4  ;;  %v7674_v37 = vld [vmem:[#allocation2 + $0xb4] sm:$0xe]  ;;  %7627 = vst [vmem:[#allocation3 + $0x3dc] sm:$0xf] %v7519_v59  ;;  %v15667_v9 = vpop.f32.mrf.mxu0  ;;  %v12532_v14 = vadd.f32 %v15636_v3, %v15633_v51  ;;  %v12420_v17 = vadd.f32 %v12419_v11, %v12418_v56 }
 0x464   : > { %v8359_v31 = vor.u32 %v8358_v45, %v8355_v28  ;;  %v8374_v57 = vrot.slane %v8372_v61, 5  ;;  %v7521_v49 = vshrl.u32 %v7178_v21, 16  ;;  %v7524_v2 = vshll.u32 %v7178_v21, 16  ;;  %v7675_v1 = vld [vmem:[#allocation2 + $0xb8] sm:$0xf]  ;;  %v12422_v21 = vpop.f32.mrf.mxu1 }
 0x465   : > { %v8369_v0 = vor.u32 %v8368_v43, %v8364_v36  ;;  %v7530_v16 = vshll.u32 %v7179_v15, 16  ;;  %v7534_v60 = vshrl.u32 %v7179_v15, 16  ;;  %v7540_v13 = vshll.u32 %v7180_v20, 16  ;;  %v7676_v10 = vld [vmem:[#allocation2 + $0xbc] sm:$0x1]  ;;  %v15674_v47 = vpop.f32.mrf.mxu0 }
 0x466   : > { %v8360_v18 = vrot.slane %v8359_v31, 4  ;;  %v7523_v62 = vrot.slane %v7521_v49, 4  ;;  %v7526_v5 = vrot.slane %v7524_v2, 5  ;;  %v11625_v44 = vrot.slane %v7674_v37, 9  ;;  %v13467_v30 = vld [vmem:[#allocation3 + $0x3c4] ss:$36 sps:$4 sm:$0xff]   ;;  %v12424_v34 = vpop.f32.mrf.mxu1 }
 0x467   : > { %v8370_v33 = vrot.slane %v8369_v0, 4  ;;  %v13465_v35 = vld [vmem:[#allocation3 + $0x3c0] ss:$36 sps:$4 sm:$0xff]   ;;  %v7532_v22 = vrot.slane %v7530_v16, 5  ;;  %v7536_v63 = vrot.slane %v7534_v60, 4  ;;  %10827 = vmatprep.mubr.bf16.mxu0 %v13467_v30  ;;  %v7542_v24 = vrot.slane %v7540_v13, 5  ;;  %v15682_v20 = vpop.f32.mrf.mxu0 }
 0x468   : > { %v8365_v52 = vsel %vm13658_vm8, %v8360_v18, %v8364_v36  ;;  %v7527_v46 = vor.u32 %v7526_v5, %v7523_v62  ;;  %v7181_v40 = vld [vmem:[#allocation2 + $0xc0] sm:$0xf]  ;;  %v7828_v4 = vrot.slane %v7675_v1, 5  ;;  %v7831_v51 = vrot.slane %v7676_v10, 5  ;;  %v7182_v3 = vld [vmem:[#allocation2 + $0xc4] sm:$0xf]  ;;  %10828 = vmatmul.mubr.bf16.gmra.mxu0 %v13465_v35 }
 0x469   : > { %v8375_v23 = vsel %vm13658_vm8, %v8370_v33, %v8374_v57  ;;  %8460 = vst [vmem:[#allocation3 + $0x40c] sm:$0xf] %v8365_v52  ;;  %v7537_v56 = vor.u32 %v7536_v63, %v7532_v22  ;;  %v15678_v7 = vadd.f32 %v12529_v50, %v12417_v32  ;;  %v15680_v28 = vadd.f32 %v12532_v14, %v12420_v17  ;;  %v7183_v45 = vld [vmem:[#allocation2 + $0xc8] sm:$0x1]  ;;  %v7677_v61 = vld [vmem:[#allocation2 + $0xc0] sm:$0xe]  ;;  %v12425_v57 = vpop.f32.mrf.mxu1  ;;  %v15690_v16 = vpop.f32.mrf.mxu0 }
 0x46a   : > { %8461 = vst [vmem:[#allocation3 + $0x430] sm:$0xf] %v8375_v23  ;;  %v7528_v15 = vrot.slane %v7527_v46, 4  ;;  %v13471_v59 = vld [vmem:[#allocation3 + $0x3bc] ss:$36 sps:$4 sm:$0xff]   ;;  %v7829_v36 = vsel %vm13679_vm11, %v11625_v44, %v7828_v4  ;;  %v7830_v43 = vrot.slane %v7828_v4, 4  ;;  %v12535_v37 = vadd.f32 %v15653_v53, %v15645_v54 }
 0x46b   : > { %v7678_v11 = vld [vmem:[#allocation2 + $0xc4] sm:$0xf]  ;;  %v12423_v31 = vadd.f32 %v12422_v21, %v12421_v27  ;;  %v13469_v49 = vld [vmem:[#allocation3 + $0x3b8] ss:$36 sps:$4 sm:$0xff]   ;;  %v7538_v2 = vrot.slane %v7537_v56, 4  ;;  %v7545_v1 = vshrl.u32 %v7181_v40, 16  ;;  %10666 = vmatprep.mubr.bf16.mxu1 %v13471_v59  ;;  %v12427_v27 = vpop.f32.mrf.mxu1  ;;  %v12545_v33 = vpop.f32.mrf.mxu0 }
 0x46c   : > { %v7533_v50 = vsel %vm13658_vm8, %v7528_v15, %v7532_v22  ;;  %7900 = vst [vmem:[#allocation3 + $0x404] sm:$0xf] %v7829_v36  ;;  %v7548_v0 = vshll.u32 %v7181_v40, 16  ;;  %v7832_v60 = vsel %vm13679_vm11, %v7830_v43, %v7831_v51  ;;  %v7554_v13 = vshll.u32 %v7182_v3, 16  ;;  %v7679_v10 = vld [vmem:[#allocation2 + $0xc8] sm:$0x1]  ;;  %10667 = vmatmul.mubr.bf16.gmra.mxu1 %v13469_v49 }
 0x46d   : > { %7628 = vst [vmem:[#allocation3 + $0x400] sm:$0xf] %v7533_v50  ;;  %v7558_v54 = vshrl.u32 %v7182_v3, 16  ;;  %v7564_v53 = vshll.u32 %v7183_v45, 16  ;;  %v7543_v18 = vsel %vm13658_vm8, %v7538_v2, %v7542_v24  ;;  %7901 = vst [vmem:[#allocation3 + $0x428] sm:$0xf] %v7832_v60  ;;  %v12428_v52 = vpop.f32.mrf.mxu1  ;;  %v15696_v63 = vadd.f32 %v12535_v37, %v12423_v31  ;;  %v12546_v4 = vpop.f32.mrf.mxu0 }
 0x46e   : > { %v7547_v62 = vrot.slane %v7545_v1, 4  ;;  %v7550_v5 = vrot.slane %v7548_v0, 5  ;;  %v11626_v44 = vrot.slane %v7677_v61, 9  ;;  %v8464_v30 = vld [vmem:[#allocation2 + $0x18] sm:$0xe]  ;;  %v7556_v32 = vrot.slane %v7554_v13, 5 }
 0x46f   : > { %7629 = vst [vmem:[#allocation3 + $0x424] sm:$0xf] %v7543_v18  ;;  %v7560_v14 = vrot.slane %v7558_v54, 4  ;;  %v7566_v17 = vrot.slane %v7564_v53, 5  ;;  %v7835_v21 = vrot.slane %v7678_v11, 5  ;;  %v7838_v22 = vrot.slane %v7679_v10, 5  ;;  %v12430_v61 = vpop.f32.mrf.mxu1 }
 0x470   : > { %v8465_v35 = vld [vmem:[#allocation2 + $0x1c] sm:$0xf]  ;;  %v7551_v46 = vor.u32 %v7550_v5, %v7547_v62  ;;  %v12538_v40 = vadd.f32 %v15665_v55, %v15659_v19  ;;  %v13484_v23 = vld [vmem:[#allocation3 + $0x454] ss:$36 sps:$4 sm:$0xff]   ;;  %v8466_v24 = vld [vmem:[#allocation2 + $0x20] sm:$0x1]  ;;  %v12426_v45 = vadd.f32 %v12425_v57, %v12424_v34  ;;  %v12541_v37 = vadd.f32 %v15674_v47, %v15667_v9  ;;  %v12548_v55 = vpop.f32.mrf.mxu0 }
 0x471   : > { %v13474_v51 = vld [vmem:[#allocation3 + $0x40c] ss:$36 sps:$4 sm:$0xff]   ;;  %v7561_v3 = vor.u32 %v7560_v14, %v7556_v32  ;;  %v7836_v15 = vsel %vm13679_vm11, %v11626_v44, %v7835_v21  ;;  %v7837_v56 = vrot.slane %v7835_v21, 4  ;;  %v11627_v11 = vrot.slane %v8464_v30, 9  ;;  %v12431_v34 = vpop.f32.mrf.mxu1  ;;  %v8470_v60 = vld [vmem:[#allocation2 + $0x30] sm:$0xe] }
 0x472   : > { %v8467_v59 = vld [vmem:[#allocation2 + $0x24] sm:$0xe]  ;;  %v7552_v43 = vrot.slane %v7551_v46, 4  ;;  %7902 = vst [vmem:[#allocation3 + $0x44c] sm:$0xf] %v7836_v15  ;;  %v8562_v19 = vrot.slane %v8465_v35, 5  ;;  %10835 = vmatprep.mubr.bf16.mxu0 %v13474_v51  ;;  %v15706_v50 = vadd.f32 %v12538_v40, %v12426_v45  ;;  %v12429_v0 = vadd.f32 %v12428_v52, %v12427_v27  ;;  %v12549_v54 = vpop.f32.mrf.mxu0 }
 0x473   : > { %v13472_v36 = vld [vmem:[#allocation3 + $0x408] ss:$36 sps:$4 sm:$0xff]   ;;  %v7562_v31 = vrot.slane %v7561_v3, 4  ;;  %v7839_v49 = vsel %vm13679_vm11, %v7837_v56, %v7838_v22  ;;  %v8565_v2 = vrot.slane %v8466_v24, 5  ;;  %v8468_v57 = vld [vmem:[#allocation2 + $0x28] sm:$0xf]  ;;  %v12544_v10 = vadd.f32 %v15690_v16, %v15682_v20  ;;  %v12433_v62 = vpop.f32.mrf.mxu1 }
 0x474   : > { %10836 = vmatmul.mubr.bf16.gmra.mxu0 %v13472_v36  ;;  %v7557_v1 = vsel %vm13658_vm8, %v7552_v43, %v7556_v32  ;;  %7903 = vst [vmem:[#allocation3 + $0x470] sm:$0xf] %v7839_v49  ;;  %v8563_v9 = vsel %vm13679_vm11, %v11627_v11, %v8562_v19  ;;  %v8564_v47 = vrot.slane %v8562_v19, 4  ;;  %v8471_v13 = vld [vmem:[#allocation2 + $0x34] sm:$0xf]  ;;  %v12432_v18 = vadd.f32 %v12431_v34, %v12430_v61  ;;  %v12551_v35 = vpop.f32.mrf.mxu0 }
 0x475   : > { %v7567_v53 = vsel %vm13658_vm8, %v7562_v31, %v7566_v17  ;;  %7630 = vst [vmem:[#allocation3 + $0x448] sm:$0xf] %v7557_v1  ;;  %10843 = vmatprep.mubr.bf16.mxu0 %v13484_v23  ;;  %8704 = vst [vmem:[#allocation3 + $0x20] sm:$0xf] %v8563_v9  ;;  %v8469_v5 = vld [vmem:[#allocation2 + $0x2c] sm:$0x1]  ;;  %v15718_v21 = vadd.f32 %v12541_v37, %v12429_v0  ;;  %v12547_v17 = vadd.f32 %v12546_v4, %v12545_v33  ;;  %v12434_v40 = vpop.f32.mrf.mxu1 }
 0x476   : > { %v11628_v44 = vrot.slane %v8467_v59, 9  ;;  %v8472_v30 = vld [vmem:[#allocation2 + $0x38] sm:$0x1]  ;;  %v13477_v32 = vld [vmem:[#allocation3 + $0x404] ss:$36 sps:$4 sm:$0xff]   ;;  %v8566_v14 = vsel %vm13679_vm11, %v8564_v47, %v8565_v2  ;;  %v8569_v48 = vrot.slane %v8468_v57, 5  ;;  %v15720_v20 = vadd.f32 %v12544_v10, %v12432_v18  ;;  %v12552_v56 = vpop.f32.mrf.mxu0 }
 0x477   : > { %7631 = vst [vmem:[#allocation3 + $0x46c] sm:$0xf] %v7567_v53  ;;  %v13482_v27 = vld [vmem:[#allocation3 + $0x450] ss:$36 sps:$4 sm:$0xff]   ;;  %v8473_v52 = vld [vmem:[#allocation2 + $0x3c] sm:$0xe]  ;;  %10674 = vmatprep.mubr.bf16.mxu1 %v13477_v32  ;;  %v12435_v15 = vadd.f32 %v12434_v40, %v12433_v62  ;;  %v12436_v36 = vpop.f32.mrf.mxu1  ;;  %v12550_v43 = vadd.f32 %v12549_v54, %v12548_v55  ;;  %v12553_v0 = vadd.f32 %v12552_v56, %v12551_v35 }
 0x478   : > { %v13475_v46 = vld [vmem:[#allocation3 + $0x400] ss:$36 sps:$4 sm:$0xff]   ;;  %8705 = vst [vmem:[#allocation3 + $0x44] sm:$0xf] %v8566_v14  ;;  %v11629_v16 = vrot.slane %v8470_v60, 9  ;;  %v8576_v22 = vrot.slane %v8471_v13, 5  ;;  %v8570_v24 = vsel %vm13679_vm11, %v11628_v44, %v8569_v48  ;;  %v12554_v34 = vpop.f32.mrf.mxu0 }
 0x479   : > { %v8474_v23 = vld [vmem:[#allocation2 + $0x40] sm:$0xf]  ;;  %v8571_v51 = vrot.slane %v8569_v48, 4  ;;  %v8572_v3 = vrot.slane %v8469_v5, 5  ;;  %v8476_v45 = vld [vmem:[#allocation2 + $0x48] sm:$0xe]  ;;  %10675 = vmatmul.mubr.bf16.gmra.mxu1 %v13475_v46  ;;  %v15728_v31 = vadd.f32 %v12547_v17, %v12435_v15  ;;  %v12437_v47 = vpop.f32.mrf.mxu1 }
 0x47a   : > { %v8477_v33 = vld [vmem:[#allocation2 + $0x4c] sm:$0xf]  ;;  %8706 = vst [vmem:[#allocation3 + $0x68] sm:$0xf] %v8570_v24  ;;  %v8577_v4 = vsel %vm13679_vm11, %v11629_v16, %v8576_v22  ;;  %v8578_v61 = vrot.slane %v8576_v22, 4  ;;  %v8579_v59 = vrot.slane %v8472_v30, 5  ;;  %v12438_v10 = vadd.f32 %v12437_v47, %v12436_v36  ;;  %v12555_v44 = vpop.f32.mrf.mxu0 }
 0x47b   : > { %v8475_v37 = vld [vmem:[#allocation2 + $0x44] sm:$0x1]  ;;  %v8478_v11 = vld [vmem:[#allocation2 + $0x50] sm:$0x1]  ;;  %v8573_v19 = vsel %vm13679_vm11, %v8571_v51, %v8572_v3  ;;  %8708 = vst [vmem:[#allocation3 + $0xb0] sm:$0xf] %v8577_v4  ;;  %v12439_v14 = vpop.f32.mrf.mxu1 }
 0x47c   : > { %v11630_v49 = vrot.slane %v8473_v52, 9  ;;  %v8583_v2 = vrot.slane %v8474_v23, 5  ;;  %v8479_v57 = vld [vmem:[#allocation2 + $0x54] sm:$0xe]  ;;  %v8480_v1 = vld [vmem:[#allocation2 + $0x58] sm:$0xf]  ;;  %v8580_v9 = vsel %vm13679_vm11, %v8578_v61, %v8579_v59  ;;  %10844 = vmatmul.mubr.bf16.gmra.mxu0 %v13482_v27  ;;  %v15736_v52 = vadd.f32 %v12555_v44, %v12554_v34  ;;  %v12557_v40 = vpop.f32.mrf.mxu0 }
 0x47d   : > { %8707 = vst [vmem:[#allocation3 + $0x8c] sm:$0xf] %v8573_v19  ;;  %v11631_v55 = vrot.slane %v8476_v45, 9  ;;  %v8590_v60 = vrot.slane %v8477_v33, 5  ;;  %v8481_v13 = vld [vmem:[#allocation2 + $0x5c] sm:$0x1]  ;;  %v15738_v16 = vadd.f32 %v12550_v43, %v12438_v10  ;;  %v12440_v56 = vpop.f32.mrf.mxu1 }
 0x47e   : > { %v8482_v54 = vld [vmem:[#allocation2 + $0x60] sm:$0xe]  ;;  %v8483_v53 = vld [vmem:[#allocation2 + $0x64] sm:$0xf]  ;;  %8709 = vst [vmem:[#allocation3 + $0xd4] sm:$0xf] %v8580_v9  ;;  %v8584_v18 = vsel %vm13679_vm11, %v11630_v49, %v8583_v2  ;;  %v12441_v36 = vadd.f32 %v12440_v56, %v12439_v14  ;;  %v12558_v19 = vpop.f32.mrf.mxu0 }
 0x47f   : > { %v8585_v62 = vrot.slane %v8583_v2, 4  ;;  %v8586_v5 = vrot.slane %v8475_v37, 5  ;;  %v8484_v30 = vld [vmem:[#allocation2 + $0x68] sm:$0x1]  ;;  %8710 = vst [vmem:[#allocation3 + $0xf8] sm:$0xf] %v8584_v18  ;;  %v8591_v48 = vsel %vm13679_vm11, %v11631_v55, %v8590_v60  ;;  %v12442_v2 = vpop.f32.mrf.mxu1  ;;  %v15746_v34 = vadd.f32 %v12558_v19, %v12557_v40 }
 0x480   : > { %v13481_v32 = vld [vmem:[#allocation3 + $0x44c] ss:$36 sps:$4 sm:$0xff]   ;;  %v8592_v17 = vrot.slane %v8590_v60, 4  ;;  %v8593_v35 = vrot.slane %v8478_v11, 5  ;;  %v8485_v27 = vld [vmem:[#allocation2 + $0x6c] sm:$0xe]  ;;  %v15750_v60 = vadd.f32 %v12553_v0, %v12441_v36 }
 0x481   : > { %v8486_v46 = vld [vmem:[#allocation2 + $0x70] sm:$0xf]  ;;  %v8587_v22 = vsel %vm13679_vm11, %v8585_v62, %v8586_v5  ;;  %8712 = vst [vmem:[#allocation3 + $0x140] sm:$0xf] %v8591_v48  ;;  %v11632_v23 = vrot.slane %v8479_v57, 9  ;;  %v8597_v24 = vrot.slane %v8480_v1, 5  ;;  %10682 = vmatprep.mubr.bf16.mxu1 %v13481_v32  ;;  %v12443_v62 = vpop.f32.mrf.mxu1 }
 0x482   : > { %v8488_v51 = vld [vmem:[#allocation2 + $0x78] sm:$0xe]  ;;  %v13479_v3 = vld [vmem:[#allocation3 + $0x448] ss:$36 sps:$4 sm:$0xff]   ;;  %8711 = vst [vmem:[#allocation3 + $0x11c] sm:$0xf] %v8587_v22  ;;  %v8594_v15 = vsel %vm13679_vm11, %v8592_v17, %v8593_v35  ;;  %v12444_v48 = vadd.f32 %v12443_v62, %v12442_v2 }
 0x483   : > { %v11633_v45 = vrot.slane %v8482_v54, 9  ;;  %v8604_v33 = vrot.slane %v8483_v53, 5  ;;  %v8487_v4 = vld [vmem:[#allocation2 + $0x74] sm:$0x1]  ;;  %v8489_v61 = vld [vmem:[#allocation2 + $0x7c] sm:$0xf]  ;;  %v8598_v43 = vsel %vm13679_vm11, %v11632_v23, %v8597_v24  ;;  %10683 = vmatmul.mubr.bf16.gmra.mxu1 %v13479_v3  ;;  %v12560_v54 = vpop.f32.mrf.mxu0 }
 0x484   : > { %v13485_v59 = vld [vmem:[#allocation3 + $0x20] ss:$36 sps:$4 sm:$0xff]   ;;  %8713 = vst [vmem:[#allocation3 + $0x164] sm:$0xf] %v8594_v15  ;;  %v8599_v37 = vrot.slane %v8597_v24, 4  ;;  %v8600_v11 = vrot.slane %v8481_v13, 5  ;;  %v15763_v56 = vadd.f32 %v15736_v52, %v12444_v48 }
 0x485   : > { %v8490_v49 = vld [vmem:[#allocation2 + $0x80] sm:$0x1]  ;;  %8714 = vst [vmem:[#allocation3 + $0x188] sm:$0xf] %v8598_v43  ;;  %v8605_v57 = vsel %vm13679_vm11, %v11633_v45, %v8604_v33  ;;  %v8606_v1 = vrot.slane %v8604_v33, 4  ;;  %v8607_v9 = vrot.slane %v8484_v30, 5  ;;  %12905 = vmatprep.mubr.bf16.mxu1 %v13485_v59  ;;  %v12561_v0 = vpop.f32.mrf.mxu0 }
 0x486   : > { %v8491_v47 = vld [vmem:[#allocation2 + $0x84] sm:$0xe]  ;;  %v8492_v55 = vld [vmem:[#allocation2 + $0x88] sm:$0xf]  ;;  %v8601_v13 = vsel %vm13679_vm11, %v8599_v37, %v8600_v11  ;;  %8716 = vst [vmem:[#allocation3 + $0x1d0] sm:$0xf] %v8605_v57  ;;  %v15758_v40 = vadd.f32 %v12561_v0, %v12560_v54 }
 0x487   : > { %v11634_v53 = vrot.slane %v8485_v27, 9  ;;  %v8611_v10 = vrot.slane %v8486_v46, 5  ;;  %v8494_v18 = vld [vmem:[#allocation2 + $0x90] sm:$0xe]  ;;  %8715 = vst [vmem:[#allocation3 + $0x1ac] sm:$0xf] %v8601_v13  ;;  %v8608_v5 = vsel %vm13679_vm11, %v8606_v1, %v8607_v9  ;;  %v12445_v46 = vpop.f32.mrf.mxu1  ;;  %v12563_v45 = vpop.f32.mrf.mxu0 }
 0x488   : > { %v11635_v44 = vrot.slane %v8488_v51, 9  ;;  %v8618_v30 = vrot.slane %v8489_v61, 5  ;;  %v8493_v32 = vld [vmem:[#allocation2 + $0x8c] sm:$0x1]  ;;  %v8495_v14 = vld [vmem:[#allocation2 + $0x94] sm:$0xf] }
 0x489   : > { %8717 = vst [vmem:[#allocation3 + $0x1f4] sm:$0xf] %v8608_v5  ;;  %v8612_v17 = vsel %vm13679_vm11, %v11634_v53, %v8611_v10  ;;  %v8613_v35 = vrot.slane %v8611_v10, 4  ;;  %v8614_v22 = vrot.slane %v8487_v4, 5  ;;  %v8496_v27 = vld [vmem:[#allocation2 + $0x98] sm:$0x1]  ;;  %v12446_v37 = vpop.f32.mrf.mxu1  ;;  %v12564_v1 = vpop.f32.mrf.mxu0 }
 0x48a   : > { %8718 = vst [vmem:[#allocation3 + $0x218] sm:$0xf] %v8612_v17  ;;  %v8619_v23 = vsel %vm13679_vm11, %v11635_v44, %v8618_v30  ;;  %v8620_v24 = vrot.slane %v8618_v30, 4  ;;  %v8621_v51 = vrot.slane %v8490_v49, 5  ;;  %v8497_v3 = vld [vmem:[#allocation2 + $0x9c] sm:$0xe]  ;;  %v12447_v57 = vadd.f32 %v12446_v37, %v12445_v46 }
 0x48b   : > { %v8498_v15 = vld [vmem:[#allocation2 + $0xa0] sm:$0xf]  ;;  %v8615_v33 = vsel %vm13679_vm11, %v8613_v35, %v8614_v22  ;;  %8720 = vst [vmem:[#allocation3 + $0x260] sm:$0xf] %v8619_v23  ;;  %v11636_v4 = vrot.slane %v8491_v47, 9  ;;  %v8625_v61 = vrot.slane %v8492_v55, 5  ;;  %v12448_v54 = vpop.f32.mrf.mxu1  ;;  %v12565_v53 = vadd.f32 %v12564_v1, %v12563_v45  ;;  %v12566_v30 = vpop.f32.mrf.mxu0 }
 0x48c   : > { %v8500_v59 = vld [vmem:[#allocation2 + $0xa8] sm:$0xe]  ;;  %v8501_v36 = vld [vmem:[#allocation2 + $0xac] sm:$0xf]  ;;  %v13486_v43 = vld [vmem:[#allocation3 + $0x68] ss:$36 sps:$4 sm:$0xff]   ;;  %v8622_v11 = vsel %vm13679_vm11, %v8620_v24, %v8621_v51  ;;  %v15774_v44 = vadd.f32 %v15746_v34, %v12447_v57 }
 0x48d   : > { %8719 = vst [vmem:[#allocation3 + $0x23c] sm:$0xf] %v8615_v33  ;;  %v11637_v19 = vrot.slane %v8494_v18, 9  ;;  %v8632_v49 = vrot.slane %v8495_v14, 5  ;;  %v8499_v2 = vld [vmem:[#allocation2 + $0xa4] sm:$0x1]  ;;  %v8626_v9 = vsel %vm13679_vm11, %v11636_v4, %v8625_v61  ;;  %12906 = vmatmul.mubr.bf16.vlgmr.msra.gmra.mxu1 %v13486_v43  ;;  %v12449_v17 = vpop.f32.mrf.mxu1  ;;  %v12567_v24 = vpop.f32.mrf.mxu0 }
 0x48e   : > { %v13487_v52 = vld [vmem:[#allocation3 + $0xb0] ss:$36 sps:$4 sm:$0xff]   ;;  %8721 = vst [vmem:[#allocation3 + $0x284] sm:$0xf] %v8622_v11  ;;  %v8627_v47 = vrot.slane %v8625_v61, 4  ;;  %v8628_v55 = vrot.slane %v8493_v32, 5  ;;  %v12450_v23 = vadd.f32 %v12449_v17, %v12448_v54 }
 0x48f   : > { %v8502_v13 = vld [vmem:[#allocation2 + $0xb0] sm:$0x1]  ;;  %8722 = vst [vmem:[#allocation3 + $0x2a8] sm:$0xf] %v8626_v9  ;;  %v8633_v10 = vsel %vm13679_vm11, %v11637_v19, %v8632_v49  ;;  %v8634_v18 = vrot.slane %v8632_v49, 4  ;;  %v8635_v62 = vrot.slane %v8496_v27, 5  ;;  %12909 = vmatprep.mubr.bf16.mxu1 %v13487_v52  ;;  %v12569_v37 = vpop.f32.mrf.mxu0 }
 0x490   : > { %v8503_v5 = vld [vmem:[#allocation2 + $0xb4] sm:$0xe]  ;;  %v8629_v14 = vsel %vm13679_vm11, %v8627_v47, %v8628_v55  ;;  %8724 = vst [vmem:[#allocation3 + $0x2f0] sm:$0xf] %v8633_v10  ;;  %v11638_v32 = vrot.slane %v8497_v3, 9  ;;  %v8639_v48 = vrot.slane %v8498_v15, 5  ;;  %v12451_v3 = vpop.f32.mrf.mxu1  ;;  %v12568_v15 = vadd.f32 %v12567_v24, %v12566_v30 }
 0x491   : > { %v8504_v0 = vld [vmem:[#allocation2 + $0xb8] sm:$0xf]  ;;  %8723 = vst [vmem:[#allocation3 + $0x2cc] sm:$0xf] %v8629_v14  ;;  %v8636_v35 = vsel %vm13679_vm11, %v8634_v18, %v8635_v62  ;;  %v11639_v22 = vrot.slane %v8500_v59, 9  ;;  %v8646_v27 = vrot.slane %v8501_v36, 5  ;;  %v15785_v36 = vadd.f32 %v15758_v40, %v12450_v23  ;;  %v12570_v40 = vpop.f32.mrf.mxu0 }
 0x492   : > { %v8506_v46 = vld [vmem:[#allocation2 + $0xc0] sm:$0xe]  ;;  %8725 = vst [vmem:[#allocation3 + $0x314] sm:$0xf] %v8636_v35  ;;  %v8640_v34 = vsel %vm13679_vm11, %v11638_v32, %v8639_v48  ;;  %v8641_v51 = vrot.slane %v8639_v48, 4  ;;  %v8642_v45 = vrot.slane %v8499_v2, 5  ;;  %v12452_v57 = vpop.f32.mrf.mxu1 }
 0x493   : > { %v8507_v33 = vld [vmem:[#allocation2 + $0xc4] sm:$0xf]  ;;  %8726 = vst [vmem:[#allocation3 + $0x338] sm:$0xf] %v8640_v34  ;;  %v8647_v4 = vsel %vm13679_vm11, %v11639_v22, %v8646_v27  ;;  %v8648_v61 = vrot.slane %v8646_v27, 4  ;;  %v8649_v43 = vrot.slane %v8502_v13, 5  ;;  %v12453_v13 = vadd.f32 %v12452_v57, %v12451_v3 }
 0x494   : > { %v8505_v59 = vld [vmem:[#allocation2 + $0xbc] sm:$0x1]  ;;  %v8643_v11 = vsel %vm13679_vm11, %v8641_v51, %v8642_v45  ;;  %8728 = vst [vmem:[#allocation3 + $0x380] sm:$0xf] %v8647_v4  ;;  %v11640_v19 = vrot.slane %v8503_v5, 9  ;;  %v8653_v49 = vrot.slane %v8504_v0, 5  ;;  %v12454_v62 = vpop.f32.mrf.mxu1  ;;  %v12571_v5 = vadd.f32 %v12570_v40, %v12569_v37  ;;  %v12572_v0 = vpop.f32.mrf.mxu0 }
 0x495   : > { %v8508_v2 = vld [vmem:[#allocation2 + $0xc8] sm:$0x1]  ;;  %v13488_v52 = vld [vmem:[#allocation3 + $0xf8] ss:$36 sps:$4 sm:$0xff]   ;;  %8727 = vst [vmem:[#allocation3 + $0x35c] sm:$0xf] %v8643_v11  ;;  %v8650_v1 = vsel %vm13679_vm11, %v8648_v61, %v8649_v43  ;;  %v15795_v48 = vadd.f32 %v12565_v53, %v12453_v13 }
 0x496   : > { %v11641_v9 = vrot.slane %v8506_v46, 9  ;;  %v8660_v47 = vrot.slane %v8507_v33, 5  ;;  %v13489_v55 = vld [vmem:[#allocation3 + $0x140] ss:$36 sps:$4 sm:$0xff]   ;;  %8729 = vst [vmem:[#allocation3 + $0x3a4] sm:$0xf] %v8650_v1  ;;  %v8654_v54 = vsel %vm13679_vm11, %v11640_v19, %v8653_v49  ;;  %12910 = vmatmul.mubr.bf16.gmra.mxu1 %v13488_v52  ;;  %v12455_v35 = vpop.f32.mrf.mxu1  ;;  %v12573_v46 = vpop.f32.mrf.mxu0 }
 0x497   : > { %v8655_v10 = vrot.slane %v8653_v49, 4  ;;  %v8656_v18 = vrot.slane %v8505_v59, 5  ;;  %8730 = vst [vmem:[#allocation3 + $0x3c8] sm:$0xf] %v8654_v54  ;;  %v8663_v32 = vrot.slane %v8508_v2, 5  ;;  %12913 = vmatprep.mubr.bf16.mxu1 %v13489_v55  ;;  %v12456_v27 = vadd.f32 %v12455_v35, %v12454_v62 }
 0x498   : > { %v8661_v30 = vsel %vm13679_vm11, %v11641_v9, %v8660_v47  ;;  %v8662_v14 = vrot.slane %v8660_v47, 4  ;;  %v12457_v23 = vpop.f32.mrf.mxu1  ;;  %v12574_v24 = vadd.f32 %v12573_v46, %v12572_v0  ;;  %v12575_v51 = vpop.f32.mrf.mxu0  ;;  %v13490_v53 = vld [vmem:[#allocation3 + $0x188] ss:$36 sps:$4 sm:$0xff]   ;;  %v13491_v33 = vld [vmem:[#allocation3 + $0x1d0] ss:$36 sps:$4 sm:$0xff]  }
 0x499   : > { %v8657_v17 = vsel %vm13679_vm11, %v8655_v10, %v8656_v18  ;;  %8732 = vst [vmem:[#allocation3 + $0x410] sm:$0xf] %v8661_v30  ;;  %v15801_v34 = vadd.f32 %v12568_v15, %v12456_v27  ;;  %v13492_v57 = vld [vmem:[#allocation3 + $0x218] ss:$36 sps:$4 sm:$0xff]   ;;  %v13493_v9 = vld [vmem:[#allocation3 + $0x260] ss:$36 sps:$4 sm:$0xff]  }
 0x49a   : > { %8731 = vst [vmem:[#allocation3 + $0x3ec] sm:$0xf] %v8657_v17  ;;  %v8664_v22 = vsel %vm13679_vm11, %v8662_v14, %v8663_v32  ;;  %v12458_v45 = vpop.f32.mrf.mxu1  ;;  %v12576_v4 = vpop.f32.mrf.mxu0  ;;  %v13494_v17 = vld [vmem:[#allocation3 + $0x2a8] ss:$36 sps:$4 sm:$0xff]  }
 0x49b   : > { %8733 = vst [vmem:[#allocation3 + $0x434] sm:$0xf] %v8664_v22  ;;  %v12459_v3 = vadd.f32 %v12458_v45, %v12457_v23  ;;  %v12577_v43 = vadd.f32 %v12576_v4, %v12575_v51  ;;  %v13495_v22 = vld [vmem:[#allocation3 + $0x2f0] ss:$36 sps:$4 sm:$0xff]  }
 0x49c   : > { %v12460_v61 = vpop.f32.mrf.mxu1  ;;  %v12578_v25 = vpop.f32.mrf.mxu0 }
 0x49d   : > { %v15803_v59 = vadd.f32 %v12571_v5, %v12459_v3 }
 0x49e   : > { %12914 = vmatmul.mubr.bf16.gmra.mxu1 %v13490_v53  ;;  %v12461_v37 = vpop.f32.mrf.mxu1  ;;  %v12579_v19 = vpop.f32.mrf.mxu0 }
 0x49f   : > { %12917 = vmatprep.mubr.bf16.mxu1 %v13491_v33  ;;  %v12462_v11 = vadd.f32 %v12461_v37, %v12460_v61  ;;  %v12580_v2 = vadd.f32 %v12579_v19, %v12578_v25  ;;  %v13496_v37 = vld [vmem:[#allocation3 + $0x338] ss:$36 sps:$4 sm:$0xff]   ;;  %v13497_v19 = vld [vmem:[#allocation3 + $0x380] ss:$36 sps:$4 sm:$0xff]  }
 0x4a0   : > { %v12463_v49 = vpop.f32.mrf.mxu1  ;;  %v12581_v52 = vpop.f32.mrf.mxu0 }
 0x4a1   : > { %v15805_v15 = vadd.f32 %v12574_v24, %v12462_v11 }
 0x4a2   : > { %v12464_v1 = vpop.f32.mrf.mxu1  ;;  %v12582_v55 = vpop.f32.mrf.mxu0 }
 0x4a3   : > { %v12465_v47 = vadd.f32 %v12464_v1, %v12463_v49  ;;  %v12583_v40 = vadd.f32 %v12582_v55, %v12581_v52 }
 0x4a4   : > { %v12466_v13 = vpop.f32.mrf.mxu1  ;;  %v12584_v10 = vpop.f32.mrf.mxu0 }
 0x4a5   : > { %v15807_v54 = vadd.f32 %v12577_v43, %v12465_v47 }
 0x4a6   : > { %12918 = vmatmul.mubr.bf16.gmra.mxu1 %v13492_v57  ;;  %v12467_v18 = vpop.f32.mrf.mxu1  ;;  %v12585_v5 = vpop.f32.mrf.mxu0 }
 0x4a7   : > { %12921 = vmatprep.mubr.bf16.mxu1 %v13493_v9  ;;  %v12468_v62 = vadd.f32 %v12467_v18, %v12466_v13  ;;  %v12586_v14 = vadd.f32 %v12585_v5, %v12584_v10 }
 0x4a8   : > { %v12469_v30 = vpop.f32.mrf.mxu1  ;;  %v12587_v0 = vpop.f32.mrf.mxu0 }
 0x4a9   : > { %v15809_v32 = vadd.f32 %v12580_v2, %v12468_v62  ;;  %v13498_v62 = vld [vmem:[#allocation3 + $0x3c8] ss:$36 sps:$4 sm:$0xff]  }
 0x4aa   : > { %v12470_v35 = vpop.f32.mrf.mxu1  ;;  %v12588_v46 = vpop.f32.mrf.mxu0 }
 0x4ab   : > { %v12471_v27 = vadd.f32 %v12470_v35, %v12469_v30  ;;  %v12589_v24 = vadd.f32 %v12588_v46, %v12587_v0 }
 0x4ac   : > { %v12472_v23 = vpop.f32.mrf.mxu1  ;;  %v12590_v53 = vpop.f32.mrf.mxu0 }
 0x4ad   : > { %v15811_v51 = vadd.f32 %v12583_v40, %v12471_v27 }
 0x4ae   : > { %12922 = vmatmul.mubr.bf16.gmra.mxu1 %v13494_v17  ;;  %v12473_v45 = vpop.f32.mrf.mxu1  ;;  %v12591_v3 = vpop.f32.mrf.mxu0 }
 0x4af   : > { %12925 = vmatprep.mubr.bf16.mxu1 %v13495_v22  ;;  %v12474_v33 = vadd.f32 %v12473_v45, %v12472_v23  ;;  %v12592_v61 = vadd.f32 %v12591_v3, %v12590_v53 }
 0x4b0   : > { %v12475_v4 = vpop.f32.mrf.mxu1  ;;  %v12721_v25 = vpop.f32.mrf.mxu0 }
 0x4b1   : > { %v15813_v43 = vadd.f32 %v12586_v14, %v12474_v33  ;;  %v13499_v14 = vld [vmem:[#allocation3 + $0x410] ss:$36 sps:$4 sm:$0xff]  }
 0x4b2   : > { %v12476_v11 = vpop.f32.mrf.mxu1  ;;  %v12722_v2 = vpop.f32.mrf.mxu0 }
 0x4b3   : > { %v12477_v49 = vadd.f32 %v12476_v11, %v12475_v4  ;;  %v12723_v57 = vadd.f32 %v12722_v2, %v12721_v25 }
 0x4b4   : > { %v12478_v52 = vpop.f32.mrf.mxu1  ;;  %v12724_v9 = vpop.f32.mrf.mxu0 }
 0x4b5   : > { %v15815_v1 = vadd.f32 %v12589_v24, %v12477_v49  ;;  %v13500_v24 = vld [vmem:[#allocation3 + $0x458] ss:$36 sps:$4 sm:$0xff]  }
 0x4b6   : > { %12926 = vmatmul.mubr.bf16.gmra.mxu1 %v13496_v37  ;;  %v12479_v47 = vpop.f32.mrf.mxu1  ;;  %v12725_v13 = vpop.f32.mrf.mxu0 }
 0x4b7   : > { %12929 = vmatprep.mubr.bf16.mxu1 %v13497_v19  ;;  %16440 = vst [vmem:[#allocation24_spill] sm:$0xff] %v15815_v1  ;;  %v12480_v55 = vadd.f32 %v12479_v47, %v12478_v52  ;;  %v12726_v10 = vadd.f32 %v12725_v13, %v12724_v9 }
 0x4b8   : > { %v12609_v40 = vpop.f32.mrf.mxu1  ;;  %v15819_v30 = vpop.f32.mrf.mxu0 }
 0x4b9   : > { %v15817_v18 = vadd.f32 %v12592_v61, %v12480_v55 }
 0x4ba   : > { %v12610_v5 = vpop.f32.mrf.mxu1  ;;  %v15821_v35 = vpop.f32.mrf.mxu0 }
 0x4bb   : > { %16441 = vst [vmem:[#allocation25_spill] sm:$0xff] %v15817_v18  ;;  %v12611_v0 = vadd.f32 %v12610_v5, %v12609_v40 }
 0x4bc   : > { %v12612_v17 = vpop.f32.mrf.mxu1  ;;  %v15824_v46 = vpop.f32.mrf.mxu0 }
 0x4bd   : > { %v10565_v22 = vadd.f32 %v12611_v0, %v15464_v8 }
 0x4be   : > { %12930 = vmatmul.mubr.bf16.gmra.mxu1 %v13498_v62  ;;  %v12613_v27 = vpop.f32.mrf.mxu1  ;;  %v15826_v45 = vpop.f32.mrf.mxu0 }
 0x4bf   : > { %12933 = vmatprep.mubr.bf16.mxu1 %v13499_v14  ;;  %v12614_v23 = vadd.f32 %v12613_v27, %v12612_v17 }
 0x4c0   : > { %v12615_v53 = vpop.f32.mrf.mxu1  ;;  %v15829_v4 = vpop.f32.mrf.mxu0 }
 0x4c1   : > { %v10568_v33 = vadd.f32 %v12614_v23, %v15467_v26 }
 0x4c2   : > { %v12616_v3 = vpop.f32.mrf.mxu1  ;;  %v15831_v37 = vpop.f32.mrf.mxu0 }
 0x4c3   : > { %v12617_v61 = vadd.f32 %v12616_v3, %v12615_v53 }
 0x4c4   : > { %v12618_v25 = vpop.f32.mrf.mxu1  ;;  %v15836_v19 = vpop.f32.mrf.mxu0 }
 0x4c5   : > { %v15834_v8 = vadd.f32 %v12617_v61, %v15563_v42 }
 0x4c6   : > { %12934 = vmatmul.mubr.bf16.gmra.mxu1 %v13500_v24  ;;  %v12619_v11 = vpop.f32.mrf.mxu1  ;;  %v15838_v52 = vpop.f32.mrf.mxu0 }
 0x4c7   : > { %v12620_v49 = vadd.f32 %v12619_v11, %v12618_v25 }
 0x4c8   : > { %v12621_v2 = vpop.f32.mrf.mxu1  ;;  %v15843_v47 = vpop.f32.mrf.mxu0 }
 0x4c9   : > { %v15841_v26 = vadd.f32 %v12620_v49, %v15568_v41  ;;  %v15866_v49 = vadd.f32 %v12723_v57, %v10565_v22 }
 0x4ca   : > { %v12622_v9 = vpop.f32.mrf.mxu1  ;;  %v15845_v40 = vpop.f32.mrf.mxu0 }
 0x4cb   : > { %v12623_v55 = vadd.f32 %v12622_v9, %v12621_v2 }
 0x4cc   : > { %v12624_v13 = vpop.f32.mrf.mxu1  ;;  %v15850_v5 = vpop.f32.mrf.mxu0 }
 0x4cd   : > { %v15848_v42 = vadd.f32 %v12623_v55, %v15587_v6 }
 0x4ce   : > { %v12625_v62 = vpop.f32.mrf.mxu1  ;;  %v15852_v17 = vpop.f32.mrf.mxu0 }
 0x4cf   : > { %v12626_v14 = vadd.f32 %v12625_v62, %v12624_v13 }
 0x4d0   : > { %v12627_v0 = vpop.f32.mrf.mxu1  ;;  %v15857_v23 = vpop.f32.mrf.mxu0 }
 0x4d1   : > { %v15855_v41 = vadd.f32 %v12626_v14, %v15596_v29  ;;  %v15875_v14 = vadd.f32 %v12726_v10, %v10568_v33 }
 0x4d2   : > { %v12628_v27 = vpop.f32.mrf.mxu1  ;;  %v15859_v3 = vpop.f32.mrf.mxu0 }
 0x4d3   : > { %v12629_v24 = vadd.f32 %v12628_v27, %v12627_v0 }
 0x4d4   : > { %v12630_v53 = vpop.f32.mrf.mxu1  ;;  %v15864_v25 = vpop.f32.mrf.mxu0 }
 0x4d5   : > { %v15862_v6 = vadd.f32 %v12629_v24, %v15619_v12 }
 0x4d6   : > { %v12631_v61 = vpop.f32.mrf.mxu1  ;;  %v15868_v9 = vpop.f32.mrf.mxu0 }
 0x4d7   : > { %v12632_v11 = vadd.f32 %v12631_v61, %v12630_v53 }
 0x4d8   : > { %v12633_v2 = vpop.f32.mrf.mxu1  ;;  %v15873_v13 = vpop.f32.mrf.mxu0 }
 0x4d9   : > { %v15871_v29 = vadd.f32 %v12632_v11, %v15629_v39 }
 0x4da   : > { %v12634_v55 = vpop.f32.mrf.mxu1  ;;  %v15877_v0 = vpop.f32.mrf.mxu0 }
 0x4db   : > { %v12635_v62 = vadd.f32 %v12634_v55, %v12633_v2 }
 0x4dc   : > { %v12636_v12 = vpop.f32.mrf.mxu1  ;;  %v15882_v22 = vpop.f32.mrf.mxu0 }
 0x4dd   : > { %v15880_v27 = vadd.f32 %v12635_v62, %v15643_v58 }
 0x4de   : > { %v12637_v57 = vpop.f32.mrf.mxu1  ;;  %v15887_v61 = vpop.f32.mrf.mxu0 }
 0x4df   : > { %16442 = vst [vmem:[#allocation13_spill] sm:$0xff] %v15880_v27  ;;  %v12638_v24 = vadd.f32 %v12637_v57, %v12636_v12 }
 0x4e0   : > { %v12639_v53 = vpop.f32.mrf.mxu1  ;;  %v15892_v55 = vpop.f32.mrf.mxu0 }
 0x4e1   : > { %v15885_v39 = vadd.f32 %v12638_v24, %v15649_v38 }
 0x4e2   : > { %v12640_v11 = vpop.f32.mrf.mxu1  ;;  %v15897_v12 = vpop.f32.mrf.mxu0 }
 0x4e3   : > { %16443 = vst [vmem:[#allocation12_spill] sm:$0xff] %v15885_v39  ;;  %v12641_v2 = vadd.f32 %v12640_v11, %v12639_v53 }
 0x4e4   : > { %v12642_v10 = vpop.f32.mrf.mxu1  ;;  %v15902_v53 = vpop.f32.mrf.mxu0 }
 0x4e5   : > { %v15890_v33 = vadd.f32 %v12641_v2, %v15678_v7 }
 0x4e6   : > { %v12643_v58 = vpop.f32.mrf.mxu1  ;;  %v15904_v27 = vpop.f32.mrf.mxu0 }
 0x4e7   : > { %v12644_v62 = vadd.f32 %v12643_v58, %v12642_v10 }
 0x4e8   : > { %v12645_v18 = vpop.f32.mrf.mxu1 }
 0x4e9   : > { %v15895_v1 = vadd.f32 %v12644_v62, %v15680_v28 }
 0x4ea   : > { %v12646_v38 = vpop.f32.mrf.mxu1 }
 0x4eb   : > { %16444 = vst [vmem:[#allocation27_spill] sm:$0xff] %v15895_v1  ;;  %v12647_v57 = vadd.f32 %v12646_v38, %v12645_v18  ;;  %v15909_v1 = vpop.f32.mrf.mxu0 }
 0x4ec   : > { %v12648_v24 = vpop.f32.mrf.mxu1 }
 0x4ed   : > { %v15900_v39 = vadd.f32 %v12647_v57, %v15696_v63  ;;  %v15914_v57 = vpop.f32.mrf.mxu0 }
 0x4ee   : > { %v12649_v7 = vpop.f32.mrf.mxu1 }
 0x4ef   : > { %16445 = vst [vmem:[#allocation28_spill] sm:$0xff] %v15900_v39  ;;  %v12650_v11 = vadd.f32 %v12649_v7, %v12648_v24  ;;  %v15919_v39 = vpop.f32.mrf.mxu0 }
 0x4f0   : > { %v12651_v2 = vpop.f32.mrf.mxu1  ;;  %16449 = vst [vmem:[#allocation15_spill] sm:$0xff] %v15919_v39 }
 0x4f1   : > { %v15907_v10 = vadd.f32 %v12650_v11, %v15706_v50 }
 0x4f2   : > { %v12652_v28 = vpop.f32.mrf.mxu1 }
 0x4f3   : > { %16446 = vst [vmem:[#allocation30_spill] sm:$0xff] %v15907_v10  ;;  %v12653_v58 = vadd.f32 %v12652_v28, %v12651_v2  ;;  %v15921_v2 = vpop.f32.mrf.mxu0 }
 0x4f4   : > { %v12654_v62 = vpop.f32.mrf.mxu1  ;;  %16450 = vst [vmem:[#allocation33_spill] sm:$0xff] %v15921_v2 }
 0x4f5   : > { %v15912_v18 = vadd.f32 %v12653_v58, %v15718_v21 }
 0x4f6   : > { %v12655_v63 = vpop.f32.mrf.mxu1 }
 0x4f7   : > { %16447 = vst [vmem:[#allocation31_spill] sm:$0xff] %v15912_v18  ;;  %v12656_v38 = vadd.f32 %v12655_v63, %v12654_v62  ;;  %v15926_v18 = vpop.f32.mrf.mxu0 }
 0x4f8   : > { %v12657_v7 = vpop.f32.mrf.mxu1 }
 0x4f9   : > { %v15917_v24 = vadd.f32 %v12656_v38, %v15720_v20 }
 0x4fa   : > { %v12658_v50 = vpop.f32.mrf.mxu1 }
 0x4fb   : > { %16448 = vst [vmem:[#allocation14_spill] sm:$0xff] %v15917_v24  ;;  %v12659_v11 = vadd.f32 %v12658_v50, %v12657_v7  ;;  %v15931_v24 = vpop.f32.mrf.mxu0 }
 0x4fc   : > { %v12660_v10 = vpop.f32.mrf.mxu1 }
 0x4fd   : > { %v15924_v28 = vadd.f32 %v12659_v11, %v15728_v31  ;;  %v15936_v31 = vpop.f32.mrf.mxu0 }
 0x4fe   : > { %v12661_v21 = vpop.f32.mrf.mxu1  ;;  %16453 = vst [vmem:[#allocation18_spill] sm:$0xff] %v15936_v31 }
 0x4ff   : > { %16451 = vst [vmem:[#allocation17_spill] sm:$0xff] %v15924_v28  ;;  %v12662_v58 = vadd.f32 %v12661_v21, %v12660_v10  ;;  %v15941_v21 = vpop.f32.mrf.mxu0 }
 0x500   : > { %v12663_v20 = vpop.f32.mrf.mxu1  ;;  %16455 = vst [vmem:[#allocation19_spill] sm:$0xff] %v15941_v21 }
 0x501   : > { %v15929_v62 = vadd.f32 %v12662_v58, %v15738_v16 }
 0x502   : > { %v12664_v63 = vpop.f32.mrf.mxu1 }
 0x503   : > { %16452 = vst [vmem:[#allocation16_spill] sm:$0xff] %v15929_v62  ;;  %v12665_v38 = vadd.f32 %v12664_v63, %v12663_v20  ;;  %v15943_v20 = vpop.f32.mrf.mxu0 }
 0x504   : > { %v12666_v39 = vpop.f32.mrf.mxu1 }
 0x505   : > { %v15934_v7 = vadd.f32 %v12665_v38, %v15750_v60  ;;  %v15948_v28 = vpop.f32.mrf.mxu0 }
 0x506   : > { %v12667_v50 = vpop.f32.mrf.mxu1 }
 0x507   : > { %v12668_v2 = vadd.f32 %v12667_v50, %v12666_v39  ;;  %v15953_v50 = vpop.f32.mrf.mxu0 }
 0x509   : > { %v15939_v10 = vadd.f32 %v12668_v2, %v15763_v56  ;;  %v15958_v31 = vpop.f32.mrf.mxu0 }
 0x50a   : > { %v12669_v11 = vpop.f32.mrf.mxu1 }
 0x50b   : > { %16454 = vst [vmem:[#allocation21_spill] sm:$0xff] %v15939_v10 }
 0x50c   : > { %v12670_v16 = vpop.f32.mrf.mxu1 }
 0x50d   : > { %v12671_v58 = vadd.f32 %v12670_v16, %v12669_v11 }
 0x50e   : > { %v12672_v62 = vpop.f32.mrf.mxu1 }
 0x50f   : > { %v15946_v63 = vadd.f32 %v12671_v58, %v15774_v44  ;;  %v15963_v58 = vpop.f32.mrf.mxu0 }
 0x510   : > { %v12673_v60 = vpop.f32.mrf.mxu1 }
 0x511   : > { %16456 = vst [vmem:[#allocation20_spill] sm:$0xff] %v15946_v63  ;;  %v12674_v38 = vadd.f32 %v12673_v60, %v12672_v62 }
 0x513   : > { %v15951_v39 = vadd.f32 %v12674_v38, %v15785_v36 }
 0x514   : > { %v12675_v56 = vpop.f32.mrf.mxu1 }
 0x515   : > { %16457 = vst [vmem:[#allocation36_spill] sm:$0xff] %v15951_v39  ;;  %v15965_v39 = vpop.f32.mrf.mxu0 }
 0x516   : > { %v12676_v2 = vpop.f32.mrf.mxu1 }
 0x517   : > { %v12677_v10 = vadd.f32 %v12676_v2, %v12675_v56  ;;  %v15970_v2 = vpop.f32.mrf.mxu0 }
 0x518   : > { %v12678_v21 = vpop.f32.mrf.mxu1 }
 0x519   : > { %v15956_v11 = vadd.f32 %v12677_v10, %v15795_v48 }
 0x51a   : > { %v12679_v16 = vpop.f32.mrf.mxu1 }
 0x51b   : > { %16458 = vst [vmem:[#allocation22_spill] sm:$0xff] %v15956_v11  ;;  %v12680_v44 = vadd.f32 %v12679_v16, %v12678_v21 }
 0x51d   : > { %v15961_v62 = vadd.f32 %v12680_v44, %v15801_v34  ;;  %v15975_v34 = vpop.f32.mrf.mxu0 }
 0x51e   : > { %16462 = vst [vmem:[#allocation41_spill] sm:$0xff] %v15975_v34 }
 0x51f   : > { %16459 = vst [vmem:[#allocation23_spill] sm:$0xff] %v15961_v62  ;;  %v15977_v11 = vpop.f32.mrf.mxu0 }
 0x520   : > { %v12681_v36 = vpop.f32.mrf.mxu1 }
 0x522   : > { %v12682_v60 = vpop.f32.mrf.mxu1 }
 0x523   : > { %v12683_v38 = vadd.f32 %v12682_v60, %v12681_v36 }
 0x524   : > { %v12684_v63 = vpop.f32.mrf.mxu1 }
 0x525   : > { %v15968_v56 = vadd.f32 %v12683_v38, %v15803_v59 }
 0x526   : > { %v12685_v48 = vpop.f32.mrf.mxu1 }
 0x527   : > { %16460 = vst [vmem:[#allocation38_spill] sm:$0xff] %v15968_v56  ;;  %v12686_v10 = vadd.f32 %v12685_v48, %v12684_v63  ;;  %v15982_v56 = vpop.f32.mrf.mxu0 }
 0x529   : > { %v15973_v21 = vadd.f32 %v12686_v10, %v15805_v15  ;;  %v15987_v48 = vpop.f32.mrf.mxu0 }
 0x52b   : > { %16461 = vst [vmem:[#allocation40_spill] sm:$0xff] %v15973_v21 }
 0x52c   : > { %v12687_v16 = vpop.f32.mrf.mxu1 }
 0x52e   : > { %v12688_v44 = vpop.f32.mrf.mxu1 }
 0x52f   : > { %v12689_v62 = vadd.f32 %v12688_v44, %v12687_v16  ;;  %v15989_v16 = vpop.f32.mrf.mxu0 }
 0x530   : > { %v12690_v36 = vpop.f32.mrf.mxu1 }
 0x531   : > { %v15980_v60 = vadd.f32 %v12689_v62, %v15807_v54 }
 0x532   : > { %v12691_v59 = vpop.f32.mrf.mxu1 }
 0x533   : > { %16463 = vst [vmem:[#allocation29_spill] sm:$0xff] %v15980_v60  ;;  %v12692_v38 = vadd.f32 %v12691_v59, %v12690_v36  ;;  %v15996_v36 = vpop.f32.mrf.mxu0 }
 0x535   : > { %v15985_v63 = vadd.f32 %v12692_v38, %v15809_v32 }
 0x537   : > { %16464 = vst [vmem:[#allocation26_spill] sm:$0xff] %v15985_v63 }
 0x539   : > { %v12693_v15 = vpop.f32.mrf.mxu1 }
 0x53b   : > { %v12694_v10 = vpop.f32.mrf.mxu1 }
 0x53c   : > { %v12695_v21 = vadd.f32 %v12694_v10, %v12693_v15  ;;  %v12729_v15 = vadd.f32 %v15821_v35, %v15819_v30  ;;  %v16007_v10 = vpop.f32.mrf.mxu0  ;;  %v16024_v30 = vld [vmem:[%s16332_s6] ss:$0 sm:$0xff] }
 0x53d   : > { %v12696_v34 = vpop.f32.mrf.mxu1 }
 0x53e   : > { %v15992_v44 = vadd.f32 %v12695_v21, %v15811_v51  ;;  %v10734_v21 = vadd.f32 %v12729_v15, %v15834_v8  ;;  %v13504_v15 = vld [vmem:[%s13654_s14 + $0x8] sm:$0xf] }
 0x53f   : > { %v12697_v54 = vpop.f32.mrf.mxu1 }
 0x540   : > { %16465 = vst [vmem:[#allocation32_spill] sm:$0xff] %v15992_v44  ;;  %v12698_v62 = vadd.f32 %v12697_v54, %v12696_v34  ;;  %v16015_v54 = vld [vmem:[%s16331_s5] ss:$0 sm:$0xff]  ;;  %v11093_v44 = vunpack.c.l.bf16 %v13504_v15 }
 0x542   : > { %v15999_v32 = vadd.f32 %v12698_v62, %v15813_v43  ;;  %v12732_v43 = vadd.f32 %v15826_v45, %v15824_v46  ;;  %v16019_v62 = vpop.f32.mrf.mxu0  ;;  %v12735_v46 = vadd.f32 %v15831_v37, %v15829_v4  ;;  %v12738_v45 = vadd.f32 %v15838_v52, %v15836_v19  ;;  %v13506_v52 = vld [vmem:[%s13654_s14 + $0xc] sm:$0xf] }
 0x543   : > { %v15994_v60 = vpop.f32.mrf.mxu1  ;;  %v12744_v4 = vadd.f32 %v15852_v17, %v15850_v5  ;;  %v12747_v37 = vadd.f32 %v15859_v3, %v15857_v23  ;;  %v16048_v19 = vadd.f32 %v15868_v9, %v15864_v25  ;;  %v12753_v5 = vadd.f32 %v15877_v0, %v15873_v13  ;;  %v13507_v17 = vld [vmem:[%s13654_s14 + $0x4] sm:$0xf] }
 0x544   : > { %16466 = vst [vmem:[#allocation34_spill] sm:$0xff] %v15999_v32  ;;  %v16036_v63 = vpop.f32.mrf.mxu0  ;;  %v11092_v23 = vunpack.c.l.bf16 %v13507_v17  ;;  %v10742_v9 = vadd.f32 %v12735_v46, %v15848_v42 }
 0x545   : > { %v16001_v59 = vpop.f32.mrf.mxu1 }
 0x547   : > { %v16003_v38 = vpop.f32.mrf.mxu1 }
 0x548   : > { %16467 = vst [vmem:[#allocation43_spill] sm:$0xff] %v16003_v38  ;;  %v10737_v38 = vadd.f32 %v12732_v43, %v15841_v26 }
 0x549   : > { %v16009_v51 = vpop.f32.mrf.mxu1 }
 0x54a   : > { %16468 = vst [vmem:[#allocation45_spill] sm:$0xff] %v16009_v51 }
 0x54d   : > { %v12907_v34 = vpop.f32.mrf.mxu1 }
 0x54e   : > { %v10895_v32 = vadd.f32 %v12907_v34, %v10734_v21  ;;  %v12741_v21 = vadd.f32 %v15845_v40, %v15843_v47  ;;  %v11094_v47 = vunpack.c.l.bf16 %v13506_v52  ;;  %v13509_v52 = vld [vmem:[%s13654_s14 + $0x10] sm:$0xf] }
 0x54f   : > { %v10886_v35 = vpop.f32.mrf.mxu1 }
 0x550   : > { %v11022_v8 = vmul.f32 %v16015_v54, %v10895_v32  ;;  %v10887_v51 = vadd.f32 %v10886_v35, %v15866_v49  ;;  %v13505_v35 = vld [vmem:[%s13654_s14] sm:$0xf]  ;;  %v10750_v3 = vadd.f32 %v12741_v21, %v15862_v6  ;;  %v10753_v6 = vadd.f32 %v12744_v4, %v15871_v29 }
 0x551   : > { %v12908_v34 = vpop.f32.mrf.mxu1  ;;  %v11091_v26 = vunpack.c.l.bf16 %v13505_v35 }
 0x552   : > { %v11061_v32 = vadd.f32 %v16024_v30, %v11022_v8  ;;  %v11020_v49 = vmul.f32 %v16015_v54, %v10887_v51  ;;  %v10898_v43 = vadd.f32 %v12908_v34, %v10737_v38 }
 0x553   : > { %v10889_v40 = vpop.f32.mrf.mxu1 }
 0x554   : > { %v11125_v8 = vadd.f32 %v11093_v44, %v11061_v32  ;;  %v11059_v51 = vadd.f32 %v16024_v30, %v11020_v49  ;;  %v11023_v15 = vmul.f32 %v16015_v54, %v10898_v43  ;;  %v10890_v38 = vadd.f32 %v10889_v40, %v15875_v14  ;;  %v16064_v44 = vpop.f32.mrf.mxu0  ;;  %v13508_v49 = vld [vmem:[%s13654_s14 + $0x18] sm:$0xf] }
 0x555   : > { %v11097_v35 = vunpack.c.l.bf16 %v13508_v49  ;;  %v11095_v40 = vunpack.c.l.bf16 %v13509_v52 }
 0x556   : > { %v12911_v25 = vpop.f32.mrf.mxu1  ;;  %v11157_v14 = vmax.f32 %v11125_v8, 0.0  ;;  %v11123_v34 = vadd.f32 %v11091_v26, %v11059_v51  ;;  %v11062_v13 = vadd.f32 %v16024_v30, %v11023_v15  ;;  %v11021_v0 = vmul.f32 %v16015_v54, %v10890_v38  ;;  %v13510_v38 = vld [vmem:[%s13654_s14 + $0x1c] sm:$0xf]  ;;  %v16078_v29 = vpop.f32.mrf.mxu0 }
 0x557   : > { %v10911_v32 = vadd.f32 %v12911_v25, %v10750_v3  ;;  %v12756_v8 = vadd.f32 %v15887_v61, %v15882_v22  ;;  %v11098_v17 = vunpack.c.l.bf16 %v13510_v38  ;;  %v10745_v3 = vadd.f32 %v12738_v45, %v15855_v41  ;;  %v13511_v61 = vld [vmem:[%s13654_s14 + $0x14] sm:$0xf] }
 0x558   : > { %v10902_v43 = vpop.f32.mrf.mxu1  ;;  %11189 = vst [vmem:[%s16059_s15 + $0x10] sm:$0xff] %v11157_v14  ;;  %v11155_v42 = vmax.f32 %v11123_v34, 0.0  ;;  %v11126_v46 = vadd.f32 %v11094_v47, %v11062_v13  ;;  %v11060_v21 = vadd.f32 %v16024_v30, %v11021_v0  ;;  %v11096_v34 = vunpack.c.l.bf16 %v13511_v61  ;;  %v13512_v0 = vld [vmem:[%s13654_s14 + $0x28] sm:$0xf] }
 0x559   : > { %v10903_v26 = vadd.f32 %v10902_v43, %v10742_v9  ;;  %v11026_v51 = vmul.f32 %v16015_v54, %v10911_v32  ;;  %v10766_v13 = vadd.f32 %v12753_v5, %v15890_v33  ;;  %v11101_v32 = vunpack.c.l.bf16 %v13512_v0  ;;  %v16093_v33 = vpop.f32.mrf.mxu0 }
 0x55a   : > { %v12912_v15 = vpop.f32.mrf.mxu1  ;;  %11187 = vst [vmem:[%s16059_s15] sm:$0xff] %v11155_v42  ;;  %v11158_v4 = vmax.f32 %v11126_v46, 0.0  ;;  %v11124_v47 = vadd.f32 %v11092_v23, %v11060_v21  ;;  %v12759_v43 = vadd.f32 %v15897_v12, %v15892_v55  ;;  %v16469_v42 = vld [vmem:[#allocation13_spill] sm:$0xff]  ;;  %v13513_v21 = vld [vmem:[%s13654_s14 + $0x20] sm:$0xf]  ;;  %v12762_v55 = vadd.f32 %v15904_v27, %v15902_v53 }
 0x55b   : > { %v11024_v25 = vmul.f32 %v16015_v54, %v10903_v26  ;;  %v10914_v9 = vadd.f32 %v12912_v15, %v10753_v6  ;;  %v11065_v14 = vadd.f32 %v16024_v30, %v11026_v51  ;;  %v10758_v46 = vadd.f32 %v12747_v37, %v16469_v42  ;;  %v16471_v53 = vld [vmem:[#allocation12_spill] sm:$0xff]  ;;  %v13516_v42 = vld [vmem:[%s13654_s14 + $0x38] sm:$0xf] }
 0x55c   : > { %v10905_v22 = vpop.f32.mrf.mxu1  ;;  %11190 = vst [vmem:[%s16059_s15 + $0x18] sm:$0xff] %v11158_v4  ;;  %v11156_v41 = vmax.f32 %v11124_v47, 0.0  ;;  %v11099_v26 = vunpack.c.l.bf16 %v13513_v21  ;;  %v13514_v4 = vld [vmem:[%s13654_s14 + $0x2c] sm:$0xf] }
 0x55d   : > { %v11063_v45 = vadd.f32 %v16024_v30, %v11024_v25  ;;  %v11027_v23 = vmul.f32 %v16015_v54, %v10914_v9  ;;  %v10906_v49 = vadd.f32 %v10905_v22, %v10745_v3  ;;  %v11129_v52 = vadd.f32 %v11097_v35, %v11065_v14  ;;  %v16470_v3 = vld [vmem:[#allocation27_spill] sm:$0xff] }
 0x55e   : > { %v12915_v6 = vpop.f32.mrf.mxu1  ;;  %11188 = vst [vmem:[%s16059_s15 + $0x8] sm:$0xff] %v11156_v41  ;;  %v10769_v37 = vadd.f32 %v12756_v8, %v16470_v3  ;;  %v11102_v47 = vunpack.c.l.bf16 %v13514_v4  ;;  %v12765_v22 = vadd.f32 %v15914_v57, %v15909_v1  ;;  %v13515_v8 = vld [vmem:[%s13654_s14 + $0x24] sm:$0xf]  ;;  %v16110_v41 = vpop.f32.mrf.mxu0  ;;  %v13517_v4 = vld [vmem:[%s13654_s14 + $0x30] sm:$0xf] }
 0x55f   : > { %v11127_v5 = vadd.f32 %v11095_v40, %v11063_v45  ;;  %v11066_v51 = vadd.f32 %v16024_v30, %v11027_v23  ;;  %v11025_v15 = vmul.f32 %v16015_v54, %v10906_v49  ;;  %v10927_v38 = vadd.f32 %v12915_v6, %v10766_v13 }
 0x560   : > { %v11161_v12 = vmax.f32 %v11129_v52, 0.0  ;;  %v10918_v35 = vpop.f32.mrf.mxu1  ;;  %v10761_v13 = vadd.f32 %v16048_v19, %v16471_v53  ;;  %v11100_v0 = vunpack.c.l.bf16 %v13515_v8  ;;  %v16472_v52 = vld [vmem:[#allocation31_spill] sm:$0xff]  ;;  %v11105_v19 = vunpack.c.l.bf16 %v13516_v42  ;;  %v16477_v42 = vld [vmem:[#allocation14_spill] sm:$0xff] }
 0x561   : > { %v11159_v25 = vmax.f32 %v11127_v5, 0.0  ;;  %v11130_v9 = vadd.f32 %v11098_v17, %v11066_v51  ;;  %v11064_v40 = vadd.f32 %v16024_v30, %v11025_v15  ;;  %v11030_v14 = vmul.f32 %v16015_v54, %v10927_v38  ;;  %v16474_v38 = vld [vmem:[#allocation15_spill] sm:$0xff] }
 0x562   : > { %11193 = vst [vmem:[%s16059_s15 + $0x30] sm:$0xff] %v11161_v12  ;;  %v10919_v61 = vadd.f32 %v10918_v35, %v10758_v46  ;;  %v12916_v27 = vpop.f32.mrf.mxu1  ;;  %v10782_v6 = vadd.f32 %v12765_v22, %v16472_v52  ;;  %v16473_v46 = vld [vmem:[#allocation28_spill] sm:$0xff]  ;;  %v16475_v12 = vld [vmem:[#allocation33_spill] sm:$0xff] }
 0x563   : > { %11191 = vst [vmem:[%s16059_s15 + $0x20] sm:$0xff] %v11159_v25  ;;  %v11162_v17 = vmax.f32 %v11130_v9, 0.0  ;;  %v11128_v45 = vadd.f32 %v11096_v34, %v11064_v40  ;;  %v11069_v23 = vadd.f32 %v16024_v30, %v11030_v14  ;;  %v10930_v49 = vadd.f32 %v12916_v27, %v10769_v37  ;;  %v16125_v9 = vld [vmem:[%s13654_s14 + $0x3c] sm:$0xf]  ;;  %v16128_v40 = vpop.f32.mrf.mxu0 }
 0x564   : > { %v11028_v1 = vmul.f32 %v16015_v54, %v10919_v61  ;;  %v10921_v57 = vpop.f32.mrf.mxu1  ;;  %v10774_v21 = vadd.f32 %v12759_v43, %v16473_v46  ;;  %v12768_v35 = vadd.f32 %v16475_v12, %v16474_v38  ;;  %v11103_v25 = vunpack.c.l.bf16 %v13517_v4 }
 0x565   : > { %11194 = vst [vmem:[%s16059_s15 + $0x38] sm:$0xff] %v11162_v17  ;;  %v11160_v5 = vmax.f32 %v11128_v45, 0.0  ;;  %v11133_v51 = vadd.f32 %v11101_v32, %v11069_v23  ;;  %v11031_v34 = vmul.f32 %v16015_v54, %v10930_v49  ;;  %v10922_v15 = vadd.f32 %v10921_v57, %v10761_v13  ;;  %v16476_v13 = vld [vmem:[#allocation30_spill] sm:$0xff]  ;;  %v16139_v23 = vld [vmem:[%s13654_s14 + $0x48] sm:$0xf] }
 0x566   : > { %v11067_v3 = vadd.f32 %v16024_v30, %v11028_v1  ;;  %v12919_v37 = vpop.f32.mrf.mxu1  ;;  %v11106_v43 = vunpack.c.l.bf16 %v16125_v9  ;;  %v10777_v8 = vadd.f32 %v12762_v55, %v16476_v13  ;;  %v16135_v17 = vld [vmem:[%s13654_s14 + $0x34] sm:$0xf]  ;;  %v11109_v49 = vunpack.c.l.bf16 %v16139_v23 }
 0x567   : > { %11192 = vst [vmem:[%s16059_s15 + $0x28] sm:$0xff] %v11160_v5  ;;  %v11165_v32 = vmax.f32 %v11133_v51, 0.0  ;;  %v11070_v14 = vadd.f32 %v16024_v30, %v11031_v34  ;;  %v11029_v22 = vmul.f32 %v16015_v54, %v10922_v15  ;;  %v10943_v61 = vadd.f32 %v12919_v37, %v10782_v6  ;;  %v16149_v51 = vld [vmem:[%s13654_s14 + $0x40] sm:$0xf]  ;;  %v16161_v37 = vld [vmem:[%s13654_s14 + $0x4c] sm:$0xf] }
 0x568   : > { %v11131_v27 = vadd.f32 %v11099_v26, %v11067_v3  ;;  %v10934_v53 = vpop.f32.mrf.mxu1  ;;  %v11104_v45 = vunpack.c.l.bf16 %v16135_v17  ;;  %v12777_v6 = vadd.f32 %v15948_v28, %v15943_v20  ;;  %v10785_v46 = vadd.f32 %v12768_v35, %v16477_v42  ;;  %v16481_v42 = vld [vmem:[#allocation21_spill] sm:$0xff] }
 0x569   : > { %11197 = vst [vmem:[%s16059_s15 + $0x50] sm:$0xff] %v11165_v32  ;;  %v11134_v1 = vadd.f32 %v11102_v47, %v11070_v14  ;;  %v11068_v57 = vadd.f32 %v16024_v30, %v11029_v22  ;;  %v11034_v52 = vmul.f32 %v16015_v54, %v10943_v61  ;;  %v10935_v26 = vadd.f32 %v10934_v53, %v10774_v21  ;;  %v16152_v47 = vpop.f32.mrf.mxu0  ;;  %v16171_v53 = vld [vmem:[%s13654_s14 + $0x44] sm:$0xf] }
 0x56a   : > { %v11163_v55 = vmax.f32 %v11131_v27, 0.0  ;;  %v12920_v5 = vpop.f32.mrf.mxu1  ;;  %v11107_v34 = vunpack.c.l.bf16 %v16149_v51  ;;  %v12771_v28 = vadd.f32 %v15931_v24, %v15926_v18  ;;  %v10798_v3 = vadd.f32 %v12777_v6, %v15934_v7  ;;  %v16478_v27 = vld [vmem:[#allocation17_spill] sm:$0xff] }
 0x56b   : > { %v11166_v15 = vmax.f32 %v11134_v1, 0.0  ;;  %v11132_v38 = vadd.f32 %v11100_v0, %v11068_v57  ;;  %v11073_v12 = vadd.f32 %v16024_v30, %v11034_v52  ;;  %v11032_v21 = vmul.f32 %v16015_v54, %v10935_v26  ;;  %v16174_v1 = vpop.f32.mrf.mxu0  ;;  %v16480_v52 = vld [vmem:[#allocation19_spill] sm:$0xff] }
 0x56c   : > { %11195 = vst [vmem:[%s16059_s15 + $0x40] sm:$0xff] %v11163_v55  ;;  %v10946_v20 = vadd.f32 %v12920_v5, %v10785_v46  ;;  %v10937_v35 = vpop.f32.mrf.mxu1  ;;  %v11110_v4 = vunpack.c.l.bf16 %v16161_v37  ;;  %v12780_v18 = vadd.f32 %v15958_v31, %v15953_v50  ;;  %v10790_v7 = vadd.f32 %v12771_v28, %v16478_v27  ;;  %v16479_v50 = vld [vmem:[#allocation18_spill] sm:$0xff]  ;;  %v16183_v5 = vld [vmem:[%s13654_s14 + $0x58] sm:$0xf] }
 0x56d   : > { %11198 = vst [vmem:[%s16059_s15 + $0x58] sm:$0xff] %v11166_v15  ;;  %v11164_v0 = vmax.f32 %v11132_v38, 0.0  ;;  %v11137_v32 = vadd.f32 %v11105_v19, %v11073_v12  ;;  %v11071_v14 = vadd.f32 %v16024_v30, %v11032_v21  ;;  %v10938_v22 = vadd.f32 %v10937_v35, %v10777_v8 }
 0x56e   : > { %v11035_v24 = vmul.f32 %v16015_v54, %v10946_v20  ;;  %v12923_v61 = vpop.f32.mrf.mxu1  ;;  %v11108_v13 = vunpack.c.l.bf16 %v16171_v53  ;;  %v12774_v26 = vadd.f32 %v16480_v52, %v16479_v50  ;;  %v10801_v46 = vadd.f32 %v12780_v18, %v16481_v42 }
 0x56f   : > { %11196 = vst [vmem:[%s16059_s15 + $0x48] sm:$0xff] %v11164_v0  ;;  %v11169_v19 = vmax.f32 %v11137_v32, 0.0  ;;  %v11135_v57 = vadd.f32 %v11103_v25, %v11071_v14  ;;  %v11033_v8 = vmul.f32 %v16015_v54, %v10938_v22  ;;  %v10959_v31 = vadd.f32 %v12923_v61, %v10798_v3  ;;  %v16194_v3 = vld [vmem:[%s13654_s14 + $0x50] sm:$0xf]  ;;  %v16198_v32 = vld [vmem:[%s13654_s14 + $0x5c] sm:$0xf]  ;;  %v16201_v22 = vpop.f32.mrf.mxu0 }
 0x570   : > { %v11074_v6 = vadd.f32 %v16024_v30, %v11035_v24  ;;  %v10950_v55 = vpop.f32.mrf.mxu1  ;;  %v11113_v15 = vunpack.c.l.bf16 %v16183_v5  ;;  %v12789_v28 = vadd.f32 %v15982_v56, %v15977_v11  ;;  %v11111_v0 = vunpack.c.l.bf16 %v16194_v3  ;;  %v16482_v61 = vld [vmem:[#allocation16_spill] sm:$0xff] }
 0x571   : > { %11201 = vst [vmem:[%s16059_s15 + $0x70] sm:$0xff] %v11169_v19  ;;  %v11167_v25 = vmax.f32 %v11135_v57, 0.0  ;;  %v11072_v38 = vadd.f32 %v16024_v30, %v11033_v8  ;;  %v11038_v12 = vmul.f32 %v16015_v54, %v10959_v31  ;;  %v10951_v21 = vadd.f32 %v10950_v55, %v10790_v7  ;;  %v16483_v19 = vld [vmem:[#allocation22_spill] sm:$0xff]  ;;  %v12811_v8 = vpop.f32.mrf.mxu0 }
 0x572   : > { %v11138_v20 = vadd.f32 %v11106_v43, %v11074_v6  ;;  %v12924_v35 = vpop.f32.mrf.mxu1  ;;  %v11114_v14 = vunpack.c.l.bf16 %v16198_v32  ;;  %v12783_v43 = vadd.f32 %v15965_v39, %v15963_v58  ;;  %v10793_v27 = vadd.f32 %v12774_v26, %v16482_v61  ;;  %v16484_v26 = vld [vmem:[#allocation20_spill] sm:$0xff]  ;;  %v16221_v55 = vld [vmem:[%s13654_s14 + $0x54] sm:$0xf] }
 0x573   : > { %11199 = vst [vmem:[%s16059_s15 + $0x60] sm:$0xff] %v11167_v25  ;;  %v11136_v18 = vadd.f32 %v11104_v45, %v11072_v38  ;;  %v11077_v11 = vadd.f32 %v16024_v30, %v11038_v12  ;;  %v11036_v56 = vmul.f32 %v16015_v54, %v10951_v21  ;;  %v10962_v9 = vadd.f32 %v12924_v35, %v10801_v46  ;;  %v16486_v21 = vld [vmem:[#allocation23_spill] sm:$0xff]  ;;  %v16487_v61 = vld [vmem:[#allocation36_spill] sm:$0xff] }
 0x574   : > { %v11170_v24 = vmax.f32 %v11138_v20, 0.0  ;;  %v10953_v7 = vpop.f32.mrf.mxu1  ;;  %v10814_v57 = vadd.f32 %v12789_v28, %v16483_v19  ;;  %v12792_v52 = vadd.f32 %v15989_v16, %v15987_v48  ;;  %v10806_v6 = vadd.f32 %v12783_v43, %v16484_v26  ;;  %v16485_v48 = vld [vmem:[#allocation41_spill] sm:$0xff]  ;;  %v16491_v26 = vld [vmem:[#allocation24_spill] sm:$0xff] }
 0x575   : > { %v11168_v17 = vmax.f32 %v11136_v18, 0.0  ;;  %v11141_v45 = vadd.f32 %v11109_v49, %v11077_v11  ;;  %v11075_v31 = vadd.f32 %v16024_v30, %v11036_v56  ;;  %v11039_v50 = vmul.f32 %v16015_v54, %v10962_v9  ;;  %v16233_v20 = vld [vmem:[%s13654_s14 + $0x68] sm:$0xf]  ;;  %v12812_v18 = vpop.f32.mrf.mxu0 }
 0x576   : > { %11202 = vst [vmem:[%s16059_s15 + $0x78] sm:$0xff] %v11170_v24  ;;  %v10954_v39 = vadd.f32 %v10953_v7, %v10793_v27  ;;  %v12927_v58 = vpop.f32.mrf.mxu1  ;;  %v11112_v42 = vunpack.c.l.bf16 %v16221_v55  ;;  %v12786_v16 = vadd.f32 %v16485_v48, %v15970_v2  ;;  %v10817_v28 = vadd.f32 %v12792_v52, %v16486_v21 }
 0x577   : > { %11200 = vst [vmem:[%s16059_s15 + $0x68] sm:$0xff] %v11168_v17  ;;  %v11173_v23 = vmax.f32 %v11141_v45, 0.0  ;;  %v11139_v49 = vadd.f32 %v11107_v34, %v11075_v31  ;;  %v11078_v46 = vadd.f32 %v16024_v30, %v11039_v50  ;;  %v10975_v25 = vadd.f32 %v12927_v58, %v10814_v57  ;;  %v12814_v17 = vpop.f32.mrf.mxu0 }
 0x578   : > { %v11037_v38 = vmul.f32 %v16015_v54, %v10954_v39  ;;  %v10966_v12 = vpop.f32.mrf.mxu1  ;;  %v11117_v35 = vunpack.c.l.bf16 %v16233_v20  ;;  %v12795_v2 = vadd.f32 %v16007_v10, %v15996_v36  ;;  %v12798_v9 = vadd.f32 %v16036_v63, %v16019_v62  ;;  %v16496_v20 = vld [vmem:[#allocation32_spill] sm:$0xff] }
 0x579   : > { %11205 = vst [vmem:[%s16059_s15 + $0x90] sm:$0xff] %v11173_v23  ;;  %v11171_v51 = vmax.f32 %v11139_v49, 0.0  ;;  %v11142_v34 = vadd.f32 %v11110_v4, %v11078_v46  ;;  %v11042_v11 = vmul.f32 %v16015_v54, %v10975_v25  ;;  %v10967_v56 = vadd.f32 %v10966_v12, %v10806_v6  ;;  %v16492_v49 = vld [vmem:[#allocation43_spill] sm:$0xff]  ;;  %v16493_v46 = vld [vmem:[#allocation45_spill] sm:$0xff] }
 0x57a   : > { %v11076_v43 = vadd.f32 %v16024_v30, %v11037_v38  ;;  %v12928_v24 = vpop.f32.mrf.mxu1  ;;  %v10809_v27 = vadd.f32 %v12786_v16, %v16487_v61  ;;  %v12801_v57 = vadd.f32 %v16078_v29, %v16064_v44  ;;  %v12804_v36 = vadd.f32 %v16110_v41, %v16093_v33  ;;  %v16488_v33 = vld [vmem:[#allocation29_spill] sm:$0xff]  ;;  %v12815_v38 = vpop.f32.mrf.mxu0 }
 0x57b   : > { %11203 = vst [vmem:[%s16059_s15 + $0x80] sm:$0xff] %v11171_v51  ;;  %v11174_v7 = vmax.f32 %v11142_v34, 0.0  ;;  %v11081_v37 = vadd.f32 %v16024_v30, %v11042_v11  ;;  %v11040_v4 = vmul.f32 %v16015_v54, %v10967_v56  ;;  %v10978_v19 = vadd.f32 %v12928_v24, %v10817_v28  ;;  %v13529_v51 = vld [vmem:[%s13654_s14 + $0x60] sm:$0xf]  ;;  %v13530_v34 = vld [vmem:[%s13654_s14 + $0x6c] sm:$0xf] }
 0x57c   : > { %v12701_v63 = vadd.f32 %v16001_v59, %v15994_v60  ;;  %v11140_v10 = vadd.f32 %v11108_v13, %v11076_v43  ;;  %v10969_v62 = vpop.f32.mrf.mxu1  ;;  %v10830_v41 = vadd.f32 %v12801_v57, %v16488_v33  ;;  %v16489_v59 = vld [vmem:[#allocation38_spill] sm:$0xff]  ;;  %v12813_v23 = vadd.f32 %v12812_v18, %v12811_v8  ;;  %v16494_v56 = vld [vmem:[#allocation40_spill] sm:$0xff]  ;;  %v16495_v61 = vld [vmem:[#allocation25_spill] sm:$0xff] }
 0x57d   : > { %11206 = vst [vmem:[%s16059_s15 + $0x98] sm:$0xff] %v11174_v7  ;;  %v11145_v45 = vadd.f32 %v11113_v15, %v11081_v37  ;;  %v11079_v31 = vadd.f32 %v16024_v30, %v11040_v4  ;;  %v11043_v44 = vmul.f32 %v16015_v54, %v10978_v19  ;;  %v10970_v29 = vadd.f32 %v10969_v62, %v10809_v27  ;;  %v16490_v13 = vld [vmem:[#allocation26_spill] sm:$0xff] }
 0x57e   : > { %v11172_v50 = vmax.f32 %v11140_v10, 0.0  ;;  %v12931_v60 = vpop.f32.mrf.mxu1  ;;  %v10822_v53 = vadd.f32 %v12795_v2, %v16489_v59  ;;  %v10833_v52 = vadd.f32 %v12804_v36, %v16490_v13  ;;  %v10685_v6 = vadd.f32 %v12701_v63, %v16491_v26  ;;  %v13531_v10 = vld [vmem:[%s13654_s14 + $0x64] sm:$0xf] }
 0x57f   : > { %v11177_v39 = vmax.f32 %v11145_v45, 0.0  ;;  %v11143_v5 = vadd.f32 %v11111_v0, %v11079_v31  ;;  %v11082_v15 = vadd.f32 %v16024_v30, %v11043_v44  ;;  %v11041_v58 = vmul.f32 %v16015_v54, %v10970_v29  ;;  %v13532_v45 = vld [vmem:[%s13654_s14 + $0x78] sm:$0xf] }
 0x580   : > { %v12704_v25 = vadd.f32 %v16493_v46, %v16492_v49  ;;  %11204 = vst [vmem:[%s16059_s15 + $0x88] sm:$0xff] %v11172_v50  ;;  %v10991_v48 = vadd.f32 %v12931_v60, %v10830_v41  ;;  %v10982_v16 = vpop.f32.mrf.mxu1  ;;  %v11115_v8 = vunpack.c.l.bf16 %v13529_v51  ;;  %v11118_v11 = vunpack.c.l.bf16 %v13530_v34  ;;  %v13533_v49 = vld [vmem:[%s13654_s14 + $0x70] sm:$0xf] }
 0x581   : > { %11209 = vst [vmem:[%s16059_s15 + $0xb0] sm:$0xff] %v11177_v39  ;;  %v11175_v3 = vmax.f32 %v11143_v5, 0.0  ;;  %v11146_v0 = vadd.f32 %v11114_v14, %v11082_v15  ;;  %v11080_v12 = vadd.f32 %v16024_v30, %v11041_v58  ;;  %v10983_v21 = vadd.f32 %v10982_v16, %v10822_v53  ;;  %v16497_v15 = vld [vmem:[#allocation34_spill] sm:$0xff] }
 0x582   : > { %v11046_v28 = vmul.f32 %v16015_v54, %v10991_v48  ;;  %v12932_v18 = vpop.f32.mrf.mxu1  ;;  %v10825_v2 = vadd.f32 %v12798_v9, %v16494_v56  ;;  %v10688_v27 = vadd.f32 %v12704_v25, %v16495_v61  ;;  %v12816_v7 = vadd.f32 %v12815_v38, %v12814_v17  ;;  %v13534_v25 = vld [vmem:[%s13654_s14 + $0x7c] sm:$0xf] }
 0x583   : > { %11207 = vst [vmem:[%s16059_s15 + $0xa0] sm:$0xff] %v11175_v3  ;;  %v11178_v43 = vmax.f32 %v11146_v0, 0.0  ;;  %v11144_v32 = vadd.f32 %v11112_v42, %v11080_v12  ;;  %v11044_v14 = vmul.f32 %v16015_v54, %v10983_v21  ;;  %v10994_v24 = vadd.f32 %v12932_v18, %v10833_v52  ;;  %v13535_v18 = vld [vmem:[%s13654_s14 + $0x74] sm:$0xf] }
 0x584   : > { %v11085_v37 = vadd.f32 %v16024_v30, %v11046_v28  ;;  %v10985_v4 = vpop.f32.mrf.mxu1  ;;  %v10846_v19 = vadd.f32 %v12813_v23, %v10685_v6  ;;  %v12807_v42 = vadd.f32 %v16152_v47, %v16128_v40  ;;  %v11116_v62 = vunpack.c.l.bf16 %v13531_v10 }
 0x585   : > { %11210 = vst [vmem:[%s16059_s15 + $0xb8] sm:$0xff] %v11178_v43  ;;  %v11176_v9 = vmax.f32 %v11144_v32, 0.0  ;;  %v11083_v57 = vadd.f32 %v16024_v30, %v11044_v14  ;;  %v11047_v55 = vmul.f32 %v16015_v54, %v10994_v24  ;;  %v10986_v36 = vadd.f32 %v10985_v4, %v10825_v2 }
 0x586   : > { %v11149_v63 = vadd.f32 %v11117_v35, %v11085_v37  ;;  %v12935_v17 = vpop.f32.mrf.mxu1  ;;  %v11121_v31 = vunpack.c.l.bf16 %v13532_v45  ;;  %v12810_v40 = vadd.f32 %v16201_v22, %v16174_v1  ;;  %v10838_v35 = vadd.f32 %v12807_v42, %v16496_v20 }
 0x587   : > { %11208 = vst [vmem:[%s16059_s15 + $0xa8] sm:$0xff] %v11176_v9  ;;  %v11147_v44 = vadd.f32 %v11115_v8, %v11083_v57  ;;  %v11086_v29 = vadd.f32 %v16024_v30, %v11047_v55  ;;  %v11045_v50 = vmul.f32 %v16015_v54, %v10986_v36  ;;  %v11007_v33 = vadd.f32 %v12935_v17, %v10846_v19 }
 0x588   : > { %v11181_v47 = vmax.f32 %v11149_v63, 0.0  ;;  %v10998_v41 = vpop.f32.mrf.mxu1  ;;  %v10849_v60 = vadd.f32 %v12816_v7, %v10688_v27  ;;  %v10841_v58 = vadd.f32 %v12810_v40, %v16497_v15  ;;  %v11119_v46 = vunpack.c.l.bf16 %v13533_v49 }
 0x589   : > { %v11179_v59 = vmax.f32 %v11147_v44, 0.0  ;;  %v11150_v53 = vadd.f32 %v11118_v11, %v11086_v29  ;;  %v11084_v13 = vadd.f32 %v16024_v30, %v11045_v50  ;;  %v11050_v52 = vmul.f32 %v16015_v54, %v11007_v33 }
 0x58a   : > { %11213 = vst [vmem:[%s16059_s15 + $0xd0] sm:$0xff] %v11181_v47  ;;  %v10999_v39 = vadd.f32 %v10998_v41, %v10838_v35  ;;  %v12936_v5 = vpop.f32.mrf.mxu1  ;;  %v11122_v48 = vunpack.c.l.bf16 %v13534_v25  ;;  %v11120_v34 = vunpack.c.l.bf16 %v13535_v18 }
 0x58b   : > { %11211 = vst [vmem:[%s16059_s15 + $0xc0] sm:$0xff] %v11179_v59  ;;  %v11182_v1 = vmax.f32 %v11150_v53, 0.0  ;;  %v11148_v22 = vadd.f32 %v11116_v62, %v11084_v13  ;;  %v11089_v26 = vadd.f32 %v16024_v30, %v11050_v52  ;;  %v11010_v6 = vadd.f32 %v12936_v5, %v10849_v60 }
 0x58c   : > { %v11048_v23 = vmul.f32 %v16015_v54, %v10999_v39  ;;  %v11001_v16 = vpop.f32.mrf.mxu1 }
 0x58d   : > { %11214 = vst [vmem:[%s16059_s15 + $0xd8] sm:$0xff] %v11182_v1  ;;  %v11180_v38 = vmax.f32 %v11148_v22, 0.0  ;;  %v11153_v3 = vadd.f32 %v11121_v31, %v11089_v26  ;;  %v11051_v0 = vmul.f32 %v16015_v54, %v11010_v6  ;;  %v11002_v12 = vadd.f32 %v11001_v16, %v10841_v58 }
 0x58e   : > { %v11087_v21 = vadd.f32 %v16024_v30, %v11048_v23 }
 0x58f   : > { %11212 = vst [vmem:[%s16059_s15 + $0xc8] sm:$0xff] %v11180_v38  ;;  %v11185_v28 = vmax.f32 %v11153_v3, 0.0  ;;  %v11090_v51 = vadd.f32 %v16024_v30, %v11051_v0  ;;  %v11049_v8 = vmul.f32 %v16015_v54, %v11002_v12 }
 0x590   : > { %v11151_v11 = vadd.f32 %v11119_v46, %v11087_v21 }
 0x591   : > { %11217 = vst [vmem:[%s16059_s15 + $0xf0] sm:$0xff] %v11185_v28  ;;  %v11154_v56 = vadd.f32 %v11122_v48, %v11090_v51  ;;  %v11088_v2 = vadd.f32 %v16024_v30, %v11049_v8 }
 0x592   : > { %v11183_v43 = vmax.f32 %v11151_v11, 0.0 }
 0x593   : > { %v11186_v32 = vmax.f32 %v11154_v56, 0.0  ;;  %v11152_v14 = vadd.f32 %v11120_v34, %v11088_v2 }
 0x594   : > { %11215 = vst [vmem:[%s16059_s15 + $0xe0] sm:$0xff] %v11183_v43 }
 0x595   : > { %11218 = vst [vmem:[%s16059_s15 + $0xf8] sm:$0xff] %v11186_v32  ;;  %v11184_v24 = vmax.f32 %v11152_v14, 0.0 }
 0x597   : > { %11216 = vst [vmem:[%s16059_s15 + $0xe8] sm:$0xff] %v11184_v24 }
 0x598 PF: > { %s18_s24 = sadd.s32 1, %s13572_s24  }
 0x599   : > { %p15_p1 = scmp.ge.s32.totalorder %s18_s24, 4  }
 0x59b   :  { %17 = sbr.rel (!%p15_p1) target bundleno = 1 (0x1), region = 85 }
 0x5a0   :  { %11240 = vsyncpa [#allocation5], 1 }
 0x5a1   :  { %11242 = vsyncpa [#allocation5 + $0x1], 1 }

</bundles_post_ra>
